<compile_context>
chip_gen: v7x
topology: tpu7x:2x2x1
jax: 0.10.0
libtpu: 0.0.40
codegen_flags: <defaults>
</compile_context>

<pallas_src>
import math
import jax
import jax.numpy as jnp
from jax.experimental import pallas as pl
from jax.experimental.pallas import tpu as pltpu

NUM_BLOCKS = 5


# ---------------------------------------------------------------------------
# Tile-size choice
# ---------------------------------------------------------------------------
def _choose_tb(S, N, hidden, budget_bytes=6 << 20):
    """Samples per grid step.

    * TB divides S (no partial blocks).
    * TB == S or TB % 8 == 0, so the (TB, c_dim) output block keeps a dense
      sublane layout under the (8, 128) tiling rule.
    * Rough per-chunk VMEM footprint stays under `budget_bytes` (conservative
      so it also fits v7x's 64 MiB VMEM with double-buffering headroom).
    """
    per_sample = 4 * N * (2 * hidden) * 6          # ~6 live f32 (N, 2h) arrays
    cands = [tb for tb in range(1, S + 1)
             if S % tb == 0 and (tb == S or tb % 8 == 0)]
    fitting = [tb for tb in cands if tb * per_sample <= budget_bytes]
    return max(fitting) if fitting else min(cands)


# ---------------------------------------------------------------------------
# Pallas kernel (factory: one kernel handles backbone and fused set_mlp+theta)
# ---------------------------------------------------------------------------
def _make_pointnet_kernel(TB, N, dim, hidden, emit_theta, fma_pos):
    H = hidden
    M = TB * N

    def kernel(x_ref, posw_ref, posb_ref,
               fc0w_ref, fc0b_ref, fc1w_ref, fc1b_ref, scw_ref,
               fccw_ref, fccb_ref, *rest):
        if emit_theta:
            thw_ref, thb_ref, c_ref, th_ref = rest
        else:
            (c_ref,) = rest

        x = x_ref[...].reshape(M, dim)                              # (M, dim)
        posb = posb_ref[...]                                        # (1, 2H)
        if fma_pos:
            # K == dim is tiny (3): VPU broadcast-FMAs instead of an MXU push.
            posw = posw_ref[...]                                    # (dim, 2H)
            net = x[:, 0:1] * posw[0:1, :]
            for d in range(1, dim):
                net = net + x[:, d:d + 1] * posw[d:d + 1, :]
            net = net + posb
        else:
            net = jnp.dot(x, posw_ref[...],
                          preferred_element_type=jnp.float32) + posb

        # --- block 0: input is the raw fc_pos output (M, 2H) ---------------
        a = jnp.maximum(net, 0.0)
        hid = jnp.dot(a, fc0w_ref[0],
                      preferred_element_type=jnp.float32) + fc0b_ref[0]
        dx = jnp.dot(jnp.maximum(hid, 0.0), fc1w_ref[0],
                     preferred_element_type=jnp.float32) + fc1b_ref[0]
        net = jnp.dot(net, scw_ref[0],
                      preferred_element_type=jnp.float32) + dx       # (M, H)

        # --- blocks 1..4: concat([net, pooled]) via split weights ----------
        #   relu(cat) @ W == relu(net) @ W[:H] + relu(pooled) @ W[H:]
        # (the pooled term is a (TB, H) row matmul, broadcast-added per sample)
        for i in range(1, NUM_BLOCKS):
            pooled = jnp.max(net.reshape(TB, N, H), axis=1)          # (TB, H)
            w0 = fc0w_ref[i]                                         # (2H, H)
            ws = scw_ref[i]                                          # (2H, H)

            a = jnp.maximum(net, 0.0)
            hid_row = jnp.dot(jnp.maximum(pooled, 0.0), w0[H:, :],
                              preferred_element_type=jnp.float32) + fc0b_ref[i]
            hid = jnp.dot(a, w0[:H, :], preferred_element_type=jnp.float32)
            hid = (hid.reshape(TB, N, H) + hid_row[:, None, :]).reshape(M, H)

            dx = jnp.dot(jnp.maximum(hid, 0.0), fc1w_ref[i],
                         preferred_element_type=jnp.float32) + fc1b_ref[i]

            xs_row = jnp.dot(pooled, ws[H:, :],
                             preferred_element_type=jnp.float32)     # (TB, H)
            xs = jnp.dot(net, ws[:H, :], preferred_element_type=jnp.float32)
            net = (xs.reshape(TB, N, H) + xs_row[:, None, :]).reshape(M, H) + dx

        pooled = jnp.max(net.reshape(TB, N, H), axis=1)              # (TB, H)
        c_ref[...] = jnp.dot(jnp.maximum(pooled, 0.0), fccw_ref[...],
                             preferred_element_type=jnp.float32) + fccb_ref[...]

        if emit_theta:
            # theta = theta_fc(unpooled net) fused here: no HBM round-trip of
            # state_feat and no extra pallas_call.
            th = jnp.dot(net, thw_ref[...],
                         preferred_element_type=jnp.float32) + thb_ref[...]
            th_ref[...] = th.reshape(TB, N, -1)

    return kernel


# ---------------------------------------------------------------------------
# pallas_call wrapper
# ---------------------------------------------------------------------------
def _bcast_spec(shape):
    zeros = (0,) * len(shape)
    return pl.BlockSpec(tuple(shape), lambda b, _z=zeros: _z)


def resnet_pointnet(x, p, theta=None):
    """ResnetPointnet forward.

    x: (S, N, dim) float32 -> c: (S, c_dim).
    If `theta=(theta_w, theta_b)` is given, the theta projection of the
    unpooled features is fused into the same kernel and (c, theta[S, N, atc])
    is returned; the unpooled features themselves never touch HBM.
    """
    S, N, dim = x.shape
    hidden = p["fc1_w"].shape[-1]
    c_dim = p["fcc_w"].shape[-1]
    emit_theta = theta is not None

    TB = _choose_tb(S, N, hidden)
    grid = (S // TB,)
    kernel = _make_pointnet_kernel(TB, N, dim, hidden,
                                   emit_theta=emit_theta, fma_pos=(dim <= 4))

    weights = [p["pos_w"], p["pos_b"], p["fc0_w"], p["fc0_b"],
               p["fc1_w"], p["fc1_b"], p["sc_w"], p["fcc_w"], p["fcc_b"]]
    args = [x] + weights
    in_specs = [pl.BlockSpec((TB, N, dim), lambda b: (b, 0, 0))]
    in_specs += [_bcast_spec(w.shape) for w in weights]
    out_specs = [pl.BlockSpec((TB, c_dim), lambda b: (b, 0))]
    out_shape = [jax.ShapeDtypeStruct((S, c_dim), jnp.float32)]

    if emit_theta:
        theta_w, theta_b = theta
        atc = theta_w.shape[-1]
        args += [theta_w, theta_b]
        in_specs += [_bcast_spec(theta_w.shape), _bcast_spec(theta_b.shape)]
        out_specs.append(pl.BlockSpec((TB, N, atc), lambda b: (b, 0, 0)))
        out_shape.append(jax.ShapeDtypeStruct((S, N, atc), jnp.float32))

    outs = pl.pallas_call(
        kernel,
        grid=grid,
        in_specs=in_specs,
        out_specs=out_specs,
        out_shape=out_shape,
        compiler_params=pltpu.CompilerParams(
            dimension_semantics=("parallel",)),
    )(*args)

    if emit_theta:
        return outs[0], outs[1]
    return outs[0]


# ---------------------------------------------------------------------------
# ATCSetEncoder2 forward
# ---------------------------------------------------------------------------
def atc_set_encoder2(pc_set, params):
    """pc_set: (B, T, N, 3) f32 -> (c_global: (B, ci_dim), theta: (B, T, atc))."""
    B, T, N, D = pc_set.shape
    pts = pc_set.reshape(B * T, N, D)
    set_feature = resnet_pointnet(pts, params["backbone"])          # (B*T, c_dim)
    set_feature = set_feature.reshape(B, T, -1)
    c_global, theta = resnet_pointnet(
        set_feature, params["set_mlp"],
        theta=(params["theta_w"], params["theta_b"]))
    return c_global, theta


# ---------------------------------------------------------------------------
# Deterministic parameter construction (PyTorch-style uniform fan-in init)
# ---------------------------------------------------------------------------
def _init_linear(key, fan_in, fan_out, bias=True):
    kw, kb = jax.random.split(key)
    bound = 1.0 / math.sqrt(fan_in)
    w = jax.random.uniform(kw, (fan_in, fan_out), jnp.float32, -bound, bound)
    b = (jax.random.uniform(kb, (1, fan_out), jnp.float32, -bound, bound)
         if bias else None)
    return w, b


def init_pointnet_params(key, dim, c_dim, hidden):
    keys = jax.random.split(key, 2 + 3 * NUM_BLOCKS)
    pos_w, pos_b = _init_linear(keys[0], dim, 2 * hidden)
    fc0_w, fc0_b, fc1_w, fc1_b, sc_w = [], [], [], [], []
    for i in range(NUM_BLOCKS):
        w0, b0 = _init_linear(keys[1 + 3 * i], 2 * hidden, hidden)
        w1, b1 = _init_linear(keys[2 + 3 * i], hidden, hidden)
        ws, _ = _init_linear(keys[3 + 3 * i], 2 * hidden, hidden, bias=False)
        fc0_w.append(w0); fc0_b.append(b0)
        fc1_w.append(w1); fc1_b.append(b1)
        sc_w.append(ws)
    fcc_w, fcc_b = _init_linear(keys[-1], hidden, c_dim)
    return dict(
        pos_w=pos_w, pos_b=pos_b,
        fc0_w=jnp.stack(fc0_w), fc0_b=jnp.stack(fc0_b),
        fc1_w=jnp.stack(fc1_w), fc1_b=jnp.stack(fc1_b),
        sc_w=jnp.stack(sc_w),
        fcc_w=fcc_w, fcc_b=fcc_b,
    )


def init_atc_set_encoder2(key, atc_num, c_dim, ci_dim, hidden_dim):
    k1, k2, k3 = jax.random.split(key, 3)
    theta_w, theta_b = _init_linear(k3, c_dim, atc_num)
    return dict(
        backbone=init_pointnet_params(k1, dim=3, c_dim=c_dim, hidden=hidden_dim),
        set_mlp=init_pointnet_params(k2, dim=c_dim, c_dim=ci_dim, hidden=hidden_dim),
        theta_w=theta_w, theta_b=theta_b,
    )


# ---------------------------------------------------------------------------
# Pure-JAX reference (uses the original concat formulation, for a sanity check)
# ---------------------------------------------------------------------------
def _pointnet_ref(x, p):
    net = x @ p["pos_w"] + p["pos_b"]
    for i in range(NUM_BLOCKS):
        if i > 0:
            pooled = jnp.max(net, axis=1, keepdims=True)
            net = jnp.concatenate([net, jnp.broadcast_to(pooled, net.shape)], axis=-1)
        hid = jnp.maximum(net, 0.0) @ p["fc0_w"][i] + p["fc0_b"][i]
        dx = jnp.maximum(hid, 0.0) @ p["fc1_w"][i] + p["fc1_b"][i]
        net = net @ p["sc_w"][i] + dx
    pooled = jnp.max(net, axis=1)
    c = jnp.maximum(pooled, 0.0) @ p["fcc_w"] + p["fcc_b"]
    return c, net


def _encoder_ref(pc_set, params):
    B, T, N, D = pc_set.shape
    sf, _ = _pointnet_ref(pc_set.reshape(B * T, N, 3), params["backbone"])
    sf = sf.reshape(B, T, -1)
    c_global, state = _pointnet_ref(sf, params["set_mlp"])
    theta = state @ params["theta_w"] + params["theta_b"]
    return c_global, theta


# ---------------------------------------------------------------------------
if __name__ == "__main__":
    # Small but representative shapes. The original module requires
    # hidden_dim == c_dim for theta_fc(state_feat) to type-check.
    B, T, N, D = 2, 8, 16, 3
    atc_num, c_dim, ci_dim, hidden_dim = 4, 32, 16, 32

    key = jax.random.PRNGKey(0)
    kp, kx = jax.random.split(key)
    params = init_atc_set_encoder2(kp, atc_num, c_dim, ci_dim, hidden_dim)
    pc_set = jax.random.normal(kx, (B, T, N, D), dtype=jnp.float32)

    c_global, theta = atc_set_encoder2(pc_set, params)
    jax.block_until_ready((c_global, theta))

    assert c_global.shape == (B, ci_dim), c_global.shape
    assert theta.shape == (B, T, atc_num), theta.shape

    # numerical sanity check against plain-JAX reference
    c_ref, theta_ref = _encoder_ref(pc_set, params)
    assert jnp.max(jnp.abs(c_global - c_ref)) < 5e-2
    assert jnp.max(jnp.abs(theta - theta_ref)) < 5e-2

    print("KERNEL_OK")
</pallas_src>

<mosaic_0001>
module attributes {stable_mosaic.version = 11 : i64} {
  func.func @kernel(%arg0: i32, %arg1: memref<16x16x3xf32, #tpu.memory_space<vmem>>, %arg2: memref<3x64xf32, #tpu.memory_space<vmem>>, %arg3: memref<1x64xf32, #tpu.memory_space<vmem>>, %arg4: memref<5x64x32xf32, #tpu.memory_space<vmem>>, %arg5: memref<5x1x32xf32, #tpu.memory_space<vmem>>, %arg6: memref<5x32x32xf32, #tpu.memory_space<vmem>>, %arg7: memref<5x1x32xf32, #tpu.memory_space<vmem>>, %arg8: memref<5x64x32xf32, #tpu.memory_space<vmem>>, %arg9: memref<32x32xf32, #tpu.memory_space<vmem>>, %arg10: memref<1x32xf32, #tpu.memory_space<vmem>>, %arg11: memref<16x32xf32, #tpu.memory_space<vmem>>) attributes {dimension_semantics = [#tpu.dimension_semantics<parallel>], iteration_bounds = array<i64: 1>, scalar_prefetch = 0 : i64, scratch_operands = 0 : i64, tpu.core_type = #tpu.core_type<tc>, window_params = [{transform_indices = @transform_0, window_bounds = array<i64: 16, 16, 3>}, {pipeline_mode = #tpu.pipeline_mode<synchronous>, transform_indices = @transform_1, window_bounds = array<i64: 3, 64>}, {pipeline_mode = #tpu.pipeline_mode<synchronous>, transform_indices = @transform_2, window_bounds = array<i64: 1, 64>}, {pipeline_mode = #tpu.pipeline_mode<synchronous>, transform_indices = @transform_3, window_bounds = array<i64: 5, 64, 32>}, {pipeline_mode = #tpu.pipeline_mode<synchronous>, transform_indices = @transform_4, window_bounds = array<i64: 5, 1, 32>}, {pipeline_mode = #tpu.pipeline_mode<synchronous>, transform_indices = @transform_5, window_bounds = array<i64: 5, 32, 32>}, {pipeline_mode = #tpu.pipeline_mode<synchronous>, transform_indices = @transform_6, window_bounds = array<i64: 5, 1, 32>}, {pipeline_mode = #tpu.pipeline_mode<synchronous>, transform_indices = @transform_7, window_bounds = array<i64: 5, 64, 32>}, {pipeline_mode = #tpu.pipeline_mode<synchronous>, transform_indices = @transform_8, window_bounds = array<i64: 32, 32>}, {pipeline_mode = #tpu.pipeline_mode<synchronous>, transform_indices = @transform_9, window_bounds = array<i64: 1, 32>}, {transform_indices = @transform_10, window_bounds = array<i64: 16, 32>}]} {
    %c0 = arith.constant 0 : index
    %c0_0 = arith.constant 0 : index
    %c0_1 = arith.constant 0 : index
    %0 = vector.load %arg1[%c0, %c0_0, %c0_1] : memref<16x16x3xf32, #tpu.memory_space<vmem>>, vector<16x16x3xf32>
    %1 = vector.shape_cast %0 : vector<16x16x3xf32> to vector<256x3xf32>
    %c0_2 = arith.constant 0 : index
    %c0_3 = arith.constant 0 : index
    %2 = vector.load %arg3[%c0_2, %c0_3] : memref<1x64xf32, #tpu.memory_space<vmem>>, vector<1x64xf32>
    %c0_4 = arith.constant 0 : index
    %c0_5 = arith.constant 0 : index
    %3 = vector.load %arg2[%c0_4, %c0_5] : memref<3x64xf32, #tpu.memory_space<vmem>>, vector<3x64xf32>
    %4 = vector.extract_strided_slice %1 {offsets = [0, 0], sizes = [256, 1], strides = [1, 1]} : vector<256x3xf32> to vector<256x1xf32>
    %5 = vector.extract_strided_slice %3 {offsets = [0, 0], sizes = [1, 64], strides = [1, 1]} : vector<3x64xf32> to vector<1x64xf32>
    %6 = vector.broadcast %4 : vector<256x1xf32> to vector<256x64xf32>
    %7 = vector.broadcast %5 : vector<1x64xf32> to vector<256x64xf32>
    %8 = arith.mulf %6, %7 : vector<256x64xf32>
    %9 = vector.extract_strided_slice %1 {offsets = [0, 1], sizes = [256, 1], strides = [1, 1]} : vector<256x3xf32> to vector<256x1xf32>
    %10 = vector.extract_strided_slice %3 {offsets = [1, 0], sizes = [1, 64], strides = [1, 1]} : vector<3x64xf32> to vector<1x64xf32>
    %11 = vector.broadcast %9 : vector<256x1xf32> to vector<256x64xf32>
    %12 = vector.broadcast %10 : vector<1x64xf32> to vector<256x64xf32>
    %13 = arith.mulf %11, %12 : vector<256x64xf32>
    %14 = arith.addf %8, %13 : vector<256x64xf32>
    %15 = vector.extract_strided_slice %1 {offsets = [0, 2], sizes = [256, 1], strides = [1, 1]} : vector<256x3xf32> to vector<256x1xf32>
    %16 = vector.extract_strided_slice %3 {offsets = [2, 0], sizes = [1, 64], strides = [1, 1]} : vector<3x64xf32> to vector<1x64xf32>
    %17 = vector.broadcast %15 : vector<256x1xf32> to vector<256x64xf32>
    %18 = vector.broadcast %16 : vector<1x64xf32> to vector<256x64xf32>
    %19 = arith.mulf %17, %18 : vector<256x64xf32>
    %20 = arith.addf %14, %19 : vector<256x64xf32>
    %21 = vector.broadcast %2 : vector<1x64xf32> to vector<256x64xf32>
    %22 = arith.addf %20, %21 : vector<256x64xf32>
    %cst = arith.constant 0.000000e+00 : f32
    %23 = vector.broadcast %cst : f32 to vector<256x64xf32>
    %24 = arith.maximumf %22, %23 : vector<256x64xf32>
    %c0_6 = arith.constant 0 : index
    %c0_7 = arith.constant 0 : index
    %c0_8 = arith.constant 0 : index
    %25 = vector.load %arg4[%c0_6, %c0_7, %c0_8] : memref<5x64x32xf32, #tpu.memory_space<vmem>>, vector<1x64x32xf32>
    %26 = vector.shape_cast %25 : vector<1x64x32xf32> to vector<64x32xf32>
    %cst_9 = arith.constant dense<0.000000e+00> : vector<256x32xf32>
    %27 = tpu.matmul %24, %26, %cst_9 {dimension_numbers = #tpu.dot_dimension_numbers<[1], [0], [0], [1], [0, 0, 1, 1], [], []>} : vector<256x64xf32>, vector<64x32xf32>, vector<256x32xf32> -> vector<256x32xf32>
    %c0_10 = arith.constant 0 : index
    %c0_11 = arith.constant 0 : index
    %c0_12 = arith.constant 0 : index
    %28 = vector.load %arg5[%c0_10, %c0_11, %c0_12] : memref<5x1x32xf32, #tpu.memory_space<vmem>>, vector<1x1x32xf32>
    %29 = vector.shape_cast %28 : vector<1x1x32xf32> to vector<1x32xf32>
    %30 = vector.broadcast %29 : vector<1x32xf32> to vector<256x32xf32>
    %31 = arith.addf %27, %30 : vector<256x32xf32>
    %cst_13 = arith.constant 0.000000e+00 : f32
    %32 = vector.broadcast %cst_13 : f32 to vector<256x32xf32>
    %33 = arith.maximumf %31, %32 : vector<256x32xf32>
    %c0_14 = arith.constant 0 : index
    %c0_15 = arith.constant 0 : index
    %c0_16 = arith.constant 0 : index
    %34 = vector.load %arg6[%c0_14, %c0_15, %c0_16] : memref<5x32x32xf32, #tpu.memory_space<vmem>>, vector<1x32x32xf32>
    %35 = vector.shape_cast %34 : vector<1x32x32xf32> to vector<32x32xf32>
    %cst_17 = arith.constant dense<0.000000e+00> : vector<256x32xf32>
    %36 = tpu.matmul %33, %35, %cst_17 {dimension_numbers = #tpu.dot_dimension_numbers<[1], [0], [0], [1], [0, 0, 1, 1], [], []>} : vector<256x32xf32>, vector<32x32xf32>, vector<256x32xf32> -> vector<256x32xf32>
    %c0_18 = arith.constant 0 : index
    %c0_19 = arith.constant 0 : index
    %c0_20 = arith.constant 0 : index
    %37 = vector.load %arg7[%c0_18, %c0_19, %c0_20] : memref<5x1x32xf32, #tpu.memory_space<vmem>>, vector<1x1x32xf32>
    %38 = vector.shape_cast %37 : vector<1x1x32xf32> to vector<1x32xf32>
    %39 = vector.broadcast %38 : vector<1x32xf32> to vector<256x32xf32>
    %40 = arith.addf %36, %39 : vector<256x32xf32>
    %c0_21 = arith.constant 0 : index
    %c0_22 = arith.constant 0 : index
    %c0_23 = arith.constant 0 : index
    %41 = vector.load %arg8[%c0_21, %c0_22, %c0_23] : memref<5x64x32xf32, #tpu.memory_space<vmem>>, vector<1x64x32xf32>
    %42 = vector.shape_cast %41 : vector<1x64x32xf32> to vector<64x32xf32>
    %cst_24 = arith.constant dense<0.000000e+00> : vector<256x32xf32>
    %43 = tpu.matmul %22, %42, %cst_24 {dimension_numbers = #tpu.dot_dimension_numbers<[1], [0], [0], [1], [0, 0, 1, 1], [], []>} : vector<256x64xf32>, vector<64x32xf32>, vector<256x32xf32> -> vector<256x32xf32>
    %44 = arith.addf %43, %40 : vector<256x32xf32>
    %45 = vector.shape_cast %44 : vector<256x32xf32> to vector<16x16x32xf32>
    %cst_25 = arith.constant dense<0xFF800000> : vector<16x32xf32>
    %46 = vector.multi_reduction <maximumf>, %45, %cst_25 [1] : vector<16x16x32xf32> to vector<16x32xf32>
    %c1 = arith.constant 1 : index
    %c0_26 = arith.constant 0 : index
    %c0_27 = arith.constant 0 : index
    %47 = vector.load %arg4[%c1, %c0_26, %c0_27] : memref<5x64x32xf32, #tpu.memory_space<vmem>>, vector<1x64x32xf32>
    %48 = vector.shape_cast %47 : vector<1x64x32xf32> to vector<64x32xf32>
    %c1_28 = arith.constant 1 : index
    %c0_29 = arith.constant 0 : index
    %c0_30 = arith.constant 0 : index
    %49 = vector.load %arg8[%c1_28, %c0_29, %c0_30] : memref<5x64x32xf32, #tpu.memory_space<vmem>>, vector<1x64x32xf32>
    %50 = vector.shape_cast %49 : vector<1x64x32xf32> to vector<64x32xf32>
    %cst_31 = arith.constant 0.000000e+00 : f32
    %51 = vector.broadcast %cst_31 : f32 to vector<256x32xf32>
    %52 = arith.maximumf %44, %51 : vector<256x32xf32>
    %cst_32 = arith.constant 0.000000e+00 : f32
    %53 = vector.broadcast %cst_32 : f32 to vector<16x32xf32>
    %54 = arith.maximumf %46, %53 : vector<16x32xf32>
    %55 = vector.extract_strided_slice %48 {offsets = [32, 0], sizes = [32, 32], strides = [1, 1]} : vector<64x32xf32> to vector<32x32xf32>
    %cst_33 = arith.constant dense<0.000000e+00> : vector<16x32xf32>
    %56 = tpu.matmul %54, %55, %cst_33 {dimension_numbers = #tpu.dot_dimension_numbers<[1], [0], [0], [1], [0, 0, 1, 1], [], []>} : vector<16x32xf32>, vector<32x32xf32>, vector<16x32xf32> -> vector<16x32xf32>
    %c1_34 = arith.constant 1 : index
    %c0_35 = arith.constant 0 : index
    %c0_36 = arith.constant 0 : index
    %57 = vector.load %arg5[%c1_34, %c0_35, %c0_36] : memref<5x1x32xf32, #tpu.memory_space<vmem>>, vector<1x1x32xf32>
    %58 = vector.shape_cast %57 : vector<1x1x32xf32> to vector<1x32xf32>
    %59 = vector.broadcast %58 : vector<1x32xf32> to vector<16x32xf32>
    %60 = arith.addf %56, %59 : vector<16x32xf32>
    %61 = vector.extract_strided_slice %48 {offsets = [0, 0], sizes = [32, 32], strides = [1, 1]} : vector<64x32xf32> to vector<32x32xf32>
    %cst_37 = arith.constant dense<0.000000e+00> : vector<256x32xf32>
    %62 = tpu.matmul %52, %61, %cst_37 {dimension_numbers = #tpu.dot_dimension_numbers<[1], [0], [0], [1], [0, 0, 1, 1], [], []>} : vector<256x32xf32>, vector<32x32xf32>, vector<256x32xf32> -> vector<256x32xf32>
    %63 = vector.shape_cast %62 : vector<256x32xf32> to vector<16x16x32xf32>
    %64 = vector.shape_cast %60 : vector<16x32xf32> to vector<16x1x32xf32>
    %65 = vector.broadcast %64 : vector<16x1x32xf32> to vector<16x16x32xf32>
    %66 = arith.addf %63, %65 : vector<16x16x32xf32>
    %67 = vector.shape_cast %66 : vector<16x16x32xf32> to vector<256x32xf32>
    %cst_38 = arith.constant 0.000000e+00 : f32
    %68 = vector.broadcast %cst_38 : f32 to vector<256x32xf32>
    %69 = arith.maximumf %67, %68 : vector<256x32xf32>
    %c1_39 = arith.constant 1 : index
    %c0_40 = arith.constant 0 : index
    %c0_41 = arith.constant 0 : index
    %70 = vector.load %arg6[%c1_39, %c0_40, %c0_41] : memref<5x32x32xf32, #tpu.memory_space<vmem>>, vector<1x32x32xf32>
    %71 = vector.shape_cast %70 : vector<1x32x32xf32> to vector<32x32xf32>
    %cst_42 = arith.constant dense<0.000000e+00> : vector<256x32xf32>
    %72 = tpu.matmul %69, %71, %cst_42 {dimension_numbers = #tpu.dot_dimension_numbers<[1], [0], [0], [1], [0, 0, 1, 1], [], []>} : vector<256x32xf32>, vector<32x32xf32>, vector<256x32xf32> -> vector<256x32xf32>
    %c1_43 = arith.constant 1 : index
    %c0_44 = arith.constant 0 : index
    %c0_45 = arith.constant 0 : index
    %73 = vector.load %arg7[%c1_43, %c0_44, %c0_45] : memref<5x1x32xf32, #tpu.memory_space<vmem>>, vector<1x1x32xf32>
    %74 = vector.shape_cast %73 : vector<1x1x32xf32> to vector<1x32xf32>
    %75 = vector.broadcast %74 : vector<1x32xf32> to vector<256x32xf32>
    %76 = arith.addf %72, %75 : vector<256x32xf32>
    %77 = vector.extract_strided_slice %50 {offsets = [32, 0], sizes = [32, 32], strides = [1, 1]} : vector<64x32xf32> to vector<32x32xf32>
    %cst_46 = arith.constant dense<0.000000e+00> : vector<16x32xf32>
    %78 = tpu.matmul %46, %77, %cst_46 {dimension_numbers = #tpu.dot_dimension_numbers<[1], [0], [0], [1], [0, 0, 1, 1], [], []>} : vector<16x32xf32>, vector<32x32xf32>, vector<16x32xf32> -> vector<16x32xf32>
    %79 = vector.extract_strided_slice %50 {offsets = [0, 0], sizes = [32, 32], strides = [1, 1]} : vector<64x32xf32> to vector<32x32xf32>
    %cst_47 = arith.constant dense<0.000000e+00> : vector<256x32xf32>
    %80 = tpu.matmul %44, %79, %cst_47 {dimension_numbers = #tpu.dot_dimension_numbers<[1], [0], [0], [1], [0, 0, 1, 1], [], []>} : vector<256x32xf32>, vector<32x32xf32>, vector<256x32xf32> -> vector<256x32xf32>
    %81 = vector.shape_cast %80 : vector<256x32xf32> to vector<16x16x32xf32>
    %82 = vector.shape_cast %78 : vector<16x32xf32> to vector<16x1x32xf32>
    %83 = vector.broadcast %82 : vector<16x1x32xf32> to vector<16x16x32xf32>
    %84 = arith.addf %81, %83 : vector<16x16x32xf32>
    %85 = vector.shape_cast %84 : vector<16x16x32xf32> to vector<256x32xf32>
    %86 = arith.addf %85, %76 : vector<256x32xf32>
    %87 = vector.shape_cast %86 : vector<256x32xf32> to vector<16x16x32xf32>
    %cst_48 = arith.constant dense<0xFF800000> : vector<16x32xf32>
    %88 = vector.multi_reduction <maximumf>, %87, %cst_48 [1] : vector<16x16x32xf32> to vector<16x32xf32>
    %c2 = arith.constant 2 : index
    %c0_49 = arith.constant 0 : index
    %c0_50 = arith.constant 0 : index
    %89 = vector.load %arg4[%c2, %c0_49, %c0_50] : memref<5x64x32xf32, #tpu.memory_space<vmem>>, vector<1x64x32xf32>
    %90 = vector.shape_cast %89 : vector<1x64x32xf32> to vector<64x32xf32>
    %c2_51 = arith.constant 2 : index
    %c0_52 = arith.constant 0 : index
    %c0_53 = arith.constant 0 : index
    %91 = vector.load %arg8[%c2_51, %c0_52, %c0_53] : memref<5x64x32xf32, #tpu.memory_space<vmem>>, vector<1x64x32xf32>
    %92 = vector.shape_cast %91 : vector<1x64x32xf32> to vector<64x32xf32>
    %cst_54 = arith.constant 0.000000e+00 : f32
    %93 = vector.broadcast %cst_54 : f32 to vector<256x32xf32>
    %94 = arith.maximumf %86, %93 : vector<256x32xf32>
    %cst_55 = arith.constant 0.000000e+00 : f32
    %95 = vector.broadcast %cst_55 : f32 to vector<16x32xf32>
    %96 = arith.maximumf %88, %95 : vector<16x32xf32>
    %97 = vector.extract_strided_slice %90 {offsets = [32, 0], sizes = [32, 32], strides = [1, 1]} : vector<64x32xf32> to vector<32x32xf32>
    %cst_56 = arith.constant dense<0.000000e+00> : vector<16x32xf32>
    %98 = tpu.matmul %96, %97, %cst_56 {dimension_numbers = #tpu.dot_dimension_numbers<[1], [0], [0], [1], [0, 0, 1, 1], [], []>} : vector<16x32xf32>, vector<32x32xf32>, vector<16x32xf32> -> vector<16x32xf32>
    %c2_57 = arith.constant 2 : index
    %c0_58 = arith.constant 0 : index
    %c0_59 = arith.constant 0 : index
    %99 = vector.load %arg5[%c2_57, %c0_58, %c0_59] : memref<5x1x32xf32, #tpu.memory_space<vmem>>, vector<1x1x32xf32>
    %100 = vector.shape_cast %99 : vector<1x1x32xf32> to vector<1x32xf32>
    %101 = vector.broadcast %100 : vector<1x32xf32> to vector<16x32xf32>
    %102 = arith.addf %98, %101 : vector<16x32xf32>
    %103 = vector.extract_strided_slice %90 {offsets = [0, 0], sizes = [32, 32], strides = [1, 1]} : vector<64x32xf32> to vector<32x32xf32>
    %cst_60 = arith.constant dense<0.000000e+00> : vector<256x32xf32>
    %104 = tpu.matmul %94, %103, %cst_60 {dimension_numbers = #tpu.dot_dimension_numbers<[1], [0], [0], [1], [0, 0, 1, 1], [], []>} : vector<256x32xf32>, vector<32x32xf32>, vector<256x32xf32> -> vector<256x32xf32>
    %105 = vector.shape_cast %104 : vector<256x32xf32> to vector<16x16x32xf32>
    %106 = vector.shape_cast %102 : vector<16x32xf32> to vector<16x1x32xf32>
    %107 = vector.broadcast %106 : vector<16x1x32xf32> to vector<16x16x32xf32>
    %108 = arith.addf %105, %107 : vector<16x16x32xf32>
    %109 = vector.shape_cast %108 : vector<16x16x32xf32> to vector<256x32xf32>
    %cst_61 = arith.constant 0.000000e+00 : f32
    %110 = vector.broadcast %cst_61 : f32 to vector<256x32xf32>
    %111 = arith.maximumf %109, %110 : vector<256x32xf32>
    %c2_62 = arith.constant 2 : index
    %c0_63 = arith.constant 0 : index
    %c0_64 = arith.constant 0 : index
    %112 = vector.load %arg6[%c2_62, %c0_63, %c0_64] : memref<5x32x32xf32, #tpu.memory_space<vmem>>, vector<1x32x32xf32>
    %113 = vector.shape_cast %112 : vector<1x32x32xf32> to vector<32x32xf32>
    %cst_65 = arith.constant dense<0.000000e+00> : vector<256x32xf32>
    %114 = tpu.matmul %111, %113, %cst_65 {dimension_numbers = #tpu.dot_dimension_numbers<[1], [0], [0], [1], [0, 0, 1, 1], [], []>} : vector<256x32xf32>, vector<32x32xf32>, vector<256x32xf32> -> vector<256x32xf32>
    %c2_66 = arith.constant 2 : index
    %c0_67 = arith.constant 0 : index
    %c0_68 = arith.constant 0 : index
    %115 = vector.load %arg7[%c2_66, %c0_67, %c0_68] : memref<5x1x32xf32, #tpu.memory_space<vmem>>, vector<1x1x32xf32>
    %116 = vector.shape_cast %115 : vector<1x1x32xf32> to vector<1x32xf32>
    %117 = vector.broadcast %116 : vector<1x32xf32> to vector<256x32xf32>
    %118 = arith.addf %114, %117 : vector<256x32xf32>
    %119 = vector.extract_strided_slice %92 {offsets = [32, 0], sizes = [32, 32], strides = [1, 1]} : vector<64x32xf32> to vector<32x32xf32>
    %cst_69 = arith.constant dense<0.000000e+00> : vector<16x32xf32>
    %120 = tpu.matmul %88, %119, %cst_69 {dimension_numbers = #tpu.dot_dimension_numbers<[1], [0], [0], [1], [0, 0, 1, 1], [], []>} : vector<16x32xf32>, vector<32x32xf32>, vector<16x32xf32> -> vector<16x32xf32>
    %121 = vector.extract_strided_slice %92 {offsets = [0, 0], sizes = [32, 32], strides = [1, 1]} : vector<64x32xf32> to vector<32x32xf32>
    %cst_70 = arith.constant dense<0.000000e+00> : vector<256x32xf32>
    %122 = tpu.matmul %86, %121, %cst_70 {dimension_numbers = #tpu.dot_dimension_numbers<[1], [0], [0], [1], [0, 0, 1, 1], [], []>} : vector<256x32xf32>, vector<32x32xf32>, vector<256x32xf32> -> vector<256x32xf32>
    %123 = vector.shape_cast %122 : vector<256x32xf32> to vector<16x16x32xf32>
    %124 = vector.shape_cast %120 : vector<16x32xf32> to vector<16x1x32xf32>
    %125 = vector.broadcast %124 : vector<16x1x32xf32> to vector<16x16x32xf32>
    %126 = arith.addf %123, %125 : vector<16x16x32xf32>
    %127 = vector.shape_cast %126 : vector<16x16x32xf32> to vector<256x32xf32>
    %128 = arith.addf %127, %118 : vector<256x32xf32>
    %129 = vector.shape_cast %128 : vector<256x32xf32> to vector<16x16x32xf32>
    %cst_71 = arith.constant dense<0xFF800000> : vector<16x32xf32>
    %130 = vector.multi_reduction <maximumf>, %129, %cst_71 [1] : vector<16x16x32xf32> to vector<16x32xf32>
    %c3 = arith.constant 3 : index
    %c0_72 = arith.constant 0 : index
    %c0_73 = arith.constant 0 : index
    %131 = vector.load %arg4[%c3, %c0_72, %c0_73] : memref<5x64x32xf32, #tpu.memory_space<vmem>>, vector<1x64x32xf32>
    %132 = vector.shape_cast %131 : vector<1x64x32xf32> to vector<64x32xf32>
    %c3_74 = arith.constant 3 : index
    %c0_75 = arith.constant 0 : index
    %c0_76 = arith.constant 0 : index
    %133 = vector.load %arg8[%c3_74, %c0_75, %c0_76] : memref<5x64x32xf32, #tpu.memory_space<vmem>>, vector<1x64x32xf32>
    %134 = vector.shape_cast %133 : vector<1x64x32xf32> to vector<64x32xf32>
    %cst_77 = arith.constant 0.000000e+00 : f32
    %135 = vector.broadcast %cst_77 : f32 to vector<256x32xf32>
    %136 = arith.maximumf %128, %135 : vector<256x32xf32>
    %cst_78 = arith.constant 0.000000e+00 : f32
    %137 = vector.broadcast %cst_78 : f32 to vector<16x32xf32>
    %138 = arith.maximumf %130, %137 : vector<16x32xf32>
    %139 = vector.extract_strided_slice %132 {offsets = [32, 0], sizes = [32, 32], strides = [1, 1]} : vector<64x32xf32> to vector<32x32xf32>
    %cst_79 = arith.constant dense<0.000000e+00> : vector<16x32xf32>
    %140 = tpu.matmul %138, %139, %cst_79 {dimension_numbers = #tpu.dot_dimension_numbers<[1], [0], [0], [1], [0, 0, 1, 1], [], []>} : vector<16x32xf32>, vector<32x32xf32>, vector<16x32xf32> -> vector<16x32xf32>
    %c3_80 = arith.constant 3 : index
    %c0_81 = arith.constant 0 : index
    %c0_82 = arith.constant 0 : index
    %141 = vector.load %arg5[%c3_80, %c0_81, %c0_82] : memref<5x1x32xf32, #tpu.memory_space<vmem>>, vector<1x1x32xf32>
    %142 = vector.shape_cast %141 : vector<1x1x32xf32> to vector<1x32xf32>
    %143 = vector.broadcast %142 : vector<1x32xf32> to vector<16x32xf32>
    %144 = arith.addf %140, %143 : vector<16x32xf32>
    %145 = vector.extract_strided_slice %132 {offsets = [0, 0], sizes = [32, 32], strides = [1, 1]} : vector<64x32xf32> to vector<32x32xf32>
    %cst_83 = arith.constant dense<0.000000e+00> : vector<256x32xf32>
    %146 = tpu.matmul %136, %145, %cst_83 {dimension_numbers = #tpu.dot_dimension_numbers<[1], [0], [0], [1], [0, 0, 1, 1], [], []>} : vector<256x32xf32>, vector<32x32xf32>, vector<256x32xf32> -> vector<256x32xf32>
    %147 = vector.shape_cast %146 : vector<256x32xf32> to vector<16x16x32xf32>
    %148 = vector.shape_cast %144 : vector<16x32xf32> to vector<16x1x32xf32>
    %149 = vector.broadcast %148 : vector<16x1x32xf32> to vector<16x16x32xf32>
    %150 = arith.addf %147, %149 : vector<16x16x32xf32>
    %151 = vector.shape_cast %150 : vector<16x16x32xf32> to vector<256x32xf32>
    %cst_84 = arith.constant 0.000000e+00 : f32
    %152 = vector.broadcast %cst_84 : f32 to vector<256x32xf32>
    %153 = arith.maximumf %151, %152 : vector<256x32xf32>
    %c3_85 = arith.constant 3 : index
    %c0_86 = arith.constant 0 : index
    %c0_87 = arith.constant 0 : index
    %154 = vector.load %arg6[%c3_85, %c0_86, %c0_87] : memref<5x32x32xf32, #tpu.memory_space<vmem>>, vector<1x32x32xf32>
    %155 = vector.shape_cast %154 : vector<1x32x32xf32> to vector<32x32xf32>
    %cst_88 = arith.constant dense<0.000000e+00> : vector<256x32xf32>
    %156 = tpu.matmul %153, %155, %cst_88 {dimension_numbers = #tpu.dot_dimension_numbers<[1], [0], [0], [1], [0, 0, 1, 1], [], []>} : vector<256x32xf32>, vector<32x32xf32>, vector<256x32xf32> -> vector<256x32xf32>
    %c3_89 = arith.constant 3 : index
    %c0_90 = arith.constant 0 : index
    %c0_91 = arith.constant 0 : index
    %157 = vector.load %arg7[%c3_89, %c0_90, %c0_91] : memref<5x1x32xf32, #tpu.memory_space<vmem>>, vector<1x1x32xf32>
    %158 = vector.shape_cast %157 : vector<1x1x32xf32> to vector<1x32xf32>
    %159 = vector.broadcast %158 : vector<1x32xf32> to vector<256x32xf32>
    %160 = arith.addf %156, %159 : vector<256x32xf32>
    %161 = vector.extract_strided_slice %134 {offsets = [32, 0], sizes = [32, 32], strides = [1, 1]} : vector<64x32xf32> to vector<32x32xf32>
    %cst_92 = arith.constant dense<0.000000e+00> : vector<16x32xf32>
    %162 = tpu.matmul %130, %161, %cst_92 {dimension_numbers = #tpu.dot_dimension_numbers<[1], [0], [0], [1], [0, 0, 1, 1], [], []>} : vector<16x32xf32>, vector<32x32xf32>, vector<16x32xf32> -> vector<16x32xf32>
    %163 = vector.extract_strided_slice %134 {offsets = [0, 0], sizes = [32, 32], strides = [1, 1]} : vector<64x32xf32> to vector<32x32xf32>
    %cst_93 = arith.constant dense<0.000000e+00> : vector<256x32xf32>
    %164 = tpu.matmul %128, %163, %cst_93 {dimension_numbers = #tpu.dot_dimension_numbers<[1], [0], [0], [1], [0, 0, 1, 1], [], []>} : vector<256x32xf32>, vector<32x32xf32>, vector<256x32xf32> -> vector<256x32xf32>
    %165 = vector.shape_cast %164 : vector<256x32xf32> to vector<16x16x32xf32>
    %166 = vector.shape_cast %162 : vector<16x32xf32> to vector<16x1x32xf32>
    %167 = vector.broadcast %166 : vector<16x1x32xf32> to vector<16x16x32xf32>
    %168 = arith.addf %165, %167 : vector<16x16x32xf32>
    %169 = vector.shape_cast %168 : vector<16x16x32xf32> to vector<256x32xf32>
    %170 = arith.addf %169, %160 : vector<256x32xf32>
    %171 = vector.shape_cast %170 : vector<256x32xf32> to vector<16x16x32xf32>
    %cst_94 = arith.constant dense<0xFF800000> : vector<16x32xf32>
    %172 = vector.multi_reduction <maximumf>, %171, %cst_94 [1] : vector<16x16x32xf32> to vector<16x32xf32>
    %c4 = arith.constant 4 : index
    %c0_95 = arith.constant 0 : index
    %c0_96 = arith.constant 0 : index
    %173 = vector.load %arg4[%c4, %c0_95, %c0_96] : memref<5x64x32xf32, #tpu.memory_space<vmem>>, vector<1x64x32xf32>
    %174 = vector.shape_cast %173 : vector<1x64x32xf32> to vector<64x32xf32>
    %c4_97 = arith.constant 4 : index
    %c0_98 = arith.constant 0 : index
    %c0_99 = arith.constant 0 : index
    %175 = vector.load %arg8[%c4_97, %c0_98, %c0_99] : memref<5x64x32xf32, #tpu.memory_space<vmem>>, vector<1x64x32xf32>
    %176 = vector.shape_cast %175 : vector<1x64x32xf32> to vector<64x32xf32>
    %cst_100 = arith.constant 0.000000e+00 : f32
    %177 = vector.broadcast %cst_100 : f32 to vector<256x32xf32>
    %178 = arith.maximumf %170, %177 : vector<256x32xf32>
    %cst_101 = arith.constant 0.000000e+00 : f32
    %179 = vector.broadcast %cst_101 : f32 to vector<16x32xf32>
    %180 = arith.maximumf %172, %179 : vector<16x32xf32>
    %181 = vector.extract_strided_slice %174 {offsets = [32, 0], sizes = [32, 32], strides = [1, 1]} : vector<64x32xf32> to vector<32x32xf32>
    %cst_102 = arith.constant dense<0.000000e+00> : vector<16x32xf32>
    %182 = tpu.matmul %180, %181, %cst_102 {dimension_numbers = #tpu.dot_dimension_numbers<[1], [0], [0], [1], [0, 0, 1, 1], [], []>} : vector<16x32xf32>, vector<32x32xf32>, vector<16x32xf32> -> vector<16x32xf32>
    %c4_103 = arith.constant 4 : index
    %c0_104 = arith.constant 0 : index
    %c0_105 = arith.constant 0 : index
    %183 = vector.load %arg5[%c4_103, %c0_104, %c0_105] : memref<5x1x32xf32, #tpu.memory_space<vmem>>, vector<1x1x32xf32>
    %184 = vector.shape_cast %183 : vector<1x1x32xf32> to vector<1x32xf32>
    %185 = vector.broadcast %184 : vector<1x32xf32> to vector<16x32xf32>
    %186 = arith.addf %182, %185 : vector<16x32xf32>
    %187 = vector.extract_strided_slice %174 {offsets = [0, 0], sizes = [32, 32], strides = [1, 1]} : vector<64x32xf32> to vector<32x32xf32>
    %cst_106 = arith.constant dense<0.000000e+00> : vector<256x32xf32>
    %188 = tpu.matmul %178, %187, %cst_106 {dimension_numbers = #tpu.dot_dimension_numbers<[1], [0], [0], [1], [0, 0, 1, 1], [], []>} : vector<256x32xf32>, vector<32x32xf32>, vector<256x32xf32> -> vector<256x32xf32>
    %189 = vector.shape_cast %188 : vector<256x32xf32> to vector<16x16x32xf32>
    %190 = vector.shape_cast %186 : vector<16x32xf32> to vector<16x1x32xf32>
    %191 = vector.broadcast %190 : vector<16x1x32xf32> to vector<16x16x32xf32>
    %192 = arith.addf %189, %191 : vector<16x16x32xf32>
    %193 = vector.shape_cast %192 : vector<16x16x32xf32> to vector<256x32xf32>
    %cst_107 = arith.constant 0.000000e+00 : f32
    %194 = vector.broadcast %cst_107 : f32 to vector<256x32xf32>
    %195 = arith.maximumf %193, %194 : vector<256x32xf32>
    %c4_108 = arith.constant 4 : index
    %c0_109 = arith.constant 0 : index
    %c0_110 = arith.constant 0 : index
    %196 = vector.load %arg6[%c4_108, %c0_109, %c0_110] : memref<5x32x32xf32, #tpu.memory_space<vmem>>, vector<1x32x32xf32>
    %197 = vector.shape_cast %196 : vector<1x32x32xf32> to vector<32x32xf32>
    %cst_111 = arith.constant dense<0.000000e+00> : vector<256x32xf32>
    %198 = tpu.matmul %195, %197, %cst_111 {dimension_numbers = #tpu.dot_dimension_numbers<[1], [0], [0], [1], [0, 0, 1, 1], [], []>} : vector<256x32xf32>, vector<32x32xf32>, vector<256x32xf32> -> vector<256x32xf32>
    %c4_112 = arith.constant 4 : index
    %c0_113 = arith.constant 0 : index
    %c0_114 = arith.constant 0 : index
    %199 = vector.load %arg7[%c4_112, %c0_113, %c0_114] : memref<5x1x32xf32, #tpu.memory_space<vmem>>, vector<1x1x32xf32>
    %200 = vector.shape_cast %199 : vector<1x1x32xf32> to vector<1x32xf32>
    %201 = vector.broadcast %200 : vector<1x32xf32> to vector<256x32xf32>
    %202 = arith.addf %198, %201 : vector<256x32xf32>
    %203 = vector.extract_strided_slice %176 {offsets = [32, 0], sizes = [32, 32], strides = [1, 1]} : vector<64x32xf32> to vector<32x32xf32>
    %cst_115 = arith.constant dense<0.000000e+00> : vector<16x32xf32>
    %204 = tpu.matmul %172, %203, %cst_115 {dimension_numbers = #tpu.dot_dimension_numbers<[1], [0], [0], [1], [0, 0, 1, 1], [], []>} : vector<16x32xf32>, vector<32x32xf32>, vector<16x32xf32> -> vector<16x32xf32>
    %205 = vector.extract_strided_slice %176 {offsets = [0, 0], sizes = [32, 32], strides = [1, 1]} : vector<64x32xf32> to vector<32x32xf32>
    %cst_116 = arith.constant dense<0.000000e+00> : vector<256x32xf32>
    %206 = tpu.matmul %170, %205, %cst_116 {dimension_numbers = #tpu.dot_dimension_numbers<[1], [0], [0], [1], [0, 0, 1, 1], [], []>} : vector<256x32xf32>, vector<32x32xf32>, vector<256x32xf32> -> vector<256x32xf32>
    %207 = vector.shape_cast %206 : vector<256x32xf32> to vector<16x16x32xf32>
    %208 = vector.shape_cast %204 : vector<16x32xf32> to vector<16x1x32xf32>
    %209 = vector.broadcast %208 : vector<16x1x32xf32> to vector<16x16x32xf32>
    %210 = arith.addf %207, %209 : vector<16x16x32xf32>
    %211 = vector.shape_cast %210 : vector<16x16x32xf32> to vector<256x32xf32>
    %212 = arith.addf %211, %202 : vector<256x32xf32>
    %213 = vector.shape_cast %212 : vector<256x32xf32> to vector<16x16x32xf32>
    %cst_117 = arith.constant dense<0xFF800000> : vector<16x32xf32>
    %214 = vector.multi_reduction <maximumf>, %213, %cst_117 [1] : vector<16x16x32xf32> to vector<16x32xf32>
    %cst_118 = arith.constant 0.000000e+00 : f32
    %215 = vector.broadcast %cst_118 : f32 to vector<16x32xf32>
    %216 = arith.maximumf %214, %215 : vector<16x32xf32>
    %c0_119 = arith.constant 0 : index
    %c0_120 = arith.constant 0 : index
    %217 = vector.load %arg9[%c0_119, %c0_120] : memref<32x32xf32, #tpu.memory_space<vmem>>, vector<32x32xf32>
    %cst_121 = arith.constant dense<0.000000e+00> : vector<16x32xf32>
    %218 = tpu.matmul %216, %217, %cst_121 {dimension_numbers = #tpu.dot_dimension_numbers<[1], [0], [0], [1], [0, 0, 1, 1], [], []>} : vector<16x32xf32>, vector<32x32xf32>, vector<16x32xf32> -> vector<16x32xf32>
    %c0_122 = arith.constant 0 : index
    %c0_123 = arith.constant 0 : index
    %219 = vector.load %arg10[%c0_122, %c0_123] : memref<1x32xf32, #tpu.memory_space<vmem>>, vector<1x32xf32>
    %220 = vector.broadcast %219 : vector<1x32xf32> to vector<16x32xf32>
    %221 = arith.addf %218, %220 : vector<16x32xf32>
    %c0_124 = arith.constant 0 : index
    %c0_125 = arith.constant 0 : index
    %222 = vector.load %arg11[%c0_124, %c0_125] : memref<16x32xf32, #tpu.memory_space<vmem>>, vector<16x32xf32>
    tpu.vector_store %arg11[%c0_124, %c0_125], %221 {strides = array<i32>} : memref<16x32xf32, #tpu.memory_space<vmem>>, vector<16x32xf32>,
    return
  }
  func.func @transform_0(%arg0: i32) -> (i32, i32, i32) {
    %c0_i32 = arith.constant 0 : i32
    %c0_i32_0 = arith.constant 0 : i32
    %c0_i32_1 = arith.constant 0 : i32
    return %arg0, %c0_i32, %c0_i32_0 : i32, i32, i32
  }
  func.func @transform_1(%arg0: i32) -> (i32, i32) {
    %c0_i32 = arith.constant 0 : i32
    %c0_i32_0 = arith.constant 0 : i32
    %c0_i32_1 = arith.constant 0 : i32
    return %c0_i32, %c0_i32_0 : i32, i32
  }
  func.func @transform_2(%arg0: i32) -> (i32, i32) {
    %c0_i32 = arith.constant 0 : i32
    %c0_i32_0 = arith.constant 0 : i32
    %c0_i32_1 = arith.constant 0 : i32
    return %c0_i32, %c0_i32_0 : i32, i32
  }
  func.func @transform_3(%arg0: i32) -> (i32, i32, i32) {
    %c0_i32 = arith.constant 0 : i32
    %c0_i32_0 = arith.constant 0 : i32
    %c0_i32_1 = arith.constant 0 : i32
    %c0_i32_2 = arith.constant 0 : i32
    return %c0_i32, %c0_i32_0, %c0_i32_1 : i32, i32, i32
  }
  func.func @transform_4(%arg0: i32) -> (i32, i32, i32) {
    %c0_i32 = arith.constant 0 : i32
    %c0_i32_0 = arith.constant 0 : i32
    %c0_i32_1 = arith.constant 0 : i32
    %c0_i32_2 = arith.constant 0 : i32
    return %c0_i32, %c0_i32_0, %c0_i32_1 : i32, i32, i32
  }
  func.func @transform_5(%arg0: i32) -> (i32, i32, i32) {
    %c0_i32 = arith.constant 0 : i32
    %c0_i32_0 = arith.constant 0 : i32
    %c0_i32_1 = arith.constant 0 : i32
    %c0_i32_2 = arith.constant 0 : i32
    return %c0_i32, %c0_i32_0, %c0_i32_1 : i32, i32, i32
  }
  func.func @transform_6(%arg0: i32) -> (i32, i32, i32) {
    %c0_i32 = arith.constant 0 : i32
    %c0_i32_0 = arith.constant 0 : i32
    %c0_i32_1 = arith.constant 0 : i32
    %c0_i32_2 = arith.constant 0 : i32
    return %c0_i32, %c0_i32_0, %c0_i32_1 : i32, i32, i32
  }
  func.func @transform_7(%arg0: i32) -> (i32, i32, i32) {
    %c0_i32 = arith.constant 0 : i32
    %c0_i32_0 = arith.constant 0 : i32
    %c0_i32_1 = arith.constant 0 : i32
    %c0_i32_2 = arith.constant 0 : i32
    return %c0_i32, %c0_i32_0, %c0_i32_1 : i32, i32, i32
  }
  func.func @transform_8(%arg0: i32) -> (i32, i32) {
    %c0_i32 = arith.constant 0 : i32
    %c0_i32_0 = arith.constant 0 : i32
    %c0_i32_1 = arith.constant 0 : i32
    return %c0_i32, %c0_i32_0 : i32, i32
  }
  func.func @transform_9(%arg0: i32) -> (i32, i32) {
    %c0_i32 = arith.constant 0 : i32
    %c0_i32_0 = arith.constant 0 : i32
    %c0_i32_1 = arith.constant 0 : i32
    return %c0_i32, %c0_i32_0 : i32, i32
  }
  func.func @transform_10(%arg0: i32) -> (i32, i32) {
    %c0_i32 = arith.constant 0 : i32
    %c0_i32_0 = arith.constant 0 : i32
    return %arg0, %c0_i32 : i32, i32
  }
}

</mosaic_0001>

<bundles_post_ra>
// kernel: tpu_custom_call.1
= control target key start
LH: loop header
LB: loop body
LE: loop exit
PB: predicated region body
PF: predicated region fallthrough
CT: control target
= control target key end

     0   :  { %v12561_v2 = vmov 1   ;;  %v12562_v3 = vmov 0   ;;  %s15806_s0 = inlined_call_operand.vmem [shape: f32[16,16,3], index: 0, kind: input, shape index: {}]   ;;  %s15807_s1 = inlined_call_operand.vmem [shape: f32[3,64], index: 1, kind: input, shape index: {}]   ;;  %s15808_s2 = inlined_call_operand.vmem [shape: f32[1,64], index: 2, kind: input, shape index: {}]   ;;  %s15809_s3 = inlined_call_operand.vmem [shape: f32[5,64,32], index: 3, kind: input, shape index: {}]   ;;  %s15810_s4 = inlined_call_operand.vmem [shape: f32[5,1,32], index: 4, kind: input, shape index: {}]   ;;  %s15811_s5 = inlined_call_operand.vmem [shape: f32[5,32,32], index: 5, kind: input, shape index: {}]   ;;  %s15812_s6 = inlined_call_operand.vmem [shape: f32[5,1,32], index: 6, kind: input, shape index: {}]   ;;  %s15813_s7 = inlined_call_operand.vmem [shape: f32[5,64,32], index: 7, kind: input, shape index: {}]   ;;  %s15814_s8 = inlined_call_operand.vmem [shape: f32[32,32], index: 8, kind: input, shape index: {}]   ;;  %s15815_s9 = inlined_call_operand.vmem [shape: f32[1,32], index: 9, kind: input, shape index: {}]   ;;  %s15816_s10 = inlined_call_operand.hbm [shape: f32[16,32], index: 10, kind: output, shape index: {}]  }
   0x1   :  { %v12626_v0 = vld [vmem:[%s15806_s0 + $0x8] sm:$0xff]  ;;  %v36_v1 = vld [vmem:[%s15806_s0] sm:$0xff]  ;;  %12486 = vset.pattern.permute.xlu0 %v12561_v2  ;;  %12488 = vset.pattern.permute.xlu1 %v12562_v3  ;;  %v12640_v4 = vld [vmem:[%s15806_s0 + $0x18] sm:$0xff] }
   0x2   :  { %77 = vperm.xlu1 %12488, %v12626_v0   ;;  %267 = vperm.xlu0 %12486, %v36_v1  }
   0x6   :  { %12489 = vset.pattern.permute.xlu1 %v12561_v2  ;;  %12487 = vset.pattern.permute.xlu0 %v12562_v3 }
   0x7   :  { %271 = vperm.xlu1 %12489, %v12626_v0   ;;  %72 = vperm.xlu0 %12487, %v36_v1  }
   0x8   :  { %15 = vsyncpa [#allocation3], 0  ;;  %v12563_v5 = vmov 2   ;;  %v12647_v6 = vld [vmem:[%s15806_s0 + $0x28] sm:$0xff]  ;;  %v38_v7 = vld [vmem:[%s15806_s0 + $0x10] sm:$0xff]  ;;  %v230_v38 = vlaneseq  ;;  %vm743_vm0 = vcmask 523264  }
   0x9   :  { %v12657_v8 = vld [vmem:[%s15806_s0 + $0x38] sm:$0xff]  ;;  %v12663_v9 = vld [vmem:[%s15806_s0 + $0x48] sm:$0xff]  ;;  %v40_v13 = vld [vmem:[%s15806_s0 + $0x20] sm:$0xff]  ;;  %vm1108_vm1 = vcmask 261120   ;;  %vm1993_vm2 = vcmask 1041409   ;;  %vm1995_vm3 = vcmask 1042434  }
   0xa   :  { %v12670_v10 = vld [vmem:[%s15806_s0 + $0x58] sm:$0xff]  ;;  %v12677_v11 = vld [vmem:[%s15806_s0 + $0x68] sm:$0xff]  ;;  %v42_v18 = vld [vmem:[%s15806_s0 + $0x30] sm:$0xff]  ;;  %v12809_v39 = vshrl.u32 %v230_v38, 7  ;;  %vm1997_vm4 = vcmask 1043459   ;;  %vm1999_vm5 = vcmask 1044484  }
   0xb   :  { %12490 = vset.pattern.permute.xlu1 %v12563_v5  ;;  %87 = vperm.xlu0 %12487, %v12640_v4   ;;  %v12684_v12 = vld [vmem:[%s15806_s0 + $0x78] sm:$0xff]  ;;  %v12694_v14 = vld [vmem:[%s15806_s0 + $0x88] sm:$0xff]  ;;  %v728_v22 = vld [vmem:[%s15809_s3] sm:$0xff]  ;;  %vm2001_vm6 = vcmask 1045509   ;;  %vm2003_vm7 = vcmask 1046534   ;;  %vm2005_vm8 = vcmask 1047559  }
   0xc   :  { %463 = vperm.xlu1 %12490, %v36_v1   ;;  %v12701_v15 = vld [vmem:[%s15806_s0 + $0x98] sm:$0xff]  ;;  %v12707_v16 = vld [vmem:[%s15806_s0 + $0xa8] sm:$0xff]  ;;  %v730_v26 = vld [vmem:[%s15809_s3 + $0x10] sm:$0xff]  ;;  %v396_v41 = vsub.s32 1, %v12809_v39  ;;  %v12817_v42 = vsub.s32 0, %v12809_v39  ;;  %v592_v47 = vsub.s32 2, %v12809_v39 }
   0xd   :  { %v12714_v17 = vld [vmem:[%s15806_s0 + $0xb8] sm:$0xff]  ;;  %v12724_v19 = vld [vmem:[%s15806_s0 + $0xc8] sm:$0xff]  ;;  %v732_v29 = vld [vmem:[%s15809_s3 + $0x20] sm:$0xff] }
   0xe   :  { %v12731_v20 = vld [vmem:[%s15806_s0 + $0xd8] sm:$0xff]  ;;  %v12738_v21 = vld [vmem:[%s15806_s0 + $0xe8] sm:$0xff]  ;;  %v44_v32 = vld [vmem:[%s15806_s0 + $0x40] sm:$0xff]  ;;  %15854 = vst [vmem:[#allocation5_spill] sm:$0xff] %v12817_v42 }
   0xf   :  { %97 = vperm.xlu0 %12487, %v12647_v6   ;;  %v729_v23 = vld [vmem:[%s15809_s3 + $0x8] sm:$0xff]  ;;  %v12751_v25 = vld [vmem:[%s15806_s0 + $0xf8] sm:$0xff]  ;;  %v734_v33 = vld [vmem:[%s15809_s3 + $0x30] sm:$0xff] }
  0x10   :  { %12491 = vset.pattern.permute.xlu1 %v12562_v3  ;;  %v11819_v24 = vpack.c.bf16 %v729_v23, %v728_v22  ;;  %v731_v27 = vld [vmem:[%s15809_s3 + $0x18] sm:$0xff]  ;;  %v733_v30 = vld [vmem:[%s15809_s3 + $0x28] sm:$0xff]  ;;  %v46_v36 = vld [vmem:[%s15806_s0 + $0x50] sm:$0xff] }
  0x11   :  { %82 = vperm.xlu1 %12491, %v38_v7   ;;  %v11823_v28 = vpack.c.bf16 %v731_v27, %v730_v26  ;;  %v11827_v31 = vpack.c.bf16 %v733_v30, %v732_v29  ;;  %v735_v34 = vld [vmem:[%s15809_s3 + $0x38] sm:$0xff]  ;;  %v48_v37 = vld [vmem:[%s15806_s0 + $0x60] sm:$0xff]  ;;  %v50_v40 = vld [vmem:[%s15806_s0 + $0x70] sm:$0xff] }
  0x12   :  { %11820 = vmatprep.subr.bf16.mxu0 %v11819_v24  ;;  %v11831_v35 = vpack.c.bf16 %v735_v34, %v734_v33  ;;  %v69_v45 = vld [vmem:[%s15807_s1] sm:$0x7] }
  0x13   :  { %107 = vperm.xlu0 %12487, %v12657_v8   ;;  %11822 = vmatpush3.bf16.msra.mxu0 %v11819_v24  ;;  %v12825_v46 = vrot.slane %v69_v45, %v396_v41  ;;  %v12830_v48 = vrot.slane %v69_v45, %v12817_v42  ;;  %v12837_v53 = vrot.slane %v69_v45, %v592_v47  ;;  %v12846_v58 = vld [vmem:[%s15808_s2] ss:$0 sm:$0xff] }
  0x14   :  { %11824 = vmatprep.subr.bf16.mxu0 %v11823_v28  ;;  %v52_v1 = vld [vmem:[%s15806_s0 + $0x80] sm:$0xff] }
  0x15   :  { %12492 = vset.pattern.permute.xlu1 %v12561_v2  ;;  %v56_v30 = vld [vmem:[%s15806_s0 + $0xa0] sm:$0xff] }
  0x16   :  { %275 = vperm.xlu1 %12492, %v38_v7  }
  0x17   :  { %117 = vperm.xlu0 %12487, %v12663_v9   ;;  %11826 = vmatpush3.bf16.msra.mxu0 %v11823_v28 }
  0x18   :  { %11828 = vmatprep.subr.bf16.mxu0 %v11827_v31 }
  0x1a   :  { %279 = vperm.xlu1 %12492, %v12640_v4  }
  0x1b   :  { %127 = vperm.xlu0 %12487, %v12670_v10   ;;  %11830 = vmatpush3.bf16.msra.mxu0 %v11827_v31 }
  0x1c   :  { %11832 = vmatprep.subr.bf16.mxu0 %v11831_v35 }
  0x1e   :  { %12493 = vset.pattern.permute.xlu1 %v12563_v5 }
  0x1f   :  { %471 = vperm.xlu1 %12493, %v38_v7   ;;  %137 = vperm.xlu0 %12487, %v12677_v11  }
  0x20   :  { %11834 = vmatpush3.bf16.msra.mxu0 %v11831_v35 }
  0x23   :  { %12494 = vset.pattern.permute.xlu1 %v12562_v3  ;;  %147 = vperm.xlu0 %12487, %v12684_v12  }
  0x24   :  { %92 = vperm.xlu1 %12494, %v40_v13  }
  0x27   :  { %157 = vperm.xlu0 %12487, %v12694_v14  }
  0x28   :  { %12495 = vset.pattern.permute.xlu1 %v12561_v2 }
  0x29   :  { %283 = vperm.xlu1 %12495, %v40_v13  }
  0x2b   :  { %167 = vperm.xlu0 %12487, %v12701_v15  }
  0x2d   :  { %287 = vperm.xlu1 %12495, %v12647_v6  }
  0x2f   :  { %177 = vperm.xlu0 %12487, %v12707_v16  }
  0x31   :  { %12496 = vset.pattern.permute.xlu1 %v12563_v5 }
  0x32   :  { %479 = vperm.xlu1 %12496, %v40_v13  }
  0x33   :  { %187 = vperm.xlu0 %12487, %v12714_v17  }
  0x36   :  { %12497 = vset.pattern.permute.xlu1 %v12562_v3 }
  0x37   :  { %102 = vperm.xlu1 %12497, %v42_v18   ;;  %197 = vperm.xlu0 %12487, %v12724_v19  }
  0x3b   :  { %12498 = vset.pattern.permute.xlu1 %v12561_v2  ;;  %207 = vperm.xlu0 %12487, %v12731_v20  }
  0x3c   :  { %291 = vperm.xlu1 %12498, %v42_v18  }
  0x3f   :  { %217 = vperm.xlu0 %12487, %v12738_v21  }
  0x40   :  { %295 = vperm.xlu1 %12498, %v12657_v8  }
  0x43   :  { %227 = vperm.xlu0 %12487, %v12751_v25  }
  0x44   :  { %12499 = vset.pattern.permute.xlu1 %v12563_v5 }
  0x45   :  { %487 = vperm.xlu1 %12499, %v42_v18   ;;  %v54_v18 = vld [vmem:[%s15806_s0 + $0x90] sm:$0xff] }
  0x47   :  { %12535 = vset.pattern.permute.xlu0 %v12563_v5 }
  0x48   :  { %467 = vperm.xlu0 %12535, %v12626_v0  }
  0x49   :  { %12500 = vset.pattern.permute.xlu1 %v12562_v3 }
  0x4a   :  { %112 = vperm.xlu1 %12500, %v44_v32  }
  0x4c   :  { %475 = vperm.xlu0 %12535, %v12640_v4  }
  0x4e   :  { %12501 = vset.pattern.permute.xlu1 %v12561_v2 }
  0x4f   :  { %299 = vperm.xlu1 %12501, %v44_v32  }
  0x50   :  { %483 = vperm.xlu0 %12535, %v12647_v6  }
  0x53   :  { %303 = vperm.xlu1 %12501, %v12663_v9  }
  0x54   :  { %491 = vperm.xlu0 %12535, %v12657_v8  }
  0x57   :  { %12502 = vset.pattern.permute.xlu1 %v12563_v5 }
  0x58   :  { %495 = vperm.xlu1 %12502, %v44_v32   ;;  %499 = vperm.xlu0 %12535, %v12663_v9  }
  0x5c   :  { %12503 = vset.pattern.permute.xlu1 %v12562_v3  ;;  %507 = vperm.xlu0 %12535, %v12670_v10  }
  0x5d   :  { %122 = vperm.xlu1 %12503, %v46_v36  }
  0x60   :  { %515 = vperm.xlu0 %12535, %v12677_v11  }
  0x61   :  { %12504 = vset.pattern.permute.xlu1 %v12561_v2 }
  0x62   :  { %307 = vperm.xlu1 %12504, %v46_v36  }
  0x64   :  { %523 = vperm.xlu0 %12535, %v12684_v12  }
  0x66   :  { %311 = vperm.xlu1 %12504, %v12670_v10  }
  0x68   :  { %531 = vperm.xlu0 %12535, %v12694_v14  }
  0x6a   :  { %12505 = vset.pattern.permute.xlu1 %v12563_v5 }
  0x6b   :  { %503 = vperm.xlu1 %12505, %v46_v36  }
  0x6c   :  { %539 = vperm.xlu0 %12535, %v12701_v15  }
  0x6f   :  { %12506 = vset.pattern.permute.xlu1 %v12562_v3 }
  0x70   :  { %132 = vperm.xlu1 %12506, %v48_v37   ;;  %547 = vperm.xlu0 %12535, %v12707_v16  }
  0x74   :  { %12507 = vset.pattern.permute.xlu1 %v12561_v2  ;;  %555 = vperm.xlu0 %12535, %v12714_v17  }
  0x75   :  { %315 = vperm.xlu1 %12507, %v48_v37  }
  0x78   :  { %563 = vperm.xlu0 %12535, %v12724_v19  }
  0x79   :  { %319 = vperm.xlu1 %12507, %v12677_v11  }
  0x7c   :  { %571 = vperm.xlu0 %12535, %v12731_v20  }
  0x7d   :  { %12508 = vset.pattern.permute.xlu1 %v12563_v5 }
  0x7e   :  { %511 = vperm.xlu1 %12508, %v48_v37  }
  0x80   :  { %579 = vperm.xlu0 %12535, %v12738_v21  }
  0x81   :  { %v12819_v43 = vpop.permute.xlu1 %77  ;;  %v268_v44 = vpop.permute.xlu0 %267 }
  0x82   :  { %12509 = vset.pattern.permute.xlu1 %v12562_v3  ;;  %v398_v49 = vmul.f32 %v12825_v46, %v268_v44  ;;  %v235_v45 = vmul.f32 %v12830_v48, %v12819_v43 }
  0x83   :  { %142 = vperm.xlu1 %12509, %v50_v40  }
  0x84   :  { %587 = vperm.xlu0 %12535, %v12751_v25  }
  0x86   :  { %v12833_v50 = vpop.permute.xlu1 %271  ;;  %v73_v51 = vpop.permute.xlu0 %72 }
  0x87   :  { %12510 = vset.pattern.permute.xlu1 %v12561_v2  ;;  %v234_v52 = vmul.f32 %v12830_v48, %v73_v51  ;;  %v399_v38 = vmul.f32 %v12825_v46, %v12833_v50 }
  0x88   :  { %323 = vperm.xlu1 %12510, %v50_v40  }
  0x89   :  { %v430_v54 = vadd.f32 %v398_v49, %v234_v52 }
  0x8a   :  { %v12839_v55 = vpop.permute.xlu0 %87 }
  0x8b   :  { %v464_v56 = vpop.permute.xlu1 %463 }
  0x8c   :  { %v594_v57 = vmul.f32 %v12837_v53, %v464_v56  ;;  %327 = vperm.xlu1 %12510, %v12684_v12   ;;  %v237_v56 = vmul.f32 %v12830_v48, %v12839_v55 }
  0x8e   :  { %v626_v59 = vadd.f32 %v594_v57, %v430_v54  ;;  %v12848_v60 = vpop.permute.xlu0 %97  ;;  %v431_v54 = vadd.f32 %v399_v38, %v235_v45 }
  0x90   :  { %12511 = vset.pattern.permute.xlu1 %v12563_v5  ;;  %v83_v61 = vpop.permute.xlu1 %82  ;;  %v12852_v62 = vadd.f32 %v12846_v58, %v626_v59 }
  0x91   :  { %519 = vperm.xlu1 %12511, %v50_v40   ;;  %v236_v36 = vmul.f32 %v12830_v48, %v83_v61  ;;  %v239_v61 = vmul.f32 %v12830_v48, %v12848_v60  ;;  %v58_v60 = vld [vmem:[%s15806_s0 + $0xb0] sm:$0xff] }
  0x92   :  { %v12854_v63 = vpop.permute.xlu0 %107  ;;  %v696_v0 = vmax.f32 %v12852_v62, 0.0 }
  0x94   :  { %10880 = vmatprep.mubr.msk.f32.mxu0 %vm743_vm0, %v696_v0 }
  0x95   :  { %12512 = vset.pattern.permute.xlu1 %v12562_v3  ;;  %v276_v4 = vpop.permute.xlu1 %275 }
  0x96   :  { %152 = vperm.xlu1 %12512, %v52_v1   ;;  %v12862_v6 = vpop.permute.xlu0 %117  ;;  %v400_v34 = vmul.f32 %v12825_v46, %v276_v4 }
  0x98   :  { %v432_v41 = vadd.f32 %v400_v34, %v236_v36  ;;  %v241_v36 = vmul.f32 %v12830_v48, %v12854_v63  ;;  %v243_v63 = vmul.f32 %v12830_v48, %v12862_v6 }
  0x99   :  { %v280_v7 = vpop.permute.xlu1 %279 }
  0x9a   :  { %12513 = vset.pattern.permute.xlu1 %v12561_v2  ;;  %v12865_v8 = vpop.permute.xlu0 %127  ;;  %v401_v50 = vmul.f32 %v12825_v46, %v280_v7 }
  0x9b   :  { %331 = vperm.xlu1 %12513, %v52_v1  }
  0x9e   :  { %v472_v9 = vpop.permute.xlu1 %471  ;;  %v12867_v10 = vpop.permute.xlu0 %137 }
  0x9f   :  { %335 = vperm.xlu1 %12513, %v12694_v14   ;;  %v596_v37 = vmul.f32 %v12837_v53, %v472_v9 }
  0xa1   :  { %v628_v47 = vadd.f32 %v596_v37, %v432_v41 }
  0xa2   :  { %v12870_v11 = vpop.permute.xlu0 %147 }
  0xa3   :  { %12514 = vset.pattern.permute.xlu1 %v12563_v5  ;;  %v93_v12 = vpop.permute.xlu1 %92 }
  0xa4   :  { %527 = vperm.xlu1 %12514, %v52_v1   ;;  %v238_v49 = vmul.f32 %v12830_v48, %v93_v12  ;;  %v12921_v1 = vadd.f32 %v12846_v58, %v628_v47  ;;  %v433_v12 = vadd.f32 %v401_v50, %v237_v56 }
  0xa6   :  { %v12873_v13 = vpop.permute.xlu0 %157 }
  0xa8   :  { %12515 = vset.pattern.permute.xlu1 %v12562_v3  ;;  %v284_v22 = vpop.permute.xlu1 %283 }
  0xa9   :  { %162 = vperm.xlu1 %12515, %v54_v18   ;;  %v402_v44 = vmul.f32 %v12825_v46, %v284_v22 }
  0xaa   :  { %v12879_v23 = vpop.permute.xlu0 %167 }
  0xab   :  { %v434_v59 = vadd.f32 %v402_v44, %v238_v49 }
  0xac   :  { %v288_v24 = vpop.permute.xlu1 %287 }
  0xad   :  { %12516 = vset.pattern.permute.xlu1 %v12561_v2 }
  0xae   :  { %339 = vperm.xlu1 %12516, %v54_v18   ;;  %v12882_v14 = vpop.permute.xlu0 %177 }
  0xb1   :  { %v480_v26 = vpop.permute.xlu1 %479 }
  0xb2   :  { %343 = vperm.xlu1 %12516, %v12701_v15   ;;  %v12885_v27 = vpop.permute.xlu0 %187  ;;  %v598_v51 = vmul.f32 %v12837_v53, %v480_v26 }
  0xb4   :  { %v630_v4 = vadd.f32 %v598_v51, %v434_v59 }
  0xb6   :  { %12517 = vset.pattern.permute.xlu1 %v12563_v5  ;;  %v103_v28 = vpop.permute.xlu1 %102  ;;  %v12888_v29 = vpop.permute.xlu0 %197 }
  0xb7   :  { %535 = vperm.xlu1 %12517, %v54_v18   ;;  %v240_v55 = vmul.f32 %v12830_v48, %v103_v28  ;;  %v403_v18 = vmul.f32 %v12825_v46, %v288_v24  ;;  %v12938_v24 = vadd.f32 %v12846_v58, %v630_v4 }
  0xb9   :  { %v435_v41 = vadd.f32 %v403_v18, %v239_v61 }
  0xba   :  { %v12893_v31 = vpop.permute.xlu0 %207 }
  0xbb   :  { %12518 = vset.pattern.permute.xlu1 %v12562_v3  ;;  %v292_v32 = vpop.permute.xlu1 %291 }
  0xbc   :  { %172 = vperm.xlu1 %12518, %v56_v30  }
  0xbe   :  { %v12896_v33 = vpop.permute.xlu0 %217 }
  0xbf   :  { %v296_v15 = vpop.permute.xlu1 %295 }
  0xc0   :  { %12519 = vset.pattern.permute.xlu1 %v12561_v2  ;;  %v405_v44 = vmul.f32 %v12825_v46, %v296_v15 }
  0xc1   :  { %347 = vperm.xlu1 %12519, %v56_v30  }
  0xc2   :  { %v12900_v35 = vpop.permute.xlu0 %227  ;;  %v437_v59 = vadd.f32 %v405_v44, %v241_v36 }
  0xc4   :  { %v488_v40 = vpop.permute.xlu1 %487 }
  0xc5   :  { %351 = vperm.xlu1 %12519, %v12707_v16   ;;  %v404_v16 = vmul.f32 %v12825_v46, %v292_v32  ;;  %v600_v7 = vmul.f32 %v12837_v53, %v488_v40  ;;  %v698_v40 = vmax.f32 %v12921_v1, 0.0 }
  0xc7   :  { %v468_v52 = vpop.permute.xlu0 %467 }
  0xc8   :  { %v595_v57 = vmul.f32 %v12837_v53, %v468_v52 }
  0xc9   :  { %12520 = vset.pattern.permute.xlu1 %v12563_v5  ;;  %v113_v43 = vpop.permute.xlu1 %112 }
  0xca   :  { %v627_v0 = vadd.f32 %v595_v57, %v431_v54  ;;  %543 = vperm.xlu1 %12520, %v56_v30   ;;  %v436_v30 = vadd.f32 %v404_v16, %v240_v55  ;;  %v700_v57 = vmax.f32 %v12938_v24, 0.0  ;;  %v242_v61 = vmul.f32 %v12830_v48, %v113_v43 }
  0xcb   :  { %v476_v9 = vpop.permute.xlu0 %475 }
  0xcc   :  { %v12927_v22 = vadd.f32 %v12846_v58, %v627_v0  ;;  %v597_v26 = vmul.f32 %v12837_v53, %v476_v9  ;;  %v632_v37 = vadd.f32 %v600_v7, %v436_v30 }
  0xce   :  { %v697_v32 = vmax.f32 %v12927_v22, 0.0  ;;  %v629_v34 = vadd.f32 %v597_v26, %v433_v12  ;;  %12521 = vset.pattern.permute.xlu1 %v12562_v3  ;;  %v300_v28 = vpop.permute.xlu1 %299  ;;  %v12952_v54 = vadd.f32 %v12846_v58, %v632_v37 }
  0xcf   :  { %182 = vperm.xlu1 %12521, %v58_v60   ;;  %v484_v38 = vpop.permute.xlu0 %483  ;;  %v406_v15 = vmul.f32 %v12825_v46, %v300_v28 }
  0xd0   :  { %v12943_v45 = vadd.f32 %v12846_v58, %v629_v34  ;;  %v599_v47 = vmul.f32 %v12837_v53, %v484_v38  ;;  %10881 = vmatmul.mubr.msk.f32.vlgmr.msra.gmra.mrb[0].mxu0 %vm743_vm0, %v697_v32  ;;  %v702_v55 = vmax.f32 %v12952_v54, 0.0 }
  0xd1   :  { %10883 = vmatprep.mubr.msk.f32.mxu0 %vm743_vm0, %v698_v40  ;;  %v438_v7 = vadd.f32 %v406_v15, %v242_v61 }
  0xd2   :  { %v699_v49 = vmax.f32 %v12943_v45, 0.0  ;;  %v631_v51 = vadd.f32 %v599_v47, %v435_v41  ;;  %v304_v52 = vpop.permute.xlu1 %303  ;;  %v60_v41 = vld [vmem:[%s15806_s0 + $0xc0] sm:$0xff] }
  0xd3   :  { %v407_v56 = vmul.f32 %v12825_v46, %v304_v52  ;;  %12522 = vset.pattern.permute.xlu1 %v12561_v2  ;;  %v492_v50 = vpop.permute.xlu0 %491 }
  0xd4   :  { %v12959_v16 = vadd.f32 %v12846_v58, %v631_v51  ;;  %v601_v6 = vmul.f32 %v12837_v53, %v492_v50  ;;  %355 = vperm.xlu1 %12522, %v58_v60   ;;  %10884 = vmatmul.mubr.msk.f32.gmra.mrb[2].mxu0 %vm743_vm0, %v699_v49 }
  0xd5   :  { %10886 = vmatprep.mubr.msk.f32.mxu0 %vm743_vm0, %v700_v57  ;;  %v439_v9 = vadd.f32 %v407_v56, %v243_v63 }
  0xd6   :  { %v701_v0 = vmax.f32 %v12959_v16, 0.0  ;;  %v633_v4 = vadd.f32 %v601_v6, %v437_v59 }
  0xd7   :  { %v496_v12 = vpop.permute.xlu1 %495  ;;  %v500_v18 = vpop.permute.xlu0 %499 }
  0xd8   :  { %v12968_v26 = vadd.f32 %v12846_v58, %v633_v4  ;;  %v602_v30 = vmul.f32 %v12837_v53, %v496_v12  ;;  %v603_v32 = vmul.f32 %v12837_v53, %v500_v18  ;;  %359 = vperm.xlu1 %12522, %v12714_v17   ;;  %10887 = vmatmul.mubr.msk.f32.gmra.mrb[4].mxu0 %vm743_vm0, %v701_v0 }
  0xd9   :  { %10889 = vmatprep.mubr.msk.f32.mxu0 %vm743_vm0, %v702_v55  ;;  %v247_v18 = vmul.f32 %v12830_v48, %v12867_v10 }
  0xda   :  { %v703_v43 = vmax.f32 %v12968_v26, 0.0  ;;  %v634_v34 = vadd.f32 %v602_v30, %v438_v7  ;;  %v635_v28 = vadd.f32 %v603_v32, %v439_v9  ;;  %v62_v9 = vld [vmem:[%s15806_s0 + $0xd0] sm:$0xff] }
  0xdb   :  { %v508_v47 = vpop.permute.xlu0 %507 }
  0xdc   :  { %v12977_v36 = vadd.f32 %v12846_v58, %v634_v34  ;;  %v12980_v37 = vadd.f32 %v12846_v58, %v635_v28  ;;  %12523 = vset.pattern.permute.xlu1 %v12563_v5  ;;  %v123_v38 = vpop.permute.xlu1 %122  ;;  %10890 = vmatmul.mubr.msk.f32.gmra.mrb[6].mxu0 %vm743_vm0, %v703_v43  ;;  %v605_v51 = vmul.f32 %v12837_v53, %v508_v47 }
  0xdd   :  { %551 = vperm.xlu1 %12523, %v58_v60   ;;  %v245_v60 = vmul.f32 %v12830_v48, %v12865_v8  ;;  %v244_v56 = vmul.f32 %v12830_v48, %v123_v38 }
  0xde   :  { %v704_v17 = vmax.f32 %v12977_v36, 0.0  ;;  %v705_v40 = vmax.f32 %v12980_v37, 0.0 }
  0xdf   :  { %v516_v12 = vpop.permute.xlu0 %515 }
  0xe0   :  { %10892 = vmatprep.mubr.msk.f32.mxu0 %vm743_vm0, %v704_v17  ;;  %v607_v43 = vmul.f32 %v12837_v53, %v516_v12 }
  0xe1   :  { %12524 = vset.pattern.permute.xlu1 %v12562_v3  ;;  %v308_v44 = vpop.permute.xlu1 %307  ;;  %10893 = vmatmul.mubr.msk.f32.gmra.mrb[8].mxu0 %vm743_vm0, %v705_v40 }
  0xe2   :  { %192 = vperm.xlu1 %12524, %v60_v41   ;;  %v408_v52 = vmul.f32 %v12825_v46, %v308_v44 }
  0xe4   :  { %v440_v59 = vadd.f32 %v408_v52, %v244_v56  ;;  %v64_v52 = vld [vmem:[%s15806_s0 + $0xe0] sm:$0xff]  ;;  %v249_v56 = vmul.f32 %v12830_v48, %v12870_v11 }
  0xe5   :  { %v312_v63 = vpop.permute.xlu1 %311 }
  0xe6   :  { %v409_v49 = vmul.f32 %v12825_v46, %v312_v63  ;;  %12525 = vset.pattern.permute.xlu1 %v12561_v2 }
  0xe7   :  { %363 = vperm.xlu1 %12525, %v60_v41  }
  0xe8   :  { %v441_v15 = vadd.f32 %v409_v49, %v245_v60 }
  0xea   :  { %v637_v50 = vadd.f32 %v605_v51, %v441_v15  ;;  %v504_v57 = vpop.permute.xlu1 %503  ;;  %v524_v15 = vpop.permute.xlu0 %523 }
  0xeb   :  { %v604_v6 = vmul.f32 %v12837_v53, %v504_v57  ;;  %367 = vperm.xlu1 %12525, %v12724_v19  }
  0xec   :  { %v13002_v61 = vadd.f32 %v12846_v58, %v637_v50 }
  0xed   :  { %v636_v8 = vadd.f32 %v604_v6, %v440_v59  ;;  %v609_v59 = vmul.f32 %v12837_v53, %v524_v15 }
  0xee   :  { %v707_v7 = vmax.f32 %v13002_v61, 0.0 }
  0xef   :  { %v13005_v0 = vadd.f32 %v12846_v58, %v636_v8  ;;  %12526 = vset.pattern.permute.xlu1 %v12563_v5  ;;  %v133_v4 = vpop.permute.xlu1 %132 }
  0xf0   :  { %559 = vperm.xlu1 %12526, %v60_v41   ;;  %v246_v38 = vmul.f32 %v12830_v48, %v133_v4 }
  0xf1   :  { %v706_v55 = vmax.f32 %v13005_v0, 0.0 }
  0xf3   :  { %10895 = vmatprep.mubr.msk.f32.mxu0 %vm743_vm0, %v706_v55 }
  0xf4   :  { %12527 = vset.pattern.permute.xlu1 %v12562_v3  ;;  %v316_v19 = vpop.permute.xlu1 %315  ;;  %10896 = vmatmul.mubr.msk.f32.gmra.mrb[10].mxu0 %vm743_vm0, %v707_v7 }
  0xf5   :  { %202 = vperm.xlu1 %12527, %v62_v9   ;;  %v410_v34 = vmul.f32 %v12825_v46, %v316_v19 }
  0xf7   :  { %v442_v41 = vadd.f32 %v410_v34, %v246_v38  ;;  %v66_v34 = vld [vmem:[%s15806_s0 + $0xf0] sm:$0xff]  ;;  %v251_v38 = vmul.f32 %v12830_v48, %v12873_v13 }
  0xf8   :  { %v320_v30 = vpop.permute.xlu1 %319 }
  0xf9   :  { %v411_v32 = vmul.f32 %v12825_v46, %v320_v30  ;;  %12528 = vset.pattern.permute.xlu1 %v12561_v2 }
  0xfa   :  { %371 = vperm.xlu1 %12528, %v62_v9  }
  0xfb   :  { %v443_v28 = vadd.f32 %v411_v32, %v247_v18 }
  0xfd   :  { %v639_v17 = vadd.f32 %v607_v43, %v443_v28  ;;  %v512_v40 = vpop.permute.xlu1 %511  ;;  %v532_v28 = vpop.permute.xlu0 %531 }
  0xfe   :  { %v606_v44 = vmul.f32 %v12837_v53, %v512_v40  ;;  %375 = vperm.xlu1 %12528, %v12731_v20  }
  0xff   :  { %v13026_v47 = vadd.f32 %v12846_v58, %v639_v17 }
 0x100   :  { %v638_v10 = vadd.f32 %v606_v44, %v442_v41  ;;  %v611_v41 = vmul.f32 %v12837_v53, %v532_v28  ;;  %v1097_v44 = vld [vmem:[%s15811_s5] sm:$0xff] }
 0x101   :  { %v709_v51 = vmax.f32 %v13026_v47, 0.0 }
 0x102   :  { %v13029_v60 = vadd.f32 %v12846_v58, %v638_v10  ;;  %12529 = vset.pattern.permute.xlu1 %v12563_v5  ;;  %v143_v63 = vpop.permute.xlu1 %142 }
 0x103   :  { %567 = vperm.xlu1 %12529, %v62_v9   ;;  %v248_v4 = vmul.f32 %v12830_v48, %v143_v63 }
 0x104   :  { %v708_v49 = vmax.f32 %v13029_v60, 0.0 }
 0x106   :  { %10898 = vmatprep.mubr.msk.f32.mxu0 %vm743_vm0, %v708_v49 }
 0x107   :  { %12530 = vset.pattern.permute.xlu1 %v12562_v3  ;;  %v324_v20 = vpop.permute.xlu1 %323  ;;  %10899 = vmatmul.mubr.msk.f32.gmra.mrb[12].mxu0 %vm743_vm0, %v709_v51 }
 0x108   :  { %212 = vperm.xlu1 %12530, %v64_v52   ;;  %v412_v6 = vmul.f32 %v12825_v46, %v324_v20  ;;  %v1100_v20 = vld [vmem:[%s15811_s5 + $0x18] sm:$0xff] }
 0x10a   :  { %v444_v9 = vadd.f32 %v412_v6, %v248_v4 }
 0x10b   :  { %v328_v50 = vpop.permute.xlu1 %327 }
 0x10c   :  { %v413_v57 = vmul.f32 %v12825_v46, %v328_v50  ;;  %12531 = vset.pattern.permute.xlu1 %v12561_v2 }
 0x10d   :  { %379 = vperm.xlu1 %12531, %v64_v52  }
 0x10e   :  { %v445_v8 = vadd.f32 %v413_v57, %v249_v56 }
 0x110   :  { %v641_v55 = vadd.f32 %v609_v59, %v445_v8  ;;  %v520_v7 = vpop.permute.xlu1 %519 }
 0x111   :  { %v608_v19 = vmul.f32 %v12837_v53, %v520_v7  ;;  %383 = vperm.xlu1 %12531, %v12738_v21   ;;  %v540_v7 = vpop.permute.xlu0 %539 }
 0x112   :  { %v13050_v12 = vadd.f32 %v12846_v58, %v641_v55 }
 0x113   :  { %v640_v11 = vadd.f32 %v608_v19, %v444_v9  ;;  %v253_v19 = vmul.f32 %v12830_v48, %v12879_v23 }
 0x114   :  { %v711_v43 = vmax.f32 %v13050_v12, 0.0 }
 0x115   :  { %v13053_v18 = vadd.f32 %v12846_v58, %v640_v11  ;;  %12532 = vset.pattern.permute.xlu1 %v12563_v5  ;;  %v153_v30 = vpop.permute.xlu1 %152 }
 0x116   :  { %575 = vperm.xlu1 %12532, %v64_v52   ;;  %v250_v49 = vmul.f32 %v12830_v48, %v153_v30  ;;  %v1099_v52 = vld [vmem:[%s15811_s5 + $0x10] sm:$0xff] }
 0x117   :  { %v710_v32 = vmax.f32 %v13053_v18, 0.0  ;;  %v11839_v50 = vpack.c.bf16 %v1100_v20, %v1099_v52 }
 0x119   :  { %10901 = vmatprep.mubr.msk.f32.mxu0 %vm743_vm0, %v710_v32 }
 0x11a   :  { %12533 = vset.pattern.permute.xlu1 %v12562_v3  ;;  %v332_v21 = vpop.permute.xlu1 %331  ;;  %10902 = vmatmul.mubr.msk.f32.gmra.mrb[14].mxu0 %vm743_vm0, %v711_v43  ;;  %v1098_v3 = vld [vmem:[%s15811_s5 + $0x8] sm:$0xff] }
 0x11b   :  { %222 = vperm.xlu1 %12533, %v66_v34   ;;  %v414_v10 = vmul.f32 %v12825_v46, %v332_v21  ;;  %v11835_v63 = vpack.c.bf16 %v1098_v3, %v1097_v44 }
 0x11d   :  { %11836 = vmatprep.subr.bf16.mxu1 %v11835_v63  ;;  %v446_v15 = vadd.f32 %v414_v10, %v250_v49  ;;  %v255_v49 = vmul.f32 %v12830_v48, %v12882_v14 }
 0x11e   :  { %v336_v17 = vpop.permute.xlu1 %335  ;;  %11838 = vmatpush3.bf16.msra.mxu1 %v11835_v63  ;;  %v548_v63 = vpop.permute.xlu0 %547 }
 0x11f   :  { %v415_v40 = vmul.f32 %v12825_v46, %v336_v17  ;;  %12534 = vset.pattern.permute.xlu1 %v12561_v2  ;;  %11840 = vmatprep.subr.bf16.mxu1 %v11839_v50 }
 0x120   :  { %387 = vperm.xlu1 %12534, %v66_v34  }
 0x121   :  { %v447_v13 = vadd.f32 %v415_v40, %v251_v38 }
 0x122   :  { %11842 = vmatpush3.bf16.msra.mxu1 %v11839_v50 }
 0x123   :  { %v643_v51 = vadd.f32 %v611_v41, %v447_v13  ;;  %v528_v2 = vpop.permute.xlu1 %527 }
 0x124   :  { %v610_v56 = vmul.f32 %v12837_v53, %v528_v2  ;;  %391 = vperm.xlu1 %12534, %v12751_v25   ;;  %v615_v2 = vmul.f32 %v12837_v53, %v548_v63 }
 0x125   :  { %v13086_v59 = vadd.f32 %v12846_v58, %v643_v51 }
 0x126   :  { %v642_v57 = vadd.f32 %v610_v56, %v446_v15 }
 0x127   :  { %v713_v55 = vmax.f32 %v13086_v59, 0.0 }
 0x128   :  { %v13089_v6 = vadd.f32 %v12846_v58, %v642_v57  ;;  %12536 = vset.pattern.permute.xlu1 %v12563_v5  ;;  %v163_v8 = vpop.permute.xlu1 %162  ;;  %v613_v5 = vmul.f32 %v12837_v53, %v540_v7 }
 0x129   :  { %583 = vperm.xlu1 %12536, %v66_v34   ;;  %v252_v43 = vmul.f32 %v12830_v48, %v163_v8 }
 0x12a   :  { %v712_v4 = vmax.f32 %v13089_v6, 0.0 }
 0x12c   :  { %10904 = vmatprep.mubr.msk.f32.mxu0 %vm743_vm0, %v712_v4 }
 0x12d   :  { %v340_v25 = vpop.permute.xlu1 %339  ;;  %10905 = vmatmul.mubr.msk.f32.gmra.mrb[16].mxu0 %vm743_vm0, %v713_v55 }
 0x12e   :  { %v416_v30 = vmul.f32 %v12825_v46, %v340_v25 }
 0x130   :  { %v448_v28 = vadd.f32 %v416_v30, %v252_v43  ;;  %v257_v30 = vmul.f32 %v12830_v48, %v12885_v27 }
 0x131   :  { %v344_v9 = vpop.permute.xlu1 %343 }
 0x132   :  { %v417_v11 = vmul.f32 %v12825_v46, %v344_v9 }
 0x134   :  { %v449_v32 = vadd.f32 %v417_v11, %v253_v19  ;;  %v556_v11 = vpop.permute.xlu0 %555 }
 0x135   :  { %v617_v43 = vmul.f32 %v12837_v53, %v556_v11 }
 0x136   :  { %v645_v34 = vadd.f32 %v613_v5, %v449_v32  ;;  %v536_v21 = vpop.permute.xlu1 %535 }
 0x137   :  { %v612_v38 = vmul.f32 %v12837_v53, %v536_v21 }
 0x138   :  { %v13104_v40 = vadd.f32 %v12846_v58, %v645_v34 }
 0x139   :  { %v644_v17 = vadd.f32 %v612_v38, %v448_v28 }
 0x13a   :  { %v715_v3 = vmax.f32 %v13104_v40, 0.0 }
 0x13b   :  { %v13107_v23 = vadd.f32 %v12846_v58, %v644_v17  ;;  %v173_v41 = vpop.permute.xlu1 %172 }
 0x13c   :  { %v254_v15 = vmul.f32 %v12830_v48, %v173_v41 }
 0x13d   :  { %v714_v44 = vmax.f32 %v13107_v23, 0.0 }
 0x13f   :  { %10907 = vmatprep.mubr.msk.f32.mxu0 %vm743_vm0, %v714_v44 }
 0x140   :  { %v348_v10 = vpop.permute.xlu1 %347  ;;  %10908 = vmatmul.mubr.msk.f32.gmra.mrb[18].mxu0 %vm743_vm0, %v715_v3 }
 0x141   :  { %v418_v52 = vmul.f32 %v12825_v46, %v348_v10 }
 0x143   :  { %v450_v57 = vadd.f32 %v418_v52, %v254_v15 }
 0x144   :  { %v352_v13 = vpop.permute.xlu1 %351 }
 0x145   :  { %v419_v51 = vmul.f32 %v12825_v46, %v352_v13 }
 0x147   :  { %v451_v20 = vadd.f32 %v419_v51, %v255_v49 }
 0x149   :  { %v647_v56 = vadd.f32 %v615_v2, %v451_v20  ;;  %v544_v50 = vpop.permute.xlu1 %543  ;;  %v564_v2 = vpop.permute.xlu0 %563  ;;  %v259_v20 = vmul.f32 %v12830_v48, %v12888_v29 }
 0x14a   :  { %v614_v8 = vmul.f32 %v12837_v53, %v544_v50  ;;  %v619_v15 = vmul.f32 %v12837_v53, %v564_v2 }
 0x14b   :  { %v13121_v55 = vadd.f32 %v12846_v58, %v647_v56 }
 0x14c   :  { %v646_v4 = vadd.f32 %v614_v8, %v450_v57 }
 0x14d   :  { %v717_v9 = vmax.f32 %v13121_v55, 0.0 }
 0x14e   :  { %v13124_v14 = vadd.f32 %v12846_v58, %v646_v4  ;;  %v183_v25 = vpop.permute.xlu1 %182 }
 0x14f   :  { %v256_v28 = vmul.f32 %v12830_v48, %v183_v25 }
 0x150   :  { %v716_v7 = vmax.f32 %v13124_v14, 0.0 }
 0x152   :  { %10910 = vmatprep.mubr.msk.f32.mxu0 %vm743_vm0, %v716_v7 }
 0x153   :  { %v356_v19 = vpop.permute.xlu1 %355  ;;  %10911 = vmatmul.mubr.msk.f32.gmra.mrb[20].mxu0 %vm743_vm0, %v717_v9 }
 0x154   :  { %v420_v34 = vmul.f32 %v12825_v46, %v356_v19 }
 0x156   :  { %v452_v41 = vadd.f32 %v420_v34, %v256_v28 }
 0x157   :  { %v360_v5 = vpop.permute.xlu1 %359 }
 0x158   :  { %v421_v32 = vmul.f32 %v12825_v46, %v360_v5 }
 0x15a   :  { %v453_v21 = vadd.f32 %v421_v32, %v257_v30 }
 0x15c   :  { %v649_v38 = vadd.f32 %v617_v43, %v453_v21  ;;  %v552_v17 = vpop.permute.xlu1 %551  ;;  %v261_v21 = vmul.f32 %v12830_v48, %v12893_v31 }
 0x15d   :  { %v616_v44 = vmul.f32 %v12837_v53, %v552_v17 }
 0x15e   :  { %v13138_v10 = vadd.f32 %v12846_v58, %v649_v38  ;;  %v572_v38 = vpop.permute.xlu0 %571 }
 0x15f   :  { %v648_v3 = vadd.f32 %v616_v44, %v452_v41  ;;  %v621_v41 = vmul.f32 %v12837_v53, %v572_v38 }
 0x160   :  { %v719_v49 = vmax.f32 %v13138_v10, 0.0 }
 0x161   :  { %v13141_v27 = vadd.f32 %v12846_v58, %v648_v3  ;;  %v193_v63 = vpop.permute.xlu1 %192 }
 0x162   :  { %v258_v8 = vmul.f32 %v12830_v48, %v193_v63 }
 0x163   :  { %v718_v13 = vmax.f32 %v13141_v27, 0.0 }
 0x165   :  { %10913 = vmatprep.mubr.msk.f32.mxu0 %vm743_vm0, %v718_v13 }
 0x166   :  { %v364_v51 = vpop.permute.xlu1 %363  ;;  %10914 = vmatmul.mubr.msk.f32.gmra.mrb[22].mxu0 %vm743_vm0, %v719_v49 }
 0x167   :  { %v422_v50 = vmul.f32 %v12825_v46, %v364_v51 }
 0x169   :  { %v454_v7 = vadd.f32 %v422_v50, %v258_v8  ;;  %v263_v8 = vmul.f32 %v12830_v48, %v12896_v33 }
 0x16a   :  { %v368_v52 = vpop.permute.xlu1 %367 }
 0x16b   :  { %v423_v56 = vmul.f32 %v12825_v46, %v368_v52 }
 0x16d   :  { %v455_v57 = vadd.f32 %v423_v56, %v259_v20 }
 0x16f   :  { %v651_v4 = vadd.f32 %v619_v15, %v455_v57  ;;  %v560_v25 = vpop.permute.xlu1 %559 }
 0x170   :  { %v618_v9 = vmul.f32 %v12837_v53, %v560_v25  ;;  %v580_v25 = vpop.permute.xlu0 %579 }
 0x171   :  { %v13155_v11 = vadd.f32 %v12846_v58, %v651_v4 }
 0x172   :  { %v650_v19 = vadd.f32 %v618_v9, %v454_v7  ;;  %v623_v9 = vmul.f32 %v12837_v53, %v580_v25 }
 0x173   :  { %v721_v32 = vmax.f32 %v13155_v11, 0.0 }
 0x174   :  { %v13158_v29 = vadd.f32 %v12846_v58, %v650_v19  ;;  %v203_v5 = vpop.permute.xlu1 %202 }
 0x175   :  { %v260_v3 = vmul.f32 %v12830_v48, %v203_v5 }
 0x176   :  { %v720_v30 = vmax.f32 %v13158_v29, 0.0 }
 0x178   :  { %10916 = vmatprep.mubr.msk.f32.mxu0 %vm743_vm0, %v720_v30 }
 0x179   :  { %v372_v43 = vpop.permute.xlu1 %371  ;;  %10917 = vmatmul.mubr.msk.f32.gmra.mrb[24].mxu0 %vm743_vm0, %v721_v32 }
 0x17a   :  { %v424_v17 = vmul.f32 %v12825_v46, %v372_v43 }
 0x17c   :  { %v456_v49 = vadd.f32 %v424_v17, %v260_v3  ;;  %v13201_v3 = vld [vmem:[%s15810_s4] ss:$0 sm:$0xff] }
 0x17d   :  { %v376_v34 = vpop.permute.xlu1 %375 }
 0x17e   :  { %v425_v28 = vmul.f32 %v12825_v46, %v376_v34 }
 0x180   :  { %v457_v44 = vadd.f32 %v425_v28, %v261_v21 }
 0x182   :  { %v653_v63 = vadd.f32 %v621_v41, %v457_v44  ;;  %v568_v13 = vpop.permute.xlu1 %567 }
 0x183   :  { %v620_v51 = vmul.f32 %v12837_v53, %v568_v13 }
 0x184   :  { %v13172_v52 = vadd.f32 %v12846_v58, %v653_v63  ;;  %v588_v63 = vpop.permute.xlu0 %587 }
 0x185   :  { %v652_v2 = vadd.f32 %v620_v51, %v456_v49  ;;  %v265_v51 = vmul.f32 %v12830_v48, %v12900_v35 }
 0x186   :  { %v723_v56 = vmax.f32 %v13172_v52, 0.0 }
 0x187   :  { %v13175_v31 = vadd.f32 %v12846_v58, %v652_v2  ;;  %v213_v20 = vpop.permute.xlu1 %212 }
 0x188   :  { %v262_v5 = vmul.f32 %v12830_v48, %v213_v20 }
 0x189   :  { %v722_v15 = vmax.f32 %v13175_v31, 0.0 }
 0x18b   :  { %10919 = vmatprep.mubr.msk.f32.mxu0 %vm743_vm0, %v722_v15 }
 0x18c   :  { %v380_v50 = vpop.permute.xlu1 %379  ;;  %10920 = vmatmul.mubr.msk.f32.gmra.mrb[26].mxu0 %vm743_vm0, %v723_v56 }
 0x18d   :  { %v426_v7 = vmul.f32 %v12825_v46, %v380_v50 }
 0x18f   :  { %v458_v43 = vadd.f32 %v426_v7, %v262_v5 }
 0x190   :  { %v384_v57 = vpop.permute.xlu1 %383 }
 0x191   :  { %v427_v4 = vmul.f32 %v12825_v46, %v384_v57  ;;  %v625_v57 = vmul.f32 %v12837_v53, %v588_v63 }
 0x193   :  { %v459_v19 = vadd.f32 %v427_v4, %v263_v8 }
 0x195   :  { %v655_v30 = vadd.f32 %v623_v9, %v459_v19  ;;  %v576_v32 = vpop.permute.xlu1 %575 }
 0x196   :  { %v622_v34 = vmul.f32 %v12837_v53, %v576_v32 }
 0x197   :  { %v13189_v28 = vadd.f32 %v12846_v58, %v655_v30 }
 0x198   :  { %v654_v21 = vadd.f32 %v622_v34, %v458_v43 }
 0x199   :  { %v725_v41 = vmax.f32 %v13189_v28, 0.0 }
 0x19a   :  { %v13192_v33 = vadd.f32 %v12846_v58, %v654_v21  ;;  %v223_v38 = vpop.permute.xlu1 %222 }
 0x19b   :  { %v264_v4 = vmul.f32 %v12830_v48, %v223_v38 }
 0x19c   :  { %v724_v17 = vmax.f32 %v13192_v33, 0.0 }
 0x19e   :  { %10922 = vmatprep.mubr.msk.f32.mxu0 %vm743_vm0, %v724_v17 }
 0x19f   :  { %v388_v44 = vpop.permute.xlu1 %387  ;;  %10923 = vmatmul.mubr.msk.f32.gmra.mrb[28].mxu0 %vm743_vm0, %v725_v41 }
 0x1a0   :  { %v428_v56 = vmul.f32 %v12825_v46, %v388_v44 }
 0x1a2   :  { %v460_v32 = vadd.f32 %v428_v56, %v264_v4 }
 0x1a3   :  { %v392_v13 = vpop.permute.xlu1 %391  ;;  %v10882_v49 = vpop.f32.mrb[0].mxu0 }
 0x1a4   :  { %v429_v2 = vmul.f32 %v12825_v46, %v392_v13  ;;  %v912_v20 = vadd.f32 %v10882_v49, %v13201_v3  ;;  %v906_v15 = vpop.f32.mrb[1].mxu0 }
 0x1a5   :  { %v907_v50 = vadd.f32 %v13201_v3, %v906_v15 }
 0x1a6   :  { %v461_v8 = vadd.f32 %v429_v2, %v265_v51  ;;  %v1066_v19 = vmax.f32 %v912_v20, 0.0 }
 0x1a7   :  { %v1065_v25 = vmax.f32 %v907_v50, 0.0  ;;  %v10885_v7 = vpop.f32.mrb[2].mxu0 }
 0x1a8   :  { %v657_v9 = vadd.f32 %v625_v57, %v461_v8  ;;  %v922_v35 = vadd.f32 %v10885_v7, %v13201_v3  ;;  %v584_v5 = vpop.permute.xlu1 %583  ;;  %v916_v30 = vpop.f32.mrb[3].mxu0 }
 0x1a9   :  { %v624_v43 = vmul.f32 %v12837_v53, %v584_v5  ;;  %v917_v46 = vadd.f32 %v13201_v3, %v916_v30  ;;  %10936 = vmatprep.mubr.msk.f32.mxu1 %vm1108_vm1, %v1065_v25 }
 0x1aa   :  { %10937 = vmatmul.mubr.msk.f32.vlgmr.msra.gmra.mrb[0].mxu1 %vm1108_vm1, %v1066_v19  ;;  %v13217_v38 = vadd.f32 %v12846_v58, %v657_v9  ;;  %v1068_v17 = vmax.f32 %v922_v35, 0.0 }
 0x1ab   :  { %v656_v34 = vadd.f32 %v624_v43, %v460_v32  ;;  %v1067_v21 = vmax.f32 %v917_v46, 0.0  ;;  %v10888_v48 = vpop.f32.mrb[4].mxu0 }
 0x1ac   :  { %v932_v41 = vadd.f32 %v10888_v48, %v13201_v3  ;;  %v926_v44 = vpop.f32.mrb[5].mxu0  ;;  %v727_v56 = vmax.f32 %v13217_v38, 0.0 }
 0x1ad   :  { %v13221_v63 = vadd.f32 %v12846_v58, %v656_v34  ;;  %v927_v53 = vadd.f32 %v13201_v3, %v926_v44  ;;  %10939 = vmatprep.mubr.msk.f32.mxu1 %vm1108_vm1, %v1067_v21  ;;  %v1430_v34 = vld [vmem:[%s15813_s7] sm:$0xff]  ;;  %v1431_v21 = vld [vmem:[%s15813_s7 + $0x8] sm:$0xff] }
 0x1ae   :  { %10940 = vmatmul.mubr.msk.f32.gmra.mrb[2].mxu1 %vm1108_vm1, %v1068_v17  ;;  %v1070_v2 = vmax.f32 %v932_v41, 0.0  ;;  %v11843_v48 = vpack.c.bf16 %v1431_v21, %v1430_v34 }
 0x1af   :  { %v726_v13 = vmax.f32 %v13221_v63, 0.0  ;;  %v1069_v49 = vmax.f32 %v927_v53, 0.0  ;;  %v10891_v51 = vpop.f32.mrb[6].mxu0 }
 0x1b0   :  { %v942_v20 = vadd.f32 %v10891_v51, %v13201_v3  ;;  %v936_v15 = vpop.f32.mrb[7].mxu0  ;;  %11844 = vmatprep.subr.bf16.mxu1 %v11843_v48  ;;  %v1432_v51 = vld [vmem:[%s15813_s7 + $0x10] sm:$0xff] }
 0x1b1   :  { %v937_v50 = vadd.f32 %v13201_v3, %v936_v15  ;;  %10925 = vmatprep.mubr.msk.f32.mxu0 %vm743_vm0, %v726_v13  ;;  %10942 = vmatprep.mubr.msk.f32.mxu1 %vm1108_vm1, %v1069_v49  ;;  %v1434_v15 = vld [vmem:[%s15813_s7 + $0x20] sm:$0xff] }
 0x1b2   :  { %10926 = vmatmul.mubr.msk.f32.gmra.mrb[30].mxu0 %vm743_vm0, %v727_v56  ;;  %10943 = vmatmul.mubr.msk.f32.gmra.mrb[4].mxu1 %vm1108_vm1, %v1070_v2  ;;  %v1072_v57 = vmax.f32 %v942_v20, 0.0  ;;  %v1433_v2 = vld [vmem:[%s15813_s7 + $0x18] sm:$0xff]  ;;  %v1435_v56 = vld [vmem:[%s15813_s7 + $0x28] sm:$0xff] }
 0x1b3   :  { %v1071_v58 = vmax.f32 %v937_v50, 0.0  ;;  %11846 = vmatpush3.bf16.msra.mxu1 %v11843_v48  ;;  %v11847_v20 = vpack.c.bf16 %v1433_v2, %v1432_v51  ;;  %v11851_v50 = vpack.c.bf16 %v1435_v56, %v1434_v15 }
 0x1b4   :  { %v10894_v8 = vpop.f32.mrb[8].mxu0 }
 0x1b5   :  { %v952_v4 = vadd.f32 %v10894_v8, %v13201_v3  ;;  %v946_v25 = vpop.f32.mrb[9].mxu0  ;;  %10945 = vmatprep.mubr.msk.f32.mxu1 %vm1108_vm1, %v1071_v58  ;;  %11848 = vmatprep.subr.bf16.mxu1 %v11847_v20 }
 0x1b6   :  { %v947_v7 = vadd.f32 %v13201_v3, %v946_v25  ;;  %10946 = vmatmul.mubr.msk.f32.gmra.mrb[6].mxu1 %vm1108_vm1, %v1072_v57 }
 0x1b7   :  { %v1074_v19 = vmax.f32 %v952_v4, 0.0  ;;  %11850 = vmatpush3.bf16.msra.mxu1 %v11847_v20 }
 0x1b8   :  { %v1073_v9 = vmax.f32 %v947_v7, 0.0  ;;  %11852 = vmatprep.subr.bf16.mxu1 %v11851_v50 }
 0x1ba   :  { %10948 = vmatprep.mubr.msk.f32.mxu1 %vm1108_vm1, %v1073_v9  ;;  %v1436_v9 = vld [vmem:[%s15813_s7 + $0x30] sm:$0xff] }
 0x1bb   :  { %10949 = vmatmul.mubr.msk.f32.gmra.mrb[8].mxu1 %vm1108_vm1, %v1074_v19  ;;  %v1437_v19 = vld [vmem:[%s15813_s7 + $0x38] sm:$0xff] }
 0x1bc   :  { %11854 = vmatpush3.bf16.msra.mxu1 %v11851_v50 }
 0x1c7   :  { %v10897_v35 = vpop.f32.mrb[10].mxu0 }
 0x1c8   :  { %v962_v5 = vadd.f32 %v10897_v35, %v13201_v3  ;;  %v956_v30 = vpop.f32.mrb[11].mxu0  ;;  %v11855_v35 = vpack.c.bf16 %v1437_v19, %v1436_v9 }
 0x1c9   :  { %v957_v32 = vadd.f32 %v13201_v3, %v956_v30 }
 0x1ca   :  { %v1076_v46 = vmax.f32 %v962_v5, 0.0  ;;  %11856 = vmatprep.subr.bf16.mxu1 %v11855_v35 }
 0x1cb   :  { %v1075_v43 = vmax.f32 %v957_v32, 0.0  ;;  %11858 = vmatpush3.bf16.msra.mxu1 %v11855_v35 }
 0x1cd   :  { %10951 = vmatprep.mubr.msk.f32.mxu1 %vm1108_vm1, %v1075_v43 }
 0x1ce   :  { %10952 = vmatmul.mubr.msk.f32.gmra.mrb[10].mxu1 %vm1108_vm1, %v1076_v46 }
 0x1da   :  { %v10900_v17 = vpop.f32.mrb[12].mxu0 }
 0x1db   :  { %v972_v41 = vadd.f32 %v10900_v17, %v13201_v3  ;;  %v966_v44 = vpop.f32.mrb[13].mxu0 }
 0x1dc   :  { %v967_v53 = vadd.f32 %v13201_v3, %v966_v44 }
 0x1dd   :  { %v1078_v49 = vmax.f32 %v972_v41, 0.0 }
 0x1de   :  { %v1077_v13 = vmax.f32 %v967_v53, 0.0 }
 0x1e0   :  { %10954 = vmatprep.mubr.msk.f32.mxu1 %vm1108_vm1, %v1077_v13 }
 0x1e1   :  { %10955 = vmatmul.mubr.msk.f32.gmra.mrb[12].mxu1 %vm1108_vm1, %v1078_v49 }
 0x1ed   :  { %v10903_v58 = vpop.f32.mrb[14].mxu0 }
 0x1ee   :  { %v982_v57 = vadd.f32 %v10903_v58, %v13201_v3  ;;  %v976_v8 = vpop.f32.mrb[15].mxu0 }
 0x1ef   :  { %v977_v4 = vadd.f32 %v13201_v3, %v976_v8 }
 0x1f0   :  { %v1080_v7 = vmax.f32 %v982_v57, 0.0 }
 0x1f1   :  { %v1079_v25 = vmax.f32 %v977_v4, 0.0 }
 0x1f3   :  { %10957 = vmatprep.mubr.msk.f32.mxu1 %vm1108_vm1, %v1079_v25 }
 0x1f4   :  { %10958 = vmatmul.mubr.msk.f32.gmra.mrb[14].mxu1 %vm1108_vm1, %v1080_v7 }
 0x200   :  { %v10906_v5 = vpop.f32.mrb[16].mxu0 }
 0x201   :  { %v992_v30 = vadd.f32 %v10906_v5, %v13201_v3  ;;  %v986_v32 = vpop.f32.mrb[17].mxu0 }
 0x202   :  { %v987_v43 = vadd.f32 %v13201_v3, %v986_v32 }
 0x203   :  { %v1082_v34 = vmax.f32 %v992_v30, 0.0 }
 0x204   :  { %v1081_v46 = vmax.f32 %v987_v43, 0.0 }
 0x206   :  { %10960 = vmatprep.mubr.msk.f32.mxu1 %vm1108_vm1, %v1081_v46 }
 0x207   :  { %10961 = vmatmul.mubr.msk.f32.gmra.mrb[16].mxu1 %vm1108_vm1, %v1082_v34 }
 0x213   :  { %v10909_v21 = vpop.f32.mrb[18].mxu0 }
 0x214   :  { %v1002_v48 = vadd.f32 %v10909_v21, %v13201_v3  ;;  %v996_v17 = vpop.f32.mrb[19].mxu0 }
 0x215   :  { %v997_v41 = vadd.f32 %v13201_v3, %v996_v17 }
 0x216   :  { %v1084_v53 = vmax.f32 %v1002_v48, 0.0 }
 0x217   :  { %v1083_v44 = vmax.f32 %v997_v41, 0.0 }
 0x219   :  { %10963 = vmatprep.mubr.msk.f32.mxu1 %vm1108_vm1, %v1083_v44 }
 0x21a   :  { %10964 = vmatmul.mubr.msk.f32.gmra.mrb[18].mxu1 %vm1108_vm1, %v1084_v53 }
 0x226   :  { %v10912_v13 = vpop.f32.mrb[20].mxu0 }
 0x227   :  { %v1012_v49 = vadd.f32 %v10912_v13, %v13201_v3  ;;  %v1006_v51 = vpop.f32.mrb[21].mxu0 }
 0x228   :  { %v1007_v2 = vadd.f32 %v13201_v3, %v1006_v51 }
 0x229   :  { %v1086_v15 = vmax.f32 %v1012_v49, 0.0 }
 0x22a   :  { %v1085_v20 = vmax.f32 %v1007_v2, 0.0 }
 0x22c   :  { %10966 = vmatprep.mubr.msk.f32.mxu1 %vm1108_vm1, %v1085_v20 }
 0x22d   :  { %10967 = vmatmul.mubr.msk.f32.gmra.mrb[20].mxu1 %vm1108_vm1, %v1086_v15 }
 0x239   :  { %v10915_v56 = vpop.f32.mrb[22].mxu0 }
 0x23a   :  { %v1022_v50 = vadd.f32 %v10915_v56, %v13201_v3  ;;  %v1016_v58 = vpop.f32.mrb[23].mxu0 }
 0x23b   :  { %v1017_v57 = vadd.f32 %v13201_v3, %v1016_v58 }
 0x23c   :  { %v1088_v4 = vmax.f32 %v1022_v50, 0.0 }
 0x23d   :  { %v1087_v8 = vmax.f32 %v1017_v57, 0.0 }
 0x23f   :  { %10969 = vmatprep.mubr.msk.f32.mxu1 %vm1108_vm1, %v1087_v8 }
 0x240   :  { %10970 = vmatmul.mubr.msk.f32.gmra.mrb[22].mxu1 %vm1108_vm1, %v1088_v4 }
 0x24c   :  { %v10918_v25 = vpop.f32.mrb[24].mxu0 }
 0x24d   :  { %v1032_v7 = vadd.f32 %v10918_v25, %v13201_v3  ;;  %v1026_v9 = vpop.f32.mrb[25].mxu0 }
 0x24e   :  { %v1027_v19 = vadd.f32 %v13201_v3, %v1026_v9 }
 0x24f   :  { %v1090_v5 = vmax.f32 %v1032_v7, 0.0 }
 0x250   :  { %v1089_v35 = vmax.f32 %v1027_v19, 0.0 }
 0x252   :  { %10972 = vmatprep.mubr.msk.f32.mxu1 %vm1108_vm1, %v1089_v35 }
 0x253   :  { %10973 = vmatmul.mubr.msk.f32.gmra.mrb[24].mxu1 %vm1108_vm1, %v1090_v5 }
 0x25f   :  { %v10921_v30 = vpop.f32.mrb[26].mxu0 }
 0x260   :  { %v1042_v32 = vadd.f32 %v10921_v30, %v13201_v3  ;;  %v1036_v43 = vpop.f32.mrb[27].mxu0 }
 0x261   :  { %v1037_v46 = vadd.f32 %v13201_v3, %v1036_v43 }
 0x262   :  { %v1092_v21 = vmax.f32 %v1042_v32, 0.0 }
 0x263   :  { %v1091_v34 = vmax.f32 %v1037_v46, 0.0 }
 0x265   :  { %10975 = vmatprep.mubr.msk.f32.mxu1 %vm1108_vm1, %v1091_v34 }
 0x266   :  { %10976 = vmatmul.mubr.msk.f32.gmra.mrb[26].mxu1 %vm1108_vm1, %v1092_v21 }
 0x272   :  { %v10924_v48 = vpop.f32.mrb[28].mxu0 }
 0x273   :  { %v1052_v17 = vadd.f32 %v10924_v48, %v13201_v3  ;;  %v1046_v41 = vpop.f32.mrb[29].mxu0 }
 0x274   :  { %v1047_v44 = vadd.f32 %v13201_v3, %v1046_v41 }
 0x275   :  { %v1094_v13 = vmax.f32 %v1052_v17, 0.0 }
 0x276   :  { %v1093_v53 = vmax.f32 %v1047_v44, 0.0 }
 0x278   :  { %10978 = vmatprep.mubr.msk.f32.mxu1 %vm1108_vm1, %v1093_v53 }
 0x279   :  { %10979 = vmatmul.mubr.msk.f32.gmra.mrb[28].mxu1 %vm1108_vm1, %v1094_v13 }
 0x285   :  { %v10927_v49 = vpop.f32.mrb[30].mxu0 }
 0x286   :  { %v1062_v51 = vadd.f32 %v10927_v49, %v13201_v3  ;;  %v1056_v2 = vpop.f32.mrb[31].mxu0 }
 0x287   :  { %v1057_v20 = vadd.f32 %v13201_v3, %v1056_v2 }
 0x288   :  { %v1096_v56 = vmax.f32 %v1062_v51, 0.0 }
 0x289   :  { %v1095_v15 = vmax.f32 %v1057_v20, 0.0 }
 0x28b   :  { %10981 = vmatprep.mubr.msk.f32.mxu1 %vm1108_vm1, %v1095_v15 }
 0x28c   :  { %10982 = vmatmul.mubr.msk.f32.gmra.mrb[30].mxu1 %vm1108_vm1, %v1096_v56 }
 0x28d   :  { %11000 = vmatprep.mubr.msk.f32.mxu1 %vm743_vm0, %v12852_v62  ;;  %v9763_v62 = vld [vmem:[%s15809_s3 + $0x40] sm:$0xff] }
 0x290   :  { %11001 = vmatmul.mubr.msk.f32.vlgmr.msra.gmra.mrb[0].mxu1 %vm743_vm0, %v12927_v22 }
 0x291   :  { %11003 = vmatprep.mubr.msk.f32.mxu1 %vm743_vm0, %v12921_v1  ;;  %v9764_v1 = vld [vmem:[%s15809_s3 + $0x48] sm:$0xff] }
 0x292   :  { %v13378_v22 = vpack.c.bf16 %v9764_v1, %v9763_v62 }
 0x294   :  { %11004 = vmatmul.mubr.msk.f32.gmra.mrb[2].mxu1 %vm743_vm0, %v12943_v45  ;;  %12027 = vmatprep.subr.bf16.mxu1 %v13378_v22  ;;  %v9766_v45 = vld [vmem:[%s15809_s3 + $0x58] sm:$0xff] }
 0x295   :  { %11006 = vmatprep.mubr.msk.f32.mxu1 %vm743_vm0, %v12938_v24  ;;  %12029 = vmatpush3.bf16.msra.mxu1 %v13378_v22  ;;  %v9765_v24 = vld [vmem:[%s15809_s3 + $0x50] sm:$0xff] }
 0x298   :  { %11007 = vmatmul.mubr.msk.f32.gmra.mrb[4].mxu1 %vm743_vm0, %v12959_v16  ;;  %v9767_v16 = vld [vmem:[%s15809_s3 + $0x60] sm:$0xff] }
 0x299   :  { %11009 = vmatprep.mubr.msk.f32.mxu1 %vm743_vm0, %v12952_v54  ;;  %v13388_v54 = vpack.c.bf16 %v9766_v45, %v9765_v24 }
 0x29b   :  { %12028 = vmatprep.subr.bf16.mxu1 %v13388_v54 }
 0x29c   :  { %11010 = vmatmul.mubr.msk.f32.gmra.mrb[6].mxu1 %vm743_vm0, %v12968_v26  ;;  %v9768_v26 = vld [vmem:[%s15809_s3 + $0x68] sm:$0xff] }
 0x29d   :  { %11012 = vmatprep.mubr.msk.f32.mxu1 %vm743_vm0, %v12977_v36  ;;  %12030 = vmatpush3.bf16.msra.mxu1 %v13388_v54  ;;  %v11859_v36 = vpack.c.bf16 %v9768_v26, %v9767_v16 }
 0x29f   :  { %11860 = vmatprep.subr.bf16.mxu0 %v11859_v36 }
 0x2a0   :  { %11013 = vmatmul.mubr.msk.f32.gmra.mrb[8].mxu1 %vm743_vm0, %v12980_v37  ;;  %11862 = vmatpush3.bf16.msra.mxu0 %v11859_v36  ;;  %v9769_v37 = vld [vmem:[%s15809_s3 + $0x70] sm:$0xff] }
 0x2a1   :  { %11015 = vmatprep.mubr.msk.f32.mxu1 %vm743_vm0, %v13005_v0 }
 0x2a4   :  { %11016 = vmatmul.mubr.msk.f32.gmra.mrb[10].mxu1 %vm743_vm0, %v13002_v61  ;;  %v9770_v61 = vld [vmem:[%s15809_s3 + $0x78] sm:$0xff] }
 0x2a5   :  { %11018 = vmatprep.mubr.msk.f32.mxu1 %vm743_vm0, %v13029_v60  ;;  %v11863_v0 = vpack.c.bf16 %v9770_v61, %v9769_v37 }
 0x2a7   :  { %11864 = vmatprep.subr.bf16.mxu0 %v11863_v0 }
 0x2a8   :  { %11019 = vmatmul.mubr.msk.f32.gmra.mrb[12].mxu1 %vm743_vm0, %v13026_v47  ;;  %11866 = vmatpush3.bf16.msra.mxu0 %v11863_v0  ;;  %v13408_v47 = vld [vmem:[%s15812_s6] ss:$0 sm:$0xff] }
 0x2a9   :  { %11021 = vmatprep.mubr.msk.f32.mxu1 %vm743_vm0, %v13053_v18  ;;  %11868 = vmatprep.subr.bf16.mxu0 %v13378_v22 }
 0x2ac   :  { %11022 = vmatmul.mubr.msk.f32.gmra.mrb[14].mxu1 %vm743_vm0, %v13050_v12 }
 0x2ad   :  { %11024 = vmatprep.mubr.msk.f32.mxu1 %vm743_vm0, %v13089_v6 }
 0x2b0   :  { %11025 = vmatmul.mubr.msk.f32.gmra.mrb[16].mxu1 %vm743_vm0, %v13086_v59 }
 0x2b1   :  { %11027 = vmatprep.mubr.msk.f32.mxu1 %vm743_vm0, %v13107_v23 }
 0x2b4   :  { %11028 = vmatmul.mubr.msk.f32.gmra.mrb[18].mxu1 %vm743_vm0, %v13104_v40 }
 0x2b5   :  { %11030 = vmatprep.mubr.msk.f32.mxu1 %vm743_vm0, %v13124_v14 }
 0x2b8   :  { %11031 = vmatmul.mubr.msk.f32.gmra.mrb[20].mxu1 %vm743_vm0, %v13121_v55 }
 0x2b9   :  { %11033 = vmatprep.mubr.msk.f32.mxu1 %vm743_vm0, %v13141_v27 }
 0x2bc   :  { %11034 = vmatmul.mubr.msk.f32.gmra.mrb[22].mxu1 %vm743_vm0, %v13138_v10 }
 0x2bd   :  { %11036 = vmatprep.mubr.msk.f32.mxu1 %vm743_vm0, %v13158_v29 }
 0x2c0   :  { %11037 = vmatmul.mubr.msk.f32.gmra.mrb[24].mxu1 %vm743_vm0, %v13155_v11 }
 0x2c1   :  { %11039 = vmatprep.mubr.msk.f32.mxu1 %vm743_vm0, %v13175_v31 }
 0x2c4   :  { %11040 = vmatmul.mubr.msk.f32.gmra.mrb[26].mxu1 %vm743_vm0, %v13172_v52 }
 0x2c5   :  { %11042 = vmatprep.mubr.msk.f32.mxu1 %vm743_vm0, %v13192_v33 }
 0x2c8   :  { %11043 = vmatmul.mubr.msk.f32.gmra.mrb[28].mxu1 %vm743_vm0, %v13189_v28 }
 0x2c9   :  { %11045 = vmatprep.mubr.msk.f32.mxu1 %vm743_vm0, %v13221_v63 }
 0x2cc   :  { %11046 = vmatmul.mubr.msk.f32.gmra.mrb[30].mxu1 %vm743_vm0, %v13217_v38 }
 0x363   :  { %v11002_v60 = vpop.f32.mrb[0].mxu1 }
 0x364   :  { %v13411_v12 = vadd.f32 %v11002_v60, %v13408_v47  ;;  %v1600_v18 = vpop.f32.mrb[1].mxu1 }
 0x365   :  { %v13414_v59 = vadd.f32 %v13408_v47, %v1600_v18 }
 0x366   :  { %v1760_v6 = vsel %vm1108_vm1, %v13411_v12, -inf }
 0x367   :  { %v1759_v40 = vsel %vm1108_vm1, %v13414_v59, -inf  ;;  %v11005_v23 = vpop.f32.mrb[2].mxu1 }
 0x368   :  { %v1761_v55 = vmax.f32 %v1759_v40, %v1760_v6  ;;  %v13421_v14 = vadd.f32 %v11005_v23, %v13408_v47  ;;  %v1610_v10 = vpop.f32.mrb[3].mxu1 }
 0x369   :  { %v13424_v27 = vadd.f32 %v13408_v47, %v1610_v10 }
 0x36a   :  { %v1769_v11 = vsel %vm1108_vm1, %v13421_v14, -inf  ;;  %v1762_v31 = vrot.slane %v1761_v55, 4 }
 0x36b   :  { %v1768_v29 = vsel %vm1108_vm1, %v13424_v27, -inf  ;;  %v11008_v52 = vpop.f32.mrb[4].mxu1 }
 0x36c   :  { %v1770_v28 = vmax.f32 %v1768_v29, %v1769_v11  ;;  %v13431_v33 = vadd.f32 %v11008_v52, %v13408_v47  ;;  %v1620_v3 = vpop.f32.mrb[5].mxu1  ;;  %v1763_v8 = vmax.f32 %v1761_v55, %v1762_v31 }
 0x36d   :  { %v13434_v38 = vadd.f32 %v13408_v47, %v1620_v3 }
 0x36e   :  { %v1771_v63 = vrot.slane %v1770_v28, 4  ;;  %v1778_v50 = vsel %vm1108_vm1, %v13431_v33, -inf  ;;  %v1764_v43 = vrot.slane %v1763_v8, 2 }
 0x36f   :  { %v1777_v58 = vsel %vm1108_vm1, %v13434_v38, -inf  ;;  %v11011_v57 = vpop.f32.mrb[6].mxu1 }
 0x370   :  { %v1779_v4 = vmax.f32 %v1777_v58, %v1778_v50  ;;  %v13441_v25 = vadd.f32 %v11011_v57, %v13408_v47  ;;  %v1630_v7 = vpop.f32.mrb[7].mxu1  ;;  %v1772_v19 = vmax.f32 %v1770_v28, %v1771_v63  ;;  %v1765_v2 = vmax.f32 %v1763_v8, %v1764_v43 }
 0x371   :  { %v13444_v9 = vadd.f32 %v13408_v47, %v1630_v7 }
 0x372   :  { %v1780_v35 = vrot.slane %v1779_v4, 4  ;;  %v1787_v5 = vsel %vm1108_vm1, %v13441_v25, -inf  ;;  %v1773_v41 = vrot.slane %v1772_v19, 2  ;;  %v1766_v0 = vrot.slane %v1765_v2, 1 }
 0x373   :  { %v1786_v30 = vsel %vm1108_vm1, %v13444_v9, -inf  ;;  %v11014_v32 = vpop.f32.mrb[8].mxu1 }
 0x374   :  { %v1781_v46 = vmax.f32 %v1779_v4, %v1780_v35  ;;  %v1788_v34 = vmax.f32 %v1786_v30, %v1787_v5  ;;  %v1640_v21 = vpop.f32.mrb[9].mxu1  ;;  %v13451_v48 = vadd.f32 %v11014_v32, %v13408_v47  ;;  %v1774_v24 = vmax.f32 %v1772_v19, %v1773_v41 }
 0x375   :  { %v13454_v17 = vadd.f32 %v13408_v47, %v1640_v21  ;;  %v13480_v50 = vmax.f32 %v1765_v2, %v1766_v0 }
 0x376   :  { %v1782_v44 = vrot.slane %v1781_v46, 2  ;;  %v1789_v53 = vrot.slane %v1788_v34, 4  ;;  %v1796_v13 = vsel %vm1108_vm1, %v13451_v48, -inf  ;;  %v1775_v10 = vrot.slane %v1774_v24, 1 }
 0x377   :  { %v1795_v49 = vsel %vm1108_vm1, %v13454_v17, -inf  ;;  %v11017_v51 = vpop.f32.mrb[10].mxu1 }
 0x378   :  { %v1790_v20 = vmax.f32 %v1788_v34, %v1789_v53  ;;  %v1797_v15 = vmax.f32 %v1795_v49, %v1796_v13  ;;  %v1650_v56 = vpop.f32.mrb[11].mxu1  ;;  %v13461_v62 = vadd.f32 %v11017_v51, %v13408_v47  ;;  %v1783_v45 = vmax.f32 %v1781_v46, %v1782_v44 }
 0x379   :  { %v13464_v1 = vadd.f32 %v13408_v47, %v1650_v56  ;;  %v13490_v30 = vmax.f32 %v1774_v24, %v1775_v10 }
 0x37a   :  { %v1791_v16 = vrot.slane %v1790_v20, 2  ;;  %v1798_v26 = vrot.slane %v1797_v15, 4  ;;  %v1805_v36 = vsel %vm1108_vm1, %v13461_v62, -inf  ;;  %v1784_v11 = vrot.slane %v1783_v45, 1 }
 0x37b   :  { %v1804_v37 = vsel %vm1108_vm1, %v13464_v1, -inf  ;;  %v11020_v61 = vpop.f32.mrb[12].mxu1 }
 0x37c   :  { %v1792_v60 = vmax.f32 %v1790_v20, %v1791_v16  ;;  %v1806_v18 = vmax.f32 %v1804_v37, %v1805_v36  ;;  %v1660_v6 = vpop.f32.mrb[13].mxu1  ;;  %v1799_v40 = vmax.f32 %v1797_v15, %v1798_v26  ;;  %v13471_v23 = vadd.f32 %v11020_v61, %v13408_v47 }
 0x37d   :  { %v13474_v55 = vadd.f32 %v13408_v47, %v1660_v6  ;;  %v13492_v32 = vmax.f32 %v1783_v45, %v1784_v11  ;;  %v1953_v26 = vmax.f32 %v13480_v50, 0.0  ;;  %v1954_v36 = vmax.f32 %v13490_v30, 0.0 }
 0x37e   :  { %v1807_v29 = vrot.slane %v1806_v18, 4  ;;  %v1793_v52 = vrot.slane %v1792_v60, 1  ;;  %v1800_v31 = vrot.slane %v1799_v40, 2  ;;  %v1814_v28 = vsel %vm1108_vm1, %v13471_v23, -inf }
 0x37f   :  { %v1813_v3 = vsel %vm1108_vm1, %v13474_v55, -inf  ;;  %v11023_v63 = vpop.f32.mrb[14].mxu1  ;;  %v1933_v8 = vmax.f32 %v13474_v55, 0.0  ;;  %v1934_v19 = vmax.f32 %v13471_v23, 0.0  ;;  %v1955_v37 = vmax.f32 %v13492_v32, 0.0 }
 0x380   :  { %v1808_v58 = vmax.f32 %v1806_v18, %v1807_v29  ;;  %v1815_v57 = vmax.f32 %v1813_v3, %v1814_v28  ;;  %v1670_v4 = vpop.f32.mrb[15].mxu1  ;;  %v1801_v7 = vmax.f32 %v1799_v40, %v1800_v31  ;;  %v13485_v35 = vadd.f32 %v11023_v63, %v13408_v47 }
 0x381   :  { %v13488_v5 = vadd.f32 %v13408_v47, %v1670_v4  ;;  %11085 = vmatprep.mubr.msk.f32.mxu1 %vm1108_vm1, %v1933_v8  ;;  %v13495_v34 = vmax.f32 %v1792_v60, %v1793_v52 }
 0x382   :  { %15855 = vst [vmem:[#allocation6_spill] sm:$0xff] %v13485_v35  ;;  %v1809_v43 = vrot.slane %v1808_v58, 2  ;;  %v1816_v46 = vrot.slane %v1815_v57, 4  ;;  %v1802_v21 = vrot.slane %v1801_v7, 1  ;;  %v1823_v41 = vsel %vm1108_vm1, %v13485_v35, -inf  ;;  %11086 = vmatmul.mubr.msk.f32.vlgmr.msra.gmra.mrb[32].mxu1 %vm1108_vm1, %v1934_v19 }
 0x383   :  { %v1822_v44 = vsel %vm1108_vm1, %v13488_v5, -inf  ;;  %v11026_v53 = vpop.f32.mrb[16].mxu1  ;;  %v1935_v2 = vmax.f32 %v13488_v5, 0.0  ;;  %v1936_v15 = vmax.f32 %v13485_v35, 0.0  ;;  %v1956_v60 = vmax.f32 %v13495_v34, 0.0 }
 0x384   :  { %v1810_v13 = vmax.f32 %v1808_v58, %v1809_v43  ;;  %v1817_v49 = vmax.f32 %v1815_v57, %v1816_v46  ;;  %v1824_v51 = vmax.f32 %v1822_v44, %v1823_v41  ;;  %v1680_v20 = vpop.f32.mrb[17].mxu1  ;;  %v13505_v56 = vadd.f32 %v11026_v53, %v13408_v47 }
 0x385   :  { %v13508_v24 = vadd.f32 %v13408_v47, %v1680_v20  ;;  %11088 = vmatprep.mubr.msk.f32.mxu1 %vm1108_vm1, %v1935_v2  ;;  %v13516_v18 = vmax.f32 %v1801_v7, %v1802_v21  ;;  %v1994_v44 = vsel %vm1993_vm2, %v1954_v36, %v1953_v26 }
 0x386   :  { %15856 = vst [vmem:[#allocation7_spill] sm:$0xff] %v13505_v56  ;;  %v1818_v45 = vrot.slane %v1817_v49, 2  ;;  %v1825_v16 = vrot.slane %v1824_v51, 4  ;;  %v1811_v61 = vrot.slane %v1810_v13, 1  ;;  %11089 = vmatmul.mubr.msk.f32.gmra.mrb[34].mxu1 %vm1108_vm1, %v1936_v15  ;;  %v1832_v11 = vsel %vm1108_vm1, %v13505_v56, -inf }
 0x387   :  { %15857 = vst [vmem:[#allocation8_spill] sm:$0xff] %v13508_v24  ;;  %v11029_v0 = vpop.f32.mrb[18].mxu1  ;;  %v1937_v29 = vmax.f32 %v13508_v24, 0.0  ;;  %v1938_v63 = vmax.f32 %v13505_v56, 0.0  ;;  %v1831_v58 = vsel %vm1108_vm1, %v13508_v24, -inf  ;;  %v1957_v53 = vmax.f32 %v13516_v18, 0.0 }
 0x388   :  { %v1819_v6 = vmax.f32 %v1817_v49, %v1818_v45  ;;  %v1826_v40 = vmax.f32 %v1824_v51, %v1825_v16  ;;  %v1690_v10 = vpop.f32.mrb[19].mxu1  ;;  %v13522_v52 = vadd.f32 %v11029_v0, %v13408_v47  ;;  %v13530_v57 = vmax.f32 %v1810_v13, %v1811_v61 }
 0x389   :  { %v13525_v31 = vadd.f32 %v13408_v47, %v1690_v10  ;;  %11091 = vmatprep.mubr.msk.f32.mxu1 %vm1108_vm1, %v1937_v29  ;;  %v1996_v51 = vsel %vm1995_vm3, %v1955_v37, %v1994_v44  ;;  %v1833_v2 = vmax.f32 %v1831_v58, %v1832_v11 }
 0x38a   :  { %15858 = vst [vmem:[#allocation9_spill] sm:$0xff] %v13522_v52  ;;  %v1820_v28 = vrot.slane %v1819_v6, 1  ;;  %v1827_v3 = vrot.slane %v1826_v40, 2  ;;  %v1841_v8 = vsel %vm1108_vm1, %v13522_v52, -inf  ;;  %11092 = vmatmul.mubr.msk.f32.gmra.mrb[36].mxu1 %vm1108_vm1, %v1938_v63  ;;  %v1940_v20 = vmax.f32 %v13522_v52, 0.0 }
 0x38b   :  { %15859 = vst [vmem:[#allocation10_spill] sm:$0xff] %v13525_v31  ;;  %v1840_v4 = vsel %vm1108_vm1, %v13525_v31, -inf  ;;  %v1939_v7 = vmax.f32 %v13525_v31, 0.0  ;;  %v11032_v19 = vpop.f32.mrb[20].mxu1  ;;  %v1998_v45 = vsel %vm1997_vm4, %v1956_v60, %v1996_v51  ;;  %v1958_v0 = vmax.f32 %v13530_v57, 0.0 }
 0x38c   :  { %v13538_v43 = vmax.f32 %v1819_v6, %v1820_v28  ;;  %v1828_v46 = vmax.f32 %v1826_v40, %v1827_v3  ;;  %v1842_v21 = vmax.f32 %v1840_v4, %v1841_v8  ;;  %v1700_v41 = vpop.f32.mrb[21].mxu1  ;;  %v13544_v13 = vadd.f32 %v11032_v19, %v13408_v47 }
 0x38d   :  { %v13547_v49 = vadd.f32 %v13408_v47, %v1700_v41  ;;  %11094 = vmatprep.mubr.msk.f32.mxu1 %vm1108_vm1, %v1939_v7  ;;  %v2000_v28 = vsel %vm1999_vm5, %v1957_v53, %v1998_v45  ;;  %v1834_v3 = vrot.slane %v1833_v2, 4 }
 0x38e   :  { %15860 = vst [vmem:[#allocation11_spill] sm:$0xff] %v13544_v13  ;;  %v1829_v15 = vrot.slane %v1828_v46, 1  ;;  %v1850_v16 = vsel %vm1108_vm1, %v13544_v13, -inf  ;;  %v1843_v6 = vrot.slane %v1842_v21, 4  ;;  %11095 = vmatmul.mubr.msk.f32.gmra.mrb[38].mxu1 %vm1108_vm1, %v1940_v20  ;;  %v1959_v60 = vmax.f32 %v13538_v43, 0.0 }
 0x38f   :  { %15861 = vst [vmem:[#allocation12_spill] sm:$0xff] %v13547_v49  ;;  %v1849_v26 = vsel %vm1108_vm1, %v13547_v49, -inf  ;;  %v1941_v36 = vmax.f32 %v13547_v49, 0.0  ;;  %v11035_v61 = vpop.f32.mrb[22].mxu1  ;;  %v1942_v63 = vmax.f32 %v13544_v13, 0.0 }
 0x390   :  { %v1851_v40 = vmax.f32 %v1849_v26, %v1850_v16  ;;  %v13561_v37 = vadd.f32 %v11035_v61, %v13408_v47  ;;  %v1710_v10 = vpop.f32.mrb[23].mxu1  ;;  %v13568_v29 = vmax.f32 %v1828_v46, %v1829_v15  ;;  %v2002_v46 = vsel %vm2001_vm6, %v1958_v0, %v2000_v28 }
 0x391   :  { %v13565_v11 = vadd.f32 %v13408_v47, %v1710_v10  ;;  %11097 = vmatprep.mubr.msk.f32.mxu1 %vm1108_vm1, %v1941_v36  ;;  %v1844_v44 = vmax.f32 %v1842_v21, %v1843_v6  ;;  %v2004_v20 = vsel %vm2003_vm7, %v1959_v60, %v2002_v46  ;;  %v1835_v26 = vmax.f32 %v1833_v2, %v1834_v3 }
 0x392   :  { %15862 = vst [vmem:[#allocation13_spill] sm:$0xff] %v13561_v37  ;;  %v1852_v58 = vrot.slane %v1851_v40, 4  ;;  %v1859_v8 = vsel %vm1108_vm1, %v13561_v37, -inf  ;;  %v1960_v41 = vmax.f32 %v13568_v29, 0.0  ;;  %11098 = vmatmul.mubr.msk.f32.gmra.mrb[40].mxu1 %vm1108_vm1, %v1942_v63  ;;  %v1944_v21 = vmax.f32 %v13561_v37, 0.0 }
 0x393   :  { %15863 = vst [vmem:[#allocation14_spill] sm:$0xff] %v13565_v11  ;;  %v1858_v4 = vsel %vm1108_vm1, %v13565_v11, -inf  ;;  %v1943_v7 = vmax.f32 %v13565_v11, 0.0  ;;  %v11038_v19 = vpop.f32.mrb[24].mxu1  ;;  %v1845_v28 = vrot.slane %v1844_v44, 2 }
 0x394   :  { %v1860_v53 = vmax.f32 %v1858_v4, %v1859_v8  ;;  %v1720_v51 = vpop.f32.mrb[25].mxu1  ;;  %v13582_v15 = vadd.f32 %v11038_v19, %v13408_v47  ;;  %v2006_v16 = vsel %vm2005_vm8, %v1960_v41, %v2004_v20  ;;  %v1853_v36 = vmax.f32 %v1851_v40, %v1852_v58 }
 0x395   :  { %v13585_v45 = vadd.f32 %v13408_v47, %v1720_v51  ;;  %11100 = vmatprep.mubr.msk.f32.mxu1 %vm1108_vm1, %v1943_v7  ;;  %11056 = vmatprep.mubr.msk.f32.mxu0 %vm1108_vm1, %v2006_v16  ;;  %v1836_v58 = vrot.slane %v1835_v26, 2  ;;  %v1846_v20 = vmax.f32 %v1844_v44, %v1845_v28 }
 0x396   :  { %15864 = vst [vmem:[#allocation15_spill] sm:$0xff] %v13582_v15  ;;  %v1861_v61 = vrot.slane %v1860_v53, 4  ;;  %v1868_v0 = vsel %vm1108_vm1, %v13582_v15, -inf  ;;  %11101 = vmatmul.mubr.msk.f32.gmra.mrb[42].mxu1 %vm1108_vm1, %v1944_v21  ;;  %v1854_v4 = vrot.slane %v1853_v36, 2  ;;  %v1946_v7 = vmax.f32 %v13582_v15, 0.0 }
 0x397   :  { %15865 = vst [vmem:[#allocation16_spill] sm:$0xff] %v13585_v45  ;;  %v1867_v6 = vsel %vm1108_vm1, %v13585_v45, -inf  ;;  %v1945_v10 = vmax.f32 %v13585_v45, 0.0  ;;  %v11041_v60 = vpop.f32.mrb[26].mxu1 }
 0x398   :  { %v1862_v63 = vmax.f32 %v1860_v53, %v1861_v61  ;;  %v1869_v8 = vmax.f32 %v1867_v6, %v1868_v0  ;;  %v1730_v2 = vpop.f32.mrb[27].mxu1  ;;  %v13598_v40 = vadd.f32 %v11041_v60, %v13408_v47  ;;  %v1837_v60 = vmax.f32 %v1835_v26, %v1836_v58 }
 0x399   :  { %v13601_v3 = vadd.f32 %v13408_v47, %v1730_v2  ;;  %11103 = vmatprep.mubr.msk.f32.mxu1 %vm1108_vm1, %v1945_v10  ;;  %v1855_v2 = vmax.f32 %v1853_v36, %v1854_v4 }
 0x39a   :  { %15866 = vst [vmem:[#allocation17_spill] sm:$0xff] %v13598_v40  ;;  %v1863_v19 = vrot.slane %v1862_v63, 2  ;;  %v1870_v41 = vrot.slane %v1869_v8, 4  ;;  %v1877_v46 = vsel %vm1108_vm1, %v13598_v40, -inf  ;;  %11104 = vmatmul.mubr.msk.f32.gmra.mrb[44].mxu1 %vm1108_vm1, %v1946_v7  ;;  %v1948_v15 = vmax.f32 %v13598_v40, 0.0 }
 0x39b   :  { %15867 = vst [vmem:[#allocation18_spill] sm:$0xff] %v13601_v3  ;;  %v1876_v53 = vsel %vm1108_vm1, %v13601_v3, -inf  ;;  %v11044_v51 = vpop.f32.mrb[28].mxu1  ;;  %v1947_v0 = vmax.f32 %v13601_v3, 0.0  ;;  %v1856_v40 = vrot.slane %v1855_v2, 1 }
 0x39c   :  { %v1878_v16 = vmax.f32 %v1876_v53, %v1877_v46  ;;  %v1740_v21 = vpop.f32.mrb[29].mxu1  ;;  %v1871_v61 = vmax.f32 %v1869_v8, %v1870_v41  ;;  %v13612_v6 = vadd.f32 %v11044_v51, %v13408_v47  ;;  %v1864_v37 = vmax.f32 %v1862_v63, %v1863_v19 }
 0x39d   :  { %v13615_v10 = vadd.f32 %v13408_v47, %v1740_v21  ;;  %11106 = vmatprep.mubr.msk.f32.mxu1 %vm1108_vm1, %v1947_v0  ;;  %v1847_v41 = vrot.slane %v1846_v20, 1  ;;  %v1838_v19 = vrot.slane %v1837_v60, 1  ;;  %v13643_v11 = vmax.f32 %v1855_v2, %v1856_v40 }
 0x39e   :  { %15868 = vst [vmem:[#allocation19_spill] sm:$0xff] %v13612_v6  ;;  %v1879_v45 = vrot.slane %v1878_v16, 4  ;;  %v1872_v44 = vrot.slane %v1871_v61, 2  ;;  %v1886_v28 = vsel %vm1108_vm1, %v13612_v6, -inf  ;;  %11107 = vmatmul.mubr.msk.f32.gmra.mrb[46].mxu1 %vm1108_vm1, %v1948_v15  ;;  %v1950_v21 = vmax.f32 %v13612_v6, 0.0 }
 0x39f   :  { %15869 = vst [vmem:[#allocation20_spill] sm:$0xff] %v13615_v10  ;;  %v1885_v8 = vsel %vm1108_vm1, %v13615_v10, -inf  ;;  %v11047_v7 = vpop.f32.mrb[30].mxu1  ;;  %v1949_v58 = vmax.f32 %v13615_v10, 0.0 }
 0x3a0   :  { %v1880_v46 = vmax.f32 %v1878_v16, %v1879_v45  ;;  %v1887_v53 = vmax.f32 %v1885_v8, %v1886_v28  ;;  %v1750_v26 = vpop.f32.mrb[31].mxu1  ;;  %v1873_v36 = vmax.f32 %v1871_v61, %v1872_v44  ;;  %v13626_v63 = vadd.f32 %v11047_v7, %v13408_v47 }
 0x3a1   :  { %v13629_v4 = vadd.f32 %v13408_v47, %v1750_v26  ;;  %v1865_v45 = vrot.slane %v1864_v37, 1  ;;  %11109 = vmatprep.mubr.msk.f32.mxu1 %vm1108_vm1, %v1949_v58  ;;  %v13639_v8 = vmax.f32 %v1846_v20, %v1847_v41  ;;  %v13645_v58 = vmax.f32 %v1837_v60, %v1838_v19 }
 0x3a2   :  { %15870 = vst [vmem:[#allocation21_spill] sm:$0xff] %v13626_v63  ;;  %v1881_v51 = vrot.slane %v1880_v46, 2  ;;  %v1888_v0 = vrot.slane %v1887_v53, 4  ;;  %v1895_v15 = vsel %vm1108_vm1, %v13626_v63, -inf  ;;  %11110 = vmatmul.mubr.msk.f32.gmra.mrb[48].mxu1 %vm1108_vm1, %v1950_v21  ;;  %v1874_v7 = vrot.slane %v1873_v36, 1 }
 0x3a3   :  { %15871 = vst [vmem:[#allocation22_spill] sm:$0xff] %v13629_v4  ;;  %v1894_v16 = vsel %vm1108_vm1, %v13629_v4, -inf  ;;  %v1951_v47 = vmax.f32 %v13629_v4, 0.0  ;;  %v1952_v10 = vmax.f32 %v13626_v63, 0.0  ;;  %v1962_v41 = vmax.f32 %v13639_v8, 0.0 }
 0x3a4   :  { %v1882_v61 = vmax.f32 %v1880_v46, %v1881_v51  ;;  %v1889_v44 = vmax.f32 %v1887_v53, %v1888_v0  ;;  %v1896_v28 = vmax.f32 %v1894_v16, %v1895_v15  ;;  %v13647_v46 = vmax.f32 %v1864_v37, %v1865_v45 }
 0x3a5   :  { %11112 = vmatprep.mubr.msk.f32.mxu1 %vm1108_vm1, %v1951_v47  ;;  %v13650_v20 = vmax.f32 %v1873_v36, %v1874_v7  ;;  %v1963_v16 = vmax.f32 %v13643_v11, 0.0  ;;  %v1961_v40 = vmax.f32 %v13645_v58, 0.0 }
 0x3a6   :  { %v1883_v26 = vrot.slane %v1882_v61, 1  ;;  %v1890_v6 = vrot.slane %v1889_v44, 2  ;;  %v1897_v3 = vrot.slane %v1896_v28, 4  ;;  %11113 = vmatmul.mubr.msk.f32.gmra.mrb[50].mxu1 %vm1108_vm1, %v1952_v10  ;;  %v1964_v60 = vmax.f32 %v13647_v46, 0.0 }
 0x3a7   :  { %v2007_v10 = vsel %vm1993_vm2, %v1962_v41, %v1961_v40  ;;  %v9775_v41 = vld [vmem:[%s15813_s7 + $0x60] sm:$0xff]  ;;  %v9778_v40 = vld [vmem:[%s15813_s7 + $0x78] sm:$0xff] }
 0x3a8   :  { %v1891_v53 = vmax.f32 %v1889_v44, %v1890_v6  ;;  %v1898_v51 = vmax.f32 %v1896_v28, %v1897_v3  ;;  %v13653_v21 = vmax.f32 %v1882_v61, %v1883_v26  ;;  %v1965_v3 = vmax.f32 %v13650_v20, 0.0 }
 0x3a9   :  { %v2008_v19 = vsel %vm1995_vm3, %v1963_v16, %v2007_v10  ;;  %v9777_v16 = vld [vmem:[%s15813_s7 + $0x70] sm:$0xff]  ;;  %v1925_v10 = vmax.f32 %v13434_v38, 0.0 }
 0x3aa   :  { %v1892_v0 = vrot.slane %v1891_v53, 1  ;;  %v1899_v15 = vrot.slane %v1898_v51, 2  ;;  %v1966_v2 = vmax.f32 %v13653_v21, 0.0  ;;  %v2009_v44 = vsel %vm1997_vm4, %v1964_v60, %v2008_v19 }
 0x3ab   :  { %v2010_v28 = vsel %vm1999_vm5, %v1965_v3, %v2009_v44  ;;  %v1922_v60 = vmax.f32 %v13411_v12, 0.0  ;;  %v1924_v3 = vmax.f32 %v13421_v14, 0.0  ;;  %v1929_v19 = vmax.f32 %v13454_v17, 0.0 }
 0x3ac   :  { %v13658_v37 = vmax.f32 %v1891_v53, %v1892_v0  ;;  %v1900_v6 = vmax.f32 %v1898_v51, %v1899_v15  ;;  %v2011_v7 = vsel %vm2001_vm6, %v1966_v2, %v2010_v28  ;;  %v1921_v53 = vmax.f32 %v13414_v59, 0.0  ;;  %v9776_v0 = vld [vmem:[%s15813_s7 + $0x68] sm:$0xff] }
 0x3ad   :  { %v11883_v15 = vpack.c.bf16 %v9776_v0, %v9775_v41  ;;  %v1927_v2 = vmax.f32 %v13444_v9, 0.0  ;;  %v1930_v44 = vmax.f32 %v13451_v48, 0.0  ;;  %v1931_v28 = vmax.f32 %v13464_v1, 0.0  ;;  %v9772_v41 = vld [vmem:[%s15813_s7 + $0x48] sm:$0xff] }
 0x3ae   :  { %v1901_v36 = vrot.slane %v1900_v6, 1  ;;  %v1967_v45 = vmax.f32 %v13658_v37, 0.0 }
 0x3b0   :  { %v1902_v61 = vmax.f32 %v1900_v6, %v1901_v36  ;;  %v2012_v26 = vsel %vm2003_vm7, %v1967_v45, %v2011_v7  ;;  %v11887_v6 = vpack.c.bf16 %v9778_v40, %v9777_v16  ;;  %v1928_v36 = vmax.f32 %v13441_v25, 0.0 }
 0x3b1   :  { %v3008_v45 = vsel %vm1993_vm2, %v13490_v30, %v13480_v50  ;;  %v1932_v30 = vmax.f32 %v13461_v62, 0.0 }
 0x3b2   :  { %v1968_v47 = vmax.f32 %v1902_v61, 0.0 }
 0x3b4   :  { %v2013_v51 = vsel %vm2005_vm8, %v1968_v47, %v2012_v26  ;;  %v3009_v47 = vsel %vm1995_vm3, %v13492_v32, %v3008_v45  ;;  %v3015_v26 = vsel %vm1993_vm2, %v13639_v8, %v13645_v58 }
 0x3b5   :  { %11057 = vmatmul.mubr.msk.f32.vlgmr.msra.gmra.mrb[32].mxu0 %vm1108_vm1, %v2013_v51  ;;  %v3010_v7 = vsel %vm1997_vm4, %v13495_v34, %v3009_v47 }
 0x3b6   :  { %11870 = vmatpush3.bf16.msra.mxu0 %v13378_v22  ;;  %11067 = vmatprep.mubr.msk.f32.mxu0 %vm1108_vm1, %v1921_v53  ;;  %v1923_v22 = vmax.f32 %v13424_v27, 0.0  ;;  %v3011_v50 = vsel %vm1999_vm5, %v13516_v18, %v3010_v7  ;;  %v3016_v53 = vsel %vm1995_vm3, %v13643_v11, %v3015_v26 }
 0x3b7   :  { %11872 = vmatprep.subr.bf16.mxu0 %v13388_v54  ;;  %v3012_v32 = vsel %vm2001_vm6, %v13530_v57, %v3011_v50  ;;  %v3017_v34 = vsel %vm1997_vm4, %v13647_v46, %v3016_v53  ;;  %v12564_v53 = vmov 1966171168  }
 0x3b8   :  { %v3013_v51 = vsel %vm2003_vm7, %v13538_v43, %v3012_v32  ;;  %v3018_v18 = vsel %vm1999_vm5, %v13650_v20, %v3017_v34  ;;  %v9815_v43 = vld [vmem:[%s15811_s5 + $0x20] sm:$0xff]  ;;  %v9817_v20 = vld [vmem:[%s15811_s5 + $0x30] sm:$0xff]  ;;  %v2418_v32 = vunpack.c.l.s4 %v12564_v53 }
 0x3b9   :  { %v3014_v8 = vsel %vm2005_vm8, %v13568_v29, %v3013_v51  ;;  %v3019_v11 = vsel %vm2001_vm6, %v13653_v21, %v3018_v18  ;;  %v9816_v29 = vld [vmem:[%s15811_s5 + $0x28] sm:$0xff]  ;;  %v9818_v21 = vld [vmem:[%s15811_s5 + $0x38] sm:$0xff]  ;;  %v9780_v51 = vld [vmem:[%s15810_s4 + $0x1] ss:$0 sm:$0xff] }
 0x3ba   :  { %11874 = vmatpush3.bf16.msra.mxu0 %v13388_v54  ;;  %v1926_v54 = vmax.f32 %v13431_v33, 0.0  ;;  %v3020_v57 = vsel %vm2003_vm7, %v13658_v37, %v3019_v11  ;;  %v11875_v46 = vpack.c.bf16 %v9816_v29, %v9815_v43  ;;  %v11879_v37 = vpack.c.bf16 %v9818_v21, %v9817_v20 }
 0x3bb   :  { %11884 = vmatprep.subr.bf16.mxu0 %v11883_v15  ;;  %v3021_v58 = vsel %vm2005_vm8, %v1902_v61, %v3020_v57  ;;  %v9771_v61 = vld [vmem:[%s15813_s7 + $0x40] sm:$0xff]  ;;  %v2419_v34 = vunpack.c.0.s8 %v2418_v32  ;;  %v9773_v32 = vld [vmem:[%s15813_s7 + $0x50] sm:$0xff] }
 0x3bc   :  { %11876 = vmatprep.subr.bf16.mxu1 %v11875_v46  ;;  %v13759_v0 = vpack.c.bf16 %v9772_v41, %v9771_v61 }
 0x3bd   :  { %11068 = vmatmul.mubr.msk.f32.vlgmr.msra.gmra.mrb[34].mxu0 %vm1108_vm1, %v1922_v60  ;;  %11878 = vmatpush3.bf16.msra.mxu1 %v11875_v46 }
 0x3be   :  { %11070 = vmatprep.mubr.msk.f32.mxu0 %vm1108_vm1, %v1923_v22  ;;  %11886 = vmatpush3.bf16.msra.mxu0 %v11883_v15 }
 0x3bf   :  { %11888 = vmatprep.subr.bf16.mxu0 %v11887_v6  ;;  %11880 = vmatprep.subr.bf16.mxu1 %v11879_v37 }
 0x3c1   :  { %11071 = vmatmul.mubr.msk.f32.gmra.mrb[36].mxu0 %vm1108_vm1, %v1924_v3  ;;  %11882 = vmatpush3.bf16.msra.mxu1 %v11879_v37 }
 0x3c2   :  { %11073 = vmatprep.mubr.msk.f32.mxu0 %vm1108_vm1, %v1925_v10  ;;  %11890 = vmatpush3.bf16.msra.mxu0 %v11887_v6 }
 0x3c3   :  { %11892 = vmatprep.subr.bf16.mxu1 %v13759_v0 }
 0x3c5   :  { %11074 = vmatmul.mubr.msk.f32.gmra.mrb[38].mxu0 %vm1108_vm1, %v1926_v54 }
 0x3c6   :  { %11076 = vmatprep.mubr.msk.f32.mxu0 %vm1108_vm1, %v1927_v2 }
 0x3c9   :  { %11077 = vmatmul.mubr.msk.f32.gmra.mrb[40].mxu0 %vm1108_vm1, %v1928_v36 }
 0x3ca   :  { %11079 = vmatprep.mubr.msk.f32.mxu0 %vm1108_vm1, %v1929_v19 }
 0x3cd   :  { %11080 = vmatmul.mubr.msk.f32.gmra.mrb[42].mxu0 %vm1108_vm1, %v1930_v44 }
 0x3ce   :  { %11082 = vmatprep.mubr.msk.f32.mxu0 %vm1108_vm1, %v1931_v28 }
 0x3d1   :  { %11083 = vmatmul.mubr.msk.f32.gmra.mrb[44].mxu0 %vm1108_vm1, %v1932_v30 }
 0x3d2   :  { %11179 = vmatprep.mubr.msk.f32.mxu0 %vm1108_vm1, %v3014_v8  ;;  %v13802_v8 = vsub.s32 %v2419_v34, %v12809_v39  ;;  %v9774_v34 = vld [vmem:[%s15813_s7 + $0x58] sm:$0xff] }
 0x3d3   :  { %v11895_v4 = vpack.c.bf16 %v9774_v34, %v9773_v32 }
 0x3d4   :  { %15872 = vst [vmem:[#allocation23_spill] sm:$0xff] %v13802_v8 }
 0x3d5   :  { %11180 = vmatmul.mubr.msk.f32.vlgmr.msra.gmra.mrb[46].mxu0 %vm1108_vm1, %v3021_v58 }
 0x455   :  { %v13762_v15 = vpop.f32.mrb[32].mxu1 }
 0x456   :  { %v13764_v16 = vpop.f32.mrb[33].mxu1 }
 0x459   :  { %v13766_v40 = vpop.f32.mrb[34].mxu1 }
 0x45a   :  { %v13768_v60 = vpop.f32.mrb[35].mxu1 }
 0x45d   :  { %v11093_v6 = vpop.f32.mrb[36].mxu1 }
 0x45e   :  { %v2335_v22 = vpop.f32.mrb[37].mxu1 }
 0x461   :  { %v13770_v3 = vpop.f32.mrb[38].mxu1 }
 0x462   :  { %v13772_v10 = vpop.f32.mrb[39].mxu1 }
 0x465   :  { %v13774_v54 = vpop.f32.mrb[40].mxu1 }
 0x466   :  { %v13776_v2 = vpop.f32.mrb[41].mxu1 }
 0x469   :  { %v13778_v36 = vpop.f32.mrb[42].mxu1 }
 0x46a   :  { %v13780_v19 = vpop.f32.mrb[43].mxu1 }
 0x46d   :  { %v13782_v45 = vpop.f32.mrb[44].mxu1 }
 0x46e   :  { %v13784_v44 = vpop.f32.mrb[45].mxu1 }
 0x471   :  { %v13786_v28 = vpop.f32.mrb[46].mxu1 }
 0x472   :  { %v13788_v47 = vpop.f32.mrb[47].mxu1 }
 0x475   :  { %v13790_v7 = vpop.f32.mrb[48].mxu1 }
 0x476   :  { %v13792_v26 = vpop.f32.mrb[49].mxu1 }
 0x479   :  { %v13794_v50 = vpop.f32.mrb[50].mxu1 }
 0x47a   :  { %v13796_v30 = vpop.f32.mrb[51].mxu1 }
 0x488   :  { %v11058_v18 = vpop.f32.mrb[32].mxu0 }
 0x489   :  { %v2090_v11 = vadd.f32 %v11058_v18, %v9780_v51  ;;  %v2084_v57 = vpop.f32.mrb[33].mxu0 }
 0x48a   :  { %v2085_v58 = vadd.f32 %v9780_v51, %v2084_v57 }
 0x48b   :  { %v2465_v43 = vcombine.high %v2090_v11, %v2090_v11  ;;  %v2472_v29 = vrot.slane %v2090_v11, %v13802_v8 }
 0x48c   :  { %v2416_v46 = vcombine.high %v2085_v58, %v2085_v58  ;;  %v2423_v20 = vrot.slane %v2085_v58, %v13802_v8 }
 0x48d   :  { %v2480_v21 = vcombine.high %v2472_v29, %v2472_v29  ;;  %v2488_v37 = vrot.slane %v2472_v29, %v13802_v8  ;;  %v2479_v61 = vrot.slane %v2465_v43, %v13802_v8 }
 0x48e   :  { %v2431_v41 = vcombine.high %v2423_v20, %v2423_v20  ;;  %v2439_v53 = vrot.slane %v2423_v20, %v13802_v8  ;;  %v2430_v51 = vrot.slane %v2416_v46, %v13802_v8 }
 0x48f   :  { %v13810_v39 = vrot.slane %v2480_v21, %v13802_v8  ;;  %v2510_v58 = vcombine.high %v2488_v37, %v2488_v37  ;;  %v2549_v43 = vrot.slane %v2488_v37, %v12817_v42  ;;  %v2481_v20 = vcombine.high %v2479_v61, %v2479_v61 }
 0x490   :  { %v11069_v18 = vpop.f32.mrb[34].mxu0  ;;  %v2517_v11 = vrot.slane %v2439_v53, %v12817_v42  ;;  %v2453_v57 = vrot.slane %v2431_v41, %v13802_v8  ;;  %v13823_v13 = vrot.slane %v2479_v61, %v13802_v8  ;;  %v2461_v52 = vcombine.high %v2439_v53, %v2439_v53 }
 0x491   :  { %v2255_v29 = vpop.f32.mrb[35].mxu0  ;;  %v2553_v49 = vrot.slane %v13810_v39, %v12817_v42  ;;  %v2446_v24 = vrot.slane %v2430_v51, %v13802_v8  ;;  %v2432_v37 = vcombine.high %v2430_v51, %v2430_v51  ;;  %v2557_v35 = vrot.slane %v2510_v58, %v12817_v42 }
 0x492   :  { %v2595_v21 = vadd.f32 %v11069_v18, %v2517_v11  ;;  %v2594_v63 = vadd.f32 %v2517_v11, %v2255_v29  ;;  %v2521_v46 = vrot.slane %v2453_v57, %v12817_v42  ;;  %v13830_v32 = vadd.f32 %v2549_v43, %v2335_v22 }
 0x493   :  { %v13832_v61 = vadd.f32 %v11093_v6, %v2549_v43  ;;  %v2509_v34 = vrot.slane %v2481_v20, %v13802_v8  ;;  %v2462_v53 = vcombine.high %v2446_v24, %v2446_v24  ;;  %v2525_v51 = vrot.slane %v2461_v52, %v12817_v42 }
 0x494   :  { %v2627_v31 = vmax.f32 %v2595_v21, 0.0  ;;  %v2626_v56 = vmax.f32 %v2594_v63, 0.0  ;;  %v11072_v41 = vpop.f32.mrb[36].mxu0  ;;  %v2460_v63 = vrot.slane %v2432_v37, %v13802_v8  ;;  %v2512_v21 = vcombine.high %v13810_v39, %v13810_v39 }
 0x495   :  { %v2597_v18 = vadd.f32 %v11072_v41, %v2521_v46  ;;  %v2265_v11 = vpop.f32.mrb[37].mxu0  ;;  %v2463_v58 = vcombine.high %v2453_v57, %v2453_v57  ;;  %v13842_v22 = vadd.f32 %v2553_v49, %v13772_v10  ;;  %v2565_v6 = vrot.slane %v13823_v13, %v12817_v42 }
 0x496   :  { %v2596_v29 = vadd.f32 %v2521_v46, %v2265_v11  ;;  %11123 = vmatprep.mubr.msk.f32.mxu1 %vm1108_vm1, %v2626_v56  ;;  %v2541_v56 = vrot.slane %v2462_v53, %v12817_v42  ;;  %v2464_v46 = vcombine.high %v2460_v63, %v2460_v63  ;;  %v13849_v52 = vadd.f32 %v13770_v3, %v2553_v49 }
 0x497   :  { %11124 = vmatmul.mubr.msk.f32.vlgmr.msra.gmra.mrb[52].mxu1 %vm1108_vm1, %v2627_v31  ;;  %v2629_v41 = vmax.f32 %v2597_v18, 0.0  ;;  %v13852_v31 = vadd.f32 %v2557_v35, %v13776_v2  ;;  %v2529_v18 = vrot.slane %v2463_v58, %v12817_v42  ;;  %v2511_v49 = vcombine.high %v13823_v13, %v13823_v13 }
 0x498   :  { %v2628_v43 = vmax.f32 %v2596_v29, 0.0  ;;  %v11075_v20 = vpop.f32.mrb[38].mxu0  ;;  %11894 = vmatpush3.bf16.msra.mxu1 %v13759_v0  ;;  %v2545_v57 = vrot.slane %v2464_v46, %v12817_v42  ;;  %v2606_v0 = vadd.f32 %v2541_v56, %v13764_v16  ;;  %v2607_v11 = vadd.f32 %v13762_v15, %v2541_v56 }
 0x499   :  { %v2599_v39 = vadd.f32 %v11075_v20, %v2525_v51  ;;  %v2275_v37 = vpop.f32.mrb[39].mxu0  ;;  %11896 = vmatprep.subr.bf16.mxu1 %v11895_v4  ;;  %v13861_v29 = vadd.f32 %v13774_v54, %v2557_v35  ;;  %v2561_v58 = vrot.slane %v2512_v21, %v12817_v42  ;;  %v2513_v20 = vcombine.high %v2509_v34, %v2509_v34 }
 0x49a   :  { %v2598_v10 = vadd.f32 %v2525_v51, %v2275_v37  ;;  %11126 = vmatprep.mubr.msk.f32.mxu1 %vm1108_vm1, %v2628_v43  ;;  %v2608_v53 = vadd.f32 %v2545_v57, %v13768_v60  ;;  %v2609_v15 = vadd.f32 %v13766_v40, %v2545_v57  ;;  %v13870_v35 = vadd.f32 %v2565_v6, %v13784_v44 }
 0x49b   :  { %11127 = vmatmul.mubr.msk.f32.gmra.mrb[54].mxu1 %vm1108_vm1, %v2629_v41  ;;  %v2631_v51 = vmax.f32 %v2599_v39, 0.0  ;;  %v13873_v13 = vadd.f32 %v13782_v45, %v2565_v6  ;;  %v2533_v60 = vrot.slane %v2446_v24, %v12817_v42  ;;  %v2617_v40 = vadd.f32 %v13778_v36, %v2561_v58 }
 0x49c   :  { %v2630_v3 = vmax.f32 %v2598_v10, 0.0  ;;  %v11078_v2 = vpop.f32.mrb[40].mxu0  ;;  %11898 = vmatpush3.bf16.msra.mxu1 %v11895_v4  ;;  %v2616_v4 = vadd.f32 %v2561_v58, %v13780_v19  ;;  %v2569_v46 = vrot.slane %v2509_v34, %v12817_v42  ;;  %v2573_v44 = vrot.slane %v2511_v49, %v12817_v42 }
 0x49d   :  { %v2601_v43 = vadd.f32 %v11078_v2, %v2529_v18  ;;  %v2285_v16 = vpop.f32.mrb[41].mxu0  ;;  %v2577_v19 = vrot.slane %v2513_v20, %v12817_v42  ;;  %v2537_v36 = vrot.slane %v2460_v63, %v12817_v42  ;;  %v2641_v58 = vmax.f32 %v2609_v15, 0.0 }
 0x49e   :  { %v2600_v56 = vadd.f32 %v2529_v18, %v2285_v16  ;;  %11129 = vmatprep.mubr.msk.f32.mxu1 %vm1108_vm1, %v2630_v3  ;;  %v2620_v24 = vadd.f32 %v2569_v46, %v13788_v47  ;;  %v2621_v45 = vadd.f32 %v13786_v28, %v2569_v46  ;;  %v2622_v34 = vadd.f32 %v2573_v44, %v13792_v26  ;;  %v9900_v46 = vld [vmem:[%s15813_s7 + $0xa8] sm:$0xff] }
 0x49f   :  { %11130 = vmatmul.mubr.msk.f32.gmra.mrb[56].mxu1 %vm1108_vm1, %v2631_v51  ;;  %v2633_v41 = vmax.f32 %v2601_v43, 0.0  ;;  %v2623_v6 = vadd.f32 %v13790_v7, %v2573_v44  ;;  %v2624_v49 = vadd.f32 %v2577_v19, %v13796_v30  ;;  %v2625_v47 = vadd.f32 %v13794_v50, %v2577_v19  ;;  %v9901_v44 = vld [vmem:[%s15813_s7 + $0xb0] sm:$0xff] }
 0x4a0   :  { %v2632_v54 = vmax.f32 %v2600_v56, 0.0  ;;  %v11081_v21 = vpop.f32.mrb[42].mxu0  ;;  %v2638_v7 = vmax.f32 %v2606_v0, 0.0  ;;  %v2639_v30 = vmax.f32 %v2607_v11, 0.0  ;;  %v2640_v50 = vmax.f32 %v2608_v53, 0.0  ;;  %v9893_v19 = vld [vmem:[%s15809_s3 + $0xb0] sm:$0xff] }
 0x4a1   :  { %v2603_v39 = vadd.f32 %v11081_v21, %v2533_v60  ;;  %v2295_v37 = vpop.f32.mrb[43].mxu0  ;;  %v2642_v20 = vmax.f32 %v13830_v32, 0.0  ;;  %v2643_v56 = vmax.f32 %v13832_v61, 0.0  ;;  %v2644_v0 = vmax.f32 %v13842_v22, 0.0  ;;  %v9899_v21 = vld [vmem:[%s15813_s7 + $0xa0] sm:$0xff] }
 0x4a2   :  { %v2602_v10 = vadd.f32 %v2533_v60, %v2295_v37  ;;  %11132 = vmatprep.mubr.msk.f32.mxu1 %vm1108_vm1, %v2632_v54  ;;  %v2645_v11 = vmax.f32 %v13849_v52, 0.0  ;;  %v2646_v53 = vmax.f32 %v13852_v31, 0.0  ;;  %v2647_v32 = vmax.f32 %v13861_v29, 0.0  ;;  %v15889_v54 = vld [vmem:[#allocation21_spill] sm:$0xff]  ;;  %v9892_v37 = vld [vmem:[%s15809_s3 + $0xa8] sm:$0xff] }
 0x4a3   :  { %11133 = vmatmul.mubr.msk.f32.gmra.mrb[58].mxu1 %vm1108_vm1, %v2633_v41  ;;  %v2635_v3 = vmax.f32 %v2603_v39, 0.0  ;;  %v2648_v15 = vmax.f32 %v2616_v4, 0.0  ;;  %v2649_v61 = vmax.f32 %v2617_v40, 0.0  ;;  %v2650_v22 = vmax.f32 %v13870_v35, 0.0  ;;  %v9891_v41 = vld [vmem:[%s15809_s3 + $0xa0] sm:$0xff] }
 0x4a4   :  { %v2634_v57 = vmax.f32 %v2602_v10, 0.0  ;;  %v11084_v18 = vpop.f32.mrb[44].mxu0  ;;  %v2651_v52 = vmax.f32 %v13873_v13, 0.0  ;;  %v2652_v31 = vmax.f32 %v2620_v24, 0.0  ;;  %v2653_v29 = vmax.f32 %v2621_v45, 0.0  ;;  %v15888_v13 = vld [vmem:[#allocation22_spill] sm:$0xff] }
 0x4a5   :  { %v2605_v2 = vadd.f32 %v11084_v18, %v2537_v36  ;;  %v2305_v51 = vpop.f32.mrb[45].mxu0  ;;  %v2654_v60 = vmax.f32 %v2622_v34, 0.0  ;;  %v2655_v4 = vmax.f32 %v2623_v6, 0.0  ;;  %v2656_v40 = vmax.f32 %v2624_v49, 0.0  ;;  %v9902_v10 = vld [vmem:[%s15813_s7 + $0xb8] sm:$0xff]  ;;  %v9887_v6 = vld [vmem:[%s15809_s3 + $0x80] sm:$0xff] }
 0x4a6   :  { %v2604_v28 = vadd.f32 %v2537_v36, %v2305_v51  ;;  %11135 = vmatprep.mubr.msk.f32.mxu1 %vm1108_vm1, %v2634_v57  ;;  %v2657_v35 = vmax.f32 %v2625_v47, 0.0  ;;  %v11923_v39 = vpack.c.bf16 %v9900_v46, %v9899_v21  ;;  %v11899_v24 = vpack.c.bf16 %v9892_v37, %v9891_v41  ;;  %v9894_v36 = vld [vmem:[%s15809_s3 + $0xb8] sm:$0xff]  ;;  %v9888_v57 = vld [vmem:[%s15809_s3 + $0x88] sm:$0xff]  ;;  %v14030_v51 = vld [vmem:[%s15812_s6 + $0x1] ss:$0 sm:$0xff] }
 0x4a7   :  { %11136 = vmatmul.mubr.msk.f32.gmra.mrb[60].mxu1 %vm1108_vm1, %v2635_v3  ;;  %v2637_v26 = vmax.f32 %v2605_v2, 0.0  ;;  %v11927_v45 = vpack.c.bf16 %v9902_v10, %v9901_v44  ;;  %v11903_v34 = vpack.c.bf16 %v9894_v36, %v9893_v19  ;;  %v14021_v18 = vpack.c.bf16 %v9888_v57, %v9887_v6 }
 0x4a8   :  { %v2636_v63 = vmax.f32 %v2604_v28, 0.0  ;;  %v13893_v43 = vpop.f32.mrb[46].mxu0  ;;  %11924 = vmatprep.subr.bf16.mxu1 %v11923_v39  ;;  %11900 = vmatprep.subr.bf16.mxu0 %v11899_v24 }
 0x4a9   :  { %v13895_v16 = vpop.f32.mrb[47].mxu0  ;;  %11902 = vmatpush3.bf16.msra.mxu0 %v11899_v24  ;;  %v3473_v44 = vcombine.high %v13893_v43, %v13893_v43  ;;  %v3480_v10 = vrot.slane %v13893_v43, %v13802_v8 }
 0x4aa   :  { %11138 = vmatprep.mubr.msk.f32.mxu1 %vm1108_vm1, %v2636_v63  ;;  %11904 = vmatprep.subr.bf16.mxu0 %v11903_v34  ;;  %v3431_v49 = vrot.slane %v13895_v16, %v13802_v8 }
 0x4ab   :  { %11139 = vmatmul.mubr.msk.f32.gmra.mrb[62].mxu1 %vm1108_vm1, %v2637_v26 }
 0x4ac   :  { %11141 = vmatprep.mubr.msk.f32.mxu1 %vm1108_vm1, %v2638_v7  ;;  %v3439_v3 = vcombine.high %v3431_v49, %v3431_v49  ;;  %v3447_v2 = vrot.slane %v3431_v49, %v13802_v8 }
 0x4ad   :  { %11906 = vmatpush3.bf16.msra.mxu0 %v11903_v34 }
 0x4ae   :  { %11908 = vmatprep.subr.bf16.mxu0 %v14021_v18  ;;  %v3461_v28 = vrot.slane %v3439_v3, %v13802_v8  ;;  %v3525_v63 = vrot.slane %v3447_v2, %v12817_v42 }
 0x4af   :  { %11142 = vmatmul.mubr.msk.f32.gmra.mrb[64].mxu1 %vm1108_vm1, %v2639_v30 }
 0x4b0   :  { %11144 = vmatprep.mubr.msk.f32.mxu1 %vm1108_vm1, %v2640_v50 }
 0x4b3   :  { %11145 = vmatmul.mubr.msk.f32.gmra.mrb[66].mxu1 %vm1108_vm1, %v2641_v58  ;;  %v3424_v58 = vcombine.high %v13895_v16, %v13895_v16 }
 0x4b4   :  { %11147 = vmatprep.mubr.msk.f32.mxu1 %vm1108_vm1, %v2642_v20 }
 0x4b7   :  { %11148 = vmatmul.mubr.msk.f32.gmra.mrb[68].mxu1 %vm1108_vm1, %v2643_v56 }
 0x4b8   :  { %11150 = vmatprep.mubr.msk.f32.mxu1 %vm1108_vm1, %v2644_v0  ;;  %v3469_v0 = vcombine.high %v3447_v2, %v3447_v2 }
 0x4ba   :  { %v3533_v16 = vrot.slane %v3469_v0, %v12817_v42 }
 0x4bb   :  { %11151 = vmatmul.mubr.msk.f32.gmra.mrb[70].mxu1 %vm1108_vm1, %v2645_v11  ;;  %v3529_v11 = vrot.slane %v3461_v28, %v12817_v42 }
 0x4bc   :  { %11153 = vmatprep.mubr.msk.f32.mxu1 %vm1108_vm1, %v2646_v53 }
 0x4bf   :  { %11154 = vmatmul.mubr.msk.f32.gmra.mrb[72].mxu1 %vm1108_vm1, %v2647_v32 }
 0x4c0   :  { %11156 = vmatprep.mubr.msk.f32.mxu1 %vm1108_vm1, %v2648_v15 }
 0x4c3   :  { %11157 = vmatmul.mubr.msk.f32.gmra.mrb[74].mxu1 %vm1108_vm1, %v2649_v61 }
 0x4c4   :  { %11159 = vmatprep.mubr.msk.f32.mxu1 %vm1108_vm1, %v2650_v22  ;;  %v3438_v22 = vrot.slane %v3424_v58, %v13802_v8 }
 0x4c7   :  { %11160 = vmatmul.mubr.msk.f32.gmra.mrb[76].mxu1 %vm1108_vm1, %v2651_v52 }
 0x4c8   :  { %11162 = vmatprep.mubr.msk.f32.mxu1 %vm1108_vm1, %v2652_v31 }
 0x4cb   :  { %11163 = vmatmul.mubr.msk.f32.gmra.mrb[78].mxu1 %vm1108_vm1, %v2653_v29 }
 0x4cc   :  { %11165 = vmatprep.mubr.msk.f32.mxu1 %vm1108_vm1, %v2654_v60 }
 0x4cf   :  { %11166 = vmatmul.mubr.msk.f32.gmra.mrb[80].mxu1 %vm1108_vm1, %v2655_v4  ;;  %v3471_v4 = vcombine.high %v3461_v28, %v3461_v28 }
 0x4d0   :  { %11168 = vmatprep.mubr.msk.f32.mxu1 %vm1108_vm1, %v2656_v40 }
 0x4d3   :  { %11169 = vmatmul.mubr.msk.f32.gmra.mrb[82].mxu1 %vm1108_vm1, %v2657_v35 }
 0x4d4   :  { %11190 = vmatprep.mubr.msk.f32.mxu1 %vm1108_vm1, %v13414_v59  ;;  %v15874_v59 = vld [vmem:[#allocation8_spill] sm:$0xff] }
 0x4d7   :  { %11191 = vmatmul.mubr.msk.f32.vlgmr.msra.gmra.mrb[52].mxu1 %vm1108_vm1, %v13411_v12  ;;  %v15873_v12 = vld [vmem:[#allocation6_spill] sm:$0xff] }
 0x4d8   :  { %11193 = vmatprep.mubr.msk.f32.mxu1 %vm1108_vm1, %v13424_v27  ;;  %v15876_v27 = vld [vmem:[#allocation10_spill] sm:$0xff]  ;;  %11926 = vmatpush3.bf16.msra.mxu1 %v11923_v39 }
 0x4d9   :  { %11928 = vmatprep.subr.bf16.mxu1 %v11927_v45 }
 0x4db   :  { %11194 = vmatmul.mubr.msk.f32.gmra.mrb[54].mxu1 %vm1108_vm1, %v13421_v14  ;;  %v15875_v14 = vld [vmem:[#allocation7_spill] sm:$0xff] }
 0x4dc   :  { %11196 = vmatprep.mubr.msk.f32.mxu1 %vm1108_vm1, %v13434_v38  ;;  %v15878_v38 = vld [vmem:[#allocation12_spill] sm:$0xff]  ;;  %11930 = vmatpush3.bf16.msra.mxu1 %v11927_v45 }
 0x4df   :  { %11197 = vmatmul.mubr.msk.f32.gmra.mrb[56].mxu1 %vm1108_vm1, %v13431_v33  ;;  %v15877_v33 = vld [vmem:[#allocation9_spill] sm:$0xff] }
 0x4e0   :  { %11199 = vmatprep.mubr.msk.f32.mxu1 %vm1108_vm1, %v13444_v9  ;;  %v15880_v9 = vld [vmem:[#allocation14_spill] sm:$0xff] }
 0x4e3   :  { %11200 = vmatmul.mubr.msk.f32.gmra.mrb[58].mxu1 %vm1108_vm1, %v13441_v25  ;;  %v15879_v25 = vld [vmem:[#allocation11_spill] sm:$0xff] }
 0x4e4   :  { %11202 = vmatprep.mubr.msk.f32.mxu1 %vm1108_vm1, %v13454_v17  ;;  %v15882_v17 = vld [vmem:[#allocation16_spill] sm:$0xff] }
 0x4e7   :  { %11203 = vmatmul.mubr.msk.f32.gmra.mrb[60].mxu1 %vm1108_vm1, %v13451_v48  ;;  %v15881_v48 = vld [vmem:[#allocation13_spill] sm:$0xff] }
 0x4e8   :  { %11205 = vmatprep.mubr.msk.f32.mxu1 %vm1108_vm1, %v13464_v1  ;;  %v15884_v1 = vld [vmem:[#allocation18_spill] sm:$0xff] }
 0x4eb   :  { %11206 = vmatmul.mubr.msk.f32.gmra.mrb[62].mxu1 %vm1108_vm1, %v13461_v62  ;;  %v15883_v62 = vld [vmem:[#allocation15_spill] sm:$0xff] }
 0x4ec   :  { %11208 = vmatprep.mubr.msk.f32.mxu1 %vm1108_vm1, %v13474_v55  ;;  %v15886_v55 = vld [vmem:[#allocation20_spill] sm:$0xff] }
 0x4ef   :  { %11209 = vmatmul.mubr.msk.f32.gmra.mrb[64].mxu1 %vm1108_vm1, %v13471_v23  ;;  %v15885_v23 = vld [vmem:[#allocation17_spill] sm:$0xff] }
 0x4f0   :  { %11211 = vmatprep.mubr.msk.f32.mxu1 %vm1108_vm1, %v13488_v5  ;;  %v15887_v5 = vld [vmem:[#allocation19_spill] sm:$0xff] }
 0x4f3   :  { %11212 = vmatmul.mubr.msk.f32.gmra.mrb[66].mxu1 %vm1108_vm1, %v15873_v12  ;;  %v3440_v12 = vcombine.high %v3438_v22, %v3438_v22 }
 0x4f4   :  { %11214 = vmatprep.mubr.msk.f32.mxu1 %vm1108_vm1, %v15874_v59 }
 0x4f7   :  { %11215 = vmatmul.mubr.msk.f32.gmra.mrb[68].mxu1 %vm1108_vm1, %v15875_v14 }
 0x4f8   :  { %11217 = vmatprep.mubr.msk.f32.mxu1 %vm1108_vm1, %v15876_v27  ;;  %v3454_v27 = vrot.slane %v3438_v22, %v13802_v8 }
 0x4fa   :  { %v3541_v37 = vrot.slane %v3454_v27, %v12817_v42  ;;  %v3470_v57 = vcombine.high %v3454_v27, %v3454_v27  ;;  %v3496_v27 = vrot.slane %v3480_v10, %v13802_v8 }
 0x4fb   :  { %11218 = vmatmul.mubr.msk.f32.gmra.mrb[70].mxu1 %vm1108_vm1, %v15877_v33  ;;  %v3537_v33 = vrot.slane %v3471_v4, %v12817_v42 }
 0x4fc   :  { %11220 = vmatprep.mubr.msk.f32.mxu1 %vm1108_vm1, %v15878_v38 }
 0x4ff   :  { %11221 = vmatmul.mubr.msk.f32.gmra.mrb[72].mxu1 %vm1108_vm1, %v15879_v25 }
 0x500   :  { %11223 = vmatprep.mubr.msk.f32.mxu1 %vm1108_vm1, %v15880_v9 }
 0x503   :  { %11224 = vmatmul.mubr.msk.f32.gmra.mrb[74].mxu1 %vm1108_vm1, %v15881_v48 }
 0x504   :  { %11226 = vmatprep.mubr.msk.f32.mxu1 %vm1108_vm1, %v15882_v17 }
 0x507   :  { %11227 = vmatmul.mubr.msk.f32.gmra.mrb[76].mxu1 %vm1108_vm1, %v15883_v62 }
 0x508   :  { %11229 = vmatprep.mubr.msk.f32.mxu1 %vm1108_vm1, %v15884_v1 }
 0x50b   :  { %11230 = vmatmul.mubr.msk.f32.gmra.mrb[78].mxu1 %vm1108_vm1, %v15885_v23 }
 0x50c   :  { %11232 = vmatprep.mubr.msk.f32.mxu1 %vm1108_vm1, %v15886_v55  ;;  %v3468_v55 = vrot.slane %v3440_v12, %v13802_v8 }
 0x50e   :  { %v3545_v2 = vrot.slane %v3468_v55, %v12817_v42 }
 0x50f   :  { %11233 = vmatmul.mubr.msk.f32.gmra.mrb[80].mxu1 %vm1108_vm1, %v15887_v5 }
 0x510   :  { %11235 = vmatprep.mubr.msk.f32.mxu1 %vm1108_vm1, %v15888_v13 }
 0x513   :  { %11236 = vmatmul.mubr.msk.f32.gmra.mrb[82].mxu1 %vm1108_vm1, %v15889_v54 }
 0x5aa   :  { %v11192_v47 = vpop.f32.mrb[52].mxu1 }
 0x5ab   :  { %v12063_v26 = vadd.f32 %v11192_v47, %v14030_v51  ;;  %v3263_v7 = vpop.f32.mrb[53].mxu1 }
 0x5ac   :  { %v12065_v30 = vadd.f32 %v14030_v51, %v3263_v7  ;;  %v14098_v7 = vrot.slane %v3473_v44, %v13802_v8 }
 0x5ad   :  { %v14036_v50 = vadd.f32 %v12063_v26, %v3525_v63 }
 0x5ae   :  { %v14040_v20 = vadd.f32 %v12065_v30, %v3525_v63  ;;  %v11195_v56 = vpop.f32.mrb[54].mxu1  ;;  %v3488_v30 = vcombine.high %v3480_v10, %v3480_v10 }
 0x5af   :  { %v12067_v53 = vadd.f32 %v11195_v56, %v14030_v51  ;;  %v3273_v32 = vpop.f32.mrb[55].mxu1  ;;  %v3667_v5 = vsel %vm1108_vm1, %v14036_v50, -inf }
 0x5b0   :  { %v12069_v15 = vadd.f32 %v14030_v51, %v3273_v32  ;;  %v3666_v13 = vsel %vm1108_vm1, %v14040_v20, -inf  ;;  %v3549_v32 = vrot.slane %v3470_v57, %v12817_v42  ;;  %v14130_v44 = vrot.slane %v3488_v30, %v13802_v8 }
 0x5b1   :  { %v14045_v61 = vadd.f32 %v12067_v53, %v3529_v11  ;;  %v3668_v19 = vmax.f32 %v3666_v13, %v3667_v5 }
 0x5b2   :  { %v14048_v52 = vadd.f32 %v12069_v15, %v3529_v11  ;;  %v11198_v31 = vpop.f32.mrb[56].mxu1 }
 0x5b3   :  { %v12071_v29 = vadd.f32 %v11198_v31, %v14030_v51  ;;  %v3283_v60 = vpop.f32.mrb[57].mxu1  ;;  %v3676_v25 = vsel %vm1108_vm1, %v14045_v61, -inf  ;;  %v3669_v56 = vrot.slane %v3668_v19, 4 }
 0x5b4   :  { %v12073_v40 = vadd.f32 %v14030_v51, %v3283_v60  ;;  %v3675_v9 = vsel %vm1108_vm1, %v14048_v52, -inf }
 0x5b5   :  { %v14053_v35 = vadd.f32 %v12071_v29, %v3533_v16  ;;  %v3677_v54 = vmax.f32 %v3675_v9, %v3676_v25  ;;  %v3472_v29 = vcombine.high %v3468_v55, %v3468_v55  ;;  %v14117_v25 = vrot.slane %v14098_v7, %v13802_v8 }
 0x5b6   :  { %v14055_v59 = vadd.f32 %v12073_v40, %v3533_v16  ;;  %v11201_v14 = vpop.f32.mrb[58].mxu1  ;;  %v3670_v9 = vmax.f32 %v3668_v19, %v3669_v56 }
 0x5b7   :  { %v3293_v38 = vpop.f32.mrb[59].mxu1  ;;  %v12075_v48 = vadd.f32 %v11201_v14, %v14030_v51  ;;  %v3685_v41 = vsel %vm1108_vm1, %v14053_v35, -inf  ;;  %v3678_v49 = vrot.slane %v3677_v54, 4  ;;  %v3489_v14 = vcombine.high %v14098_v7, %v14098_v7 }
 0x5b8   :  { %v12077_v17 = vadd.f32 %v14030_v51, %v3293_v38  ;;  %v3684_v39 = vsel %vm1108_vm1, %v14055_v59, -inf  ;;  %v3671_v19 = vrot.slane %v3670_v9, 2  ;;  %v3519_v7 = vcombine.high %v14117_v25, %v14117_v25 }
 0x5b9   :  { %v14065_v62 = vadd.f32 %v12075_v48, %v3537_v33  ;;  %v3686_v3 = vmax.f32 %v3684_v39, %v3685_v41  ;;  %v3679_v15 = vmax.f32 %v3677_v54, %v3678_v49  ;;  %v3553_v54 = vrot.slane %v3472_v29, %v12817_v42 }
 0x5ba   :  { %v14067_v1 = vadd.f32 %v12077_v17, %v3537_v33  ;;  %v11204_v23 = vpop.f32.mrb[60].mxu1  ;;  %v3557_v49 = vrot.slane %v3496_v27, %v12817_v42 }
 0x5bb   :  { %v12079_v21 = vadd.f32 %v11204_v23, %v14030_v51  ;;  %v3303_v46 = vpop.f32.mrb[61].mxu1  ;;  %v3694_v24 = vsel %vm1108_vm1, %v14065_v62, -inf  ;;  %v3687_v22 = vrot.slane %v3686_v3, 4  ;;  %v3680_v55 = vrot.slane %v3679_v15, 2 }
 0x5bc   :  { %v3693_v45 = vsel %vm1108_vm1, %v14067_v1, -inf  ;;  %v12081_v34 = vadd.f32 %v14030_v51, %v3303_v46 }
 0x5bd   :  { %v14088_v36 = vadd.f32 %v12079_v21, %v3541_v37  ;;  %v3695_v28 = vmax.f32 %v3693_v45, %v3694_v24  ;;  %v3688_v5 = vmax.f32 %v3686_v3, %v3687_v22  ;;  %v3681_v3 = vmax.f32 %v3679_v15, %v3680_v55 }
 0x5be   :  { %v11207_v6 = vpop.f32.mrb[62].mxu1  ;;  %v14094_v63 = vadd.f32 %v12081_v34, %v3541_v37 }
 0x5bf   :  { %v3313_v47 = vpop.f32.mrb[63].mxu1  ;;  %v3703_v43 = vsel %vm1108_vm1, %v14088_v36, -inf  ;;  %v12083_v26 = vadd.f32 %v11207_v6, %v14030_v51  ;;  %v3696_v60 = vrot.slane %v3695_v28, 4 }
 0x5c0   :  { %v12085_v58 = vadd.f32 %v14030_v51, %v3313_v47  ;;  %v3702_v0 = vsel %vm1108_vm1, %v14094_v63, -inf }
 0x5c1   :  { %v14103_v11 = vadd.f32 %v12083_v26, %v3545_v2  ;;  %v3704_v31 = vmax.f32 %v3702_v0, %v3703_v43  ;;  %v3697_v46 = vmax.f32 %v3695_v28, %v3696_v60  ;;  %v3518_v0 = vcombine.high %v3496_v27, %v3496_v27 }
 0x5c2   :  { %v11210_v53 = vpop.f32.mrb[64].mxu1  ;;  %v14108_v40 = vadd.f32 %v12085_v58, %v3545_v2  ;;  %v3689_v2 = vrot.slane %v3688_v5, 2  ;;  %v3561_v60 = vrot.slane %v14130_v44, %v12817_v42 }
 0x5c3   :  { %v3323_v16 = vpop.f32.mrb[65].mxu1  ;;  %v3712_v4 = vsel %vm1108_vm1, %v14103_v11, -inf  ;;  %v12087_v12 = vadd.f32 %v11210_v53, %v14030_v51  ;;  %v3705_v33 = vrot.slane %v3704_v31, 4  ;;  %v3698_v26 = vrot.slane %v3697_v46, 2 }
 0x5c4   :  { %v12089_v38 = vadd.f32 %v14030_v51, %v3323_v16  ;;  %v3711_v48 = vsel %vm1108_vm1, %v14108_v40, -inf  ;;  %v3690_v27 = vmax.f32 %v3688_v5, %v3689_v2 }
 0x5c5   :  { %v14121_v17 = vadd.f32 %v12087_v12, %v3549_v32  ;;  %v3713_v13 = vmax.f32 %v3711_v48, %v3712_v4  ;;  %v3706_v10 = vmax.f32 %v3704_v31, %v3705_v33  ;;  %v3672_v31 = vmax.f32 %v3670_v9, %v3671_v19 }
 0x5c6   :  { %v11213_v23 = vpop.f32.mrb[66].mxu1  ;;  %v14126_v39 = vadd.f32 %v12089_v38, %v3549_v32  ;;  %v3682_v4 = vrot.slane %v3681_v3, 1  ;;  %v3565_v19 = vrot.slane %v3518_v0, %v12817_v42  ;;  %v3691_v2 = vrot.slane %v3690_v27, 1 }
 0x5c7   :  { %v3333_v21 = vpop.f32.mrb[67].mxu1  ;;  %v3721_v41 = vsel %vm1108_vm1, %v14121_v17, -inf  ;;  %v12091_v37 = vadd.f32 %v11213_v23, %v14030_v51  ;;  %v3714_v24 = vrot.slane %v3713_v13, 4  ;;  %v3707_v53 = vrot.slane %v3706_v10, 2 }
 0x5c8   :  { %v12093_v45 = vadd.f32 %v14030_v51, %v3333_v21  ;;  %v3720_v34 = vsel %vm1108_vm1, %v14126_v39, -inf  ;;  %v3699_v23 = vmax.f32 %v3697_v46, %v3698_v26  ;;  %v14159_v5 = vmax.f32 %v3681_v3, %v3682_v4 }
 0x5c9   :  { %v14135_v6 = vadd.f32 %v12091_v37, %v3553_v54  ;;  %v3715_v47 = vmax.f32 %v3713_v13, %v3714_v24  ;;  %v3722_v28 = vmax.f32 %v3720_v34, %v3721_v41  ;;  %v3708_v13 = vmax.f32 %v3706_v10, %v3707_v53 }
 0x5ca   :  { %v11216_v57 = vpop.f32.mrb[68].mxu1  ;;  %v14140_v58 = vadd.f32 %v12093_v45, %v3553_v54  ;;  %v3673_v37 = vrot.slane %v3672_v31, 1  ;;  %v3520_v34 = vcombine.high %v14130_v44, %v14130_v44  ;;  %v3573_v0 = vrot.slane %v14117_v25, %v12817_v42 }
 0x5cb   :  { %v3343_v43 = vpop.f32.mrb[69].mxu1  ;;  %v3730_v30 = vsel %vm1108_vm1, %v14135_v6, -inf  ;;  %v12095_v56 = vadd.f32 %v11216_v57, %v14030_v51  ;;  %v3723_v32 = vrot.slane %v3722_v28, 4  ;;  %v3716_v12 = vrot.slane %v3715_v47, 2 }
 0x5cc   :  { %v12097_v22 = vadd.f32 %v14030_v51, %v3343_v43  ;;  %v3729_v15 = vsel %vm1108_vm1, %v14140_v58, -inf  ;;  %v14167_v53 = vmax.f32 %v3672_v31, %v3673_v37  ;;  %v14181_v31 = vmax.f32 %v3690_v27, %v3691_v2 }
 0x5cd   :  { %v14146_v16 = vadd.f32 %v12095_v56, %v3557_v49  ;;  %v3724_v33 = vmax.f32 %v3722_v28, %v3723_v32  ;;  %v3731_v38 = vmax.f32 %v3729_v15, %v3730_v30  ;;  %v3717_v46 = vmax.f32 %v3715_v47, %v3716_v12 }
 0x5ce   :  { %v11219_v29 = vpop.f32.mrb[70].mxu1  ;;  %v14150_v55 = vadd.f32 %v12097_v22, %v3557_v49  ;;  %v3700_v28 = vrot.slane %v3699_v23, 1  ;;  %v3709_v30 = vrot.slane %v3708_v13, 1  ;;  %v14177_v32 = vrot.slane %v3489_v14, %v13802_v8 }
 0x5cf   :  { %v3353_v48 = vpop.f32.mrb[71].mxu1  ;;  %v12099_v9 = vadd.f32 %v11219_v29, %v14030_v51  ;;  %v3725_v54 = vrot.slane %v3724_v33, 2  ;;  %v3732_v21 = vrot.slane %v3731_v38, 4  ;;  %v3718_v22 = vrot.slane %v3717_v46, 1 }
 0x5d0   :  { %v12101_v41 = vadd.f32 %v14030_v51, %v3353_v48  ;;  %v3569_v15 = vrot.slane %v3520_v34, %v12817_v42  ;;  %v14183_v12 = vmax.f32 %v3699_v23, %v3700_v28  ;;  %v14190_v14 = vmax.f32 %v3708_v13, %v3709_v30 }
 0x5d1   :  { %v14154_v24 = vadd.f32 %v12099_v9, %v3561_v60  ;;  %v3733_v57 = vmax.f32 %v3731_v38, %v3732_v21  ;;  %v3726_v56 = vmax.f32 %v3724_v33, %v3725_v54  ;;  %v4908_v33 = vsel %vm1993_vm2, %v14159_v5, %v14167_v53 }
 0x5d2   :  { %v11222_v45 = vpop.f32.mrb[72].mxu1  ;;  %v14161_v49 = vadd.f32 %v12101_v41, %v3561_v60  ;;  %v3739_v38 = vsel %vm1108_vm1, %v14146_v16, -inf  ;;  %v3738_v27 = vsel %vm1108_vm1, %v14150_v55, -inf  ;;  %v4909_v30 = vsel %vm1995_vm3, %v14181_v31, %v4908_v33 }
 0x5d3   :  { %v3363_v10 = vpop.f32.mrb[73].mxu1  ;;  %v12103_v43 = vadd.f32 %v11222_v45, %v14030_v51  ;;  %v3734_v4 = vrot.slane %v3733_v57, 2  ;;  %v3727_v9 = vrot.slane %v3726_v56, 1  ;;  %v3748_v23 = vsel %vm1108_vm1, %v14154_v24, -inf }
 0x5d4   :  { %v12105_v26 = vadd.f32 %v14030_v51, %v3363_v10  ;;  %v3747_v25 = vsel %vm1108_vm1, %v14161_v49, -inf  ;;  %v3740_v28 = vmax.f32 %v3738_v27, %v3739_v38 }
 0x5d5   :  { %v14169_v44 = vadd.f32 %v12103_v43, %v3565_v19  ;;  %v3735_v41 = vmax.f32 %v3733_v57, %v3734_v4  ;;  %v14215_v43 = vmax.f32 %v3726_v56, %v3727_v9 }
 0x5d6   :  { %v14171_v3 = vadd.f32 %v12105_v26, %v3565_v19  ;;  %v11225_v47 = vpop.f32.mrb[74].mxu1  ;;  %v14207_v19 = vmax.f32 %v3717_v46, %v3718_v22 }
 0x5d7   :  { %v12107_v29 = vadd.f32 %v11225_v47, %v14030_v51  ;;  %v3373_v60 = vpop.f32.mrb[75].mxu1  ;;  %v3757_v13 = vsel %vm1108_vm1, %v14169_v44, -inf  ;;  %v3736_v26 = vrot.slane %v3735_v41, 1  ;;  %v3749_v47 = vmax.f32 %v3747_v25, %v3748_v23 }
 0x5d8   :  { %v12109_v54 = vadd.f32 %v14030_v51, %v3373_v60  ;;  %v3756_v37 = vsel %vm1108_vm1, %v14171_v3, -inf  ;;  %v3521_v23 = vcombine.high %v14177_v32, %v14177_v32 }
 0x5d9   :  { %v14194_v48 = vadd.f32 %v12107_v29, %v3569_v15  ;;  %v3758_v60 = vmax.f32 %v3756_v37, %v3757_v13  ;;  %v3737_v9 = vmax.f32 %v3735_v41, %v3736_v26  ;;  %v3750_v13 = vrot.slane %v3749_v47, 4 }
 0x5da   :  { %v11228_v21 = vpop.f32.mrb[76].mxu1  ;;  %v14211_v10 = vadd.f32 %v12109_v54, %v3569_v15  ;;  %v4910_v15 = vsel %vm1997_vm4, %v14183_v12, %v4909_v30  ;;  %v3577_v41 = vrot.slane %v14177_v32, %v12817_v42  ;;  %v3863_v32 = vmax.f32 %v14183_v12, 0.0 }
 0x5db   :  { %v3383_v45 = vpop.f32.mrb[77].mxu1  ;;  %v3766_v34 = vsel %vm1108_vm1, %v14194_v48, -inf  ;;  %v12111_v2 = vadd.f32 %v11228_v21, %v14030_v51  ;;  %v4911_v56 = vsel %vm1999_vm5, %v14190_v14, %v4910_v15  ;;  %v3741_v21 = vrot.slane %v3740_v28, 4 }
 0x5dc   :  { %v12113_v57 = vadd.f32 %v14030_v51, %v3383_v45  ;;  %v3765_v46 = vsel %vm1108_vm1, %v14211_v10, -inf  ;;  %v4912_v27 = vsel %vm2001_vm6, %v14207_v19, %v4911_v56  ;;  %v3862_v15 = vmax.f32 %v14181_v31, 0.0 }
 0x5dd   :  { %v14221_v22 = vadd.f32 %v12111_v2, %v3573_v0  ;;  %v3767_v4 = vmax.f32 %v3765_v46, %v3766_v34  ;;  %v3861_v2 = vmax.f32 %v14159_v5, 0.0  ;;  %v3581_v56 = vrot.slane %v3519_v7, %v12817_v42 }
 0x5de   :  { %v11231_v29 = vpop.f32.mrb[78].mxu1  ;;  %v14225_v54 = vadd.f32 %v12113_v57, %v3573_v0  ;;  %v4913_v0 = vsel %vm2003_vm7, %v14215_v43, %v4912_v27  ;;  %v3759_v57 = vrot.slane %v3758_v60, 4  ;;  %v3860_v27 = vmax.f32 %v14167_v53, 0.0 }
 0x5df   :  { %15890 = vst [vmem:[#allocation6_spill] sm:$0xff] %v14221_v22  ;;  %v3393_v38 = vpop.f32.mrb[79].mxu1  ;;  %v3775_v33 = vsel %vm1108_vm1, %v14221_v22, -inf  ;;  %v4914_v45 = vsel %vm2005_vm8, %v3737_v9, %v4913_v0  ;;  %v3768_v26 = vrot.slane %v3767_v4, 4  ;;  %v12115_v30 = vadd.f32 %v11231_v29, %v14030_v51 }
 0x5e0   :  { %15891 = vst [vmem:[#allocation8_spill] sm:$0xff] %v14225_v54  ;;  %v3774_v25 = vsel %vm1108_vm1, %v14225_v54, -inf  ;;  %11369 = vmatprep.mubr.msk.f32.mxu1 %vm1108_vm1, %v4914_v45  ;;  %v3751_v5 = vmax.f32 %v3749_v47, %v3750_v13  ;;  %v3864_v45 = vmax.f32 %v14190_v14, 0.0  ;;  %v12117_v29 = vadd.f32 %v14030_v51, %v3393_v38 }
 0x5e1   :  { %v3776_v37 = vmax.f32 %v3774_v25, %v3775_v33  ;;  %v3585_v33 = vrot.slane %v3521_v23, %v12817_v42  ;;  %v3742_v25 = vmax.f32 %v3740_v28, %v3741_v21  ;;  %v14250_v0 = vadd.f32 %v12115_v30, %v3577_v41 }
 0x5e2   :  { %v11234_v34 = vpop.f32.mrb[80].mxu1  ;;  %v3760_v54 = vmax.f32 %v3758_v60, %v3759_v57  ;;  %v3769_v31 = vmax.f32 %v3767_v4, %v3768_v26  ;;  %v3865_v7 = vmax.f32 %v14207_v19, 0.0  ;;  %v3900_v23 = vsel %vm1993_vm2, %v3861_v2, %v3860_v27 }
 0x5e3   :  { %v3403_v46 = vpop.f32.mrb[81].mxu1  ;;  %v3777_v8 = vrot.slane %v3776_v37, 4  ;;  %v3784_v53 = vsel %vm1108_vm1, %v14250_v0, -inf  ;;  %v3866_v12 = vmax.f32 %v14215_v43, 0.0  ;;  %v3901_v28 = vsel %vm1995_vm3, %v3862_v15, %v3900_v23 }
 0x5e4   :  { %v14260_v47 = vadd.f32 %v12117_v29, %v3577_v41  ;;  %v3867_v14 = vmax.f32 %v3737_v9, 0.0  ;;  %v3902_v38 = vsel %vm1997_vm4, %v3863_v32, %v3901_v28  ;;  %v12119_v60 = vadd.f32 %v11234_v34, %v14030_v51 }
 0x5e5   :  { %v12121_v4 = vadd.f32 %v14030_v51, %v3403_v46  ;;  %v3752_v19 = vrot.slane %v3751_v5, 2  ;;  %v3778_v21 = vmax.f32 %v3776_v37, %v3777_v8  ;;  %v3903_v13 = vsel %vm1999_vm5, %v3864_v45, %v3902_v38 }
 0x5e6   :  { %v11237_v22 = vpop.f32.mrb[82].mxu1  ;;  %v3783_v2 = vsel %vm1108_vm1, %v14260_v47, -inf  ;;  %v3743_v57 = vrot.slane %v3742_v25, 2  ;;  %v3904_v43 = vsel %vm2001_vm6, %v3865_v7, %v3903_v13  ;;  %v14269_v41 = vadd.f32 %v12119_v60, %v3581_v56 }
 0x5e7   :  { %v3413_v42 = vpop.f32.mrb[83].mxu1  ;;  %v3785_v26 = vmax.f32 %v3783_v2, %v3784_v53  ;;  %v3761_v9 = vrot.slane %v3760_v54, 2  ;;  %v3905_v30 = vsel %vm2003_vm7, %v3866_v12, %v3904_v43  ;;  %v14272_v15 = vadd.f32 %v12121_v4, %v3581_v56 }
 0x5e8   :  { %v12123_v34 = vadd.f32 %v11237_v22, %v14030_v51  ;;  %v3770_v46 = vrot.slane %v3769_v31, 2  ;;  %v3906_v8 = vsel %vm2005_vm8, %v3867_v14, %v3905_v30  ;;  %v3793_v27 = vsel %vm1108_vm1, %v14269_v41, -inf }
 0x5e9   :  { %v3786_v37 = vrot.slane %v3785_v26, 4  ;;  %v3753_v32 = vmax.f32 %v3751_v5, %v3752_v19  ;;  %v3779_v45 = vrot.slane %v3778_v21, 2  ;;  %11246 = vmatprep.mubr.msk.f32.mxu0 %vm1108_vm1, %v3906_v8  ;;  %v3792_v29 = vsel %vm1108_vm1, %v14272_v15, -inf }
 0x5ea   :  { %v3794_v23 = vmax.f32 %v3792_v29, %v3793_v27  ;;  %v14281_v56 = vadd.f32 %v12123_v34, %v3585_v33  ;;  %v12125_v22 = vadd.f32 %v14030_v51, %v3413_v42  ;;  %v3762_v53 = vmax.f32 %v3760_v54, %v3761_v9 }
 0x5eb   :  { %v3787_v7 = vmax.f32 %v3785_v26, %v3786_v37  ;;  %v3744_v12 = vmax.f32 %v3742_v25, %v3743_v57  ;;  %v3771_v28 = vmax.f32 %v3769_v31, %v3770_v46  ;;  %v3780_v60 = vmax.f32 %v3778_v21, %v3779_v45 }
 0x5ec   :  { %v3795_v38 = vrot.slane %v3794_v23, 4  ;;  %v3802_v5 = vsel %vm1108_vm1, %v14281_v56, -inf  ;;  %v14286_v4 = vadd.f32 %v12125_v22, %v3585_v33  ;;  %v3754_v19 = vrot.slane %v3753_v32, 1 }
 0x5ed   :  { %v3788_v14 = vrot.slane %v3787_v7, 2  ;;  %v3763_v43 = vrot.slane %v3762_v53, 1  ;;  %v3745_v30 = vrot.slane %v3744_v12, 1  ;;  %v3772_v42 = vrot.slane %v3771_v28, 1 }
 0x5ee   :  { %v3796_v2 = vmax.f32 %v3794_v23, %v3795_v38  ;;  %v3801_v26 = vsel %vm1108_vm1, %v14286_v4, -inf  ;;  %v3781_v25 = vrot.slane %v3780_v60, 1  ;;  %v3755_v31 = vmax.f32 %v3753_v32, %v3754_v19 }
 0x5ef   :  { %v3789_v13 = vmax.f32 %v3787_v7, %v3788_v14  ;;  %v3803_v54 = vmax.f32 %v3801_v26, %v3802_v5  ;;  %v3764_v34 = vmax.f32 %v3762_v53, %v3763_v43  ;;  %v3746_v46 = vmax.f32 %v3744_v12, %v3745_v30 }
 0x5f0   :  { %v3797_v51 = vrot.slane %v3796_v2, 2  ;;  %v3773_v33 = vmax.f32 %v3771_v28, %v3772_v42  ;;  %v3782_v27 = vmax.f32 %v3780_v60, %v3781_v25  ;;  %v3869_v45 = vmax.f32 %v3755_v31, 0.0  ;;  %v9890_v25 = vld [vmem:[%s15809_s3 + $0x98] sm:$0xff] }
 0x5f1   :  { %v3790_v57 = vrot.slane %v3789_v13, 1  ;;  %v3804_v9 = vrot.slane %v3803_v54, 4  ;;  %v3870_v23 = vmax.f32 %v3764_v34, 0.0  ;;  %v3868_v14 = vmax.f32 %v3746_v46, 0.0 }
 0x5f2   :  { %v3798_v21 = vmax.f32 %v3796_v2, %v3797_v51  ;;  %v4915_v38 = vsel %vm1993_vm2, %v3755_v31, %v3746_v46  ;;  %v3871_v5 = vmax.f32 %v3773_v33, 0.0  ;;  %v3872_v19 = vmax.f32 %v3782_v27, 0.0 }
 0x5f3   :  { %v3805_v37 = vmax.f32 %v3803_v54, %v3804_v9  ;;  %v3791_v29 = vmax.f32 %v3789_v13, %v3790_v57  ;;  %v4916_v32 = vsel %vm1995_vm3, %v3764_v34, %v4915_v38  ;;  %v3907_v28 = vsel %vm1993_vm2, %v3869_v45, %v3868_v14  ;;  %v9889_v54 = vld [vmem:[%s15809_s3 + $0x90] sm:$0xff]  ;;  %v9940_v45 = vld [vmem:[%s15811_s5 + $0x48] sm:$0xff] }
 0x5f4   :  { %v3799_v8 = vrot.slane %v3798_v21, 1  ;;  %v4917_v53 = vsel %vm1997_vm4, %v3773_v33, %v4916_v32  ;;  %v3908_v43 = vsel %vm1995_vm3, %v3870_v23, %v3907_v28  ;;  %v11911_v33 = vpack.c.bf16 %v9890_v25, %v9889_v54  ;;  %v9942_v23 = vld [vmem:[%s15811_s5 + $0x58] sm:$0xff] }
 0x5f5   :  { %v3806_v7 = vrot.slane %v3805_v37, 2  ;;  %v3873_v12 = vmax.f32 %v3791_v29, 0.0  ;;  %v4918_v60 = vsel %vm1999_vm5, %v3782_v27, %v4917_v53  ;;  %v3909_v51 = vsel %vm1997_vm4, %v3871_v5, %v3908_v43  ;;  %v9939_v27 = vld [vmem:[%s15811_s5 + $0x40] sm:$0xff] }
 0x5f6   :  { %v3800_v22 = vmax.f32 %v3798_v21, %v3799_v8  ;;  %v4919_v42 = vsel %vm2001_vm6, %v3791_v29, %v4918_v60  ;;  %v3910_v57 = vsel %vm1999_vm5, %v3872_v19, %v3909_v51  ;;  %v3828_v8 = vmax.f32 %v14040_v20, 0.0 }
 0x5f7   :  { %v3807_v26 = vmax.f32 %v3805_v37, %v3806_v7  ;;  %v3911_v34 = vsel %vm2001_vm6, %v3873_v12, %v3910_v57  ;;  %v11915_v29 = vpack.c.bf16 %v9940_v45, %v9939_v27  ;;  %v9941_v7 = vld [vmem:[%s15811_s5 + $0x50] sm:$0xff]  ;;  %v3830_v38 = vmax.f32 %v14048_v52, 0.0 }
 0x5f8   :  { %v3874_v13 = vmax.f32 %v3800_v22, 0.0  ;;  %v4920_v31 = vsel %vm2003_vm7, %v3800_v22, %v4919_v42  ;;  %v3829_v22 = vmax.f32 %v14036_v50, 0.0  ;;  %v11919_v14 = vpack.c.bf16 %v9942_v23, %v9941_v7 }
 0x5f9   :  { %v3808_v2 = vrot.slane %v3807_v26, 1  ;;  %v3832_v5 = vmax.f32 %v14055_v59, 0.0  ;;  %v3834_v32 = vmax.f32 %v14067_v1, 0.0  ;;  %v3835_v19 = vmax.f32 %v14065_v62, 0.0 }
 0x5fa   :  { %v3912_v46 = vsel %vm2003_vm7, %v3874_v13, %v3911_v34  ;;  %v3837_v53 = vmax.f32 %v14088_v36, 0.0  ;;  %v3838_v12 = vmax.f32 %v14108_v40, 0.0  ;;  %v3839_v28 = vmax.f32 %v14103_v11, 0.0  ;;  %v15892_v34 = vld [vmem:[#allocation8_spill] sm:$0xff] }
 0x5fb   :  { %v3809_v30 = vmax.f32 %v3807_v26, %v3808_v2  ;;  %v3833_v26 = vmax.f32 %v14053_v35, 0.0  ;;  %v3836_v2 = vmax.f32 %v14094_v63, 0.0  ;;  %v3840_v60 = vmax.f32 %v14126_v39, 0.0 }
 0x5fc   :  { %v3841_v13 = vmax.f32 %v14121_v17, 0.0  ;;  %v3842_v43 = vmax.f32 %v14140_v58, 0.0  ;;  %v3844_v42 = vmax.f32 %v14150_v55, 0.0  ;;  %v3845_v51 = vmax.f32 %v14146_v16, 0.0 }
 0x5fd   :  { %v4921_v21 = vsel %vm2005_vm8, %v3809_v30, %v4920_v31  ;;  %v3875_v9 = vmax.f32 %v3809_v30, 0.0  ;;  %v3843_v30 = vmax.f32 %v14135_v6, 0.0  ;;  %v3846_v54 = vmax.f32 %v14161_v49, 0.0 }
 0x5fe   :  { %11370 = vmatmul.mubr.msk.f32.vlgmr.msra.gmra.mrb[84].mxu1 %vm1108_vm1, %v4921_v21  ;;  %v3847_v25 = vmax.f32 %v14154_v24, 0.0  ;;  %v3848_v31 = vmax.f32 %v14171_v3, 0.0  ;;  %v3849_v57 = vmax.f32 %v14169_v44, 0.0  ;;  %v3850_v21 = vmax.f32 %v14211_v10, 0.0 }
 0x5ff   :  { %v3913_v37 = vsel %vm2005_vm8, %v3875_v9, %v3912_v46  ;;  %v3851_v9 = vmax.f32 %v14194_v48, 0.0  ;;  %v3852_v46 = vmax.f32 %v15892_v34, 0.0  ;;  %v3855_v27 = vmax.f32 %v14250_v0, 0.0 }
 0x600   :  { %11247 = vmatmul.mubr.msk.f32.vlgmr.msra.gmra.mrb[48].mxu0 %vm1108_vm1, %v3913_v37  ;;  %v3854_v37 = vmax.f32 %v14260_v47, 0.0  ;;  %v3856_v45 = vmax.f32 %v14272_v15, 0.0  ;;  %v3858_v7 = vmax.f32 %v14286_v4, 0.0  ;;  %v3859_v23 = vmax.f32 %v14281_v56, 0.0 }
 0x601   :  { %11910 = vmatpush3.bf16.msra.mxu0 %v14021_v18  ;;  %11257 = vmatprep.mubr.msk.f32.mxu0 %vm1108_vm1, %v3828_v8  ;;  %v3831_v18 = vmax.f32 %v14045_v61, 0.0 }
 0x602   :  { %11912 = vmatprep.subr.bf16.mxu0 %v11911_v33 }
 0x605   :  { %11914 = vmatpush3.bf16.msra.mxu0 %v11911_v33  ;;  %v15893_v33 = vld [vmem:[#allocation6_spill] sm:$0xff] }
 0x606   :  { %11916 = vmatprep.subr.bf16.mxu0 %v11915_v29  ;;  %v3853_v8 = vmax.f32 %v15893_v33, 0.0 }
 0x608   :  { %11258 = vmatmul.mubr.msk.f32.vlgmr.msra.gmra.mrb[50].mxu0 %vm1108_vm1, %v3829_v22  ;;  %v9895_v22 = vld [vmem:[%s15813_s7 + $0x80] sm:$0xff] }
 0x609   :  { %11260 = vmatprep.mubr.msk.f32.mxu0 %vm1108_vm1, %v3830_v38  ;;  %11918 = vmatpush3.bf16.msra.mxu0 %v11915_v29  ;;  %v3857_v29 = vmax.f32 %v14269_v41, 0.0 }
 0x60a   :  { %11920 = vmatprep.subr.bf16.mxu0 %v11919_v14 }
 0x60c   :  { %11261 = vmatmul.mubr.msk.f32.gmra.mrb[52].mxu0 %vm1108_vm1, %v3831_v18 }
 0x60d   :  { %11263 = vmatprep.mubr.msk.f32.mxu0 %vm1108_vm1, %v3832_v5  ;;  %11922 = vmatpush3.bf16.msra.mxu0 %v11919_v14  ;;  %v9896_v14 = vld [vmem:[%s15813_s7 + $0x88] sm:$0xff] }
 0x60e   :  { %v11931_v38 = vpack.c.bf16 %v9896_v14, %v9895_v22 }
 0x610   :  { %11264 = vmatmul.mubr.msk.f32.gmra.mrb[54].mxu0 %vm1108_vm1, %v3833_v26  ;;  %11932 = vmatprep.subr.bf16.mxu0 %v11931_v38  ;;  %v9904_v26 = vld [vmem:[%s15810_s4 + $0x2] ss:$0 sm:$0xff] }
 0x611   :  { %11266 = vmatprep.mubr.msk.f32.mxu0 %vm1108_vm1, %v3834_v32 }
 0x614   :  { %11267 = vmatmul.mubr.msk.f32.gmra.mrb[56].mxu0 %vm1108_vm1, %v3835_v19 }
 0x615   :  { %11269 = vmatprep.mubr.msk.f32.mxu0 %vm1108_vm1, %v3836_v2 }
 0x618   :  { %11270 = vmatmul.mubr.msk.f32.gmra.mrb[58].mxu0 %vm1108_vm1, %v3837_v53  ;;  %v15894_v53 = vld [vmem:[#allocation23_spill] sm:$0xff] }
 0x619   :  { %11272 = vmatprep.mubr.msk.f32.mxu0 %vm1108_vm1, %v3838_v12 }
 0x61c   :  { %11273 = vmatmul.mubr.msk.f32.gmra.mrb[60].mxu0 %vm1108_vm1, %v3839_v28 }
 0x61d   :  { %11275 = vmatprep.mubr.msk.f32.mxu0 %vm1108_vm1, %v3840_v60 }
 0x620   :  { %11276 = vmatmul.mubr.msk.f32.gmra.mrb[62].mxu0 %vm1108_vm1, %v3841_v13 }
 0x621   :  { %11278 = vmatprep.mubr.msk.f32.mxu0 %vm1108_vm1, %v3842_v43 }
 0x624   :  { %11279 = vmatmul.mubr.msk.f32.gmra.mrb[64].mxu0 %vm1108_vm1, %v3843_v30 }
 0x625   :  { %11281 = vmatprep.mubr.msk.f32.mxu0 %vm1108_vm1, %v3844_v42  ;;  %v15895_v42 = vld [vmem:[#allocation5_spill] sm:$0xff] }
 0x628   :  { %11282 = vmatmul.mubr.msk.f32.gmra.mrb[66].mxu0 %vm1108_vm1, %v3845_v51 }
 0x629   :  { %11284 = vmatprep.mubr.msk.f32.mxu0 %vm1108_vm1, %v3846_v54 }
 0x62c   :  { %11285 = vmatmul.mubr.msk.f32.gmra.mrb[68].mxu0 %vm1108_vm1, %v3847_v25 }
 0x62d   :  { %11287 = vmatprep.mubr.msk.f32.mxu0 %vm1108_vm1, %v3848_v31 }
 0x630   :  { %11288 = vmatmul.mubr.msk.f32.gmra.mrb[70].mxu0 %vm1108_vm1, %v3849_v57 }
 0x631   :  { %11290 = vmatprep.mubr.msk.f32.mxu0 %vm1108_vm1, %v3850_v21 }
 0x634   :  { %11291 = vmatmul.mubr.msk.f32.gmra.mrb[72].mxu0 %vm1108_vm1, %v3851_v9 }
 0x635   :  { %11293 = vmatprep.mubr.msk.f32.mxu0 %vm1108_vm1, %v3852_v46  ;;  %v9897_v46 = vld [vmem:[%s15813_s7 + $0x90] sm:$0xff] }
 0x638   :  { %11294 = vmatmul.mubr.msk.f32.gmra.mrb[74].mxu0 %vm1108_vm1, %v3853_v8  ;;  %v9898_v8 = vld [vmem:[%s15813_s7 + $0x98] sm:$0xff] }
 0x639   :  { %11296 = vmatprep.mubr.msk.f32.mxu0 %vm1108_vm1, %v3854_v37 }
 0x63c   :  { %11297 = vmatmul.mubr.msk.f32.gmra.mrb[76].mxu0 %vm1108_vm1, %v3855_v27 }
 0x63d   :  { %11299 = vmatprep.mubr.msk.f32.mxu0 %vm1108_vm1, %v3856_v45 }
 0x640   :  { %11300 = vmatmul.mubr.msk.f32.gmra.mrb[78].mxu0 %vm1108_vm1, %v3857_v29 }
 0x641   :  { %11302 = vmatprep.mubr.msk.f32.mxu0 %vm1108_vm1, %v3858_v7 }
 0x644   :  { %11303 = vmatmul.mubr.msk.f32.gmra.mrb[80].mxu0 %vm1108_vm1, %v3859_v23 }
 0x6d1   :  { %v14395_v18 = vpop.f32.mrb[84].mxu1 }
 0x6d2   :  { %v14397_v5 = vpop.f32.mrb[85].mxu1 }
 0x6d3   :  { %v11248_v32 = vpop.f32.mrb[48].mxu0 }
 0x6d4   :  { %v3984_v19 = vpop.f32.mrb[49].mxu0 }
 0x6d5   :  { %v3985_v2 = vadd.f32 %v9904_v26, %v3984_v19  ;;  %v11935_v19 = vpack.c.bf16 %v9898_v8, %v9897_v46 }
 0x6d7   :  { %v4323_v12 = vrot.slane %v3985_v2, %v15894_v53  ;;  %v4316_v54 = vcombine.high %v3985_v2, %v3985_v2 }
 0x6d9   :  { %v4331_v28 = vcombine.high %v4323_v12, %v4323_v12  ;;  %v4339_v13 = vrot.slane %v4323_v12, %v15894_v53  ;;  %v4330_v23 = vrot.slane %v4316_v54, %v15894_v53 }
 0x6db   :  { %v11259_v60 = vpop.f32.mrb[50].mxu0  ;;  %v4353_v30 = vrot.slane %v4331_v28, %v15894_v53  ;;  %v4417_v51 = vrot.slane %v4339_v13, %v15895_v42  ;;  %v4361_v31 = vcombine.high %v4339_v13, %v4339_v13  ;;  %v4346_v54 = vrot.slane %v4330_v23, %v15894_v53 }
 0x6dc   :  { %v4155_v43 = vpop.f32.mrb[51].mxu0 }
 0x6dd   :  { %v4421_v25 = vrot.slane %v4353_v30, %v15895_v42  ;;  %v4495_v57 = vadd.f32 %v11259_v60, %v4417_v51  ;;  %v4494_v21 = vadd.f32 %v4417_v51, %v4155_v43  ;;  %v4425_v22 = vrot.slane %v4361_v31, %v15895_v42 }
 0x6de   :  { %v4363_v14 = vcombine.high %v4353_v30, %v4353_v30  ;;  %v4433_v46 = vrot.slane %v4346_v54, %v15895_v42 }
 0x6df   :  { %v11262_v9 = vpop.f32.mrb[52].mxu0  ;;  %v4527_v45 = vmax.f32 %v4495_v57, 0.0  ;;  %v4526_v29 = vmax.f32 %v4494_v21, 0.0 }
 0x6e0   :  { %v4497_v37 = vadd.f32 %v11262_v9, %v4421_v25  ;;  %v4165_v27 = vpop.f32.mrb[53].mxu0  ;;  %v4429_v51 = vrot.slane %v4363_v14, %v15895_v42 }
 0x6e1   :  { %v4496_v7 = vadd.f32 %v4421_v25, %v4165_v27  ;;  %11313 = vmatprep.mubr.msk.f32.mxu0 %vm1108_vm1, %v4526_v29  ;;  %v4332_v25 = vcombine.high %v4330_v23, %v4330_v23  ;;  %v3990_v23 = vadd.f32 %v11248_v32, %v9904_v26 }
 0x6e2   :  { %11314 = vmatmul.mubr.msk.f32.vlgmr.msra.gmra.mrb[82].mxu0 %vm1108_vm1, %v4527_v45  ;;  %v4529_v43 = vmax.f32 %v4497_v37, 0.0 }
 0x6e3   :  { %v4528_v2 = vmax.f32 %v4496_v7, 0.0  ;;  %v11265_v12 = vpop.f32.mrb[54].mxu0  ;;  %11934 = vmatpush3.bf16.msra.mxu0 %v11931_v38  ;;  %v4360_v8 = vrot.slane %v4332_v25, %v15894_v53 }
 0x6e4   :  { %v4499_v28 = vadd.f32 %v11265_v12, %v4425_v22  ;;  %v4175_v60 = vpop.f32.mrb[55].mxu0  ;;  %11936 = vmatprep.subr.bf16.mxu0 %v11935_v19 }
 0x6e5   :  { %v4498_v13 = vadd.f32 %v4425_v22, %v4175_v60  ;;  %11316 = vmatprep.mubr.msk.f32.mxu0 %vm1108_vm1, %v4528_v2  ;;  %v4437_v14 = vrot.slane %v4360_v8, %v15895_v42  ;;  %v4362_v2 = vcombine.high %v4346_v54, %v4346_v54 }
 0x6e6   :  { %11317 = vmatmul.mubr.msk.f32.gmra.mrb[84].mxu0 %vm1108_vm1, %v4529_v43  ;;  %v4531_v38 = vmax.f32 %v4499_v28, 0.0  ;;  %v4372_v43 = vrot.slane %v3990_v23, %v15894_v53 }
 0x6e7   :  { %v4530_v30 = vmax.f32 %v4498_v13, 0.0  ;;  %v11268_v31 = vpop.f32.mrb[56].mxu0  ;;  %11938 = vmatpush3.bf16.msra.mxu0 %v11935_v19  ;;  %v4441_v25 = vrot.slane %v4362_v2, %v15895_v42 }
 0x6e8   :  { %v4501_v57 = vadd.f32 %v11268_v31, %v4429_v51  ;;  %v4185_v21 = vpop.f32.mrb[57].mxu0 }
 0x6e9   :  { %v4500_v9 = vadd.f32 %v4429_v51, %v4185_v21  ;;  %11319 = vmatprep.mubr.msk.f32.mxu0 %vm1108_vm1, %v4530_v30  ;;  %v4364_v30 = vcombine.high %v4360_v8, %v4360_v8  ;;  %v4380_v21 = vcombine.high %v4372_v43, %v4372_v43 }
 0x6ea   :  { %11320 = vmatmul.mubr.msk.f32.gmra.mrb[86].mxu0 %vm1108_vm1, %v4531_v38  ;;  %v4533_v22 = vmax.f32 %v4501_v57, 0.0 }
 0x6eb   :  { %v4532_v37 = vmax.f32 %v4500_v9, 0.0  ;;  %v11271_v27 = vpop.f32.mrb[58].mxu0  ;;  %v4445_v38 = vrot.slane %v4364_v30, %v15895_v42 }
 0x6ec   :  { %v4503_v45 = vadd.f32 %v11271_v27, %v4433_v46  ;;  %v4195_v29 = vpop.f32.mrb[59].mxu0 }
 0x6ed   :  { %v4502_v7 = vadd.f32 %v4433_v46, %v4195_v29  ;;  %11322 = vmatprep.mubr.msk.f32.mxu0 %vm1108_vm1, %v4532_v37  ;;  %v4388_v46 = vrot.slane %v4372_v43, %v15894_v53 }
 0x6ee   :  { %11323 = vmatmul.mubr.msk.f32.gmra.mrb[88].mxu0 %vm1108_vm1, %v4533_v22  ;;  %v4535_v51 = vmax.f32 %v4503_v45, 0.0 }
 0x6ef   :  { %v4534_v19 = vmax.f32 %v4502_v7, 0.0  ;;  %v11274_v12 = vpop.f32.mrb[60].mxu0  ;;  %v4449_v22 = vrot.slane %v4388_v46, %v15895_v42 }
 0x6f0   :  { %v4505_v28 = vadd.f32 %v11274_v12, %v4437_v14  ;;  %v4205_v60 = vpop.f32.mrb[61].mxu0 }
 0x6f1   :  { %v4504_v13 = vadd.f32 %v4437_v14, %v4205_v60  ;;  %11325 = vmatprep.mubr.msk.f32.mxu0 %vm1108_vm1, %v4534_v19  ;;  %v4402_v14 = vrot.slane %v4380_v21, %v15894_v53 }
 0x6f2   :  { %11326 = vmatmul.mubr.msk.f32.gmra.mrb[90].mxu0 %vm1108_vm1, %v4535_v51  ;;  %v4537_v9 = vmax.f32 %v4505_v28, 0.0 }
 0x6f3   :  { %v4536_v26 = vmax.f32 %v4504_v13, 0.0  ;;  %v11277_v32 = vpop.f32.mrb[62].mxu0  ;;  %v4365_v13 = vcombine.high %v3990_v23, %v3990_v23  ;;  %v4453_v51 = vrot.slane %v4402_v14, %v15895_v42 }
 0x6f4   :  { %v4507_v31 = vadd.f32 %v11277_v32, %v4441_v25  ;;  %v4215_v54 = vpop.f32.mrb[63].mxu0 }
 0x6f5   :  { %v4506_v57 = vadd.f32 %v4441_v25, %v4215_v54  ;;  %11328 = vmatprep.mubr.msk.f32.mxu0 %vm1108_vm1, %v4536_v26  ;;  %v4410_v25 = vcombine.high %v4388_v46, %v4388_v46 }
 0x6f6   :  { %11329 = vmatmul.mubr.msk.f32.gmra.mrb[92].mxu0 %vm1108_vm1, %v4537_v9  ;;  %v4539_v7 = vmax.f32 %v4507_v31, 0.0 }
 0x6f7   :  { %v4538_v37 = vmax.f32 %v4506_v57, 0.0  ;;  %v11280_v27 = vpop.f32.mrb[64].mxu0  ;;  %v4379_v57 = vrot.slane %v4365_v13, %v15894_v53  ;;  %v4457_v9 = vrot.slane %v4410_v25, %v15895_v42 }
 0x6f8   :  { %v4509_v45 = vadd.f32 %v11280_v27, %v4445_v38  ;;  %v4225_v8 = vpop.f32.mrb[65].mxu0 }
 0x6f9   :  { %v4508_v29 = vadd.f32 %v4445_v38, %v4225_v8  ;;  %11331 = vmatprep.mubr.msk.f32.mxu0 %vm1108_vm1, %v4538_v37  ;;  %v4412_v38 = vcombine.high %v4402_v14, %v4402_v14 }
 0x6fa   :  { %11332 = vmatmul.mubr.msk.f32.gmra.mrb[94].mxu0 %vm1108_vm1, %v4539_v7  ;;  %v4541_v43 = vmax.f32 %v4509_v45, 0.0  ;;  %v4395_v7 = vrot.slane %v4379_v57, %v15894_v53 }
 0x6fb   :  { %v4540_v2 = vmax.f32 %v4508_v29, 0.0  ;;  %v11283_v19 = vpop.f32.mrb[66].mxu0  ;;  %v4461_v29 = vrot.slane %v4412_v38, %v15895_v42 }
 0x6fc   :  { %v4511_v12 = vadd.f32 %v11283_v19, %v4449_v22  ;;  %v4235_v28 = vpop.f32.mrb[67].mxu0  ;;  %v4465_v13 = vrot.slane %v4395_v7, %v15895_v42 }
 0x6fd   :  { %v4510_v60 = vadd.f32 %v4449_v22, %v4235_v28  ;;  %11334 = vmatprep.mubr.msk.f32.mxu0 %vm1108_vm1, %v4540_v2  ;;  %v4381_v22 = vcombine.high %v4379_v57, %v4379_v57  ;;  %v4411_v57 = vcombine.high %v4395_v7, %v4395_v7 }
 0x6fe   :  { %11335 = vmatmul.mubr.msk.f32.gmra.mrb[96].mxu0 %vm1108_vm1, %v4541_v43  ;;  %v4543_v21 = vmax.f32 %v4511_v12, 0.0 }
 0x6ff   :  { %v4542_v30 = vmax.f32 %v4510_v60, 0.0  ;;  %v11286_v26 = vpop.f32.mrb[68].mxu0  ;;  %v4409_v43 = vrot.slane %v4381_v22, %v15894_v53 }
 0x700   :  { %v4513_v32 = vadd.f32 %v11286_v26, %v4453_v51  ;;  %v4245_v31 = vpop.f32.mrb[69].mxu0 }
 0x701   :  { %v4512_v54 = vadd.f32 %v4453_v51, %v4245_v31  ;;  %11337 = vmatprep.mubr.msk.f32.mxu0 %vm1108_vm1, %v4542_v30 }
 0x702   :  { %11338 = vmatmul.mubr.msk.f32.gmra.mrb[98].mxu0 %vm1108_vm1, %v4543_v21  ;;  %v4545_v8 = vmax.f32 %v4513_v32, 0.0 }
 0x703   :  { %v4544_v23 = vmax.f32 %v4512_v54, 0.0  ;;  %v11289_v37 = vpop.f32.mrb[70].mxu0  ;;  %v4469_v54 = vrot.slane %v4409_v43, %v15895_v42 }
 0x704   :  { %v4515_v27 = vadd.f32 %v11289_v37, %v4457_v9  ;;  %v4255_v46 = vpop.f32.mrb[71].mxu0 }
 0x705   :  { %v4514_v45 = vadd.f32 %v4457_v9, %v4255_v46  ;;  %11340 = vmatprep.mubr.msk.f32.mxu0 %vm1108_vm1, %v4544_v23  ;;  %v4473_v46 = vrot.slane %v4411_v57, %v15895_v42 }
 0x706   :  { %11341 = vmatmul.mubr.msk.f32.gmra.mrb[100].mxu0 %vm1108_vm1, %v4545_v8  ;;  %v4547_v60 = vmax.f32 %v4515_v27, 0.0 }
 0x707   :  { %v4546_v2 = vmax.f32 %v4514_v45, 0.0  ;;  %v11292_v19 = vpop.f32.mrb[72].mxu0  ;;  %v4413_v45 = vcombine.high %v4409_v43, %v4409_v43 }
 0x708   :  { %v4517_v12 = vadd.f32 %v11292_v19, %v4461_v29  ;;  %v4265_v14 = vpop.f32.mrb[73].mxu0 }
 0x709   :  { %v4516_v28 = vadd.f32 %v4461_v29, %v4265_v14  ;;  %11343 = vmatprep.mubr.msk.f32.mxu0 %vm1108_vm1, %v4546_v2 }
 0x70a   :  { %11344 = vmatmul.mubr.msk.f32.gmra.mrb[102].mxu0 %vm1108_vm1, %v4547_v60  ;;  %v4549_v31 = vmax.f32 %v4517_v12, 0.0  ;;  %v4477_v12 = vrot.slane %v4413_v45, %v15895_v42 }
 0x70b   :  { %v4548_v51 = vmax.f32 %v4516_v28, 0.0  ;;  %v11295_v25 = vpop.f32.mrb[74].mxu0 }
 0x70c   :  { %v4519_v30 = vadd.f32 %v11295_v25, %v4465_v13  ;;  %v4275_v26 = vpop.f32.mrb[75].mxu0 }
 0x70d   :  { %v4518_v32 = vadd.f32 %v4465_v13, %v4275_v26  ;;  %11346 = vmatprep.mubr.msk.f32.mxu0 %vm1108_vm1, %v4548_v51 }
 0x70e   :  { %11347 = vmatmul.mubr.msk.f32.gmra.mrb[104].mxu0 %vm1108_vm1, %v4549_v31  ;;  %v4551_v27 = vmax.f32 %v4519_v30, 0.0 }
 0x70f   :  { %v4550_v21 = vmax.f32 %v4518_v32, 0.0  ;;  %v11298_v9 = vpop.f32.mrb[76].mxu0 }
 0x710   :  { %v4521_v38 = vadd.f32 %v11298_v9, %v4469_v54  ;;  %v4285_v23 = vpop.f32.mrb[77].mxu0 }
 0x711   :  { %v4520_v37 = vadd.f32 %v4469_v54, %v4285_v23  ;;  %11349 = vmatprep.mubr.msk.f32.mxu0 %vm1108_vm1, %v4550_v21 }
 0x712   :  { %11350 = vmatmul.mubr.msk.f32.gmra.mrb[106].mxu0 %vm1108_vm1, %v4551_v27  ;;  %v4553_v19 = vmax.f32 %v4521_v38, 0.0 }
 0x713   :  { %v4552_v8 = vmax.f32 %v4520_v37, 0.0  ;;  %v11301_v29 = vpop.f32.mrb[78].mxu0 }
 0x714   :  { %v4523_v22 = vadd.f32 %v11301_v29, %v4473_v46  ;;  %v4295_v2 = vpop.f32.mrb[79].mxu0 }
 0x715   :  { %v4522_v7 = vadd.f32 %v4473_v46, %v4295_v2  ;;  %11352 = vmatprep.mubr.msk.f32.mxu0 %vm1108_vm1, %v4552_v8 }
 0x716   :  { %11353 = vmatmul.mubr.msk.f32.gmra.mrb[108].mxu0 %vm1108_vm1, %v4553_v19  ;;  %v4555_v43 = vmax.f32 %v4523_v22, 0.0 }
 0x717   :  { %v4554_v14 = vmax.f32 %v4522_v7, 0.0  ;;  %v11304_v28 = vpop.f32.mrb[80].mxu0 }
 0x718   :  { %v4525_v60 = vadd.f32 %v11304_v28, %v4477_v12  ;;  %v4305_v13 = vpop.f32.mrb[81].mxu0 }
 0x719   :  { %v4524_v51 = vadd.f32 %v4477_v12, %v4305_v13  ;;  %11355 = vmatprep.mubr.msk.f32.mxu0 %vm1108_vm1, %v4554_v14 }
 0x71a   :  { %11356 = vmatmul.mubr.msk.f32.gmra.mrb[110].mxu0 %vm1108_vm1, %v4555_v43  ;;  %v4557_v30 = vmax.f32 %v4525_v60, 0.0 }
 0x71b   :  { %v4556_v25 = vmax.f32 %v4524_v51, 0.0 }
 0x71d   :  { %11358 = vmatprep.mubr.msk.f32.mxu0 %vm1108_vm1, %v4556_v25 }
 0x71e   :  { %11359 = vmatmul.mubr.msk.f32.gmra.mrb[112].mxu0 %vm1108_vm1, %v4557_v30 }
 0x71f   :  { %11380 = vmatprep.mubr.msk.f32.mxu0 %vm1108_vm1, %v14040_v20  ;;  %v10024_v20 = vld [vmem:[%s15813_s7 + $0xe8] sm:$0xff] }
 0x722   :  { %11381 = vmatmul.mubr.msk.f32.vlgmr.msra.gmra.mrb[82].mxu0 %vm1108_vm1, %v14036_v50  ;;  %v10023_v50 = vld [vmem:[%s15813_s7 + $0xe0] sm:$0xff] }
 0x723   :  { %11383 = vmatprep.mubr.msk.f32.mxu0 %vm1108_vm1, %v14048_v52  ;;  %v11963_v52 = vpack.c.bf16 %v10024_v20, %v10023_v50 }
 0x725   :  { %11964 = vmatprep.subr.bf16.mxu0 %v11963_v52 }
 0x726   :  { %11384 = vmatmul.mubr.msk.f32.gmra.mrb[84].mxu0 %vm1108_vm1, %v14045_v61  ;;  %v10015_v61 = vld [vmem:[%s15809_s3 + $0xe0] sm:$0xff] }
 0x727   :  { %11386 = vmatprep.mubr.msk.f32.mxu0 %vm1108_vm1, %v14055_v59  ;;  %v10025_v59 = vld [vmem:[%s15813_s7 + $0xf0] sm:$0xff]  ;;  %11966 = vmatpush3.bf16.msra.mxu0 %v11963_v52 }
 0x72a   :  { %11387 = vmatmul.mubr.msk.f32.gmra.mrb[86].mxu0 %vm1108_vm1, %v14053_v35  ;;  %v10016_v35 = vld [vmem:[%s15809_s3 + $0xe8] sm:$0xff] }
 0x72b   :  { %11389 = vmatprep.mubr.msk.f32.mxu0 %vm1108_vm1, %v14067_v1  ;;  %v11939_v1 = vpack.c.bf16 %v10016_v35, %v10015_v61 }
 0x72d   :  { %11940 = vmatprep.subr.bf16.mxu1 %v11939_v1 }
 0x72e   :  { %11390 = vmatmul.mubr.msk.f32.gmra.mrb[88].mxu0 %vm1108_vm1, %v14065_v62  ;;  %v10026_v62 = vld [vmem:[%s15813_s7 + $0xf8] sm:$0xff]  ;;  %11942 = vmatpush3.bf16.msra.mxu1 %v11939_v1 }
 0x72f   :  { %11392 = vmatprep.mubr.msk.f32.mxu0 %vm1108_vm1, %v14094_v63  ;;  %v10017_v63 = vld [vmem:[%s15809_s3 + $0xf0] sm:$0xff] }
 0x732   :  { %11393 = vmatmul.mubr.msk.f32.gmra.mrb[90].mxu0 %vm1108_vm1, %v14088_v36  ;;  %v11967_v36 = vpack.c.bf16 %v10026_v62, %v10025_v59  ;;  %v5373_v59 = vcombine.high %v14395_v18, %v14395_v18  ;;  %v5380_v62 = vrot.slane %v14395_v18, %v15894_v53 }
 0x733   :  { %11395 = vmatprep.mubr.msk.f32.mxu0 %vm1108_vm1, %v14108_v40 }
 0x734   :  { %11968 = vmatprep.subr.bf16.mxu0 %v11967_v36 }
 0x735   :  { %11970 = vmatpush3.bf16.msra.mxu0 %v11967_v36 }
 0x736   :  { %11396 = vmatmul.mubr.msk.f32.gmra.mrb[92].mxu0 %vm1108_vm1, %v14103_v11  ;;  %v10018_v11 = vld [vmem:[%s15809_s3 + $0xf8] sm:$0xff] }
 0x737   :  { %11398 = vmatprep.mubr.msk.f32.mxu0 %vm1108_vm1, %v14126_v39  ;;  %v11943_v40 = vpack.c.bf16 %v10018_v11, %v10017_v63  ;;  %v10012_v39 = vld [vmem:[%s15809_s3 + $0xc8] sm:$0xff] }
 0x739   :  { %11944 = vmatprep.subr.bf16.mxu1 %v11943_v40 }
 0x73a   :  { %11399 = vmatmul.mubr.msk.f32.gmra.mrb[94].mxu0 %vm1108_vm1, %v14121_v17  ;;  %v10011_v17 = vld [vmem:[%s15809_s3 + $0xc0] sm:$0xff]  ;;  %11946 = vmatpush3.bf16.msra.mxu1 %v11943_v40 }
 0x73b   :  { %11401 = vmatprep.mubr.msk.f32.mxu0 %vm1108_vm1, %v14140_v58  ;;  %v5331_v58 = vrot.slane %v14397_v5, %v15894_v53 }
 0x73e   :  { %11402 = vmatmul.mubr.msk.f32.gmra.mrb[96].mxu0 %vm1108_vm1, %v14135_v6  ;;  %v14562_v6 = vpack.c.bf16 %v10012_v39, %v10011_v17 }
 0x73f   :  { %11404 = vmatprep.mubr.msk.f32.mxu0 %vm1108_vm1, %v14150_v55  ;;  %v5347_v55 = vrot.slane %v5331_v58, %v15894_v53 }
 0x740   :  { %11948 = vmatprep.subr.bf16.mxu1 %v14562_v6 }
 0x742   :  { %11405 = vmatmul.mubr.msk.f32.gmra.mrb[98].mxu0 %vm1108_vm1, %v14146_v16  ;;  %v5339_v16 = vcombine.high %v5331_v58, %v5331_v58 }
 0x743   :  { %11407 = vmatprep.mubr.msk.f32.mxu0 %vm1108_vm1, %v14161_v49 }
 0x746   :  { %11408 = vmatmul.mubr.msk.f32.gmra.mrb[100].mxu0 %vm1108_vm1, %v14154_v24  ;;  %v14571_v24 = vld [vmem:[%s15812_s6 + $0x2] ss:$0 sm:$0xff] }
 0x747   :  { %11410 = vmatprep.mubr.msk.f32.mxu0 %vm1108_vm1, %v14171_v3  ;;  %v5425_v3 = vrot.slane %v5347_v55, %v15895_v42 }
 0x74a   :  { %11411 = vmatmul.mubr.msk.f32.gmra.mrb[102].mxu0 %vm1108_vm1, %v14169_v44  ;;  %v5361_v44 = vrot.slane %v5339_v16, %v15894_v53 }
 0x74b   :  { %11413 = vmatprep.mubr.msk.f32.mxu0 %vm1108_vm1, %v14211_v10 }
 0x74c   :  { %v5371_v23 = vcombine.high %v5361_v44, %v5361_v44 }
 0x74e   :  { %11414 = vmatmul.mubr.msk.f32.gmra.mrb[104].mxu0 %vm1108_vm1, %v14194_v48  ;;  %v5437_v22 = vrot.slane %v5371_v23, %v15895_v42 }
 0x74f   :  { %11416 = vmatprep.mubr.msk.f32.mxu0 %vm1108_vm1, %v15892_v34  ;;  %v5429_v34 = vrot.slane %v5361_v44, %v15895_v42 }
 0x752   :  { %11417 = vmatmul.mubr.msk.f32.gmra.mrb[106].mxu0 %vm1108_vm1, %v15893_v33 }
 0x753   :  { %11419 = vmatprep.mubr.msk.f32.mxu0 %vm1108_vm1, %v14260_v47 }
 0x756   :  { %11420 = vmatmul.mubr.msk.f32.gmra.mrb[108].mxu0 %vm1108_vm1, %v14250_v0 }
 0x757   :  { %11422 = vmatprep.mubr.msk.f32.mxu0 %vm1108_vm1, %v14272_v15 }
 0x75a   :  { %11423 = vmatmul.mubr.msk.f32.gmra.mrb[110].mxu0 %vm1108_vm1, %v14269_v41  ;;  %v5324_v41 = vcombine.high %v14397_v5, %v14397_v5 }
 0x75b   :  { %11425 = vmatprep.mubr.msk.f32.mxu0 %vm1108_vm1, %v14286_v4  ;;  %v5369_v4 = vcombine.high %v5347_v55, %v5347_v55 }
 0x75c   :  { %v5338_v54 = vrot.slane %v5324_v41, %v15894_v53 }
 0x75d   :  { %v5433_v5 = vrot.slane %v5369_v4, %v15895_v42 }
 0x75e   :  { %11426 = vmatmul.mubr.msk.f32.gmra.mrb[112].mxu0 %vm1108_vm1, %v14281_v56  ;;  %v5340_v46 = vcombine.high %v5338_v54, %v5338_v54  ;;  %v5354_v29 = vrot.slane %v5338_v54, %v15894_v53 }
 0x760   :  { %v5368_v51 = vrot.slane %v5340_v46, %v15894_v53  ;;  %v5441_v35 = vrot.slane %v5354_v29, %v15895_v42  ;;  %v5370_v39 = vcombine.high %v5354_v29, %v5354_v29  ;;  %v5396_v29 = vrot.slane %v5380_v62, %v15894_v53 }
 0x762   :  { %v5445_v55 = vrot.slane %v5368_v51, %v15895_v42 }
 0x7f5   :  { %v11382_v49 = vpop.f32.mrb[82].mxu0 }
 0x7f6   :  { %v12127_v48 = vadd.f32 %v11382_v49, %v14571_v24  ;;  %v5163_v10 = vpop.f32.mrb[83].mxu0 }
 0x7f7   :  { %v12129_v0 = vadd.f32 %v14571_v24, %v5163_v10  ;;  %v14639_v10 = vrot.slane %v5373_v59, %v15894_v53 }
 0x7f8   :  { %v14577_v47 = vadd.f32 %v12127_v48, %v5425_v3 }
 0x7f9   :  { %v14581_v15 = vadd.f32 %v12129_v0, %v5425_v3  ;;  %v11385_v56 = vpop.f32.mrb[84].mxu0  ;;  %v5388_v0 = vcombine.high %v5380_v62, %v5380_v62 }
 0x7fa   :  { %v12131_v33 = vadd.f32 %v11385_v56, %v14571_v24  ;;  %v5173_v26 = vpop.f32.mrb[85].mxu0  ;;  %v5567_v43 = vsel %vm1108_vm1, %v14577_v47, -inf }
 0x7fb   :  { %v12133_v32 = vadd.f32 %v14571_v24, %v5173_v26  ;;  %v5566_v25 = vsel %vm1108_vm1, %v14581_v15, -inf  ;;  %v5449_v26 = vrot.slane %v5370_v39, %v15895_v42  ;;  %v14671_v59 = vrot.slane %v5388_v0, %v15894_v53 }
 0x7fc   :  { %v14586_v31 = vadd.f32 %v12131_v33, %v5429_v34  ;;  %v5568_v63 = vmax.f32 %v5566_v25, %v5567_v43 }
 0x7fd   :  { %v14589_v57 = vadd.f32 %v12133_v32, %v5429_v34  ;;  %v11388_v21 = vpop.f32.mrb[86].mxu0 }
 0x7fe   :  { %v12135_v9 = vadd.f32 %v11388_v21, %v14571_v24  ;;  %v5183_v38 = vpop.f32.mrb[87].mxu0  ;;  %v5576_v7 = vsel %vm1108_vm1, %v14586_v31, -inf  ;;  %v5569_v56 = vrot.slane %v5568_v63, 4 }
 0x7ff   :  { %v12137_v37 = vadd.f32 %v14571_v24, %v5183_v38  ;;  %v5575_v19 = vsel %vm1108_vm1, %v14589_v57, -inf }
 0x800   :  { %v14594_v27 = vadd.f32 %v12135_v9, %v5433_v5  ;;  %v5577_v30 = vmax.f32 %v5575_v19, %v5576_v7  ;;  %v5372_v9 = vcombine.high %v5368_v51, %v5368_v51  ;;  %v14658_v7 = vrot.slane %v14639_v10, %v15894_v53 }
 0x801   :  { %v14596_v45 = vadd.f32 %v12137_v37, %v5433_v5  ;;  %v11391_v8 = vpop.f32.mrb[88].mxu0  ;;  %v5570_v19 = vmax.f32 %v5568_v63, %v5569_v56 }
 0x802   :  { %v5193_v2 = vpop.f32.mrb[89].mxu0  ;;  %v12139_v12 = vadd.f32 %v11391_v8, %v14571_v24  ;;  %v5585_v61 = vsel %vm1108_vm1, %v14594_v27, -inf  ;;  %v5578_v58 = vrot.slane %v5577_v30, 4  ;;  %v5389_v8 = vcombine.high %v14639_v10, %v14639_v10 }
 0x803   :  { %v12141_v14 = vadd.f32 %v14571_v24, %v5193_v2  ;;  %v5584_v52 = vsel %vm1108_vm1, %v14596_v45, -inf  ;;  %v5571_v63 = vrot.slane %v5570_v19, 2  ;;  %v5419_v10 = vcombine.high %v14658_v7, %v14658_v7 }
 0x804   :  { %v14606_v28 = vadd.f32 %v12139_v12, %v5437_v22  ;;  %v5586_v16 = vmax.f32 %v5584_v52, %v5585_v61  ;;  %v5579_v32 = vmax.f32 %v5577_v30, %v5578_v58  ;;  %v5453_v30 = vrot.slane %v5372_v9, %v15895_v42 }
 0x805   :  { %v14608_v60 = vadd.f32 %v12141_v14, %v5437_v22  ;;  %v11394_v13 = vpop.f32.mrb[90].mxu0  ;;  %v5457_v58 = vrot.slane %v5396_v29, %v15895_v42 }
 0x806   :  { %v12143_v50 = vadd.f32 %v11394_v13, %v14571_v24  ;;  %v5203_v20 = vpop.f32.mrb[91].mxu0  ;;  %v5594_v1 = vsel %vm1108_vm1, %v14606_v28, -inf  ;;  %v5587_v54 = vrot.slane %v5586_v16, 4  ;;  %v5580_v51 = vrot.slane %v5579_v32, 2 }
 0x807   :  { %v5593_v36 = vsel %vm1108_vm1, %v14608_v60, -inf  ;;  %v12145_v40 = vadd.f32 %v14571_v24, %v5203_v20 }
 0x808   :  { %v14629_v11 = vadd.f32 %v12143_v50, %v5441_v35  ;;  %v5595_v44 = vmax.f32 %v5593_v36, %v5594_v1  ;;  %v5588_v43 = vmax.f32 %v5586_v16, %v5587_v54  ;;  %v5581_v16 = vmax.f32 %v5579_v32, %v5580_v51 }
 0x809   :  { %v11397_v17 = vpop.f32.mrb[92].mxu0  ;;  %v14635_v3 = vadd.f32 %v12145_v40, %v5441_v35 }
 0x80a   :  { %v5213_v49 = vpop.f32.mrb[93].mxu0  ;;  %v5603_v18 = vsel %vm1108_vm1, %v14629_v11, -inf  ;;  %v12147_v48 = vadd.f32 %v11397_v17, %v14571_v24  ;;  %v5596_v38 = vrot.slane %v5595_v44, 4 }
 0x80b   :  { %v12149_v41 = vadd.f32 %v14571_v24, %v5213_v49  ;;  %v5602_v4 = vsel %vm1108_vm1, %v14635_v3, -inf }
 0x80c   :  { %v14644_v34 = vadd.f32 %v12147_v48, %v5445_v55  ;;  %v5604_v21 = vmax.f32 %v5602_v4, %v5603_v18  ;;  %v5597_v20 = vmax.f32 %v5595_v44, %v5596_v38  ;;  %v5418_v4 = vcombine.high %v5396_v29, %v5396_v29 }
 0x80d   :  { %v11400_v33 = vpop.f32.mrb[94].mxu0  ;;  %v14649_v37 = vadd.f32 %v12149_v41, %v5445_v55  ;;  %v5589_v55 = vrot.slane %v5588_v43, 2  ;;  %v5461_v38 = vrot.slane %v14671_v59, %v15895_v42 }
 0x80e   :  { %v5223_v5 = vpop.f32.mrb[95].mxu0  ;;  %v5612_v23 = vsel %vm1108_vm1, %v14644_v34, -inf  ;;  %v12151_v46 = vadd.f32 %v11400_v33, %v14571_v24  ;;  %v5605_v22 = vrot.slane %v5604_v21, 4  ;;  %v5598_v48 = vrot.slane %v5597_v20, 2 }
 0x80f   :  { %v12153_v2 = vadd.f32 %v14571_v24, %v5223_v5  ;;  %v5611_v12 = vsel %vm1108_vm1, %v14649_v37, -inf  ;;  %v5590_v29 = vmax.f32 %v5588_v43, %v5589_v55 }
 0x810   :  { %v14662_v14 = vadd.f32 %v12151_v46, %v5449_v26  ;;  %v5613_v25 = vmax.f32 %v5611_v12, %v5612_v23  ;;  %v5606_v62 = vmax.f32 %v5604_v21, %v5605_v22  ;;  %v5572_v21 = vmax.f32 %v5570_v19, %v5571_v63 }
 0x811   :  { %v11403_v13 = vpop.f32.mrb[96].mxu0  ;;  %v14667_v52 = vadd.f32 %v12153_v2, %v5449_v26  ;;  %v5582_v23 = vrot.slane %v5581_v16, 1  ;;  %v5465_v63 = vrot.slane %v5418_v4, %v15895_v42  ;;  %v5591_v55 = vrot.slane %v5590_v29, 1 }
 0x812   :  { %v5233_v50 = vpop.f32.mrb[97].mxu0  ;;  %v5621_v61 = vsel %vm1108_vm1, %v14662_v14, -inf  ;;  %v12155_v35 = vadd.f32 %v11403_v13, %v14571_v24  ;;  %v5614_v1 = vrot.slane %v5613_v25, 4  ;;  %v5607_v33 = vrot.slane %v5606_v62, 2 }
 0x813   :  { %v12157_v36 = vadd.f32 %v14571_v24, %v5233_v50  ;;  %v5620_v40 = vsel %vm1108_vm1, %v14667_v52, -inf  ;;  %v5599_v13 = vmax.f32 %v5597_v20, %v5598_v48  ;;  %v14700_v43 = vmax.f32 %v5581_v16, %v5582_v23 }
 0x814   :  { %v14676_v17 = vadd.f32 %v12155_v35, %v5453_v30  ;;  %v5615_v49 = vmax.f32 %v5613_v25, %v5614_v1  ;;  %v5622_v44 = vmax.f32 %v5620_v40, %v5621_v61  ;;  %v5608_v25 = vmax.f32 %v5606_v62, %v5607_v33 }
 0x815   :  { %v11406_v39 = vpop.f32.mrb[98].mxu0  ;;  %v14681_v41 = vadd.f32 %v12157_v36, %v5453_v30  ;;  %v5573_v35 = vrot.slane %v5572_v21, 1  ;;  %v5420_v40 = vcombine.high %v14671_v59, %v14671_v59  ;;  %v5473_v4 = vrot.slane %v14658_v7, %v15895_v42 }
 0x816   :  { %v5243_v18 = vpop.f32.mrb[99].mxu0  ;;  %v5630_v0 = vsel %vm1108_vm1, %v14676_v17, -inf  ;;  %v12159_v56 = vadd.f32 %v11406_v39, %v14571_v24  ;;  %v5623_v26 = vrot.slane %v5622_v44, 4  ;;  %v5616_v46 = vrot.slane %v5615_v49, 2 }
 0x817   :  { %v12161_v54 = vadd.f32 %v14571_v24, %v5243_v18  ;;  %v5629_v32 = vsel %vm1108_vm1, %v14681_v41, -inf  ;;  %v14708_v33 = vmax.f32 %v5572_v21, %v5573_v35  ;;  %v14722_v21 = vmax.f32 %v5590_v29, %v5591_v55 }
 0x818   :  { %v14687_v5 = vadd.f32 %v12159_v56, %v5457_v58  ;;  %v5624_v22 = vmax.f32 %v5622_v44, %v5623_v26  ;;  %v5631_v2 = vmax.f32 %v5629_v32, %v5630_v0  ;;  %v5617_v20 = vmax.f32 %v5615_v49, %v5616_v46 }
 0x819   :  { %v11409_v9 = vpop.f32.mrb[100].mxu0  ;;  %v14691_v51 = vadd.f32 %v12161_v54, %v5457_v58  ;;  %v5600_v44 = vrot.slane %v5599_v13, 1  ;;  %v5609_v0 = vrot.slane %v5608_v25, 1  ;;  %v14718_v26 = vrot.slane %v5389_v8, %v15894_v53 }
 0x81a   :  { %v5253_v12 = vpop.f32.mrb[101].mxu0  ;;  %v12163_v19 = vadd.f32 %v11409_v9, %v14571_v24  ;;  %v5625_v30 = vrot.slane %v5624_v22, 2  ;;  %v5632_v50 = vrot.slane %v5631_v2, 4  ;;  %v5618_v54 = vrot.slane %v5617_v20, 1 }
 0x81b   :  { %v12165_v61 = vadd.f32 %v14571_v24, %v5253_v12  ;;  %v5469_v32 = vrot.slane %v5420_v40, %v15895_v42  ;;  %v14724_v46 = vmax.f32 %v5599_v13, %v5600_v44  ;;  %v14731_v8 = vmax.f32 %v5608_v25, %v5609_v0 }
 0x81c   :  { %v14695_v1 = vadd.f32 %v12163_v19, %v5461_v38  ;;  %v5633_v39 = vmax.f32 %v5631_v2, %v5632_v50  ;;  %v5626_v56 = vmax.f32 %v5624_v22, %v5625_v30  ;;  %v6808_v22 = vsel %vm1993_vm2, %v14700_v43, %v14708_v33 }
 0x81d   :  { %v11412_v36 = vpop.f32.mrb[102].mxu0  ;;  %v14702_v58 = vadd.f32 %v12165_v61, %v5461_v38  ;;  %v5639_v2 = vsel %vm1108_vm1, %v14687_v5, -inf  ;;  %v5638_v29 = vsel %vm1108_vm1, %v14691_v51, -inf  ;;  %v6809_v0 = vsel %vm1995_vm3, %v14722_v21, %v6808_v22 }
 0x81e   :  { %v5263_v62 = vpop.f32.mrb[103].mxu0  ;;  %v12167_v18 = vadd.f32 %v11412_v36, %v14571_v24  ;;  %v5634_v23 = vrot.slane %v5633_v39, 2  ;;  %v5627_v19 = vrot.slane %v5626_v56, 1  ;;  %v5648_v13 = vsel %vm1108_vm1, %v14695_v1, -inf }
 0x81f   :  { %v12169_v48 = vadd.f32 %v14571_v24, %v5263_v62  ;;  %v5647_v7 = vsel %vm1108_vm1, %v14702_v58, -inf  ;;  %v5640_v44 = vmax.f32 %v5638_v29, %v5639_v2 }
 0x820   :  { %v14710_v59 = vadd.f32 %v12167_v18, %v5465_v63  ;;  %v5635_v61 = vmax.f32 %v5633_v39, %v5634_v23  ;;  %v14756_v18 = vmax.f32 %v5626_v56, %v5627_v19 }
 0x821   :  { %v14712_v16 = vadd.f32 %v12169_v48, %v5465_v63  ;;  %v11415_v49 = vpop.f32.mrb[104].mxu0  ;;  %v14748_v63 = vmax.f32 %v5617_v20, %v5618_v54 }
 0x822   :  { %v12171_v9 = vadd.f32 %v11415_v49, %v14571_v24  ;;  %v5273_v38 = vpop.f32.mrb[105].mxu0  ;;  %v5657_v25 = vsel %vm1108_vm1, %v14710_v59, -inf  ;;  %v5636_v48 = vrot.slane %v5635_v61, 1  ;;  %v5649_v49 = vmax.f32 %v5647_v7, %v5648_v13 }
 0x823   :  { %v12173_v30 = vadd.f32 %v14571_v24, %v5273_v38  ;;  %v5656_v35 = vsel %vm1108_vm1, %v14712_v16, -inf  ;;  %v5421_v13 = vcombine.high %v14718_v26, %v14718_v26 }
 0x824   :  { %v14735_v12 = vadd.f32 %v12171_v9, %v5469_v32  ;;  %v5658_v38 = vmax.f32 %v5656_v35, %v5657_v25  ;;  %v5637_v19 = vmax.f32 %v5635_v61, %v5636_v48  ;;  %v5650_v25 = vrot.slane %v5649_v49, 4 }
 0x825   :  { %v11418_v50 = vpop.f32.mrb[106].mxu0  ;;  %v14752_v62 = vadd.f32 %v12173_v30, %v5469_v32  ;;  %v6810_v32 = vsel %vm1997_vm4, %v14724_v46, %v6809_v0  ;;  %v5477_v61 = vrot.slane %v14718_v26, %v15895_v42  ;;  %v5763_v26 = vmax.f32 %v14724_v46, 0.0 }
 0x826   :  { %v5283_v36 = vpop.f32.mrb[107].mxu0  ;;  %v5666_v40 = vsel %vm1108_vm1, %v14735_v12, -inf  ;;  %v12175_v55 = vadd.f32 %v11418_v50, %v14571_v24  ;;  %v6811_v56 = vsel %vm1999_vm5, %v14731_v8, %v6810_v32  ;;  %v5641_v50 = vrot.slane %v5640_v44, 4 }
 0x827   :  { %v12177_v39 = vadd.f32 %v14571_v24, %v5283_v36  ;;  %v5665_v20 = vsel %vm1108_vm1, %v14752_v62, -inf  ;;  %v6812_v29 = vsel %vm2001_vm6, %v14748_v63, %v6811_v56  ;;  %v5762_v32 = vmax.f32 %v14722_v21, 0.0 }
 0x828   :  { %v14762_v54 = vadd.f32 %v12175_v55, %v5473_v4  ;;  %v5667_v23 = vmax.f32 %v5665_v20, %v5666_v40  ;;  %v5761_v55 = vmax.f32 %v14700_v43, 0.0  ;;  %v5481_v56 = vrot.slane %v5419_v10, %v15895_v42 }
 0x829   :  { %v11421_v9 = vpop.f32.mrb[108].mxu0  ;;  %v14766_v30 = vadd.f32 %v12177_v39, %v5473_v4  ;;  %v6813_v4 = vsel %vm2003_vm7, %v14756_v18, %v6812_v29  ;;  %v5659_v39 = vrot.slane %v5658_v38, 4  ;;  %v5760_v29 = vmax.f32 %v14708_v33, 0.0 }
 0x82a   :  { %15896 = vst [vmem:[#allocation7_spill] sm:$0xff] %v14762_v54  ;;  %v5293_v2 = vpop.f32.mrb[109].mxu0  ;;  %v5675_v22 = vsel %vm1108_vm1, %v14762_v54, -inf  ;;  %v6814_v36 = vsel %vm2005_vm8, %v5637_v19, %v6813_v4  ;;  %v5668_v48 = vrot.slane %v5667_v23, 4  ;;  %v12179_v0 = vadd.f32 %v11421_v9, %v14571_v24 }
 0x82b   :  { %15897 = vst [vmem:[#allocation10_spill] sm:$0xff] %v14766_v30  ;;  %v5674_v7 = vsel %vm1108_vm1, %v14766_v30, -inf  ;;  %11559 = vmatprep.mubr.msk.f32.mxu0 %vm1108_vm1, %v6814_v36  ;;  %v5651_v43 = vmax.f32 %v5649_v49, %v5650_v25  ;;  %v5764_v36 = vmax.f32 %v14731_v8, 0.0  ;;  %v12181_v9 = vadd.f32 %v14571_v24, %v5293_v2 }
 0x82c   :  { %v5676_v35 = vmax.f32 %v5674_v7, %v5675_v22  ;;  %v5485_v22 = vrot.slane %v5421_v13, %v15895_v42  ;;  %v5642_v7 = vmax.f32 %v5640_v44, %v5641_v50  ;;  %v14791_v4 = vadd.f32 %v12179_v0, %v5477_v61 }
 0x82d   :  { %v11424_v40 = vpop.f32.mrb[110].mxu0  ;;  %v5660_v30 = vmax.f32 %v5658_v38, %v5659_v39  ;;  %v5669_v21 = vmax.f32 %v5667_v23, %v5668_v48  ;;  %v5765_v10 = vmax.f32 %v14748_v63, 0.0  ;;  %v5800_v13 = vsel %vm1993_vm2, %v5761_v55, %v5760_v29 }
 0x82e   :  { %v5303_v20 = vpop.f32.mrb[111].mxu0  ;;  %v5677_v53 = vrot.slane %v5676_v35, 4  ;;  %v5684_v33 = vsel %vm1108_vm1, %v14791_v4, -inf  ;;  %v5766_v46 = vmax.f32 %v14756_v18, 0.0  ;;  %v5801_v44 = vsel %vm1995_vm3, %v5762_v32, %v5800_v13 }
 0x82f   :  { %v14801_v49 = vadd.f32 %v12181_v9, %v5477_v61  ;;  %v5767_v8 = vmax.f32 %v5637_v19, 0.0  ;;  %v5802_v2 = vsel %vm1997_vm4, %v5763_v26, %v5801_v44  ;;  %v12183_v38 = vadd.f32 %v11424_v40, %v14571_v24 }
 0x830   :  { %v12185_v23 = vadd.f32 %v14571_v24, %v5303_v20  ;;  %v5652_v63 = vrot.slane %v5651_v43, 2  ;;  %v5678_v50 = vmax.f32 %v5676_v35, %v5677_v53  ;;  %v5803_v25 = vsel %vm1999_vm5, %v5764_v36, %v5802_v2 }
 0x831   :  { %v11427_v54 = vpop.f32.mrb[112].mxu0  ;;  %v5683_v55 = vsel %vm1108_vm1, %v14801_v49, -inf  ;;  %v5643_v39 = vrot.slane %v5642_v7, 2  ;;  %v5804_v18 = vsel %vm2001_vm6, %v5765_v10, %v5803_v25  ;;  %v14810_v61 = vadd.f32 %v12183_v38, %v5481_v56 }
 0x832   :  { %v5313_v42 = vpop.f32.mrb[113].mxu0  ;;  %v5685_v48 = vmax.f32 %v5683_v55, %v5684_v33  ;;  %v5661_v19 = vrot.slane %v5660_v30, 2  ;;  %v5805_v0 = vsel %vm2003_vm7, %v5766_v46, %v5804_v18  ;;  %v14813_v32 = vadd.f32 %v12185_v23, %v5481_v56 }
 0x833   :  { %v12187_v40 = vadd.f32 %v11427_v54, %v14571_v24  ;;  %v5670_v20 = vrot.slane %v5669_v21, 2  ;;  %v5806_v53 = vsel %vm2005_vm8, %v5767_v8, %v5805_v0  ;;  %v5693_v29 = vsel %vm1108_vm1, %v14810_v61, -inf }
 0x834   :  { %v5686_v35 = vrot.slane %v5685_v48, 4  ;;  %v5653_v26 = vmax.f32 %v5651_v43, %v5652_v63  ;;  %v5679_v36 = vrot.slane %v5678_v50, 2  ;;  %11436 = vmatprep.mubr.msk.f32.mxu1 %vm1108_vm1, %v5806_v53  ;;  %v5692_v9 = vsel %vm1108_vm1, %v14813_v32, -inf }
 0x835   :  { %v5694_v13 = vmax.f32 %v5692_v9, %v5693_v29  ;;  %v14822_v56 = vadd.f32 %v12187_v40, %v5485_v22  ;;  %v12189_v54 = vadd.f32 %v14571_v24, %v5313_v42  ;;  %v5662_v33 = vmax.f32 %v5660_v30, %v5661_v19 }
 0x836   :  { %v5687_v10 = vmax.f32 %v5685_v48, %v5686_v35  ;;  %v5644_v46 = vmax.f32 %v5642_v7, %v5643_v39  ;;  %v5671_v44 = vmax.f32 %v5669_v21, %v5670_v20  ;;  %v5680_v38 = vmax.f32 %v5678_v50, %v5679_v36 }
 0x837   :  { %v5695_v2 = vrot.slane %v5694_v13, 4  ;;  %v5702_v43 = vsel %vm1108_vm1, %v14822_v56, -inf  ;;  %v14827_v23 = vadd.f32 %v12189_v54, %v5485_v22  ;;  %v5654_v63 = vrot.slane %v5653_v26, 1 }
 0x838   :  { %v5688_v8 = vrot.slane %v5687_v10, 2  ;;  %v5663_v18 = vrot.slane %v5662_v33, 1  ;;  %v5645_v0 = vrot.slane %v5644_v46, 1  ;;  %v5672_v42 = vrot.slane %v5671_v44, 1 }
 0x839   :  { %v5696_v55 = vmax.f32 %v5694_v13, %v5695_v2  ;;  %v5701_v48 = vsel %vm1108_vm1, %v14827_v23, -inf  ;;  %v5681_v7 = vrot.slane %v5680_v38, 1  ;;  %v5655_v21 = vmax.f32 %v5653_v26, %v5654_v63 }
 0x83a   :  { %v5689_v25 = vmax.f32 %v5687_v10, %v5688_v8  ;;  %v5703_v30 = vmax.f32 %v5701_v48, %v5702_v43  ;;  %v5664_v40 = vmax.f32 %v5662_v33, %v5663_v18  ;;  %v5646_v20 = vmax.f32 %v5644_v46, %v5645_v0 }
 0x83b   :  { %v5697_v24 = vrot.slane %v5696_v55, 2  ;;  %v5673_v22 = vmax.f32 %v5671_v44, %v5672_v42  ;;  %v5682_v29 = vmax.f32 %v5680_v38, %v5681_v7  ;;  %v5769_v36 = vmax.f32 %v5655_v21, 0.0  ;;  %v10014_v7 = vld [vmem:[%s15809_s3 + $0xd8] sm:$0xff] }
 0x83c   :  { %v5690_v39 = vrot.slane %v5689_v25, 1  ;;  %v5704_v19 = vrot.slane %v5703_v30, 4  ;;  %v5770_v13 = vmax.f32 %v5664_v40, 0.0  ;;  %v5768_v8 = vmax.f32 %v5646_v20, 0.0 }
 0x83d   :  { %v5698_v50 = vmax.f32 %v5696_v55, %v5697_v24  ;;  %v6815_v2 = vsel %vm1993_vm2, %v5655_v21, %v5646_v20  ;;  %v5771_v43 = vmax.f32 %v5673_v22, 0.0  ;;  %v5772_v63 = vmax.f32 %v5682_v29, 0.0 }
 0x83e   :  { %v5705_v35 = vmax.f32 %v5703_v30, %v5704_v19  ;;  %v5691_v9 = vmax.f32 %v5689_v25, %v5690_v39  ;;  %v6816_v26 = vsel %vm1995_vm3, %v5664_v40, %v6815_v2  ;;  %v5807_v44 = vsel %vm1993_vm2, %v5769_v36, %v5768_v8  ;;  %v10013_v30 = vld [vmem:[%s15809_s3 + $0xd0] sm:$0xff]  ;;  %v10064_v36 = vld [vmem:[%s15811_s5 + $0x68] sm:$0xff] }
 0x83f   :  { %v5699_v53 = vrot.slane %v5698_v50, 1  ;;  %v6817_v33 = vsel %vm1997_vm4, %v5673_v22, %v6816_v26  ;;  %v5808_v18 = vsel %vm1995_vm3, %v5770_v13, %v5807_v44  ;;  %v11951_v22 = vpack.c.bf16 %v10014_v7, %v10013_v30  ;;  %v10066_v13 = vld [vmem:[%s15811_s5 + $0x78] sm:$0xff] }
 0x840   :  { %v5706_v10 = vrot.slane %v5705_v35, 2  ;;  %v5773_v46 = vmax.f32 %v5691_v9, 0.0  ;;  %v6818_v38 = vsel %vm1999_vm5, %v5682_v29, %v6817_v33  ;;  %v5809_v24 = vsel %vm1997_vm4, %v5771_v43, %v5808_v18  ;;  %v10063_v29 = vld [vmem:[%s15811_s5 + $0x60] sm:$0xff] }
 0x841   :  { %v5700_v54 = vmax.f32 %v5698_v50, %v5699_v53  ;;  %v6819_v42 = vsel %vm2001_vm6, %v5691_v9, %v6818_v38  ;;  %v5810_v39 = vsel %vm1999_vm5, %v5772_v63, %v5809_v24  ;;  %v5728_v53 = vmax.f32 %v14581_v15, 0.0 }
 0x842   :  { %v5707_v48 = vmax.f32 %v5705_v35, %v5706_v10  ;;  %v5811_v40 = vsel %vm2001_vm6, %v5773_v46, %v5810_v39  ;;  %v11955_v9 = vpack.c.bf16 %v10064_v36, %v10063_v29  ;;  %v10065_v10 = vld [vmem:[%s15811_s5 + $0x70] sm:$0xff]  ;;  %v5730_v2 = vmax.f32 %v14589_v57, 0.0 }
 0x843   :  { %v5774_v25 = vmax.f32 %v5700_v54, 0.0  ;;  %v6820_v21 = vsel %vm2003_vm7, %v5700_v54, %v6819_v42  ;;  %v5729_v54 = vmax.f32 %v14577_v47, 0.0  ;;  %v11959_v8 = vpack.c.bf16 %v10066_v13, %v10065_v10 }
 0x844   :  { %v5708_v55 = vrot.slane %v5707_v48, 1  ;;  %v5732_v43 = vmax.f32 %v14596_v45, 0.0  ;;  %v5734_v26 = vmax.f32 %v14608_v60, 0.0  ;;  %v5735_v63 = vmax.f32 %v14606_v28, 0.0 }
 0x845   :  { %v5812_v20 = vsel %vm2003_vm7, %v5774_v25, %v5811_v40  ;;  %v5737_v33 = vmax.f32 %v14629_v11, 0.0  ;;  %v5738_v46 = vmax.f32 %v14649_v37, 0.0  ;;  %v5739_v44 = vmax.f32 %v14644_v34, 0.0  ;;  %v15898_v40 = vld [vmem:[#allocation10_spill] sm:$0xff] }
 0x846   :  { %v5709_v0 = vmax.f32 %v5707_v48, %v5708_v55  ;;  %v5733_v48 = vmax.f32 %v14594_v27, 0.0  ;;  %v5736_v55 = vmax.f32 %v14635_v3, 0.0  ;;  %v5740_v38 = vmax.f32 %v14667_v52, 0.0 }
 0x847   :  { %v5741_v25 = vmax.f32 %v14662_v14, 0.0  ;;  %v5742_v18 = vmax.f32 %v14681_v41, 0.0  ;;  %v5744_v42 = vmax.f32 %v14691_v51, 0.0  ;;  %v5745_v24 = vmax.f32 %v14687_v5, 0.0 }
 0x848   :  { %v6821_v50 = vsel %vm2005_vm8, %v5709_v0, %v6820_v21  ;;  %v5775_v19 = vmax.f32 %v5709_v0, 0.0  ;;  %v5743_v0 = vmax.f32 %v14676_v17, 0.0  ;;  %v5746_v30 = vmax.f32 %v14702_v58, 0.0 }
 0x849   :  { %11560 = vmatmul.mubr.msk.f32.vlgmr.msra.gmra.mrb[114].mxu0 %vm1108_vm1, %v6821_v50  ;;  %v5747_v7 = vmax.f32 %v14695_v1, 0.0  ;;  %v5748_v21 = vmax.f32 %v14712_v16, 0.0  ;;  %v5749_v39 = vmax.f32 %v14710_v59, 0.0  ;;  %v5750_v50 = vmax.f32 %v14752_v62, 0.0 }
 0x84a   :  { %v5813_v35 = vsel %vm2005_vm8, %v5775_v19, %v5812_v20  ;;  %v5751_v19 = vmax.f32 %v14735_v12, 0.0  ;;  %v5752_v20 = vmax.f32 %v15898_v40, 0.0  ;;  %v5755_v29 = vmax.f32 %v14791_v4, 0.0 }
 0x84b   :  { %11437 = vmatmul.mubr.msk.f32.vlgmr.msra.gmra.mrb[86].mxu1 %vm1108_vm1, %v5813_v35  ;;  %v5754_v35 = vmax.f32 %v14801_v49, 0.0  ;;  %v5756_v36 = vmax.f32 %v14813_v32, 0.0  ;;  %v5758_v10 = vmax.f32 %v14827_v23, 0.0  ;;  %v5759_v13 = vmax.f32 %v14822_v56, 0.0 }
 0x84c   :  { %11950 = vmatpush3.bf16.msra.mxu1 %v14562_v6  ;;  %11447 = vmatprep.mubr.msk.f32.mxu1 %vm1108_vm1, %v5728_v53  ;;  %v5731_v6 = vmax.f32 %v14586_v31, 0.0 }
 0x84d   :  { %11952 = vmatprep.subr.bf16.mxu1 %v11951_v22 }
 0x850   :  { %11954 = vmatpush3.bf16.msra.mxu1 %v11951_v22  ;;  %v15899_v22 = vld [vmem:[#allocation7_spill] sm:$0xff] }
 0x851   :  { %11956 = vmatprep.subr.bf16.mxu1 %v11955_v9  ;;  %v5753_v53 = vmax.f32 %v15899_v22, 0.0 }
 0x853   :  { %11448 = vmatmul.mubr.msk.f32.vlgmr.msra.gmra.mrb[88].mxu1 %vm1108_vm1, %v5729_v54  ;;  %v10019_v54 = vld [vmem:[%s15813_s7 + $0xc0] sm:$0xff] }
 0x854   :  { %11450 = vmatprep.mubr.msk.f32.mxu1 %vm1108_vm1, %v5730_v2  ;;  %11958 = vmatpush3.bf16.msra.mxu1 %v11955_v9  ;;  %v5757_v9 = vmax.f32 %v14810_v61, 0.0 }
 0x855   :  { %11960 = vmatprep.subr.bf16.mxu1 %v11959_v8 }
 0x857   :  { %11451 = vmatmul.mubr.msk.f32.gmra.mrb[90].mxu1 %vm1108_vm1, %v5731_v6 }
 0x858   :  { %11453 = vmatprep.mubr.msk.f32.mxu1 %vm1108_vm1, %v5732_v43  ;;  %11962 = vmatpush3.bf16.msra.mxu1 %v11959_v8  ;;  %v10020_v8 = vld [vmem:[%s15813_s7 + $0xc8] sm:$0xff] }
 0x859   :  { %v11971_v2 = vpack.c.bf16 %v10020_v8, %v10019_v54 }
 0x85b   :  { %11454 = vmatmul.mubr.msk.f32.gmra.mrb[92].mxu1 %vm1108_vm1, %v5733_v48  ;;  %11972 = vmatprep.subr.bf16.mxu1 %v11971_v2  ;;  %v10028_v48 = vld [vmem:[%s15810_s4 + $0x3] ss:$0 sm:$0xff] }
 0x85c   :  { %11456 = vmatprep.mubr.msk.f32.mxu1 %vm1108_vm1, %v5734_v26 }
 0x85f   :  { %11457 = vmatmul.mubr.msk.f32.gmra.mrb[94].mxu1 %vm1108_vm1, %v5735_v63 }
 0x860   :  { %11459 = vmatprep.mubr.msk.f32.mxu1 %vm1108_vm1, %v5736_v55 }
 0x863   :  { %11460 = vmatmul.mubr.msk.f32.gmra.mrb[96].mxu1 %vm1108_vm1, %v5737_v33  ;;  %v15900_v33 = vld [vmem:[#allocation23_spill] sm:$0xff] }
 0x864   :  { %11462 = vmatprep.mubr.msk.f32.mxu1 %vm1108_vm1, %v5738_v46 }
 0x867   :  { %11463 = vmatmul.mubr.msk.f32.gmra.mrb[98].mxu1 %vm1108_vm1, %v5739_v44 }
 0x868   :  { %11465 = vmatprep.mubr.msk.f32.mxu1 %vm1108_vm1, %v5740_v38 }
 0x86b   :  { %11466 = vmatmul.mubr.msk.f32.gmra.mrb[100].mxu1 %vm1108_vm1, %v5741_v25 }
 0x86c   :  { %11468 = vmatprep.mubr.msk.f32.mxu1 %vm1108_vm1, %v5742_v18 }
 0x86f   :  { %11469 = vmatmul.mubr.msk.f32.gmra.mrb[102].mxu1 %vm1108_vm1, %v5743_v0 }
 0x870   :  { %11471 = vmatprep.mubr.msk.f32.mxu1 %vm1108_vm1, %v5744_v42  ;;  %v15901_v42 = vld [vmem:[#allocation5_spill] sm:$0xff] }
 0x873   :  { %11472 = vmatmul.mubr.msk.f32.gmra.mrb[104].mxu1 %vm1108_vm1, %v5745_v24 }
 0x874   :  { %11474 = vmatprep.mubr.msk.f32.mxu1 %vm1108_vm1, %v5746_v30 }
 0x877   :  { %11475 = vmatmul.mubr.msk.f32.gmra.mrb[106].mxu1 %vm1108_vm1, %v5747_v7 }
 0x878   :  { %11477 = vmatprep.mubr.msk.f32.mxu1 %vm1108_vm1, %v5748_v21 }
 0x87b   :  { %11478 = vmatmul.mubr.msk.f32.gmra.mrb[108].mxu1 %vm1108_vm1, %v5749_v39 }
 0x87c   :  { %11480 = vmatprep.mubr.msk.f32.mxu1 %vm1108_vm1, %v5750_v50 }
 0x87f   :  { %11481 = vmatmul.mubr.msk.f32.gmra.mrb[110].mxu1 %vm1108_vm1, %v5751_v19 }
 0x880   :  { %11483 = vmatprep.mubr.msk.f32.mxu1 %vm1108_vm1, %v5752_v20  ;;  %v10021_v20 = vld [vmem:[%s15813_s7 + $0xd0] sm:$0xff] }
 0x883   :  { %11484 = vmatmul.mubr.msk.f32.gmra.mrb[112].mxu1 %vm1108_vm1, %v5753_v53  ;;  %v10022_v53 = vld [vmem:[%s15813_s7 + $0xd8] sm:$0xff] }
 0x884   :  { %11486 = vmatprep.mubr.msk.f32.mxu1 %vm1108_vm1, %v5754_v35 }
 0x887   :  { %11487 = vmatmul.mubr.msk.f32.gmra.mrb[114].mxu1 %vm1108_vm1, %v5755_v29 }
 0x888   :  { %11489 = vmatprep.mubr.msk.f32.mxu1 %vm1108_vm1, %v5756_v36 }
 0x88b   :  { %11490 = vmatmul.mubr.msk.f32.gmra.mrb[116].mxu1 %vm1108_vm1, %v5757_v9 }
 0x88c   :  { %11492 = vmatprep.mubr.msk.f32.mxu1 %vm1108_vm1, %v5758_v10 }
 0x88f   :  { %11493 = vmatmul.mubr.msk.f32.gmra.mrb[118].mxu1 %vm1108_vm1, %v5759_v13 }
 0x91c   :  { %v14936_v6 = vpop.f32.mrb[114].mxu0 }
 0x91d   :  { %v14938_v43 = vpop.f32.mrb[115].mxu0 }
 0x91e   :  { %v11438_v26 = vpop.f32.mrb[86].mxu1 }
 0x91f   :  { %v5884_v63 = vpop.f32.mrb[87].mxu1 }
 0x920   :  { %v5885_v55 = vadd.f32 %v10028_v48, %v5884_v63  ;;  %v11975_v63 = vpack.c.bf16 %v10022_v53, %v10021_v20 }
 0x922   :  { %v6223_v46 = vrot.slane %v5885_v55, %v15900_v33  ;;  %v6216_v30 = vcombine.high %v5885_v55, %v5885_v55 }
 0x924   :  { %v6231_v44 = vcombine.high %v6223_v46, %v6223_v46  ;;  %v6239_v25 = vrot.slane %v6223_v46, %v15900_v33  ;;  %v6230_v13 = vrot.slane %v6216_v30, %v15900_v33 }
 0x926   :  { %v11449_v38 = vpop.f32.mrb[88].mxu1  ;;  %v6253_v0 = vrot.slane %v6231_v44, %v15900_v33  ;;  %v6317_v24 = vrot.slane %v6239_v25, %v15901_v42  ;;  %v6261_v21 = vcombine.high %v6239_v25, %v6239_v25  ;;  %v6246_v30 = vrot.slane %v6230_v13, %v15900_v33 }
 0x927   :  { %v6055_v18 = vpop.f32.mrb[89].mxu1 }
 0x928   :  { %v6321_v7 = vrot.slane %v6253_v0, %v15901_v42  ;;  %v6395_v39 = vadd.f32 %v11449_v38, %v6317_v24  ;;  %v6394_v50 = vadd.f32 %v6317_v24, %v6055_v18  ;;  %v6325_v54 = vrot.slane %v6261_v21, %v15901_v42 }
 0x929   :  { %v6263_v8 = vcombine.high %v6253_v0, %v6253_v0  ;;  %v6333_v20 = vrot.slane %v6246_v30, %v15901_v42 }
 0x92a   :  { %v11452_v19 = vpop.f32.mrb[90].mxu1  ;;  %v6427_v36 = vmax.f32 %v6395_v39, 0.0  ;;  %v6426_v9 = vmax.f32 %v6394_v50, 0.0 }
 0x92b   :  { %v6397_v35 = vadd.f32 %v11452_v19, %v6321_v7  ;;  %v6065_v29 = vpop.f32.mrb[91].mxu1  ;;  %v6329_v24 = vrot.slane %v6263_v8, %v15901_v42 }
 0x92c   :  { %v6396_v10 = vadd.f32 %v6321_v7, %v6065_v29  ;;  %11503 = vmatprep.mubr.msk.f32.mxu1 %vm1108_vm1, %v6426_v9  ;;  %v6232_v7 = vcombine.high %v6230_v13, %v6230_v13  ;;  %v5890_v13 = vadd.f32 %v11438_v26, %v10028_v48 }
 0x92d   :  { %11504 = vmatmul.mubr.msk.f32.vlgmr.msra.gmra.mrb[120].mxu1 %vm1108_vm1, %v6427_v36  ;;  %v6429_v18 = vmax.f32 %v6397_v35, 0.0 }
 0x92e   :  { %v6428_v55 = vmax.f32 %v6396_v10, 0.0  ;;  %v11455_v46 = vpop.f32.mrb[92].mxu1  ;;  %11974 = vmatpush3.bf16.msra.mxu1 %v11971_v2  ;;  %v6260_v53 = vrot.slane %v6232_v7, %v15900_v33 }
 0x92f   :  { %v6399_v44 = vadd.f32 %v11455_v46, %v6325_v54  ;;  %v6075_v38 = vpop.f32.mrb[93].mxu1  ;;  %11976 = vmatprep.subr.bf16.mxu1 %v11975_v63 }
 0x930   :  { %v6398_v25 = vadd.f32 %v6325_v54, %v6075_v38  ;;  %11506 = vmatprep.mubr.msk.f32.mxu1 %vm1108_vm1, %v6428_v55  ;;  %v6337_v8 = vrot.slane %v6260_v53, %v15901_v42  ;;  %v6262_v55 = vcombine.high %v6246_v30, %v6246_v30 }
 0x931   :  { %11507 = vmatmul.mubr.msk.f32.gmra.mrb[122].mxu1 %vm1108_vm1, %v6429_v18  ;;  %v6431_v2 = vmax.f32 %v6399_v44, 0.0  ;;  %v6272_v18 = vrot.slane %v5890_v13, %v15900_v33 }
 0x932   :  { %v6430_v0 = vmax.f32 %v6398_v25, 0.0  ;;  %v11458_v21 = vpop.f32.mrb[94].mxu1  ;;  %11978 = vmatpush3.bf16.msra.mxu1 %v11975_v63  ;;  %v6341_v7 = vrot.slane %v6262_v55, %v15901_v42 }
 0x933   :  { %v6401_v39 = vadd.f32 %v11458_v21, %v6329_v24  ;;  %v6085_v50 = vpop.f32.mrb[95].mxu1 }
 0x934   :  { %v6400_v19 = vadd.f32 %v6329_v24, %v6085_v50  ;;  %11509 = vmatprep.mubr.msk.f32.mxu1 %vm1108_vm1, %v6430_v0  ;;  %v6264_v0 = vcombine.high %v6260_v53, %v6260_v53  ;;  %v6280_v50 = vcombine.high %v6272_v18, %v6272_v18 }
 0x935   :  { %11510 = vmatmul.mubr.msk.f32.gmra.mrb[124].mxu1 %vm1108_vm1, %v6431_v2  ;;  %v6433_v54 = vmax.f32 %v6401_v39, 0.0 }
 0x936   :  { %v6432_v35 = vmax.f32 %v6400_v19, 0.0  ;;  %v11461_v29 = vpop.f32.mrb[96].mxu1  ;;  %v6345_v2 = vrot.slane %v6264_v0, %v15901_v42 }
 0x937   :  { %v6403_v36 = vadd.f32 %v11461_v29, %v6333_v20  ;;  %v6095_v9 = vpop.f32.mrb[97].mxu1 }
 0x938   :  { %v6402_v10 = vadd.f32 %v6333_v20, %v6095_v9  ;;  %11512 = vmatprep.mubr.msk.f32.mxu1 %vm1108_vm1, %v6432_v35  ;;  %v6288_v20 = vrot.slane %v6272_v18, %v15900_v33 }
 0x939   :  { %11513 = vmatmul.mubr.msk.f32.gmra.mrb[126].mxu1 %vm1108_vm1, %v6433_v54  ;;  %v6435_v24 = vmax.f32 %v6403_v36, 0.0 }
 0x93a   :  { %v6434_v63 = vmax.f32 %v6402_v10, 0.0  ;;  %v11464_v46 = vpop.f32.mrb[98].mxu1  ;;  %v6349_v54 = vrot.slane %v6288_v20, %v15901_v42 }
 0x93b   :  { %v6405_v44 = vadd.f32 %v11464_v46, %v6337_v8  ;;  %v6105_v38 = vpop.f32.mrb[99].mxu1 }
 0x93c   :  { %v6404_v25 = vadd.f32 %v6337_v8, %v6105_v38  ;;  %11515 = vmatprep.mubr.msk.f32.mxu1 %vm1108_vm1, %v6434_v63  ;;  %v6302_v8 = vrot.slane %v6280_v50, %v15900_v33 }
 0x93d   :  { %11516 = vmatmul.mubr.msk.f32.gmra.mrb[128].mxu1 %vm1108_vm1, %v6435_v24  ;;  %v6437_v19 = vmax.f32 %v6405_v44, 0.0 }
 0x93e   :  { %v6436_v48 = vmax.f32 %v6404_v25, 0.0  ;;  %v11467_v26 = vpop.f32.mrb[100].mxu1  ;;  %v6265_v25 = vcombine.high %v5890_v13, %v5890_v13  ;;  %v6353_v24 = vrot.slane %v6302_v8, %v15901_v42 }
 0x93f   :  { %v6407_v21 = vadd.f32 %v11467_v26, %v6341_v7  ;;  %v6115_v30 = vpop.f32.mrb[101].mxu1 }
 0x940   :  { %v6406_v39 = vadd.f32 %v6341_v7, %v6115_v30  ;;  %11518 = vmatprep.mubr.msk.f32.mxu1 %vm1108_vm1, %v6436_v48  ;;  %v6310_v7 = vcombine.high %v6288_v20, %v6288_v20 }
 0x941   :  { %11519 = vmatmul.mubr.msk.f32.gmra.mrb[130].mxu1 %vm1108_vm1, %v6437_v19  ;;  %v6439_v10 = vmax.f32 %v6407_v21, 0.0 }
 0x942   :  { %v6438_v35 = vmax.f32 %v6406_v39, 0.0  ;;  %v11470_v29 = vpop.f32.mrb[102].mxu1  ;;  %v6279_v39 = vrot.slane %v6265_v25, %v15900_v33  ;;  %v6357_v19 = vrot.slane %v6310_v7, %v15901_v42 }
 0x943   :  { %v6409_v36 = vadd.f32 %v11470_v29, %v6345_v2  ;;  %v6125_v53 = vpop.f32.mrb[103].mxu1 }
 0x944   :  { %v6408_v9 = vadd.f32 %v6345_v2, %v6125_v53  ;;  %11521 = vmatprep.mubr.msk.f32.mxu1 %vm1108_vm1, %v6438_v35  ;;  %v6312_v2 = vcombine.high %v6302_v8, %v6302_v8 }
 0x945   :  { %11522 = vmatmul.mubr.msk.f32.gmra.mrb[132].mxu1 %vm1108_vm1, %v6439_v10  ;;  %v6441_v18 = vmax.f32 %v6409_v36, 0.0  ;;  %v6295_v10 = vrot.slane %v6279_v39, %v15900_v33 }
 0x946   :  { %v6440_v55 = vmax.f32 %v6408_v9, 0.0  ;;  %v11473_v63 = vpop.f32.mrb[104].mxu1  ;;  %v6361_v9 = vrot.slane %v6312_v2, %v15901_v42 }
 0x947   :  { %v6411_v46 = vadd.f32 %v11473_v63, %v6349_v54  ;;  %v6135_v44 = vpop.f32.mrb[105].mxu1  ;;  %v6365_v25 = vrot.slane %v6295_v10, %v15901_v42 }
 0x948   :  { %v6410_v38 = vadd.f32 %v6349_v54, %v6135_v44  ;;  %11524 = vmatprep.mubr.msk.f32.mxu1 %vm1108_vm1, %v6440_v55  ;;  %v6281_v54 = vcombine.high %v6279_v39, %v6279_v39  ;;  %v6311_v39 = vcombine.high %v6295_v10, %v6295_v10 }
 0x949   :  { %11525 = vmatmul.mubr.msk.f32.gmra.mrb[134].mxu1 %vm1108_vm1, %v6441_v18  ;;  %v6443_v50 = vmax.f32 %v6411_v46, 0.0 }
 0x94a   :  { %v6442_v0 = vmax.f32 %v6410_v38, 0.0  ;;  %v11476_v48 = vpop.f32.mrb[106].mxu1  ;;  %v6309_v18 = vrot.slane %v6281_v54, %v15900_v33 }
 0x94b   :  { %v6413_v26 = vadd.f32 %v11476_v48, %v6353_v24  ;;  %v6145_v21 = vpop.f32.mrb[107].mxu1 }
 0x94c   :  { %v6412_v30 = vadd.f32 %v6353_v24, %v6145_v21  ;;  %11527 = vmatprep.mubr.msk.f32.mxu1 %vm1108_vm1, %v6442_v0 }
 0x94d   :  { %11528 = vmatmul.mubr.msk.f32.gmra.mrb[136].mxu1 %vm1108_vm1, %v6443_v50  ;;  %v6445_v53 = vmax.f32 %v6413_v26, 0.0 }
 0x94e   :  { %v6444_v13 = vmax.f32 %v6412_v30, 0.0  ;;  %v11479_v35 = vpop.f32.mrb[108].mxu1  ;;  %v6369_v30 = vrot.slane %v6309_v18, %v15901_v42 }
 0x94f   :  { %v6415_v29 = vadd.f32 %v11479_v35, %v6357_v19  ;;  %v6155_v20 = vpop.f32.mrb[109].mxu1 }
 0x950   :  { %v6414_v36 = vadd.f32 %v6357_v19, %v6155_v20  ;;  %11530 = vmatprep.mubr.msk.f32.mxu1 %vm1108_vm1, %v6444_v13  ;;  %v6373_v20 = vrot.slane %v6311_v39, %v15901_v42 }
 0x951   :  { %11531 = vmatmul.mubr.msk.f32.gmra.mrb[138].mxu1 %vm1108_vm1, %v6445_v53  ;;  %v6447_v38 = vmax.f32 %v6415_v29, 0.0 }
 0x952   :  { %v6446_v55 = vmax.f32 %v6414_v36, 0.0  ;;  %v11482_v63 = vpop.f32.mrb[110].mxu1  ;;  %v6313_v36 = vcombine.high %v6309_v18, %v6309_v18 }
 0x953   :  { %v6417_v46 = vadd.f32 %v11482_v63, %v6361_v9  ;;  %v6165_v8 = vpop.f32.mrb[111].mxu1 }
 0x954   :  { %v6416_v44 = vadd.f32 %v6361_v9, %v6165_v8  ;;  %11533 = vmatprep.mubr.msk.f32.mxu1 %vm1108_vm1, %v6446_v55 }
 0x955   :  { %11534 = vmatmul.mubr.msk.f32.gmra.mrb[140].mxu1 %vm1108_vm1, %v6447_v38  ;;  %v6449_v21 = vmax.f32 %v6417_v46, 0.0  ;;  %v6377_v46 = vrot.slane %v6313_v36, %v15901_v42 }
 0x956   :  { %v6448_v24 = vmax.f32 %v6416_v44, 0.0  ;;  %v11485_v7 = vpop.f32.mrb[112].mxu1 }
 0x957   :  { %v6419_v0 = vadd.f32 %v11485_v7, %v6365_v25  ;;  %v6175_v48 = vpop.f32.mrb[113].mxu1 }
 0x958   :  { %v6418_v26 = vadd.f32 %v6365_v25, %v6175_v48  ;;  %11536 = vmatprep.mubr.msk.f32.mxu1 %vm1108_vm1, %v6448_v24 }
 0x959   :  { %11537 = vmatmul.mubr.msk.f32.gmra.mrb[142].mxu1 %vm1108_vm1, %v6449_v21  ;;  %v6451_v29 = vmax.f32 %v6419_v0, 0.0 }
 0x95a   :  { %v6450_v50 = vmax.f32 %v6418_v26, 0.0  ;;  %v11488_v19 = vpop.f32.mrb[114].mxu1 }
 0x95b   :  { %v6421_v2 = vadd.f32 %v11488_v19, %v6369_v30  ;;  %v6185_v13 = vpop.f32.mrb[115].mxu1 }
 0x95c   :  { %v6420_v35 = vadd.f32 %v6369_v30, %v6185_v13  ;;  %11539 = vmatprep.mubr.msk.f32.mxu1 %vm1108_vm1, %v6450_v50 }
 0x95d   :  { %11540 = vmatmul.mubr.msk.f32.gmra.mrb[144].mxu1 %vm1108_vm1, %v6451_v29  ;;  %v6453_v63 = vmax.f32 %v6421_v2, 0.0 }
 0x95e   :  { %v6452_v53 = vmax.f32 %v6420_v35, 0.0  ;;  %v11491_v9 = vpop.f32.mrb[116].mxu1 }
 0x95f   :  { %v6423_v54 = vadd.f32 %v11491_v9, %v6373_v20  ;;  %v6195_v55 = vpop.f32.mrb[117].mxu1 }
 0x960   :  { %v6422_v10 = vadd.f32 %v6373_v20, %v6195_v55  ;;  %11542 = vmatprep.mubr.msk.f32.mxu1 %vm1108_vm1, %v6452_v53 }
 0x961   :  { %11543 = vmatmul.mubr.msk.f32.gmra.mrb[146].mxu1 %vm1108_vm1, %v6453_v63  ;;  %v6455_v18 = vmax.f32 %v6423_v54, 0.0 }
 0x962   :  { %v6454_v8 = vmax.f32 %v6422_v10, 0.0  ;;  %v11494_v44 = vpop.f32.mrb[118].mxu1 }
 0x963   :  { %v6425_v38 = vadd.f32 %v11494_v44, %v6377_v46  ;;  %v6205_v25 = vpop.f32.mrb[119].mxu1 }
 0x964   :  { %v6424_v24 = vadd.f32 %v6377_v46, %v6205_v25  ;;  %11545 = vmatprep.mubr.msk.f32.mxu1 %vm1108_vm1, %v6454_v8 }
 0x965   :  { %11546 = vmatmul.mubr.msk.f32.gmra.mrb[148].mxu1 %vm1108_vm1, %v6455_v18  ;;  %v6457_v0 = vmax.f32 %v6425_v38, 0.0 }
 0x966   :  { %v6456_v7 = vmax.f32 %v6424_v24, 0.0 }
 0x968   :  { %11548 = vmatprep.mubr.msk.f32.mxu1 %vm1108_vm1, %v6456_v7 }
 0x969   :  { %11549 = vmatmul.mubr.msk.f32.gmra.mrb[150].mxu1 %vm1108_vm1, %v6457_v0 }
 0x96a   :  { %11570 = vmatprep.mubr.msk.f32.mxu1 %vm1108_vm1, %v14581_v15  ;;  %v10148_v15 = vld [vmem:[%s15813_s7 + $0x128] sm:$0xff] }
 0x96d   :  { %11571 = vmatmul.mubr.msk.f32.vlgmr.msra.gmra.mrb[120].mxu1 %vm1108_vm1, %v14577_v47  ;;  %v10147_v47 = vld [vmem:[%s15813_s7 + $0x120] sm:$0xff] }
 0x96e   :  { %11573 = vmatprep.mubr.msk.f32.mxu1 %vm1108_vm1, %v14589_v57  ;;  %v12003_v57 = vpack.c.bf16 %v10148_v15, %v10147_v47 }
 0x970   :  { %12004 = vmatprep.subr.bf16.mxu1 %v12003_v57 }
 0x971   :  { %11574 = vmatmul.mubr.msk.f32.gmra.mrb[122].mxu1 %vm1108_vm1, %v14586_v31  ;;  %v10139_v31 = vld [vmem:[%s15809_s3 + $0x120] sm:$0xff] }
 0x972   :  { %11576 = vmatprep.mubr.msk.f32.mxu1 %vm1108_vm1, %v14596_v45  ;;  %v10149_v45 = vld [vmem:[%s15813_s7 + $0x130] sm:$0xff]  ;;  %12006 = vmatpush3.bf16.msra.mxu1 %v12003_v57 }
 0x975   :  { %11577 = vmatmul.mubr.msk.f32.gmra.mrb[124].mxu1 %vm1108_vm1, %v14594_v27  ;;  %v10140_v27 = vld [vmem:[%s15809_s3 + $0x128] sm:$0xff] }
 0x976   :  { %11579 = vmatprep.mubr.msk.f32.mxu1 %vm1108_vm1, %v14608_v60  ;;  %v11979_v60 = vpack.c.bf16 %v10140_v27, %v10139_v31 }
 0x978   :  { %11980 = vmatprep.subr.bf16.mxu0 %v11979_v60 }
 0x979   :  { %11580 = vmatmul.mubr.msk.f32.gmra.mrb[126].mxu1 %vm1108_vm1, %v14606_v28  ;;  %v10150_v28 = vld [vmem:[%s15813_s7 + $0x138] sm:$0xff]  ;;  %11982 = vmatpush3.bf16.msra.mxu0 %v11979_v60 }
 0x97a   :  { %11582 = vmatprep.mubr.msk.f32.mxu1 %vm1108_vm1, %v14635_v3  ;;  %v10141_v3 = vld [vmem:[%s15809_s3 + $0x130] sm:$0xff] }
 0x97d   :  { %11583 = vmatmul.mubr.msk.f32.gmra.mrb[128].mxu1 %vm1108_vm1, %v14629_v11  ;;  %v12007_v11 = vpack.c.bf16 %v10150_v28, %v10149_v45  ;;  %v7273_v45 = vcombine.high %v14936_v6, %v14936_v6  ;;  %v7280_v28 = vrot.slane %v14936_v6, %v15900_v33 }
 0x97e   :  { %11585 = vmatprep.mubr.msk.f32.mxu1 %vm1108_vm1, %v14649_v37 }
 0x97f   :  { %12008 = vmatprep.subr.bf16.mxu1 %v12007_v11 }
 0x980   :  { %12010 = vmatpush3.bf16.msra.mxu1 %v12007_v11 }
 0x981   :  { %11586 = vmatmul.mubr.msk.f32.gmra.mrb[130].mxu1 %vm1108_vm1, %v14644_v34  ;;  %v10142_v34 = vld [vmem:[%s15809_s3 + $0x138] sm:$0xff] }
 0x982   :  { %11588 = vmatprep.mubr.msk.f32.mxu1 %vm1108_vm1, %v14667_v52  ;;  %v11983_v37 = vpack.c.bf16 %v10142_v34, %v10141_v3  ;;  %v10136_v52 = vld [vmem:[%s15809_s3 + $0x108] sm:$0xff] }
 0x984   :  { %11984 = vmatprep.subr.bf16.mxu0 %v11983_v37 }
 0x985   :  { %11589 = vmatmul.mubr.msk.f32.gmra.mrb[132].mxu1 %vm1108_vm1, %v14662_v14  ;;  %v10135_v14 = vld [vmem:[%s15809_s3 + $0x100] sm:$0xff]  ;;  %11986 = vmatpush3.bf16.msra.mxu0 %v11983_v37 }
 0x986   :  { %11591 = vmatprep.mubr.msk.f32.mxu1 %vm1108_vm1, %v14681_v41  ;;  %v7231_v41 = vrot.slane %v14938_v43, %v15900_v33 }
 0x989   :  { %11592 = vmatmul.mubr.msk.f32.gmra.mrb[134].mxu1 %vm1108_vm1, %v14676_v17  ;;  %v15103_v17 = vpack.c.bf16 %v10136_v52, %v10135_v14 }
 0x98a   :  { %11594 = vmatprep.mubr.msk.f32.mxu1 %vm1108_vm1, %v14691_v51  ;;  %v7247_v51 = vrot.slane %v7231_v41, %v15900_v33 }
 0x98b   :  { %11988 = vmatprep.subr.bf16.mxu0 %v15103_v17 }
 0x98d   :  { %11595 = vmatmul.mubr.msk.f32.gmra.mrb[136].mxu1 %vm1108_vm1, %v14687_v5  ;;  %v7239_v5 = vcombine.high %v7231_v41, %v7231_v41 }
 0x98e   :  { %11597 = vmatprep.mubr.msk.f32.mxu1 %vm1108_vm1, %v14702_v58 }
 0x991   :  { %11598 = vmatmul.mubr.msk.f32.gmra.mrb[138].mxu1 %vm1108_vm1, %v14695_v1  ;;  %v15112_v1 = vld [vmem:[%s15812_s6 + $0x3] ss:$0 sm:$0xff] }
 0x992   :  { %11600 = vmatprep.mubr.msk.f32.mxu1 %vm1108_vm1, %v14712_v16  ;;  %v7325_v16 = vrot.slane %v7247_v51, %v15901_v42 }
 0x995   :  { %11601 = vmatmul.mubr.msk.f32.gmra.mrb[140].mxu1 %vm1108_vm1, %v14710_v59  ;;  %v7261_v59 = vrot.slane %v7239_v5, %v15900_v33 }
 0x996   :  { %11603 = vmatprep.mubr.msk.f32.mxu1 %vm1108_vm1, %v14752_v62 }
 0x997   :  { %v7271_v13 = vcombine.high %v7261_v59, %v7261_v59 }
 0x999   :  { %11604 = vmatmul.mubr.msk.f32.gmra.mrb[142].mxu1 %vm1108_vm1, %v14735_v12  ;;  %v7337_v54 = vrot.slane %v7271_v13, %v15901_v42 }
 0x99a   :  { %11606 = vmatprep.mubr.msk.f32.mxu1 %vm1108_vm1, %v15898_v40  ;;  %v7329_v40 = vrot.slane %v7261_v59, %v15901_v42 }
 0x99d   :  { %11607 = vmatmul.mubr.msk.f32.gmra.mrb[144].mxu1 %vm1108_vm1, %v15899_v22 }
 0x99e   :  { %11609 = vmatprep.mubr.msk.f32.mxu1 %vm1108_vm1, %v14801_v49 }
 0x9a1   :  { %11610 = vmatmul.mubr.msk.f32.gmra.mrb[146].mxu1 %vm1108_vm1, %v14791_v4 }
 0x9a2   :  { %11612 = vmatprep.mubr.msk.f32.mxu1 %vm1108_vm1, %v14813_v32 }
 0x9a5   :  { %11613 = vmatmul.mubr.msk.f32.gmra.mrb[148].mxu1 %vm1108_vm1, %v14810_v61  ;;  %v7224_v61 = vcombine.high %v14938_v43, %v14938_v43 }
 0x9a6   :  { %11615 = vmatprep.mubr.msk.f32.mxu1 %vm1108_vm1, %v14827_v23  ;;  %v7269_v23 = vcombine.high %v7247_v51, %v7247_v51 }
 0x9a7   :  { %v7238_v30 = vrot.slane %v7224_v61, %v15900_v33 }
 0x9a8   :  { %v7333_v43 = vrot.slane %v7269_v23, %v15901_v42 }
 0x9a9   :  { %11616 = vmatmul.mubr.msk.f32.gmra.mrb[150].mxu1 %vm1108_vm1, %v14822_v56  ;;  %v7240_v20 = vcombine.high %v7238_v30, %v7238_v30  ;;  %v7254_v9 = vrot.slane %v7238_v30, %v15900_v33 }
 0x9ab   :  { %v7268_v24 = vrot.slane %v7240_v20, %v15900_v33  ;;  %v7341_v27 = vrot.slane %v7254_v9, %v15901_v42  ;;  %v7270_v52 = vcombine.high %v7254_v9, %v7254_v9  ;;  %v7296_v9 = vrot.slane %v7280_v28, %v15900_v33 }
 0x9ad   :  { %v7345_v51 = vrot.slane %v7268_v24, %v15901_v42 }
 0xa40   :  { %v11572_v58 = vpop.f32.mrb[120].mxu1 }
 0xa41   :  { %v12191_v12 = vadd.f32 %v11572_v58, %v15112_v1  ;;  %v7063_v62 = vpop.f32.mrb[121].mxu1 }
 0xa42   :  { %v12193_v4 = vadd.f32 %v15112_v1, %v7063_v62  ;;  %v15180_v62 = vrot.slane %v7273_v45, %v15900_v33 }
 0xa43   :  { %v15118_v49 = vadd.f32 %v12191_v12, %v7325_v16 }
 0xa44   :  { %v15122_v32 = vadd.f32 %v12193_v4, %v7325_v16  ;;  %v11575_v56 = vpop.f32.mrb[122].mxu1  ;;  %v7288_v4 = vcombine.high %v7280_v28, %v7280_v28 }
 0xa45   :  { %v12195_v22 = vadd.f32 %v11575_v56, %v15112_v1  ;;  %v7073_v48 = vpop.f32.mrb[123].mxu1  ;;  %v7467_v18 = vsel %vm1108_vm1, %v15118_v49, -inf }
 0xa46   :  { %v12197_v26 = vadd.f32 %v15112_v1, %v7073_v48  ;;  %v7466_v7 = vsel %vm1108_vm1, %v15122_v32, -inf  ;;  %v7349_v48 = vrot.slane %v7270_v52, %v15901_v42  ;;  %v15212_v45 = vrot.slane %v7288_v4, %v15900_v33 }
 0xa47   :  { %v15127_v21 = vadd.f32 %v12195_v22, %v7329_v40  ;;  %v7468_v3 = vmax.f32 %v7466_v7, %v7467_v18 }
 0xa48   :  { %v15130_v39 = vadd.f32 %v12197_v26, %v7329_v40  ;;  %v11578_v50 = vpop.f32.mrb[124].mxu1 }
 0xa49   :  { %v12199_v19 = vadd.f32 %v11578_v50, %v15112_v1  ;;  %v7083_v2 = vpop.f32.mrb[125].mxu1  ;;  %v7476_v10 = vsel %vm1108_vm1, %v15127_v21, -inf  ;;  %v7469_v56 = vrot.slane %v7468_v3, 4 }
 0xa4a   :  { %v12201_v35 = vadd.f32 %v15112_v1, %v7083_v2  ;;  %v7475_v63 = vsel %vm1108_vm1, %v15130_v39, -inf }
 0xa4b   :  { %v15135_v29 = vadd.f32 %v12199_v19, %v7333_v43  ;;  %v7477_v0 = vmax.f32 %v7475_v63, %v7476_v10  ;;  %v7272_v19 = vcombine.high %v7268_v24, %v7268_v24  ;;  %v15199_v10 = vrot.slane %v15180_v62, %v15900_v33 }
 0xa4c   :  { %v15137_v36 = vadd.f32 %v12201_v35, %v7333_v43  ;;  %v11581_v53 = vpop.f32.mrb[126].mxu1  ;;  %v7470_v63 = vmax.f32 %v7468_v3, %v7469_v56 }
 0xa4d   :  { %v7093_v55 = vpop.f32.mrb[127].mxu1  ;;  %v12203_v46 = vadd.f32 %v11581_v53, %v15112_v1  ;;  %v7485_v31 = vsel %vm1108_vm1, %v15135_v29, -inf  ;;  %v7478_v41 = vrot.slane %v7477_v0, 4  ;;  %v7289_v53 = vcombine.high %v15180_v62, %v15180_v62 }
 0xa4e   :  { %v12205_v8 = vadd.f32 %v15112_v1, %v7093_v55  ;;  %v7484_v57 = vsel %vm1108_vm1, %v15137_v36, -inf  ;;  %v7471_v3 = vrot.slane %v7470_v63, 2  ;;  %v7319_v62 = vcombine.high %v15199_v10, %v15199_v10 }
 0xa4f   :  { %v15147_v44 = vadd.f32 %v12203_v46, %v7337_v54  ;;  %v7486_v5 = vmax.f32 %v7484_v57, %v7485_v31  ;;  %v7479_v26 = vmax.f32 %v7477_v0, %v7478_v41  ;;  %v7353_v0 = vrot.slane %v7272_v19, %v15901_v42 }
 0xa50   :  { %v15149_v38 = vadd.f32 %v12205_v8, %v7337_v54  ;;  %v11584_v25 = vpop.f32.mrb[128].mxu1  ;;  %v7357_v41 = vrot.slane %v7296_v9, %v15901_v42 }
 0xa51   :  { %v12207_v47 = vadd.f32 %v11584_v25, %v15112_v1  ;;  %v7103_v15 = vpop.f32.mrb[129].mxu1  ;;  %v7494_v60 = vsel %vm1108_vm1, %v15147_v44, -inf  ;;  %v7487_v30 = vrot.slane %v7486_v5, 4  ;;  %v7480_v24 = vrot.slane %v7479_v26, 2 }
 0xa52   :  { %v7493_v11 = vsel %vm1108_vm1, %v15149_v38, -inf  ;;  %v12209_v37 = vadd.f32 %v15112_v1, %v7103_v15 }
 0xa53   :  { %v15170_v34 = vadd.f32 %v12207_v47, %v7341_v27  ;;  %v7495_v59 = vmax.f32 %v7493_v11, %v7494_v60  ;;  %v7488_v18 = vmax.f32 %v7486_v5, %v7487_v30  ;;  %v7481_v5 = vmax.f32 %v7479_v26, %v7480_v24 }
 0xa54   :  { %v11587_v14 = vpop.f32.mrb[130].mxu1  ;;  %v15176_v16 = vadd.f32 %v12209_v37, %v7341_v27 }
 0xa55   :  { %v7113_v58 = vpop.f32.mrb[131].mxu1  ;;  %v7503_v6 = vsel %vm1108_vm1, %v15170_v34, -inf  ;;  %v12211_v12 = vadd.f32 %v11587_v14, %v15112_v1  ;;  %v7496_v2 = vrot.slane %v7495_v59, 4 }
 0xa56   :  { %v12213_v61 = vadd.f32 %v15112_v1, %v7113_v58  ;;  %v7502_v23 = vsel %vm1108_vm1, %v15176_v16, -inf }
 0xa57   :  { %v15185_v40 = vadd.f32 %v12211_v12, %v7345_v51  ;;  %v7504_v50 = vmax.f32 %v7502_v23, %v7503_v6  ;;  %v7497_v15 = vmax.f32 %v7495_v59, %v7496_v2  ;;  %v7318_v23 = vcombine.high %v7296_v9, %v7296_v9 }
 0xa58   :  { %v11590_v22 = vpop.f32.mrb[132].mxu1  ;;  %v15190_v35 = vadd.f32 %v12213_v61, %v7345_v51  ;;  %v7489_v51 = vrot.slane %v7488_v18, 2  ;;  %v7361_v2 = vrot.slane %v15212_v45, %v15901_v42 }
 0xa59   :  { %v7123_v43 = vpop.f32.mrb[133].mxu1  ;;  %v7512_v13 = vsel %vm1108_vm1, %v15185_v40, -inf  ;;  %v12215_v20 = vadd.f32 %v11590_v22, %v15112_v1  ;;  %v7505_v54 = vrot.slane %v7504_v50, 4  ;;  %v7498_v12 = vrot.slane %v7497_v15, 2 }
 0xa5a   :  { %v12217_v55 = vadd.f32 %v15112_v1, %v7123_v43  ;;  %v7511_v46 = vsel %vm1108_vm1, %v15190_v35, -inf  ;;  %v7490_v9 = vmax.f32 %v7488_v18, %v7489_v51 }
 0xa5b   :  { %v15203_v8 = vadd.f32 %v12215_v20, %v7349_v48  ;;  %v7513_v7 = vmax.f32 %v7511_v46, %v7512_v13  ;;  %v7506_v28 = vmax.f32 %v7504_v50, %v7505_v54  ;;  %v7472_v50 = vmax.f32 %v7470_v63, %v7471_v3 }
 0xa5c   :  { %v11593_v25 = vpop.f32.mrb[134].mxu1  ;;  %v15208_v57 = vadd.f32 %v12217_v55, %v7349_v48  ;;  %v7482_v13 = vrot.slane %v7481_v5, 1  ;;  %v7365_v3 = vrot.slane %v7318_v23, %v15901_v42  ;;  %v7491_v51 = vrot.slane %v7490_v9, 1 }
 0xa5d   :  { %v7133_v47 = vpop.f32.mrb[135].mxu1  ;;  %v7521_v31 = vsel %vm1108_vm1, %v15203_v8, -inf  ;;  %v12219_v27 = vadd.f32 %v11593_v25, %v15112_v1  ;;  %v7514_v60 = vrot.slane %v7513_v7, 4  ;;  %v7507_v22 = vrot.slane %v7506_v28, 2 }
 0xa5e   :  { %v12221_v11 = vadd.f32 %v15112_v1, %v7133_v47  ;;  %v7520_v37 = vsel %vm1108_vm1, %v15208_v57, -inf  ;;  %v7499_v25 = vmax.f32 %v7497_v15, %v7498_v12  ;;  %v15241_v18 = vmax.f32 %v7481_v5, %v7482_v13 }
 0xa5f   :  { %v15217_v14 = vadd.f32 %v12219_v27, %v7353_v0  ;;  %v7515_v58 = vmax.f32 %v7513_v7, %v7514_v60  ;;  %v7522_v59 = vmax.f32 %v7520_v37, %v7521_v31  ;;  %v7508_v7 = vmax.f32 %v7506_v28, %v7507_v22 }
 0xa60   :  { %v11596_v52 = vpop.f32.mrb[136].mxu1  ;;  %v15222_v61 = vadd.f32 %v12221_v11, %v7353_v0  ;;  %v7473_v27 = vrot.slane %v7472_v50, 1  ;;  %v7320_v37 = vcombine.high %v15212_v45, %v15212_v45  ;;  %v7373_v23 = vrot.slane %v15199_v10, %v15901_v42 }
 0xa61   :  { %v7143_v6 = vpop.f32.mrb[137].mxu1  ;;  %v7530_v4 = vsel %vm1108_vm1, %v15217_v14, -inf  ;;  %v12223_v56 = vadd.f32 %v11596_v52, %v15112_v1  ;;  %v7523_v48 = vrot.slane %v7522_v59, 4  ;;  %v7516_v20 = vrot.slane %v7515_v58, 2 }
 0xa62   :  { %v12225_v30 = vadd.f32 %v15112_v1, %v7143_v6  ;;  %v7529_v26 = vsel %vm1108_vm1, %v15222_v61, -inf  ;;  %v15249_v22 = vmax.f32 %v7472_v50, %v7473_v27  ;;  %v15263_v50 = vmax.f32 %v7490_v9, %v7491_v51 }
 0xa63   :  { %v15228_v43 = vadd.f32 %v12223_v56, %v7357_v41  ;;  %v7524_v54 = vmax.f32 %v7522_v59, %v7523_v48  ;;  %v7531_v55 = vmax.f32 %v7529_v26, %v7530_v4  ;;  %v7517_v15 = vmax.f32 %v7515_v58, %v7516_v20 }
 0xa64   :  { %v11599_v19 = vpop.f32.mrb[138].mxu1  ;;  %v15232_v24 = vadd.f32 %v12225_v30, %v7357_v41  ;;  %v7500_v59 = vrot.slane %v7499_v25, 1  ;;  %v7509_v4 = vrot.slane %v7508_v7, 1  ;;  %v15259_v48 = vrot.slane %v7289_v53, %v15900_v33 }
 0xa65   :  { %v7153_v46 = vpop.f32.mrb[139].mxu1  ;;  %v12227_v63 = vadd.f32 %v11599_v19, %v15112_v1  ;;  %v7525_v0 = vrot.slane %v7524_v54, 2  ;;  %v7532_v47 = vrot.slane %v7531_v55, 4  ;;  %v7518_v30 = vrot.slane %v7517_v15, 1 }
 0xa66   :  { %v12229_v31 = vadd.f32 %v15112_v1, %v7153_v46  ;;  %v7369_v26 = vrot.slane %v7320_v37, %v15901_v42  ;;  %v15265_v20 = vmax.f32 %v7499_v25, %v7500_v59  ;;  %v15272_v53 = vmax.f32 %v7508_v7, %v7509_v4 }
 0xa67   :  { %v15236_v60 = vadd.f32 %v12227_v63, %v7361_v2  ;;  %v7533_v52 = vmax.f32 %v7531_v55, %v7532_v47  ;;  %v7526_v56 = vmax.f32 %v7524_v54, %v7525_v0  ;;  %v8708_v54 = vsel %vm1993_vm2, %v15241_v18, %v15249_v22 }
 0xa68   :  { %v11602_v11 = vpop.f32.mrb[140].mxu1  ;;  %v15243_v41 = vadd.f32 %v12229_v31, %v7361_v2  ;;  %v7539_v55 = vsel %vm1108_vm1, %v15228_v43, -inf  ;;  %v7538_v9 = vsel %vm1108_vm1, %v15232_v24, -inf  ;;  %v8709_v4 = vsel %vm1995_vm3, %v15263_v50, %v8708_v54 }
 0xa69   :  { %v7163_v28 = vpop.f32.mrb[141].mxu1  ;;  %v12231_v6 = vadd.f32 %v11602_v11, %v15112_v1  ;;  %v7534_v13 = vrot.slane %v7533_v52, 2  ;;  %v7527_v63 = vrot.slane %v7526_v56, 1  ;;  %v7548_v25 = vsel %vm1108_vm1, %v15236_v60, -inf }
 0xa6a   :  { %v12233_v12 = vadd.f32 %v15112_v1, %v7163_v28  ;;  %v7547_v10 = vsel %vm1108_vm1, %v15243_v41, -inf  ;;  %v7540_v59 = vmax.f32 %v7538_v9, %v7539_v55 }
 0xa6b   :  { %v15251_v45 = vadd.f32 %v12231_v6, %v7365_v3  ;;  %v7535_v31 = vmax.f32 %v7533_v52, %v7534_v13  ;;  %v15297_v6 = vmax.f32 %v7526_v56, %v7527_v63 }
 0xa6c   :  { %v15253_v5 = vadd.f32 %v12233_v12, %v7365_v3  ;;  %v11605_v58 = vpop.f32.mrb[142].mxu1  ;;  %v15289_v3 = vmax.f32 %v7517_v15, %v7518_v30 }
 0xa6d   :  { %v12235_v19 = vadd.f32 %v11605_v58, %v15112_v1  ;;  %v7173_v2 = vpop.f32.mrb[143].mxu1  ;;  %v7557_v7 = vsel %vm1108_vm1, %v15251_v45, -inf  ;;  %v7536_v12 = vrot.slane %v7535_v31, 1  ;;  %v7549_v58 = vmax.f32 %v7547_v10, %v7548_v25 }
 0xa6e   :  { %v12237_v0 = vadd.f32 %v15112_v1, %v7173_v2  ;;  %v7556_v27 = vsel %vm1108_vm1, %v15253_v5, -inf  ;;  %v7321_v25 = vcombine.high %v15259_v48, %v15259_v48 }
 0xa6f   :  { %v15276_v46 = vadd.f32 %v12235_v19, %v7369_v26  ;;  %v7558_v2 = vmax.f32 %v7556_v27, %v7557_v7  ;;  %v7537_v63 = vmax.f32 %v7535_v31, %v7536_v12  ;;  %v7550_v7 = vrot.slane %v7549_v58, 4 }
 0xa70   :  { %v11608_v47 = vpop.f32.mrb[144].mxu1  ;;  %v15293_v28 = vadd.f32 %v12237_v0, %v7369_v26  ;;  %v8710_v26 = vsel %vm1997_vm4, %v15265_v20, %v8709_v4  ;;  %v7377_v31 = vrot.slane %v15259_v48, %v15901_v42  ;;  %v7663_v48 = vmax.f32 %v15265_v20, 0.0 }
 0xa71   :  { %v7183_v11 = vpop.f32.mrb[145].mxu1  ;;  %v7566_v37 = vsel %vm1108_vm1, %v15276_v46, -inf  ;;  %v12239_v51 = vadd.f32 %v11608_v47, %v15112_v1  ;;  %v8711_v56 = vsel %vm1999_vm5, %v15272_v53, %v8710_v26  ;;  %v7541_v47 = vrot.slane %v7540_v59, 4 }
 0xa72   :  { %v12241_v52 = vadd.f32 %v15112_v1, %v7183_v11  ;;  %v7565_v15 = vsel %vm1108_vm1, %v15293_v28, -inf  ;;  %v8712_v9 = vsel %vm2001_vm6, %v15289_v3, %v8711_v56  ;;  %v7662_v26 = vmax.f32 %v15263_v50, 0.0 }
 0xa73   :  { %v15303_v30 = vadd.f32 %v12239_v51, %v7373_v23  ;;  %v7567_v13 = vmax.f32 %v7565_v15, %v7566_v37  ;;  %v7661_v51 = vmax.f32 %v15241_v18, 0.0  ;;  %v7381_v56 = vrot.slane %v7319_v62, %v15901_v42 }
 0xa74   :  { %v11611_v19 = vpop.f32.mrb[146].mxu1  ;;  %v15307_v0 = vadd.f32 %v12241_v52, %v7373_v23  ;;  %v8713_v23 = vsel %vm2003_vm7, %v15297_v6, %v8712_v9  ;;  %v7559_v52 = vrot.slane %v7558_v2, 4  ;;  %v7660_v9 = vmax.f32 %v15249_v22, 0.0 }
 0xa75   :  { %15902 = vst [vmem:[#allocation9_spill] sm:$0xff] %v15303_v30  ;;  %v7193_v55 = vpop.f32.mrb[147].mxu1  ;;  %v7575_v54 = vsel %vm1108_vm1, %v15303_v30, -inf  ;;  %v8714_v11 = vsel %vm2005_vm8, %v7537_v63, %v8713_v23  ;;  %v7568_v12 = vrot.slane %v7567_v13, 4  ;;  %v12243_v4 = vadd.f32 %v11611_v19, %v15112_v1 }
 0xa76   :  { %15903 = vst [vmem:[#allocation12_spill] sm:$0xff] %v15307_v0  ;;  %v7574_v10 = vsel %vm1108_vm1, %v15307_v0, -inf  ;;  %11749 = vmatprep.mubr.msk.f32.mxu1 %vm1108_vm1, %v8714_v11  ;;  %v7551_v18 = vmax.f32 %v7549_v58, %v7550_v7  ;;  %v7664_v11 = vmax.f32 %v15272_v53, 0.0  ;;  %v12245_v19 = vadd.f32 %v15112_v1, %v7193_v55 }
 0xa77   :  { %v7576_v27 = vmax.f32 %v7574_v10, %v7575_v54  ;;  %v7385_v54 = vrot.slane %v7321_v25, %v15901_v42  ;;  %v7542_v10 = vmax.f32 %v7540_v59, %v7541_v47  ;;  %v15332_v23 = vadd.f32 %v12243_v4, %v7377_v31 }
 0xa78   :  { %v11614_v37 = vpop.f32.mrb[148].mxu1  ;;  %v7560_v0 = vmax.f32 %v7558_v2, %v7559_v52  ;;  %v7569_v50 = vmax.f32 %v7567_v13, %v7568_v12  ;;  %v7665_v62 = vmax.f32 %v15289_v3, 0.0  ;;  %v7700_v25 = vsel %vm1993_vm2, %v7661_v51, %v7660_v9 }
 0xa79   :  { %v7203_v15 = vpop.f32.mrb[149].mxu1  ;;  %v7577_v33 = vrot.slane %v7576_v27, 4  ;;  %v7584_v22 = vsel %vm1108_vm1, %v15332_v23, -inf  ;;  %v7666_v20 = vmax.f32 %v15297_v6, 0.0  ;;  %v7701_v59 = vsel %vm1995_vm3, %v7662_v26, %v7700_v25 }
 0xa7a   :  { %v15342_v58 = vadd.f32 %v12245_v19, %v7377_v31  ;;  %v7667_v53 = vmax.f32 %v7537_v63, 0.0  ;;  %v7702_v55 = vsel %vm1997_vm4, %v7663_v48, %v7701_v59  ;;  %v12247_v2 = vadd.f32 %v11614_v37, %v15112_v1 }
 0xa7b   :  { %v12249_v13 = vadd.f32 %v15112_v1, %v7203_v15  ;;  %v7552_v3 = vrot.slane %v7551_v18, 2  ;;  %v7578_v47 = vmax.f32 %v7576_v27, %v7577_v33  ;;  %v7703_v7 = vsel %vm1999_vm5, %v7664_v11, %v7702_v55 }
 0xa7c   :  { %v11617_v30 = vpop.f32.mrb[150].mxu1  ;;  %v7583_v51 = vsel %vm1108_vm1, %v15342_v58, -inf  ;;  %v7543_v52 = vrot.slane %v7542_v10, 2  ;;  %v7704_v6 = vsel %vm2001_vm6, %v7665_v62, %v7703_v7  ;;  %v15351_v31 = vadd.f32 %v12247_v2, %v7381_v56 }
 0xa7d   :  { %v7213_v42 = vpop.f32.mrb[151].mxu1  ;;  %v7585_v12 = vmax.f32 %v7583_v51, %v7584_v22  ;;  %v7561_v63 = vrot.slane %v7560_v0, 2  ;;  %v7705_v4 = vsel %vm2003_vm7, %v7666_v20, %v7704_v6  ;;  %v15354_v26 = vadd.f32 %v12249_v13, %v7381_v56 }
 0xa7e   :  { %v12251_v37 = vadd.f32 %v11617_v30, %v15112_v1  ;;  %v7570_v15 = vrot.slane %v7569_v50, 2  ;;  %v7706_v33 = vsel %vm2005_vm8, %v7667_v53, %v7705_v4  ;;  %v7593_v9 = vsel %vm1108_vm1, %v15351_v31, -inf }
 0xa7f   :  { %v7586_v27 = vrot.slane %v7585_v12, 4  ;;  %v7553_v48 = vmax.f32 %v7551_v18, %v7552_v3  ;;  %v7579_v11 = vrot.slane %v7578_v47, 2  ;;  %11626 = vmatprep.mubr.msk.f32.mxu0 %vm1108_vm1, %v7706_v33  ;;  %v7592_v19 = vsel %vm1108_vm1, %v15354_v26, -inf }
 0xa80   :  { %v7594_v25 = vmax.f32 %v7592_v19, %v7593_v9  ;;  %v15363_v56 = vadd.f32 %v12251_v37, %v7385_v54  ;;  %v12253_v30 = vadd.f32 %v15112_v1, %v7213_v42  ;;  %v7562_v22 = vmax.f32 %v7560_v0, %v7561_v63 }
 0xa81   :  { %v7587_v62 = vmax.f32 %v7585_v12, %v7586_v27  ;;  %v7544_v20 = vmax.f32 %v7542_v10, %v7543_v52  ;;  %v7571_v59 = vmax.f32 %v7569_v50, %v7570_v15  ;;  %v7580_v2 = vmax.f32 %v7578_v47, %v7579_v11 }
 0xa82   :  { %v7595_v55 = vrot.slane %v7594_v25, 4  ;;  %v7602_v18 = vsel %vm1108_vm1, %v15363_v56, -inf  ;;  %v15368_v13 = vadd.f32 %v12253_v30, %v7385_v54  ;;  %v7554_v3 = vrot.slane %v7553_v48, 1 }
 0xa83   :  { %v7588_v53 = vrot.slane %v7587_v62, 2  ;;  %v7563_v6 = vrot.slane %v7562_v22, 1  ;;  %v7545_v4 = vrot.slane %v7544_v20, 1  ;;  %v7572_v42 = vrot.slane %v7571_v59, 1 }
 0xa84   :  { %v7596_v51 = vmax.f32 %v7594_v25, %v7595_v55  ;;  %v7601_v12 = vsel %vm1108_vm1, %v15368_v13, -inf  ;;  %v7581_v10 = vrot.slane %v7580_v2, 1  ;;  %v7555_v50 = vmax.f32 %v7553_v48, %v7554_v3 }
 0xa85   :  { %v7589_v7 = vmax.f32 %v7587_v62, %v7588_v53  ;;  %v7603_v0 = vmax.f32 %v7601_v12, %v7602_v18  ;;  %v7564_v37 = vmax.f32 %v7562_v22, %v7563_v6  ;;  %v7546_v15 = vmax.f32 %v7544_v20, %v7545_v4 }
 0xa86   :  { %v7597_v1 = vrot.slane %v7596_v51, 2  ;;  %v7573_v54 = vmax.f32 %v7571_v59, %v7572_v42  ;;  %v7582_v9 = vmax.f32 %v7580_v2, %v7581_v10  ;;  %v7669_v11 = vmax.f32 %v7555_v50, 0.0  ;;  %v10138_v10 = vld [vmem:[%s15809_s3 + $0x118] sm:$0xff] }
 0xa87   :  { %v7590_v52 = vrot.slane %v7589_v7, 1  ;;  %v7604_v63 = vrot.slane %v7603_v0, 4  ;;  %v7670_v25 = vmax.f32 %v7564_v37, 0.0  ;;  %v7668_v53 = vmax.f32 %v7546_v15, 0.0 }
 0xa88   :  { %v7598_v47 = vmax.f32 %v7596_v51, %v7597_v1  ;;  %v8715_v55 = vsel %vm1993_vm2, %v7555_v50, %v7546_v15  ;;  %v7671_v18 = vmax.f32 %v7573_v54, 0.0  ;;  %v7672_v3 = vmax.f32 %v7582_v9, 0.0 }
 0xa89   :  { %v7605_v27 = vmax.f32 %v7603_v0, %v7604_v63  ;;  %v7591_v19 = vmax.f32 %v7589_v7, %v7590_v52  ;;  %v8716_v48 = vsel %vm1995_vm3, %v7564_v37, %v8715_v55  ;;  %v7707_v59 = vsel %vm1993_vm2, %v7669_v11, %v7668_v53  ;;  %v10137_v0 = vld [vmem:[%s15809_s3 + $0x110] sm:$0xff]  ;;  %v10188_v11 = vld [vmem:[%s15811_s5 + $0x88] sm:$0xff]  ;;  %s12565_s3 = smov [#allocation2]  }
 0xa8a   :  { %v7599_v33 = vrot.slane %v7598_v47, 1  ;;  %v8717_v22 = vsel %vm1997_vm4, %v7573_v54, %v8716_v48  ;;  %v7708_v6 = vsel %vm1995_vm3, %v7670_v25, %v7707_v59  ;;  %v11991_v54 = vpack.c.bf16 %v10138_v10, %v10137_v0  ;;  %v10190_v25 = vld [vmem:[%s15811_s5 + $0x98] sm:$0xff]  ;;  %s9653_s15 = sshll.u32 %s12565_s3, 4  ;;  %s9654_s15 = int_to_ptr.vmem [resolvable:$true] %s9653_s15 }
 0xa8b   :  { %v7606_v62 = vrot.slane %v7605_v27, 2  ;;  %v7673_v20 = vmax.f32 %v7591_v19, 0.0  ;;  %v8718_v2 = vsel %vm1999_vm5, %v7582_v9, %v8717_v22  ;;  %v7709_v1 = vsel %vm1997_vm4, %v7671_v18, %v7708_v6  ;;  %v10187_v9 = vld [vmem:[%s15811_s5 + $0x80] sm:$0xff]  ;;  %s12537_s16 = scalar_lea.vmem %s9654_s15, 256  ;;  %p12542_p1 = scmp.lt.s32.totalorder %s9654_s15, %s9654_s15 }
 0xa8c   :  { %v7600_v30 = vmax.f32 %v7598_v47, %v7599_v33  ;;  %v8719_v42 = vsel %vm2001_vm6, %v7591_v19, %v8718_v2  ;;  %v7710_v52 = vsel %vm1999_vm5, %v7672_v3, %v7709_v1  ;;  %v7628_v33 = vmax.f32 %v15122_v32, 0.0  ;;  %p12538_p0 = scmp.ne.s32.totalorder %s9654_s15, %s12537_s16  ;;  %p12543_p2 = scmp.lt.s32.totalorder %s12537_s16, %s12537_s16 }
 0xa8d   :  { %v7607_v12 = vmax.f32 %v7605_v27, %v7606_v62  ;;  %v7711_v37 = vsel %vm2001_vm6, %v7673_v20, %v7710_v52  ;;  %v11995_v19 = vpack.c.bf16 %v10188_v11, %v10187_v9  ;;  %v10189_v62 = vld [vmem:[%s15811_s5 + $0x90] sm:$0xff]  ;;  %v7630_v55 = vmax.f32 %v15130_v39, 0.0 }
 0xa8e   :  { %v7674_v7 = vmax.f32 %v7600_v30, 0.0  ;;  %v8720_v50 = vsel %vm2003_vm7, %v7600_v30, %v8719_v42  ;;  %v7629_v30 = vmax.f32 %v15118_v49, 0.0  ;;  %v11999_v53 = vpack.c.bf16 %v10190_v25, %v10189_v62  ;;  %p12544_p3 = por %p12543_p2, %p12542_p1 }
 0xa8f   :  { %v7608_v51 = vrot.slane %v7607_v12, 1  ;;  %v7632_v18 = vmax.f32 %v15137_v36, 0.0  ;;  %v7634_v48 = vmax.f32 %v15149_v38, 0.0  ;;  %v7635_v3 = vmax.f32 %v15147_v44, 0.0 }
 0xa90   :  { %v7712_v15 = vsel %vm2003_vm7, %v7674_v7, %v7711_v37  ;;  %v7637_v22 = vmax.f32 %v15170_v34, 0.0  ;;  %v7638_v20 = vmax.f32 %v15190_v35, 0.0  ;;  %v7639_v59 = vmax.f32 %v15185_v40, 0.0  ;;  %v15904_v37 = vld [vmem:[#allocation12_spill] sm:$0xff]  ;;  %p12545_p4 = pnand %p12544_p3, %p12538_p0 }
 0xa91   :  { %v7609_v4 = vmax.f32 %v7607_v12, %v7608_v51  ;;  %v7633_v12 = vmax.f32 %v15135_v29, 0.0  ;;  %v7636_v51 = vmax.f32 %v15176_v16, 0.0  ;;  %v7640_v2 = vmax.f32 %v15208_v57, 0.0 }
 0xa92   :  { %v7641_v7 = vmax.f32 %v15203_v8, 0.0  ;;  %v7642_v6 = vmax.f32 %v15222_v61, 0.0  ;;  %v7644_v42 = vmax.f32 %v15232_v24, 0.0  ;;  %v7645_v1 = vmax.f32 %v15228_v43, 0.0 }
 0xa93   :  { %v8721_v47 = vsel %vm2005_vm8, %v7609_v4, %v8720_v50  ;;  %v7675_v63 = vmax.f32 %v7609_v4, 0.0  ;;  %v7643_v4 = vmax.f32 %v15217_v14, 0.0  ;;  %v7646_v0 = vmax.f32 %v15243_v41, 0.0 }
 0xa94   :  { %11750 = vmatmul.mubr.msk.f32.vlgmr.msra.gmra.mrb[152].mxu1 %vm1108_vm1, %v8721_v47  ;;  %v7647_v10 = vmax.f32 %v15236_v60, 0.0  ;;  %v7648_v50 = vmax.f32 %v15253_v5, 0.0  ;;  %v7649_v52 = vmax.f32 %v15251_v45, 0.0  ;;  %v7650_v47 = vmax.f32 %v15293_v28, 0.0 }
 0xa95   :  { %v7713_v27 = vsel %vm2005_vm8, %v7675_v63, %v7712_v15  ;;  %v7651_v63 = vmax.f32 %v15276_v46, 0.0  ;;  %v7652_v15 = vmax.f32 %v15904_v37, 0.0  ;;  %v7655_v9 = vmax.f32 %v15332_v23, 0.0 }
 0xa96   :  { %11627 = vmatmul.mubr.msk.f32.vlgmr.msra.gmra.mrb[116].mxu0 %vm1108_vm1, %v7713_v27  ;;  %v7654_v27 = vmax.f32 %v15342_v58, 0.0  ;;  %v7656_v11 = vmax.f32 %v15354_v26, 0.0  ;;  %v7658_v62 = vmax.f32 %v15368_v13, 0.0  ;;  %v7659_v25 = vmax.f32 %v15363_v56, 0.0 }
 0xa97   :  { %11990 = vmatpush3.bf16.msra.mxu0 %v15103_v17  ;;  %11637 = vmatprep.mubr.msk.f32.mxu0 %vm1108_vm1, %v7628_v33  ;;  %v7631_v17 = vmax.f32 %v15127_v21, 0.0 }
 0xa98   :  { %11992 = vmatprep.subr.bf16.mxu0 %v11991_v54 }
 0xa9b   :  { %11994 = vmatpush3.bf16.msra.mxu0 %v11991_v54  ;;  %v15905_v54 = vld [vmem:[#allocation9_spill] sm:$0xff] }
 0xa9c   :  { %11996 = vmatprep.subr.bf16.mxu0 %v11995_v19  ;;  %v7653_v33 = vmax.f32 %v15905_v54, 0.0 }
 0xa9e   :  { %11638 = vmatmul.mubr.msk.f32.vlgmr.msra.gmra.mrb[118].mxu0 %vm1108_vm1, %v7629_v30  ;;  %v10143_v30 = vld [vmem:[%s15813_s7 + $0x100] sm:$0xff] }
 0xa9f   :  { %11640 = vmatprep.mubr.msk.f32.mxu0 %vm1108_vm1, %v7630_v55  ;;  %11998 = vmatpush3.bf16.msra.mxu0 %v11995_v19  ;;  %v7657_v19 = vmax.f32 %v15351_v31, 0.0 }
 0xaa0   :  { %12000 = vmatprep.subr.bf16.mxu0 %v11999_v53 }
 0xaa2   :  { %11641 = vmatmul.mubr.msk.f32.gmra.mrb[120].mxu0 %vm1108_vm1, %v7631_v17 }
 0xaa3   :  { %11643 = vmatprep.mubr.msk.f32.mxu0 %vm1108_vm1, %v7632_v18  ;;  %12002 = vmatpush3.bf16.msra.mxu0 %v11999_v53  ;;  %v10144_v53 = vld [vmem:[%s15813_s7 + $0x108] sm:$0xff] }
 0xaa4   :  { %v12011_v55 = vpack.c.bf16 %v10144_v53, %v10143_v30 }
 0xaa6   :  { %11644 = vmatmul.mubr.msk.f32.gmra.mrb[122].mxu0 %vm1108_vm1, %v7633_v12  ;;  %12012 = vmatprep.subr.bf16.mxu0 %v12011_v55  ;;  %v10152_v12 = vld [vmem:[%s15810_s4 + $0x4] ss:$0 sm:$0xff] }
 0xaa7   :  { %11646 = vmatprep.mubr.msk.f32.mxu0 %vm1108_vm1, %v7634_v48 }
 0xaaa   :  { %11647 = vmatmul.mubr.msk.f32.gmra.mrb[124].mxu0 %vm1108_vm1, %v7635_v3 }
 0xaab   :  { %11649 = vmatprep.mubr.msk.f32.mxu0 %vm1108_vm1, %v7636_v51 }
 0xaae   :  { %11650 = vmatmul.mubr.msk.f32.gmra.mrb[126].mxu0 %vm1108_vm1, %v7637_v22  ;;  %v15906_v22 = vld [vmem:[#allocation23_spill] sm:$0xff] }
 0xaaf   :  { %11652 = vmatprep.mubr.msk.f32.mxu0 %vm1108_vm1, %v7638_v20 }
 0xab2   :  { %11653 = vmatmul.mubr.msk.f32.gmra.mrb[128].mxu0 %vm1108_vm1, %v7639_v59 }
 0xab3   :  { %11655 = vmatprep.mubr.msk.f32.mxu0 %vm1108_vm1, %v7640_v2 }
 0xab6   :  { %11656 = vmatmul.mubr.msk.f32.gmra.mrb[130].mxu0 %vm1108_vm1, %v7641_v7 }
 0xab7   :  { %11658 = vmatprep.mubr.msk.f32.mxu0 %vm1108_vm1, %v7642_v6 }
 0xaba   :  { %11659 = vmatmul.mubr.msk.f32.gmra.mrb[132].mxu0 %vm1108_vm1, %v7643_v4 }
 0xabb   :  { %11661 = vmatprep.mubr.msk.f32.mxu0 %vm1108_vm1, %v7644_v42  ;;  %v15907_v42 = vld [vmem:[#allocation5_spill] sm:$0xff] }
 0xabe   :  { %11662 = vmatmul.mubr.msk.f32.gmra.mrb[134].mxu0 %vm1108_vm1, %v7645_v1 }
 0xabf   :  { %11664 = vmatprep.mubr.msk.f32.mxu0 %vm1108_vm1, %v7646_v0 }
 0xac2   :  { %11665 = vmatmul.mubr.msk.f32.gmra.mrb[136].mxu0 %vm1108_vm1, %v7647_v10 }
 0xac3   :  { %11667 = vmatprep.mubr.msk.f32.mxu0 %vm1108_vm1, %v7648_v50 }
 0xac6   :  { %11668 = vmatmul.mubr.msk.f32.gmra.mrb[138].mxu0 %vm1108_vm1, %v7649_v52 }
 0xac7   :  { %11670 = vmatprep.mubr.msk.f32.mxu0 %vm1108_vm1, %v7650_v47 }
 0xaca   :  { %11671 = vmatmul.mubr.msk.f32.gmra.mrb[140].mxu0 %vm1108_vm1, %v7651_v63 }
 0xacb   :  { %11673 = vmatprep.mubr.msk.f32.mxu0 %vm1108_vm1, %v7652_v15  ;;  %v10145_v15 = vld [vmem:[%s15813_s7 + $0x110] sm:$0xff] }
 0xace   :  { %11674 = vmatmul.mubr.msk.f32.gmra.mrb[142].mxu0 %vm1108_vm1, %v7653_v33  ;;  %v10146_v33 = vld [vmem:[%s15813_s7 + $0x118] sm:$0xff] }
 0xacf   :  { %11676 = vmatprep.mubr.msk.f32.mxu0 %vm1108_vm1, %v7654_v27 }
 0xad2   :  { %11677 = vmatmul.mubr.msk.f32.gmra.mrb[144].mxu0 %vm1108_vm1, %v7655_v9 }
 0xad3   :  { %11679 = vmatprep.mubr.msk.f32.mxu0 %vm1108_vm1, %v7656_v11 }
 0xad6   :  { %11680 = vmatmul.mubr.msk.f32.gmra.mrb[146].mxu0 %vm1108_vm1, %v7657_v19 }
 0xad7   :  { %11682 = vmatprep.mubr.msk.f32.mxu0 %vm1108_vm1, %v7658_v62 }
 0xada   :  { %11683 = vmatmul.mubr.msk.f32.gmra.mrb[148].mxu0 %vm1108_vm1, %v7659_v25 }
 0xb67   :  { %v15477_v17 = vpop.f32.mrb[152].mxu1 }
 0xb68   :  { %v15479_v18 = vpop.f32.mrb[153].mxu1 }
 0xb69   :  { %v11628_v48 = vpop.f32.mrb[116].mxu0 }
 0xb6a   :  { %v7784_v3 = vpop.f32.mrb[117].mxu0 }
 0xb6b   :  { %v7785_v51 = vadd.f32 %v10152_v12, %v7784_v3  ;;  %v12015_v3 = vpack.c.bf16 %v10146_v33, %v10145_v15 }
 0xb6d   :  { %v8123_v20 = vrot.slane %v7785_v51, %v15906_v22  ;;  %v8116_v0 = vcombine.high %v7785_v51, %v7785_v51 }
 0xb6f   :  { %v8131_v59 = vcombine.high %v8123_v20, %v8123_v20  ;;  %v8139_v7 = vrot.slane %v8123_v20, %v15906_v22  ;;  %v8130_v25 = vrot.slane %v8116_v0, %v15906_v22 }
 0xb71   :  { %v11639_v2 = vpop.f32.mrb[118].mxu0  ;;  %v8153_v4 = vrot.slane %v8131_v59, %v15906_v22  ;;  %v8217_v1 = vrot.slane %v8139_v7, %v15907_v42  ;;  %v8161_v50 = vcombine.high %v8139_v7, %v8139_v7  ;;  %v8146_v0 = vrot.slane %v8130_v25, %v15906_v22 }
 0xb72   :  { %v7955_v6 = vpop.f32.mrb[119].mxu0 }
 0xb73   :  { %v8221_v10 = vrot.slane %v8153_v4, %v15907_v42  ;;  %v8295_v52 = vadd.f32 %v11639_v2, %v8217_v1  ;;  %v8294_v47 = vadd.f32 %v8217_v1, %v7955_v6  ;;  %v8225_v30 = vrot.slane %v8161_v50, %v15907_v42 }
 0xb74   :  { %v8163_v53 = vcombine.high %v8153_v4, %v8153_v4  ;;  %v8233_v15 = vrot.slane %v8146_v0, %v15907_v42 }
 0xb75   :  { %v11642_v63 = vpop.f32.mrb[120].mxu0  ;;  %v8327_v11 = vmax.f32 %v8295_v52, 0.0  ;;  %v8326_v19 = vmax.f32 %v8294_v47, 0.0 }
 0xb76   :  { %v8297_v27 = vadd.f32 %v11642_v63, %v8221_v10  ;;  %v7965_v9 = vpop.f32.mrb[121].mxu0  ;;  %v8229_v1 = vrot.slane %v8163_v53, %v15907_v42 }
 0xb77   :  { %v8296_v62 = vadd.f32 %v8221_v10, %v7965_v9  ;;  %11693 = vmatprep.mubr.msk.f32.mxu0 %vm1108_vm1, %v8326_v19  ;;  %v8132_v10 = vcombine.high %v8130_v25, %v8130_v25  ;;  %v7790_v25 = vadd.f32 %v11628_v48, %v10152_v12 }
 0xb78   :  { %11694 = vmatmul.mubr.msk.f32.vlgmr.msra.gmra.mrb[150].mxu0 %vm1108_vm1, %v8327_v11  ;;  %v8329_v6 = vmax.f32 %v8297_v27, 0.0 }
 0xb79   :  { %v8328_v51 = vmax.f32 %v8296_v62, 0.0  ;;  %v11645_v20 = vpop.f32.mrb[122].mxu0  ;;  %12014 = vmatpush3.bf16.msra.mxu0 %v12011_v55  ;;  %v8160_v33 = vrot.slane %v8132_v10, %v15906_v22 }
 0xb7a   :  { %v8299_v59 = vadd.f32 %v11645_v20, %v8225_v30  ;;  %v7975_v2 = vpop.f32.mrb[123].mxu0  ;;  %12016 = vmatprep.subr.bf16.mxu0 %v12015_v3 }
 0xb7b   :  { %v8298_v7 = vadd.f32 %v8225_v30, %v7975_v2  ;;  %11696 = vmatprep.mubr.msk.f32.mxu0 %vm1108_vm1, %v8328_v51  ;;  %v8237_v53 = vrot.slane %v8160_v33, %v15907_v42  ;;  %v8162_v51 = vcombine.high %v8146_v0, %v8146_v0 }
 0xb7c   :  { %11697 = vmatmul.mubr.msk.f32.gmra.mrb[152].mxu0 %vm1108_vm1, %v8329_v6  ;;  %v8331_v55 = vmax.f32 %v8299_v59, 0.0  ;;  %v8172_v6 = vrot.slane %v7790_v25, %v15906_v22 }
 0xb7d   :  { %v8330_v4 = vmax.f32 %v8298_v7, 0.0  ;;  %v11648_v50 = vpop.f32.mrb[124].mxu0  ;;  %12018 = vmatpush3.bf16.msra.mxu0 %v12015_v3  ;;  %v8241_v10 = vrot.slane %v8162_v51, %v15907_v42 }
 0xb7e   :  { %v8301_v52 = vadd.f32 %v11648_v50, %v8229_v1  ;;  %v7985_v47 = vpop.f32.mrb[125].mxu0 }
 0xb7f   :  { %v8300_v63 = vadd.f32 %v8229_v1, %v7985_v47  ;;  %11699 = vmatprep.mubr.msk.f32.mxu0 %vm1108_vm1, %v8330_v4  ;;  %v8164_v4 = vcombine.high %v8160_v33, %v8160_v33  ;;  %v8180_v47 = vcombine.high %v8172_v6, %v8172_v6 }
 0xb80   :  { %11700 = vmatmul.mubr.msk.f32.gmra.mrb[154].mxu0 %vm1108_vm1, %v8331_v55  ;;  %v8333_v30 = vmax.f32 %v8301_v52, 0.0 }
 0xb81   :  { %v8332_v27 = vmax.f32 %v8300_v63, 0.0  ;;  %v11651_v9 = vpop.f32.mrb[126].mxu0  ;;  %v8245_v55 = vrot.slane %v8164_v4, %v15907_v42 }
 0xb82   :  { %v8303_v11 = vadd.f32 %v11651_v9, %v8233_v15  ;;  %v7995_v19 = vpop.f32.mrb[127].mxu0 }
 0xb83   :  { %v8302_v62 = vadd.f32 %v8233_v15, %v7995_v19  ;;  %11702 = vmatprep.mubr.msk.f32.mxu0 %vm1108_vm1, %v8332_v27  ;;  %v8188_v15 = vrot.slane %v8172_v6, %v15906_v22 }
 0xb84   :  { %11703 = vmatmul.mubr.msk.f32.gmra.mrb[156].mxu0 %vm1108_vm1, %v8333_v30  ;;  %v8335_v1 = vmax.f32 %v8303_v11, 0.0 }
 0xb85   :  { %v8334_v3 = vmax.f32 %v8302_v62, 0.0  ;;  %v11654_v20 = vpop.f32.mrb[128].mxu0  ;;  %v8249_v30 = vrot.slane %v8188_v15, %v15907_v42 }
 0xb86   :  { %v8305_v59 = vadd.f32 %v11654_v20, %v8237_v53  ;;  %v8005_v2 = vpop.f32.mrb[129].mxu0 }
 0xb87   :  { %v8304_v7 = vadd.f32 %v8237_v53, %v8005_v2  ;;  %11705 = vmatprep.mubr.msk.f32.mxu0 %vm1108_vm1, %v8334_v3  ;;  %v8202_v53 = vrot.slane %v8180_v47, %v15906_v22 }
 0xb88   :  { %11706 = vmatmul.mubr.msk.f32.gmra.mrb[158].mxu0 %vm1108_vm1, %v8335_v1  ;;  %v8337_v63 = vmax.f32 %v8305_v59, 0.0 }
 0xb89   :  { %v8336_v12 = vmax.f32 %v8304_v7, 0.0  ;;  %v11657_v48 = vpop.f32.mrb[130].mxu0  ;;  %v8165_v7 = vcombine.high %v7790_v25, %v7790_v25  ;;  %v8253_v1 = vrot.slane %v8202_v53, %v15907_v42 }
 0xb8a   :  { %v8307_v50 = vadd.f32 %v11657_v48, %v8241_v10  ;;  %v8015_v0 = vpop.f32.mrb[131].mxu0 }
 0xb8b   :  { %v8306_v52 = vadd.f32 %v8241_v10, %v8015_v0  ;;  %11708 = vmatprep.mubr.msk.f32.mxu0 %vm1108_vm1, %v8336_v12  ;;  %v8210_v10 = vcombine.high %v8188_v15, %v8188_v15 }
 0xb8c   :  { %11709 = vmatmul.mubr.msk.f32.gmra.mrb[160].mxu0 %vm1108_vm1, %v8337_v63  ;;  %v8339_v62 = vmax.f32 %v8307_v50, 0.0 }
 0xb8d   :  { %v8338_v27 = vmax.f32 %v8306_v52, 0.0  ;;  %v11660_v9 = vpop.f32.mrb[132].mxu0  ;;  %v8179_v52 = vrot.slane %v8165_v7, %v15906_v22  ;;  %v8257_v63 = vrot.slane %v8210_v10, %v15907_v42 }
 0xb8e   :  { %v8309_v11 = vadd.f32 %v11660_v9, %v8245_v55  ;;  %v8025_v33 = vpop.f32.mrb[133].mxu0 }
 0xb8f   :  { %v8308_v19 = vadd.f32 %v8245_v55, %v8025_v33  ;;  %11711 = vmatprep.mubr.msk.f32.mxu0 %vm1108_vm1, %v8338_v27  ;;  %v8212_v55 = vcombine.high %v8202_v53, %v8202_v53 }
 0xb90   :  { %11712 = vmatmul.mubr.msk.f32.gmra.mrb[162].mxu0 %vm1108_vm1, %v8339_v62  ;;  %v8341_v6 = vmax.f32 %v8309_v11, 0.0  ;;  %v8195_v62 = vrot.slane %v8179_v52, %v15906_v22 }
 0xb91   :  { %v8340_v51 = vmax.f32 %v8308_v19, 0.0  ;;  %v11663_v3 = vpop.f32.mrb[134].mxu0  ;;  %v8261_v19 = vrot.slane %v8212_v55, %v15907_v42 }
 0xb92   :  { %v8311_v20 = vadd.f32 %v11663_v3, %v8249_v30  ;;  %v8035_v59 = vpop.f32.mrb[135].mxu0  ;;  %v8265_v7 = vrot.slane %v8195_v62, %v15907_v42 }
 0xb93   :  { %v8310_v2 = vadd.f32 %v8249_v30, %v8035_v59  ;;  %11714 = vmatprep.mubr.msk.f32.mxu0 %vm1108_vm1, %v8340_v51  ;;  %v8181_v30 = vcombine.high %v8179_v52, %v8179_v52  ;;  %v8211_v52 = vcombine.high %v8195_v62, %v8195_v62 }
 0xb94   :  { %11715 = vmatmul.mubr.msk.f32.gmra.mrb[164].mxu0 %vm1108_vm1, %v8341_v6  ;;  %v8343_v47 = vmax.f32 %v8311_v20, 0.0 }
 0xb95   :  { %v8342_v4 = vmax.f32 %v8310_v2, 0.0  ;;  %v11666_v12 = vpop.f32.mrb[136].mxu0  ;;  %v8209_v6 = vrot.slane %v8181_v30, %v15906_v22 }
 0xb96   :  { %v8313_v48 = vadd.f32 %v11666_v12, %v8253_v1  ;;  %v8045_v50 = vpop.f32.mrb[137].mxu0 }
 0xb97   :  { %v8312_v0 = vadd.f32 %v8253_v1, %v8045_v50  ;;  %11717 = vmatprep.mubr.msk.f32.mxu0 %vm1108_vm1, %v8342_v4 }
 0xb98   :  { %11718 = vmatmul.mubr.msk.f32.gmra.mrb[166].mxu0 %vm1108_vm1, %v8343_v47  ;;  %v8345_v33 = vmax.f32 %v8313_v48, 0.0 }
 0xb99   :  { %v8344_v25 = vmax.f32 %v8312_v0, 0.0  ;;  %v11669_v27 = vpop.f32.mrb[138].mxu0  ;;  %v8269_v0 = vrot.slane %v8209_v6, %v15907_v42 }
 0xb9a   :  { %v8315_v9 = vadd.f32 %v11669_v27, %v8257_v63  ;;  %v8055_v15 = vpop.f32.mrb[139].mxu0 }
 0xb9b   :  { %v8314_v11 = vadd.f32 %v8257_v63, %v8055_v15  ;;  %11720 = vmatprep.mubr.msk.f32.mxu0 %vm1108_vm1, %v8344_v25  ;;  %v8273_v15 = vrot.slane %v8211_v52, %v15907_v42 }
 0xb9c   :  { %11721 = vmatmul.mubr.msk.f32.gmra.mrb[168].mxu0 %vm1108_vm1, %v8345_v33  ;;  %v8347_v2 = vmax.f32 %v8315_v9, 0.0 }
 0xb9d   :  { %v8346_v51 = vmax.f32 %v8314_v11, 0.0  ;;  %v11672_v3 = vpop.f32.mrb[140].mxu0  ;;  %v8213_v11 = vcombine.high %v8209_v6, %v8209_v6 }
 0xb9e   :  { %v8317_v20 = vadd.f32 %v11672_v3, %v8261_v19  ;;  %v8065_v53 = vpop.f32.mrb[141].mxu0 }
 0xb9f   :  { %v8316_v59 = vadd.f32 %v8261_v19, %v8065_v53  ;;  %11723 = vmatprep.mubr.msk.f32.mxu0 %vm1108_vm1, %v8346_v51 }
 0xba0   :  { %11724 = vmatmul.mubr.msk.f32.gmra.mrb[170].mxu0 %vm1108_vm1, %v8347_v2  ;;  %v8349_v50 = vmax.f32 %v8317_v20, 0.0  ;;  %v8277_v20 = vrot.slane %v8213_v11, %v15907_v42 }
 0xba1   :  { %v8348_v1 = vmax.f32 %v8316_v59, 0.0  ;;  %v11675_v10 = vpop.f32.mrb[142].mxu0 }
 0xba2   :  { %v8319_v4 = vadd.f32 %v11675_v10, %v8265_v7  ;;  %v8075_v12 = vpop.f32.mrb[143].mxu0 }
 0xba3   :  { %v8318_v48 = vadd.f32 %v8265_v7, %v8075_v12  ;;  %11726 = vmatprep.mubr.msk.f32.mxu0 %vm1108_vm1, %v8348_v1 }
 0xba4   :  { %11727 = vmatmul.mubr.msk.f32.gmra.mrb[172].mxu0 %vm1108_vm1, %v8349_v50  ;;  %v8351_v9 = vmax.f32 %v8319_v4, 0.0 }
 0xba5   :  { %v8350_v47 = vmax.f32 %v8318_v48, 0.0  ;;  %v11678_v63 = vpop.f32.mrb[144].mxu0 }
 0xba6   :  { %v8321_v55 = vadd.f32 %v11678_v63, %v8269_v0  ;;  %v8085_v25 = vpop.f32.mrb[145].mxu0 }
 0xba7   :  { %v8320_v27 = vadd.f32 %v8269_v0, %v8085_v25  ;;  %11729 = vmatprep.mubr.msk.f32.mxu0 %vm1108_vm1, %v8350_v47 }
 0xba8   :  { %11730 = vmatmul.mubr.msk.f32.gmra.mrb[174].mxu0 %vm1108_vm1, %v8351_v9  ;;  %v8353_v3 = vmax.f32 %v8321_v55, 0.0 }
 0xba9   :  { %v8352_v33 = vmax.f32 %v8320_v27, 0.0  ;;  %v11681_v19 = vpop.f32.mrb[146].mxu0 }
 0xbaa   :  { %v8323_v30 = vadd.f32 %v11681_v19, %v8273_v15  ;;  %v8095_v51 = vpop.f32.mrb[147].mxu0 }
 0xbab   :  { %v8322_v62 = vadd.f32 %v8273_v15, %v8095_v51  ;;  %11732 = vmatprep.mubr.msk.f32.mxu0 %vm1108_vm1, %v8352_v33 }
 0xbac   :  { %11733 = vmatmul.mubr.msk.f32.gmra.mrb[176].mxu0 %vm1108_vm1, %v8353_v3  ;;  %v8355_v6 = vmax.f32 %v8323_v30, 0.0 }
 0xbad   :  { %v8354_v53 = vmax.f32 %v8322_v62, 0.0  ;;  %v11684_v59 = vpop.f32.mrb[148].mxu0 }
 0xbae   :  { %v8325_v2 = vadd.f32 %v11684_v59, %v8277_v20  ;;  %v8105_v7 = vpop.f32.mrb[149].mxu0 }
 0xbaf   :  { %v8324_v1 = vadd.f32 %v8277_v20, %v8105_v7  ;;  %11735 = vmatprep.mubr.msk.f32.mxu0 %vm1108_vm1, %v8354_v53 }
 0xbb0   :  { %11736 = vmatmul.mubr.msk.f32.gmra.mrb[178].mxu0 %vm1108_vm1, %v8355_v6  ;;  %v8357_v4 = vmax.f32 %v8325_v2, 0.0 }
 0xbb1   :  { %v8356_v10 = vmax.f32 %v8324_v1, 0.0 }
 0xbb3   :  { %11738 = vmatprep.mubr.msk.f32.mxu0 %vm1108_vm1, %v8356_v10 }
 0xbb4   :  { %11739 = vmatmul.mubr.msk.f32.gmra.mrb[180].mxu0 %vm1108_vm1, %v8357_v4 }
 0xbb5   :  { %11760 = vmatprep.mubr.msk.f32.mxu0 %vm1108_vm1, %v15122_v32  ;;  %v9527_v32 = vld [vmem:[%s15814_s8 + $0x8] sm:$0xff] }
 0xbb8   :  { %11761 = vmatmul.mubr.msk.f32.vlgmr.msra.gmra.mrb[150].mxu0 %vm1108_vm1, %v15118_v49  ;;  %v9526_v49 = vld [vmem:[%s15814_s8] sm:$0xff] }
 0xbb9   :  { %11763 = vmatprep.mubr.msk.f32.mxu0 %vm1108_vm1, %v15130_v39  ;;  %v12019_v39 = vpack.c.bf16 %v9527_v32, %v9526_v49 }
 0xbbb   :  { %12020 = vmatprep.subr.bf16.mxu1 %v12019_v39 }
 0xbbc   :  { %11764 = vmatmul.mubr.msk.f32.gmra.mrb[152].mxu0 %vm1108_vm1, %v15127_v21  ;;  %v9528_v21 = vld [vmem:[%s15814_s8 + $0x10] sm:$0xff]  ;;  %12022 = vmatpush3.bf16.msra.mxu1 %v12019_v39 }
 0xbbd   :  { %11766 = vmatprep.mubr.msk.f32.mxu0 %vm1108_vm1, %v15137_v36 }
 0xbc0   :  { %11767 = vmatmul.mubr.msk.f32.gmra.mrb[154].mxu0 %vm1108_vm1, %v15135_v29  ;;  %v9529_v29 = vld [vmem:[%s15814_s8 + $0x18] sm:$0xff] }
 0xbc1   :  { %11769 = vmatprep.mubr.msk.f32.mxu0 %vm1108_vm1, %v15149_v38  ;;  %v12023_v36 = vpack.c.bf16 %v9529_v29, %v9528_v21 }
 0xbc3   :  { %12024 = vmatprep.subr.bf16.mxu1 %v12023_v36 }
 0xbc4   :  { %11770 = vmatmul.mubr.msk.f32.gmra.mrb[156].mxu0 %vm1108_vm1, %v15147_v44  ;;  %12026 = vmatpush3.bf16.msra.mxu1 %v12023_v36  ;;  %v9131_v44 = vrot.slane %v15479_v18, %v15906_v22 }
 0xbc5   :  { %11772 = vmatprep.mubr.msk.f32.mxu0 %vm1108_vm1, %v15176_v16  ;;  %v15632_v16 = vld [vmem:[%s15812_s6 + $0x4] ss:$0 sm:$0xff] }
 0xbc6   :  { %v9139_v38 = vcombine.high %v9131_v44, %v9131_v44 }
 0xbc8   :  { %11773 = vmatmul.mubr.msk.f32.gmra.mrb[158].mxu0 %vm1108_vm1, %v15170_v34  ;;  %v9147_v34 = vrot.slane %v9131_v44, %v15906_v22 }
 0xbc9   :  { %11775 = vmatprep.mubr.msk.f32.mxu0 %vm1108_vm1, %v15190_v35  ;;  %v9161_v35 = vrot.slane %v9139_v38, %v15906_v22 }
 0xbcb   :  { %v9171_v0 = vcombine.high %v9161_v35, %v9161_v35 }
 0xbcc   :  { %11776 = vmatmul.mubr.msk.f32.gmra.mrb[160].mxu0 %vm1108_vm1, %v15185_v40 }
 0xbcd   :  { %11778 = vmatprep.mubr.msk.f32.mxu0 %vm1108_vm1, %v15208_v57  ;;  %v9237_v59 = vrot.slane %v9171_v0, %v15907_v42 }
 0xbd0   :  { %11779 = vmatmul.mubr.msk.f32.gmra.mrb[162].mxu0 %vm1108_vm1, %v15203_v8  ;;  %v9225_v8 = vrot.slane %v9147_v34, %v15907_v42 }
 0xbd1   :  { %11781 = vmatprep.mubr.msk.f32.mxu0 %vm1108_vm1, %v15222_v61  ;;  %v9124_v61 = vcombine.high %v15479_v18, %v15479_v18 }
 0xbd4   :  { %11782 = vmatmul.mubr.msk.f32.gmra.mrb[164].mxu0 %vm1108_vm1, %v15217_v14 }
 0xbd5   :  { %11784 = vmatprep.mubr.msk.f32.mxu0 %vm1108_vm1, %v15232_v24  ;;  %v9173_v24 = vcombine.high %v15477_v17, %v15477_v17 }
 0xbd8   :  { %11785 = vmatmul.mubr.msk.f32.gmra.mrb[166].mxu0 %vm1108_vm1, %v15228_v43 }
 0xbd9   :  { %11787 = vmatprep.mubr.msk.f32.mxu0 %vm1108_vm1, %v15243_v41  ;;  %v9180_v41 = vrot.slane %v15477_v17, %v15906_v22 }
 0xbdb   :  { %v9188_v18 = vcombine.high %v9180_v41, %v9180_v41  ;;  %v15654_v12 = vrot.slane %v9180_v41, %v15906_v22 }
 0xbdc   :  { %11788 = vmatmul.mubr.msk.f32.gmra.mrb[168].mxu0 %vm1108_vm1, %v15236_v60 }
 0xbdd   :  { %11790 = vmatprep.mubr.msk.f32.mxu0 %vm1108_vm1, %v15253_v5  ;;  %v15669_v3 = vrot.slane %v9188_v18, %v15906_v22  ;;  %v9218_v38 = vcombine.high %v15654_v12, %v15654_v12 }
 0xbe0   :  { %11791 = vmatmul.mubr.msk.f32.gmra.mrb[170].mxu0 %vm1108_vm1, %v15251_v45 }
 0xbe1   :  { %11793 = vmatprep.mubr.msk.f32.mxu0 %vm1108_vm1, %v15293_v28 }
 0xbe4   :  { %11794 = vmatmul.mubr.msk.f32.gmra.mrb[172].mxu0 %vm1108_vm1, %v15276_v46  ;;  %v9169_v46 = vcombine.high %v9147_v34, %v9147_v34 }
 0xbe5   :  { %11796 = vmatprep.mubr.msk.f32.mxu0 %vm1108_vm1, %v15904_v37  ;;  %v15651_v37 = vrot.slane %v9173_v24, %v15906_v22 }
 0xbe6   :  { %v9233_v63 = vrot.slane %v9169_v46, %v15907_v42 }
 0xbe7   :  { %v9189_v33 = vcombine.high %v15651_v37, %v15651_v37  ;;  %v15666_v62 = vrot.slane %v15651_v37, %v15906_v22 }
 0xbe8   :  { %11797 = vmatmul.mubr.msk.f32.gmra.mrb[174].mxu0 %vm1108_vm1, %v15905_v54 }
 0xbe9   :  { %11799 = vmatprep.mubr.msk.f32.mxu0 %vm1108_vm1, %v15342_v58 }
 0xbec   :  { %11800 = vmatmul.mubr.msk.f32.gmra.mrb[176].mxu0 %vm1108_vm1, %v15332_v23  ;;  %v9229_v23 = vrot.slane %v9161_v35, %v15907_v42 }
 0xbed   :  { %11802 = vmatprep.mubr.msk.f32.mxu0 %vm1108_vm1, %v15354_v26  ;;  %v9138_v26 = vrot.slane %v9124_v61, %v15906_v22 }
 0xbef   :  { %v9140_v27 = vcombine.high %v9138_v26, %v9138_v26  ;;  %v9154_v9 = vrot.slane %v9138_v26, %v15906_v22 }
 0xbf0   :  { %11803 = vmatmul.mubr.msk.f32.gmra.mrb[178].mxu0 %vm1108_vm1, %v15351_v31 }
 0xbf1   :  { %11805 = vmatprep.mubr.msk.f32.mxu0 %vm1108_vm1, %v15368_v13  ;;  %v9168_v32 = vrot.slane %v9140_v27, %v15906_v22  ;;  %v9170_v21 = vcombine.high %v9154_v9, %v9154_v9  ;;  %v9241_v35 = vrot.slane %v9154_v9, %v15907_v42 }
 0xbf4   :  { %11806 = vmatmul.mubr.msk.f32.gmra.mrb[180].mxu0 %vm1108_vm1, %v15363_v56 }
 0xc8b   :  { %v11762_v40 = vpop.f32.mrb[150].mxu0 }
 0xc8c   :  { %v12255_v57 = vadd.f32 %v11762_v40, %v15632_v16  ;;  %v8963_v14 = vpop.f32.mrb[151].mxu0 }
 0xc8d   :  { %v12257_v43 = vadd.f32 %v15632_v16, %v8963_v14 }
 0xc8e   :  { %v12256_v60 = vadd.f32 %v12255_v57, %v9225_v8 }
 0xc8f   :  { %v12258_v45 = vadd.f32 %v12257_v43, %v9225_v8  ;;  %v11765_v5 = vpop.f32.mrb[152].mxu0  ;;  %v15682_v8 = vrot.slane %v15654_v12, %v15907_v42 }
 0xc90   :  { %v9367_v28 = vsel %vm1108_vm1, %v12256_v60, -inf  ;;  %v12259_v58 = vadd.f32 %v11765_v5, %v15632_v16  ;;  %v8973_v31 = vpop.f32.mrb[153].mxu0  ;;  %v9245_v5 = vrot.slane %v9168_v32, %v15907_v42 }
 0xc91   :  { %v9366_v56 = vsel %vm1108_vm1, %v12258_v45, -inf  ;;  %v12261_v13 = vadd.f32 %v15632_v16, %v8973_v31 }
 0xc92   :  { %v9368_v54 = vmax.f32 %v9366_v56, %v9367_v28  ;;  %v12260_v17 = vadd.f32 %v12259_v58, %v9229_v23  ;;  %v9249_v58 = vrot.slane %v9170_v21, %v15907_v42 }
 0xc93   :  { %v12262_v48 = vadd.f32 %v12261_v13, %v9229_v23  ;;  %v11768_v50 = vpop.f32.mrb[154].mxu0 }
 0xc94   :  { %v9369_v52 = vrot.slane %v9368_v54, 4  ;;  %v9376_v47 = vsel %vm1108_vm1, %v12260_v17, -inf  ;;  %v12263_v55 = vadd.f32 %v11768_v50, %v15632_v16  ;;  %v8983_v25 = vpop.f32.mrb[155].mxu0  ;;  %v15692_v50 = vrot.slane %v15669_v3, %v15907_v42 }
 0xc95   :  { %v9375_v15 = vsel %vm1108_vm1, %v12262_v48, -inf  ;;  %v12265_v11 = vadd.f32 %v15632_v16, %v8983_v25 }
 0xc96   :  { %v9370_v19 = vmax.f32 %v9368_v54, %v9369_v52  ;;  %v9377_v30 = vmax.f32 %v9375_v15, %v9376_v47  ;;  %v12264_v51 = vadd.f32 %v12263_v55, %v9233_v63  ;;  %v9172_v54 = vcombine.high %v9168_v32, %v9168_v32 }
 0xc97   :  { %v12266_v20 = vadd.f32 %v12265_v11, %v9233_v63  ;;  %v11771_v53 = vpop.f32.mrb[156].mxu0 }
 0xc98   :  { %v9371_v2 = vrot.slane %v9370_v19, 2  ;;  %v9378_v7 = vrot.slane %v9377_v30, 4  ;;  %v9385_v1 = vsel %vm1108_vm1, %v12264_v51, -inf  ;;  %v12267_v6 = vadd.f32 %v11771_v53, %v15632_v16  ;;  %v8993_v10 = vpop.f32.mrb[157].mxu0 }
 0xc99   :  { %v9384_v4 = vsel %vm1108_vm1, %v12266_v20, -inf  ;;  %v12269_v49 = vadd.f32 %v15632_v16, %v8993_v10  ;;  %v9253_v51 = vrot.slane %v9172_v54, %v15907_v42 }
 0xc9a   :  { %v9372_v39 = vmax.f32 %v9370_v19, %v9371_v2  ;;  %v9379_v29 = vmax.f32 %v9377_v30, %v9378_v7  ;;  %v9386_v36 = vmax.f32 %v9384_v4, %v9385_v1  ;;  %v12268_v44 = vadd.f32 %v12267_v6, %v9237_v59 }
 0xc9b   :  { %v12270_v34 = vadd.f32 %v12269_v49, %v9237_v59  ;;  %v11774_v40 = vpop.f32.mrb[158].mxu0 }
 0xc9c   :  { %v9373_v57 = vrot.slane %v9372_v39, 1  ;;  %v9380_v14 = vrot.slane %v9379_v29, 2  ;;  %v9387_v61 = vrot.slane %v9386_v36, 4  ;;  %v9394_v43 = vsel %vm1108_vm1, %v12268_v44, -inf  ;;  %v9003_v24 = vpop.f32.mrb[159].mxu0 }
 0xc9d   :  { %v9393_v60 = vsel %vm1108_vm1, %v12270_v34, -inf  ;;  %v12271_v41 = vadd.f32 %v11774_v40, %v15632_v16  ;;  %v12273_v45 = vadd.f32 %v15632_v16, %v9003_v24  ;;  %v15705_v40 = vrot.slane %v9218_v38, %v15907_v42 }
 0xc9e   :  { %v9381_v46 = vmax.f32 %v9379_v29, %v9380_v14  ;;  %v9388_v28 = vmax.f32 %v9386_v36, %v9387_v61  ;;  %v9395_v23 = vmax.f32 %v9393_v60, %v9394_v43  ;;  %v9374_v31 = vmax.f32 %v9372_v39, %v9373_v57 }
 0xc9f   :  { %v12272_v26 = vadd.f32 %v12271_v41, %v9241_v35  ;;  %v12274_v56 = vadd.f32 %v12273_v45, %v9241_v35  ;;  %v11777_v13 = vpop.f32.mrb[160].mxu0 }
 0xca0   :  { %v9382_v17 = vrot.slane %v9381_v46, 1  ;;  %v9389_v18 = vrot.slane %v9388_v28, 2  ;;  %v9396_v12 = vrot.slane %v9395_v23, 4  ;;  %v9013_v48 = vpop.f32.mrb[161].mxu0  ;;  %v12275_v47 = vadd.f32 %v11777_v13, %v15632_v16 }
 0xca1   :  { %v9403_v0 = vsel %vm1108_vm1, %v12272_v26, -inf  ;;  %v9402_v52 = vsel %vm1108_vm1, %v12274_v56, -inf  ;;  %v12277_v63 = vadd.f32 %v15632_v16, %v9013_v48  ;;  %v9510_v15 = vmax.f32 %v9374_v31, 0.0 }
 0xca2   :  { %v9383_v55 = vmax.f32 %v9381_v46, %v9382_v17  ;;  %v9390_v25 = vmax.f32 %v9388_v28, %v9389_v18  ;;  %v9397_v27 = vmax.f32 %v9395_v23, %v9396_v12  ;;  %v9404_v9 = vmax.f32 %v9402_v52, %v9403_v0 }
 0xca3   :  { %v12276_v11 = vadd.f32 %v12275_v47, %v9245_v5  ;;  %v12278_v19 = vadd.f32 %v12277_v63, %v9245_v5  ;;  %v11780_v30 = vpop.f32.mrb[162].mxu0  ;;  %v9220_v26 = vcombine.high %v15669_v3, %v15669_v3 }
 0xca4   :  { %v9511_v20 = vmax.f32 %v9383_v55, 0.0  ;;  %v9391_v53 = vrot.slane %v9390_v25, 1  ;;  %v9398_v59 = vrot.slane %v9397_v27, 2  ;;  %v9405_v2 = vrot.slane %v9404_v9, 4  ;;  %v9023_v7 = vpop.f32.mrb[163].mxu0 }
 0xca5   :  { %v9412_v1 = vsel %vm1108_vm1, %v12276_v11, -inf  ;;  %v9411_v6 = vsel %vm1108_vm1, %v12278_v19, -inf  ;;  %v12279_v10 = vadd.f32 %v11780_v30, %v15632_v16  ;;  %v12281_v4 = vadd.f32 %v15632_v16, %v9023_v7 }
 0xca6   :  { %v9553_v49 = vsel %vm1993_vm2, %v9511_v20, %v9510_v15  ;;  %v9392_v32 = vmax.f32 %v9390_v25, %v9391_v53  ;;  %v9399_v21 = vmax.f32 %v9397_v27, %v9398_v59  ;;  %v9406_v39 = vmax.f32 %v9404_v9, %v9405_v2 }
 0xca7   :  { %v9413_v29 = vmax.f32 %v9411_v6, %v9412_v1  ;;  %v12280_v36 = vadd.f32 %v12279_v10, %v9249_v58  ;;  %v12282_v44 = vadd.f32 %v12281_v4, %v9249_v58  ;;  %v11783_v34 = vpop.f32.mrb[164].mxu0  ;;  %v15723_v19 = vrot.slane %v15666_v62, %v15907_v42 }
 0xca8   :  { %v9512_v35 = vmax.f32 %v9392_v32, 0.0  ;;  %v9400_v57 = vrot.slane %v9399_v21, 1  ;;  %v9407_v14 = vrot.slane %v9406_v39, 2  ;;  %v12283_v61 = vadd.f32 %v11783_v34, %v15632_v16  ;;  %v9033_v43 = vpop.f32.mrb[165].mxu0 }
 0xca9   :  { %v9414_v24 = vrot.slane %v9413_v29, 4  ;;  %v9421_v60 = vsel %vm1108_vm1, %v12280_v36, -inf  ;;  %v9420_v41 = vsel %vm1108_vm1, %v12282_v44, -inf  ;;  %v12285_v45 = vadd.f32 %v15632_v16, %v9033_v43 }
 0xcaa   :  { %v9401_v5 = vmax.f32 %v9399_v21, %v9400_v57  ;;  %v9408_v46 = vmax.f32 %v9406_v39, %v9407_v14  ;;  %v9422_v28 = vmax.f32 %v9420_v41, %v9421_v60  ;;  %v12284_v23 = vadd.f32 %v12283_v61, %v9253_v51 }
 0xcab   :  { %v9415_v58 = vmax.f32 %v9413_v29, %v9414_v24  ;;  %v12286_v38 = vadd.f32 %v12285_v45, %v9253_v51  ;;  %v11786_v31 = vpop.f32.mrb[166].mxu0  ;;  %v9554_v56 = vsel %vm1995_vm3, %v9512_v35, %v9553_v49  ;;  %v15735_v29 = vrot.slane %v9189_v33, %v15906_v22 }
 0xcac   :  { %v9513_v13 = vmax.f32 %v9401_v5, 0.0  ;;  %v9409_v54 = vrot.slane %v9408_v46, 1  ;;  %v9423_v17 = vrot.slane %v9422_v28, 4  ;;  %v9430_v18 = vsel %vm1108_vm1, %v12284_v23, -inf  ;;  %v9043_v12 = vpop.f32.mrb[167].mxu0 }
 0xcad   :  { %v9416_v48 = vrot.slane %v9415_v58, 2  ;;  %v9429_v0 = vsel %vm1108_vm1, %v12286_v38, -inf  ;;  %v12287_v52 = vadd.f32 %v11786_v31, %v15632_v16  ;;  %v12289_v47 = vadd.f32 %v15632_v16, %v9043_v12 }
 0xcae   :  { %v9410_v63 = vmax.f32 %v9408_v46, %v9409_v54  ;;  %v9424_v55 = vmax.f32 %v9422_v28, %v9423_v17  ;;  %v9431_v25 = vmax.f32 %v9429_v0, %v9430_v18  ;;  %v9555_v3 = vsel %vm1997_vm4, %v9513_v13, %v9554_v56 }
 0xcaf   :  { %v9417_v27 = vmax.f32 %v9415_v58, %v9416_v48  ;;  %v12288_v9 = vadd.f32 %v12287_v52, %v15682_v8  ;;  %v12290_v15 = vadd.f32 %v12289_v47, %v15682_v8  ;;  %v11789_v11 = vpop.f32.mrb[168].mxu0  ;;  %v9269_v46 = vrot.slane %v9220_v26, %v15907_v42 }
 0xcb0   :  { %v9514_v30 = vmax.f32 %v9410_v63, 0.0  ;;  %v9425_v51 = vrot.slane %v9424_v55, 2  ;;  %v9432_v20 = vrot.slane %v9431_v25, 4  ;;  %v12291_v53 = vadd.f32 %v11789_v11, %v15632_v16  ;;  %v9053_v59 = vpop.f32.mrb[169].mxu0 }
 0xcb1   :  { %v9418_v2 = vrot.slane %v9417_v27, 1  ;;  %v9439_v7 = vsel %vm1108_vm1, %v12288_v9, -inf  ;;  %v9438_v1 = vsel %vm1108_vm1, %v12290_v15, -inf  ;;  %v12293_v6 = vadd.f32 %v15632_v16, %v9053_v59 }
 0xcb2   :  { %v9426_v10 = vmax.f32 %v9424_v55, %v9425_v51  ;;  %v9433_v8 = vmax.f32 %v9431_v25, %v9432_v20  ;;  %v9440_v4 = vmax.f32 %v9438_v1, %v9439_v7  ;;  %v12292_v49 = vadd.f32 %v12291_v53, %v15692_v50 }
 0xcb3   :  { %v9419_v32 = vmax.f32 %v9417_v27, %v9418_v2  ;;  %v12294_v21 = vadd.f32 %v12293_v6, %v15692_v50  ;;  %v11792_v39 = vpop.f32.mrb[170].mxu0  ;;  %v9556_v36 = vsel %vm1999_vm5, %v9514_v30, %v9555_v3  ;;  %v9219_v55 = vcombine.high %v15666_v62, %v15666_v62 }
 0xcb4   :  { %v9427_v44 = vrot.slane %v9426_v10, 1  ;;  %v9434_v34 = vrot.slane %v9433_v8, 2  ;;  %v9441_v35 = vrot.slane %v9440_v4, 4  ;;  %v9448_v57 = vsel %vm1108_vm1, %v12292_v49, -inf  ;;  %v9063_v14 = vpop.f32.mrb[171].mxu0 }
 0xcb5   :  { %v9515_v61 = vmax.f32 %v9419_v32, 0.0  ;;  %v9447_v43 = vsel %vm1108_vm1, %v12294_v21, -inf  ;;  %v12295_v50 = vadd.f32 %v11792_v39, %v15632_v16  ;;  %v12297_v24 = vadd.f32 %v15632_v16, %v9063_v14 }
 0xcb6   :  { %v9435_v60 = vmax.f32 %v9433_v8, %v9434_v34  ;;  %v9442_v41 = vmax.f32 %v9440_v4, %v9441_v35  ;;  %v9449_v37 = vmax.f32 %v9447_v43, %v9448_v57  ;;  %v9428_v22 = vmax.f32 %v9426_v10, %v9427_v44 }
 0xcb7   :  { %v12296_v33 = vadd.f32 %v12295_v50, %v15705_v40  ;;  %v12298_v45 = vadd.f32 %v12297_v24, %v15705_v40  ;;  %v11795_v5 = vpop.f32.mrb[172].mxu0  ;;  %v9557_v28 = vsel %vm2001_vm6, %v9515_v61, %v9556_v36  ;;  %v9277_v7 = vrot.slane %v15735_v29, %v15907_v42 }
 0xcb8   :  { %v9443_v23 = vrot.slane %v9442_v41, 2  ;;  %v9450_v58 = vrot.slane %v9449_v37, 4  ;;  %v12299_v38 = vadd.f32 %v11795_v5, %v15632_v16  ;;  %v9073_v31 = vpop.f32.mrb[173].mxu0  ;;  %v9436_v56 = vrot.slane %v9435_v60, 1 }
 0xcb9   :  { %v9457_v13 = vsel %vm1108_vm1, %v12296_v33, -inf  ;;  %v9456_v54 = vsel %vm1108_vm1, %v12298_v45, -inf  ;;  %v12301_v17 = vadd.f32 %v15632_v16, %v9073_v31  ;;  %v9516_v18 = vmax.f32 %v9428_v22, 0.0 }
 0xcba   :  { %v9444_v12 = vmax.f32 %v9442_v41, %v9443_v23  ;;  %v9451_v40 = vmax.f32 %v9449_v37, %v9450_v58  ;;  %v9458_v48 = vmax.f32 %v9456_v54, %v9457_v13  ;;  %v12300_v0 = vadd.f32 %v12299_v38, %v9269_v46 }
 0xcbb   :  { %v12302_v26 = vadd.f32 %v12301_v17, %v9269_v46  ;;  %v11798_v52 = vpop.f32.mrb[174].mxu0  ;;  %v9437_v47 = vmax.f32 %v9435_v60, %v9436_v56  ;;  %v9558_v63 = vsel %vm2003_vm7, %v9516_v18, %v9557_v28  ;;  %v9281_v39 = vrot.slane %v9219_v55, %v15907_v42 }
 0xcbc   :  { %v9445_v25 = vrot.slane %v9444_v12, 1  ;;  %v9452_v3 = vrot.slane %v9451_v40, 2  ;;  %v9459_v27 = vrot.slane %v9458_v48, 4  ;;  %v9466_v9 = vsel %vm1108_vm1, %v12300_v0, -inf  ;;  %v9083_v15 = vpop.f32.mrb[175].mxu0 }
 0xcbd   :  { %v9465_v11 = vsel %vm1108_vm1, %v12302_v26, -inf  ;;  %v12303_v30 = vadd.f32 %v11798_v52, %v15632_v16  ;;  %v12305_v51 = vadd.f32 %v15632_v16, %v9083_v15  ;;  %v9517_v20 = vmax.f32 %v9437_v47, 0.0 }
 0xcbe   :  { %v9453_v53 = vmax.f32 %v9451_v40, %v9452_v3  ;;  %v9460_v59 = vmax.f32 %v9458_v48, %v9459_v27  ;;  %v9467_v2 = vmax.f32 %v9465_v11, %v9466_v9  ;;  %v9446_v62 = vmax.f32 %v9444_v12, %v9445_v25 }
 0xcbf   :  { %v12304_v1 = vadd.f32 %v12303_v30, %v15723_v19  ;;  %v12306_v6 = vadd.f32 %v12305_v51, %v15723_v19  ;;  %v11801_v10 = vpop.f32.mrb[176].mxu0  ;;  %v9559_v8 = vsel %vm2005_vm8, %v9517_v20, %v9558_v63  ;;  %v9221_v41 = vcombine.high %v15735_v29, %v15735_v29 }
 0xcc0   :  { %v9454_v4 = vrot.slane %v9453_v53, 1  ;;  %v9461_v49 = vrot.slane %v9460_v59, 2  ;;  %v9468_v32 = vrot.slane %v9467_v2, 4  ;;  %11816 = vmatprep.mubr.msk.f32.mxu1 %vm1108_vm1, %v9559_v8  ;;  %v9093_v21 = vpop.f32.mrb[177].mxu0  ;;  %v12307_v34 = vadd.f32 %v11801_v10, %v15632_v16 }
 0xcc1   :  { %v9475_v36 = vsel %vm1108_vm1, %v12304_v1, -inf  ;;  %v9474_v44 = vsel %vm1108_vm1, %v12306_v6, -inf  ;;  %v12309_v35 = vadd.f32 %v15632_v16, %v9093_v21  ;;  %v9518_v43 = vmax.f32 %v9446_v62, 0.0 }
 0xcc2   :  { %v9455_v19 = vmax.f32 %v9453_v53, %v9454_v4  ;;  %v9462_v57 = vmax.f32 %v9460_v59, %v9461_v49  ;;  %v9469_v14 = vmax.f32 %v9467_v2, %v9468_v32  ;;  %v9476_v61 = vmax.f32 %v9474_v44, %v9475_v36 }
 0xcc3   :  { %v12308_v50 = vadd.f32 %v12307_v34, %v9277_v7  ;;  %v12310_v24 = vadd.f32 %v12309_v35, %v9277_v7  ;;  %v11804_v60 = vpop.f32.mrb[178].mxu0  ;;  %v9285_v12 = vrot.slane %v9221_v41, %v15907_v42 }
 0xcc4   :  { %v9519_v37 = vmax.f32 %v9455_v19, 0.0  ;;  %v9463_v22 = vrot.slane %v9462_v57, 1  ;;  %v9470_v33 = vrot.slane %v9469_v14, 2  ;;  %v9477_v45 = vrot.slane %v9476_v61, 4  ;;  %v9103_v5 = vpop.f32.mrb[179].mxu0 }
 0xcc5   :  { %v9484_v46 = vsel %vm1108_vm1, %v12308_v50, -inf  ;;  %v9483_v28 = vsel %vm1108_vm1, %v12310_v24, -inf  ;;  %v12311_v23 = vadd.f32 %v11804_v60, %v15632_v16  ;;  %v12313_v58 = vadd.f32 %v15632_v16, %v9103_v5 }
 0xcc6   :  { %v9560_v38 = vsel %vm1993_vm2, %v9519_v37, %v9518_v43  ;;  %v9464_v31 = vmax.f32 %v9462_v57, %v9463_v22  ;;  %v9471_v56 = vmax.f32 %v9469_v14, %v9470_v33  ;;  %v9478_v13 = vmax.f32 %v9476_v61, %v9477_v45  ;;  %v10259_v22 = vld [vmem:[%s15815_s9] ss:$0 sm:$0xff] }
 0xcc7   :  { %v9485_v54 = vmax.f32 %v9483_v28, %v9484_v46  ;;  %v12312_v29 = vadd.f32 %v12311_v23, %v9281_v39  ;;  %v12314_v17 = vadd.f32 %v12313_v58, %v9281_v39  ;;  %v11807_v18 = vpop.f32.mrb[180].mxu0 }
 0xcc8   :  { %v9520_v40 = vmax.f32 %v9464_v31, 0.0  ;;  %v9472_v48 = vrot.slane %v9471_v56, 1  ;;  %v9479_v0 = vrot.slane %v9478_v13, 2  ;;  %v12315_v26 = vadd.f32 %v11807_v18, %v15632_v16  ;;  %v9113_v52 = vpop.f32.mrb[181].mxu0 }
 0xcc9   :  { %v9486_v47 = vrot.slane %v9485_v54, 4  ;;  %v9493_v63 = vsel %vm1108_vm1, %v12312_v29, -inf  ;;  %v9492_v55 = vsel %vm1108_vm1, %v12314_v17, -inf  ;;  %v12317_v25 = vadd.f32 %v15632_v16, %v9113_v52 }
 0xcca   :  { %v9561_v3 = vsel %vm1995_vm3, %v9520_v40, %v9560_v38  ;;  %v9473_v27 = vmax.f32 %v9471_v56, %v9472_v48  ;;  %v9480_v9 = vmax.f32 %v9478_v13, %v9479_v0  ;;  %v9494_v15 = vmax.f32 %v9492_v55, %v9493_v63 }
 0xccb   :  { %v9487_v11 = vmax.f32 %v9485_v54, %v9486_v47  ;;  %v12316_v42 = vadd.f32 %v12315_v26, %v9285_v12  ;;  %v12318_v30 = vadd.f32 %v12317_v25, %v9285_v12 }
 0xccc   :  { %v9521_v51 = vmax.f32 %v9473_v27, 0.0  ;;  %v9481_v20 = vrot.slane %v9480_v9, 1  ;;  %v9495_v53 = vrot.slane %v9494_v15, 4 }
 0xccd   :  { %v9488_v59 = vrot.slane %v9487_v11, 2  ;;  %v9502_v2 = vsel %vm1108_vm1, %v12316_v42, -inf  ;;  %v9501_v7 = vsel %vm1108_vm1, %v12318_v30, -inf }
 0xcce   :  { %v9482_v62 = vmax.f32 %v9480_v9, %v9481_v20  ;;  %v9496_v1 = vmax.f32 %v9494_v15, %v9495_v53  ;;  %v9503_v6 = vmax.f32 %v9501_v7, %v9502_v2  ;;  %v9562_v16 = vsel %vm1997_vm4, %v9521_v51, %v9561_v3 }
 0xccf   :  { %v9489_v10 = vmax.f32 %v9487_v11, %v9488_v59 }
 0xcd0   :  { %v9522_v8 = vmax.f32 %v9482_v62, 0.0  ;;  %v9497_v4 = vrot.slane %v9496_v1, 2  ;;  %v9504_v49 = vrot.slane %v9503_v6, 4 }
 0xcd1   :  { %v9490_v32 = vrot.slane %v9489_v10, 1 }
 0xcd2   :  { %v9498_v21 = vmax.f32 %v9496_v1, %v9497_v4  ;;  %v9505_v39 = vmax.f32 %v9503_v6, %v9504_v49  ;;  %v9563_v36 = vsel %vm1999_vm5, %v9522_v8, %v9562_v16 }
 0xcd3   :  { %v9491_v44 = vmax.f32 %v9489_v10, %v9490_v32 }
 0xcd4   :  { %v9499_v34 = vrot.slane %v9498_v21, 1  ;;  %v9506_v35 = vrot.slane %v9505_v39, 2 }
 0xcd5   :  { %v9523_v19 = vmax.f32 %v9491_v44, 0.0 }
 0xcd6   :  { %v9500_v57 = vmax.f32 %v9498_v21, %v9499_v34  ;;  %v9507_v14 = vmax.f32 %v9505_v39, %v9506_v35 }
 0xcd7   :  { %v9564_v61 = vsel %vm2001_vm6, %v9523_v19, %v9563_v36 }
 0xcd8   :  { %v9524_v43 = vmax.f32 %v9500_v57, 0.0  ;;  %v9508_v50 = vrot.slane %v9507_v14, 1 }
 0xcda   :  { %v9509_v24 = vmax.f32 %v9507_v14, %v9508_v50  ;;  %v9565_v60 = vsel %vm2003_vm7, %v9524_v43, %v9564_v61 }
 0xcdc   :  { %v9525_v41 = vmax.f32 %v9509_v24, 0.0 }
 0xcde   :  { %v9566_v37 = vsel %vm2005_vm8, %v9525_v41, %v9565_v60 }
 0xcdf   :  { %11817 = vmatmul.mubr.msk.f32.vlgmr.msra.gmra.mrb[154].mxu1 %vm1108_vm1, %v9566_v37 }
 0xdb2   :  { %v11818_v33 = vpop.f32.mrb[154].mxu1 }
 0xdb3   :  { %v9643_v45 = vadd.f32 %v11818_v33, %v10259_v22  ;;  %v9637_v5 = vpop.f32.mrb[155].mxu1 }
 0xdb4   :  { %v9638_v46 = vadd.f32 %v10259_v22, %v9637_v5 }
 0xdb5   :  { %9647 = vst.msk [vmem:[#allocation2 + $0x8] sm:$0xff] %vm1108_vm1, %v9643_v45 }
 0xdb6   :  { %9646 = vst.msk [vmem:[#allocation2] sm:$0xff] %vm1108_vm1, %v9638_v46 }
 0xdb7   :  { %12548 = shalt.err (!%p12545_p4)
}
 0xdb8   :  { %s12549_s18 = scalar_lea.hbm %s15816_s10, 256 }
 0xdb9   :  { %p12550_p5 = scmp.ne.s32.totalorder %s15816_s10, %s12549_s18  ;;  %p12553_p6 = scmp.lt.u32.totalorder %s12549_s18, %s15816_s10 }
 0xdbb   :  { %p12555_p7 = pnand %p12553_p6, %p12550_p5 }
 0xdbd   :  { %12558 = shalt.err (!%p12555_p7)
}
 0xdbe   :  { %s12566_s21 = smov 128   ;;  %s12567_s2 = smov 8  }
 0xdbf   :  { %9659 = dma.vmem_to_hbm [thread:$0]  %s9654_s15, 256, %s15816_s10, [#allocation3], %s12566_s21, %s12566_s21, %s12567_s2  }
 0xdc0   :  { %12559 = dma.done.wait [#allocation3], 256  }
 0xdc1   :  { %12560 = vsyncadd [#allocation3], 4294967040 }
 0xdc2   :  { %9663 = vsyncpa [#allocation3], 1 }

</bundles_post_ra>
